<compile_context>
chip_gen: v6e
topology: v6e:2x2x1
jax: 0.10.0
libtpu: 0.0.40
codegen_flags: <defaults>
</compile_context>

<pallas_src>
import jax
import jax.numpy as jnp
from jax.experimental import pallas as pl
from jax.experimental.pallas import tpu as pltpu

NEG_SLOPE = 0.01      # nn.LeakyReLU() default
BN_EPS = 1e-5         # nn.BatchNorm2d default
NUM_LAYERS = 16
H = W = 32            # spatial size implied by fc1 = Linear(3*8*8, 100) after two stride-2 convs
HW = H * W            # 1024

TAPS3 = tuple((dy, dx) for dy in (-1, 0, 1) for dx in (-1, 0, 1))      # 3x3 conv, pad 1
TAPS4 = tuple((ky - 1, kx - 1) for ky in range(4) for kx in range(4))  # 4x4 conv, pad 1


def _lrelu(v):
    return jnp.where(v > 0, v, NEG_SLOPE * v)


def fused_kernel(x_ref, wl_ref, bl_ref, w1_ref, b1_ref, w2_ref, b2_ref,
                 sel_ref, fc1w_ref, fc1b_ref, fc2w_ref, fc2b_ref,
                 o_ref, col_ref, msk_ref):
    flat = x_ref.shape[1]          # N * H * W
    n = flat // HW                 # batch size (Python int)

    def shifted(a, off):
        # a[:, p] -> a[:, p + off]; wrapped values are zeroed by the boundary masks.
        if off == 0:
            return a
        return pltpu.roll(a, (-off) % flat, axis=1)

    def edge_mask(hw, ww, dy, dx):
        # valid iff 0 <= h+dy < H and 0 <= w+dx < W   (hw = h*W + w, ww = w)
        conds = []
        if dy < 0:
            conds.append(hw >= (-dy) * W)
        elif dy > 0:
            conds.append(hw < (H - dy) * W)
        if dx < 0:
            conds.append(ww >= -dx)
        elif dx > 0:
            conds.append(ww <= W - 1 - dx)
        m = conds[0]
        for c in conds[1:]:
            m = jnp.logical_and(m, c)
        return m.astype(jnp.float32)

    # ------------- one-time setup: zero im2col scratch, build 3x3 boundary masks -------------
    col_ref[...] = jnp.zeros_like(col_ref)

    pos = jax.lax.broadcasted_iota(jnp.int32, (1, flat), 1)
    ww = pos & (W - 1)       # w
    hw = pos & (HW - 1)      # h*W + w   (per-sample flat offset)

    row = 0
    for dy, dx in TAPS3:
        if dy == 0 and dx == 0:
            continue
        msk_ref[row:row + 1, :] = edge_mask(hw, ww, dy, dx)
        row += 1

    # -------- 16 cumulative residual blocks: LeakyReLU -> 3x3 conv (no bias) -> BN(eval) --------
    def layer_body(l, carry):
        cur, cum = carry
        a = _lrelu(cur)                                        # (3, flat)
        midx = 0
        for t, (dy, dx) in enumerate(TAPS3):
            v = shifted(a, dy * W + dx)
            if not (dy == 0 and dx == 0):
                v = v * msk_ref[midx:midx + 1, :]
                midx += 1
            col_ref[3 * t:3 * t + 3, :] = v                    # im2col row group for this tap
        out = jnp.dot(wl_ref[l], col_ref[0:32, :],
                      preferred_element_type=jnp.float32) + bl_ref[l]
        out = out + cum                                        # layer(input) + sum_feature
        cum = (cum + out) * 0.5                                # cumulative_feature
        return out, cum

    cur0 = x_ref[...]
    cur, _ = jax.lax.fori_loop(0, NUM_LAYERS, layer_body, (cur0, cur0 * 0.5))

    # -------- head conv1: 4x4 / stride 2 / pad 1, evaluated densely on the 32-grid --------
    a1 = _lrelu(cur)
    for t, (dy, dx) in enumerate(TAPS4):
        v = shifted(a1, dy * W + dx)
        if not (dy == 0 and dx == 0):
            v = v * edge_mask(hw, ww, dy, dx)
        col_ref[3 * t:3 * t + 3, :] = v
    full1 = jnp.dot(w1_ref[...], col_ref[...],
                    preferred_element_type=jnp.float32) + b1_ref[...]
    # full1 at even (h, w) columns equals bn1(conv1(.)) on the 16x16 grid; the other columns
    # are finite don't-care values discarded by the final selection matmul.

    # -------- head conv2: same 4x4 stride-2 conv, expressed as a dilation-2 conv on the 32-grid --------
    a2 = _lrelu(full1)
    for t, (dy, dx) in enumerate(TAPS4):
        v = shifted(a2, 2 * dy * W + 2 * dx)
        if not (dy == 0 and dx == 0):
            v = v * edge_mask(hw, ww, 2 * dy, 2 * dx)
        col_ref[3 * t:3 * t + 3, :] = v
    full2 = jnp.dot(w2_ref[...], col_ref[...],
                    preferred_element_type=jnp.float32) + b2_ref[...]
    feat = _lrelu(full2)       # LeakyReLU of the (to-be-flattened) features, densely

    # -------- pick the 8x8 output pixels (stride-4 columns) and reorder to (N, 3*8*8) --------
    zsel = jnp.dot(feat, sel_ref[...], preferred_element_type=jnp.float32)   # (3, N*64)
    zrows = []
    for b in range(n):
        zrows.append(jnp.concatenate(
            [zsel[c:c + 1, b * 64:(b + 1) * 64] for c in range(3)], axis=1))  # (1, 192)
    z = jnp.concatenate(zrows, axis=0)                                        # (N, 192)

    # -------- FC head + log_softmax over dim=0 (the batch axis, as in the PyTorch code) --------
    h1 = _lrelu(jnp.dot(z, fc1w_ref[...], preferred_element_type=jnp.float32)
                + fc1b_ref[...])
    logits = jnp.dot(h1, fc2w_ref[...], preferred_element_type=jnp.float32) + fc2b_ref[...]
    m = jnp.max(logits, axis=0, keepdims=True)
    lse = jnp.log(jnp.sum(jnp.exp(logits - m), axis=0, keepdims=True)) + m
    o_ref[...] = logits - lse


def _vmem():
    return pl.BlockSpec(memory_space=pltpu.MemorySpace.VMEM)


@jax.jit
def reinforce_net_forward(x, p):
    n, c, h, w = x.shape
    assert (c, h, w) == (3, H, W)
    flat = n * h * w

    # lane-dense layout: (C, N*H*W), column index = b*H*W + h*W + w
    xk = jnp.transpose(x, (1, 0, 2, 3)).reshape(c, flat)

    # 0/1 selection matrix picking the stride-4 columns (the 8x8 output pixels):
    # output column q = b*64 + ho*8 + wo  <-  source column b*1024 + (4*ho)*32 + 4*wo
    q = jnp.arange(n * 64)
    src = (q // 64) * HW + ((q % 64) // 8) * (4 * W) + (q % 8) * 4
    sel = (jnp.arange(flat)[:, None] == src[None, :]).astype(jnp.float32)

    kernel = pl.pallas_call(
        fused_kernel,
        out_shape=jax.ShapeDtypeStruct((n, 10), jnp.float32),
        in_specs=[_vmem() for _ in range(12)],
        out_specs=_vmem(),
        scratch_shapes=[
            pltpu.VMEM((48, flat), jnp.float32),   # im2col scratch (3 rows per tap, max 16 taps)
            pltpu.VMEM((8, flat), jnp.float32),    # boundary masks for the 8 non-center 3x3 taps
        ],
    )
    # TODO(synk): for large batches on v7x, add a batch grid with
    # dimension_semantics=("parallel",) to use both TensorCores; at N=2 it is not worth it.
    return kernel(xk, p["wl"], p["bl"], p["w1"], p["b1"], p["w2"], p["b2"],
                  sel, p["fc1_w"], p["fc1_b"], p["fc2_w"], p["fc2_b"])


def init_params(key):
    ks = jax.random.split(key, 21)
    f32 = jnp.float32
    layer_w = 0.2 * jax.random.normal(ks[0], (NUM_LAYERS, 3, 3, 3, 3), f32)   # (l, O, I, kH, kW)
    l_gamma = 1.0 + 0.1 * jax.random.normal(ks[1], (NUM_LAYERS, 3), f32)
    l_beta = 0.1 * jax.random.normal(ks[2], (NUM_LAYERS, 3), f32)
    l_mean = 0.1 * jax.random.normal(ks[3], (NUM_LAYERS, 3), f32)
    l_var = jax.random.uniform(ks[4], (NUM_LAYERS, 3), f32, 0.5, 1.5)

    c1w = 0.15 * jax.random.normal(ks[5], (3, 3, 4, 4), f32)
    c1b = 0.1 * jax.random.normal(ks[6], (3,), f32)
    g1 = 1.0 + 0.1 * jax.random.normal(ks[7], (3,), f32)
    be1 = 0.1 * jax.random.normal(ks[8], (3,), f32)
    m1 = 0.1 * jax.random.normal(ks[9], (3,), f32)
    v1 = jax.random.uniform(ks[10], (3,), f32, 0.5, 1.5)

    c2w = 0.15 * jax.random.normal(ks[11], (3, 3, 4, 4), f32)
    c2b = 0.1 * jax.random.normal(ks[12], (3,), f32)
    g2 = 1.0 + 0.1 * jax.random.normal(ks[13], (3,), f32)
    be2 = 0.1 * jax.random.normal(ks[14], (3,), f32)
    m2 = 0.1 * jax.random.normal(ks[15], (3,), f32)
    v2 = jax.random.uniform(ks[16], (3,), f32, 0.5, 1.5)

    fc1_w = 0.05 * jax.random.normal(ks[17], (3 * 8 * 8, 100), f32)   # = torch fc1.weight.T
    fc1_b = 0.1 * jax.random.normal(ks[18], (100,), f32)
    fc2_w = 0.1 * jax.random.normal(ks[19], (100, 10), f32)           # = torch fc2.weight.T
    fc2_b = 0.1 * jax.random.normal(ks[20], (10,), f32)

    # eval-mode BatchNorm folded into per-channel scale / bias
    l_scale = l_gamma / jnp.sqrt(l_var + BN_EPS)
    l_bias = l_beta - l_mean * l_scale
    s1 = g1 / jnp.sqrt(v1 + BN_EPS); t1 = be1 - m1 * s1
    s2 = g2 / jnp.sqrt(v2 + BN_EPS); t2 = be2 - m2 * s2

    raw = dict(layer_w=layer_w, l_scale=l_scale, l_bias=l_bias,
               c1w=c1w, c1b=c1b, s1=s1, t1=t1,
               c2w=c2w, c2b=c2b, s2=s2, t2=t2,
               fc1_w=fc1_w, fc1_b=fc1_b, fc2_w=fc2_w, fc2_b=fc2_b)

    # ---- kernel-side packing: BN scale folded into conv weights; im2col column order is
    #      (tap_row*kW + tap_col)*3 + in_channel, matching the kernel's scratch layout ----
    wl = layer_w * l_scale[:, :, None, None, None]                       # (16, 3, 3, 3, 3)
    wl = jnp.transpose(wl, (0, 1, 3, 4, 2)).reshape(NUM_LAYERS, 3, 27)
    wl = jnp.pad(wl, ((0, 0), (0, 0), (0, 5)))                           # 27 -> 32 columns

    w1 = jnp.transpose(c1w * s1[:, None, None, None], (0, 2, 3, 1)).reshape(3, 48)
    w2 = jnp.transpose(c2w * s2[:, None, None, None], (0, 2, 3, 1)).reshape(3, 48)

    kparams = dict(
        wl=wl,
        bl=l_bias.reshape(NUM_LAYERS, 3, 1),
        w1=w1,
        b1=(t1 + c1b * s1).reshape(3, 1),     # conv1 bias folded through bn1
        w2=w2,
        b2=(t2 + c2b * s2).reshape(3, 1),     # conv2 bias folded through bn2
        fc1_w=fc1_w,
        fc1_b=fc1_b.reshape(1, 100),
        fc2_w=fc2_w,
        fc2_b=fc2_b.reshape(1, 10),
    )
    return raw, kparams


def reference_forward(x, p):
    hi = jax.lax.Precision.HIGHEST

    def conv(v, w, stride, pad):
        return jax.lax.conv_general_dilated(
            v, w, (stride, stride), [(pad, pad), (pad, pad)],
            dimension_numbers=("NCHW", "OIHW", "NCHW"), precision=hi)

    def bn(v, s, b):
        return v * s[None, :, None, None] + b[None, :, None, None]

    cum = x * 0.5
    cur = x
    for l in range(NUM_LAYERS):
        o = bn(conv(_lrelu(cur), p["layer_w"][l], 1, 1),
               p["l_scale"][l], p["l_bias"][l]) + cum
        cum = (cum + o) * 0.5
        cur = o
    h = conv(_lrelu(cur), p["c1w"], 2, 1) + p["c1b"][None, :, None, None]
    h = bn(h, p["s1"], p["t1"])
    h = conv(_lrelu(h), p["c2w"], 2, 1) + p["c2b"][None, :, None, None]
    h = bn(h, p["s2"], p["t2"])
    h = h.reshape(-1, 3 * 8 * 8)
    h = _lrelu(h)
    h = jnp.dot(h, p["fc1_w"], precision=hi) + p["fc1_b"]
    h = _lrelu(h)
    logits = jnp.dot(h, p["fc2_w"], precision=hi) + p["fc2_b"]
    return jax.nn.log_softmax(logits, axis=0)


if __name__ == "__main__":
    key = jax.random.PRNGKey(0)
    pkey, xkey = jax.random.split(key)
    raw_params, kernel_params = init_params(pkey)

    # 32x32 spatial input so the two stride-2 convs yield 8x8 -> fc1(3*8*8).
    x = jax.random.normal(xkey, (2, 3, 32, 32), jnp.float32)

    out = reinforce_net_forward(x, kernel_params)
    out = jax.block_until_ready(out)
    assert out.shape == (2, 10)

    ref = reference_forward(x, raw_params)
    if not bool(jnp.allclose(out, ref, atol=2e-2, rtol=2e-2)):
        max_err = float(jnp.max(jnp.abs(out - ref)))
        raise AssertionError(f"Pallas kernel mismatch vs reference, max abs err = {max_err}")

    # TODO(synk): Dropout/Dropout2d (train-mode stochastic masking) and train-mode BatchNorm
    # batch statistics are not modeled; this kernel implements the inference forward pass.
    print("KERNEL_OK")
</pallas_src>

<mosaic_0001>
module attributes {stable_mosaic.version = 11 : i64} {
  func.func @fused_kernel(%arg0: memref<3x2048xf32, #tpu.memory_space<vmem>>, %arg1: memref<16x3x32xf32, #tpu.memory_space<vmem>>, %arg2: memref<16x3x1xf32, #tpu.memory_space<vmem>>, %arg3: memref<3x48xf32, #tpu.memory_space<vmem>>, %arg4: memref<3x1xf32, #tpu.memory_space<vmem>>, %arg5: memref<3x48xf32, #tpu.memory_space<vmem>>, %arg6: memref<3x1xf32, #tpu.memory_space<vmem>>, %arg7: memref<2048x128xf32, #tpu.memory_space<vmem>>, %arg8: memref<192x100xf32, #tpu.memory_space<vmem>>, %arg9: memref<1x100xf32, #tpu.memory_space<vmem>>, %arg10: memref<100x10xf32, #tpu.memory_space<vmem>>, %arg11: memref<1x10xf32, #tpu.memory_space<vmem>>, %arg12: memref<2x10xf32, #tpu.memory_space<vmem>>, %arg13: memref<48x2048xf32, #tpu.memory_space<vmem>>, %arg14: memref<8x2048xf32, #tpu.memory_space<vmem>>) attributes {dimension_semantics = [], scalar_prefetch = 0 : i64, scratch_operands = 2 : i64, tpu.core_type = #tpu.core_type<tc>} {
    %cst = arith.constant 0.000000e+00 : f32
    %0 = vector.broadcast %cst : f32 to vector<48x2048xf32>
    %c0 = arith.constant 0 : index
    %c0_0 = arith.constant 0 : index
    %1 = vector.load %arg13[%c0, %c0_0] : memref<48x2048xf32, #tpu.memory_space<vmem>>, vector<48x2048xf32>
    tpu.vector_store %arg13[%c0, %c0_0], %0 {strides = array<i32>} : memref<48x2048xf32, #tpu.memory_space<vmem>>, vector<48x2048xf32>,
    %2 = tpu.iota {dimensions = array<i32: 1>} : vector<1x2048xi32>
    %c31_i32 = arith.constant 31 : i32
    %3 = vector.broadcast %c31_i32 : i32 to vector<1x2048xi32>
    %4 = arith.andi %2, %3 : vector<1x2048xi32>
    %c1023_i32 = arith.constant 1023 : i32
    %5 = vector.broadcast %c1023_i32 : i32 to vector<1x2048xi32>
    %6 = arith.andi %2, %5 : vector<1x2048xi32>
    %c32_i32 = arith.constant 32 : i32
    %7 = vector.broadcast %c32_i32 : i32 to vector<1x2048xi32>
    %8 = arith.cmpi sge, %6, %7 : vector<1x2048xi32>
    %c1_i32 = arith.constant 1 : i32
    %9 = vector.broadcast %c1_i32 : i32 to vector<1x2048xi32>
    %10 = arith.cmpi sge, %4, %9 : vector<1x2048xi32>
    %11 = arith.andi %8, %10 : vector<1x2048xi1>
    %12 = arith.extui %11 : vector<1x2048xi1> to vector<1x2048xi32>
    %13 = arith.sitofp %12 : vector<1x2048xi32> to vector<1x2048xf32>
    %c0_1 = arith.constant 0 : index
    %c0_2 = arith.constant 0 : index
    %14 = vector.load %arg14[%c0_1, %c0_2] : memref<8x2048xf32, #tpu.memory_space<vmem>>, vector<1x2048xf32>
    tpu.vector_store %arg14[%c0_1, %c0_2], %13 {strides = array<i32>} : memref<8x2048xf32, #tpu.memory_space<vmem>>, vector<1x2048xf32>,
    %c32_i32_3 = arith.constant 32 : i32
    %15 = vector.broadcast %c32_i32_3 : i32 to vector<1x2048xi32>
    %16 = arith.cmpi sge, %6, %15 : vector<1x2048xi32>
    %17 = arith.extui %16 : vector<1x2048xi1> to vector<1x2048xi32>
    %18 = arith.sitofp %17 : vector<1x2048xi32> to vector<1x2048xf32>
    %c1 = arith.constant 1 : index
    %c0_4 = arith.constant 0 : index
    %19 = vector.load %arg14[%c1, %c0_4] : memref<8x2048xf32, #tpu.memory_space<vmem>>, vector<1x2048xf32>
    tpu.vector_store %arg14[%c1, %c0_4], %18 {strides = array<i32>} : memref<8x2048xf32, #tpu.memory_space<vmem>>, vector<1x2048xf32>,
    %c32_i32_5 = arith.constant 32 : i32
    %20 = vector.broadcast %c32_i32_5 : i32 to vector<1x2048xi32>
    %21 = arith.cmpi sge, %6, %20 : vector<1x2048xi32>
    %c30_i32 = arith.constant 30 : i32
    %22 = vector.broadcast %c30_i32 : i32 to vector<1x2048xi32>
    %23 = arith.cmpi sle, %4, %22 : vector<1x2048xi32>
    %24 = arith.andi %21, %23 : vector<1x2048xi1>
    %25 = arith.extui %24 : vector<1x2048xi1> to vector<1x2048xi32>
    %26 = arith.sitofp %25 : vector<1x2048xi32> to vector<1x2048xf32>
    %c2 = arith.constant 2 : index
    %c0_6 = arith.constant 0 : index
    %27 = vector.load %arg14[%c2, %c0_6] : memref<8x2048xf32, #tpu.memory_space<vmem>>, vector<1x2048xf32>
    tpu.vector_store %arg14[%c2, %c0_6], %26 {strides = array<i32>} : memref<8x2048xf32, #tpu.memory_space<vmem>>, vector<1x2048xf32>,
    %c1_i32_7 = arith.constant 1 : i32
    %28 = vector.broadcast %c1_i32_7 : i32 to vector<1x2048xi32>
    %29 = arith.cmpi sge, %4, %28 : vector<1x2048xi32>
    %30 = arith.extui %29 : vector<1x2048xi1> to vector<1x2048xi32>
    %31 = arith.sitofp %30 : vector<1x2048xi32> to vector<1x2048xf32>
    %c3 = arith.constant 3 : index
    %c0_8 = arith.constant 0 : index
    %32 = vector.load %arg14[%c3, %c0_8] : memref<8x2048xf32, #tpu.memory_space<vmem>>, vector<1x2048xf32>
    tpu.vector_store %arg14[%c3, %c0_8], %31 {strides = array<i32>} : memref<8x2048xf32, #tpu.memory_space<vmem>>, vector<1x2048xf32>,
    %c30_i32_9 = arith.constant 30 : i32
    %33 = vector.broadcast %c30_i32_9 : i32 to vector<1x2048xi32>
    %34 = arith.cmpi sle, %4, %33 : vector<1x2048xi32>
    %35 = arith.extui %34 : vector<1x2048xi1> to vector<1x2048xi32>
    %36 = arith.sitofp %35 : vector<1x2048xi32> to vector<1x2048xf32>
    %c4 = arith.constant 4 : index
    %c0_10 = arith.constant 0 : index
    %37 = vector.load %arg14[%c4, %c0_10] : memref<8x2048xf32, #tpu.memory_space<vmem>>, vector<1x2048xf32>
    tpu.vector_store %arg14[%c4, %c0_10], %36 {strides = array<i32>} : memref<8x2048xf32, #tpu.memory_space<vmem>>, vector<1x2048xf32>,
    %c992_i32 = arith.constant 992 : i32
    %38 = vector.broadcast %c992_i32 : i32 to vector<1x2048xi32>
    %39 = arith.cmpi slt, %6, %38 : vector<1x2048xi32>
    %c1_i32_11 = arith.constant 1 : i32
    %40 = vector.broadcast %c1_i32_11 : i32 to vector<1x2048xi32>
    %41 = arith.cmpi sge, %4, %40 : vector<1x2048xi32>
    %42 = arith.andi %39, %41 : vector<1x2048xi1>
    %43 = arith.extui %42 : vector<1x2048xi1> to vector<1x2048xi32>
    %44 = arith.sitofp %43 : vector<1x2048xi32> to vector<1x2048xf32>
    %c5 = arith.constant 5 : index
    %c0_12 = arith.constant 0 : index
    %45 = vector.load %arg14[%c5, %c0_12] : memref<8x2048xf32, #tpu.memory_space<vmem>>, vector<1x2048xf32>
    tpu.vector_store %arg14[%c5, %c0_12], %44 {strides = array<i32>} : memref<8x2048xf32, #tpu.memory_space<vmem>>, vector<1x2048xf32>,
    %c992_i32_13 = arith.constant 992 : i32
    %46 = vector.broadcast %c992_i32_13 : i32 to vector<1x2048xi32>
    %47 = arith.cmpi slt, %6, %46 : vector<1x2048xi32>
    %48 = arith.extui %47 : vector<1x2048xi1> to vector<1x2048xi32>
    %49 = arith.sitofp %48 : vector<1x2048xi32> to vector<1x2048xf32>
    %c6 = arith.constant 6 : index
    %c0_14 = arith.constant 0 : index
    %50 = vector.load %arg14[%c6, %c0_14] : memref<8x2048xf32, #tpu.memory_space<vmem>>, vector<1x2048xf32>
    tpu.vector_store %arg14[%c6, %c0_14], %49 {strides = array<i32>} : memref<8x2048xf32, #tpu.memory_space<vmem>>, vector<1x2048xf32>,
    %c992_i32_15 = arith.constant 992 : i32
    %51 = vector.broadcast %c992_i32_15 : i32 to vector<1x2048xi32>
    %52 = arith.cmpi slt, %6, %51 : vector<1x2048xi32>
    %c30_i32_16 = arith.constant 30 : i32
    %53 = vector.broadcast %c30_i32_16 : i32 to vector<1x2048xi32>
    %54 = arith.cmpi sle, %4, %53 : vector<1x2048xi32>
    %55 = arith.andi %52, %54 : vector<1x2048xi1>
    %56 = arith.extui %55 : vector<1x2048xi1> to vector<1x2048xi32>
    %57 = arith.sitofp %56 : vector<1x2048xi32> to vector<1x2048xf32>
    %c7 = arith.constant 7 : index
    %c0_17 = arith.constant 0 : index
    %58 = vector.load %arg14[%c7, %c0_17] : memref<8x2048xf32, #tpu.memory_space<vmem>>, vector<1x2048xf32>
    tpu.vector_store %arg14[%c7, %c0_17], %57 {strides = array<i32>} : memref<8x2048xf32, #tpu.memory_space<vmem>>, vector<1x2048xf32>,
    %c0_18 = arith.constant 0 : index
    %c0_19 = arith.constant 0 : index
    %59 = vector.load %arg0[%c0_18, %c0_19] : memref<3x2048xf32, #tpu.memory_space<vmem>>, vector<3x2048xf32>
    %cst_20 = arith.constant 5.000000e-01 : f32
    %60 = vector.broadcast %cst_20 : f32 to vector<3x2048xf32>
    %61 = arith.mulf %59, %60 : vector<3x2048xf32>
    %c0_i32 = arith.constant 0 : i32
    %c16_i32 = arith.constant 16 : i32
    %62 = arith.addi %c0_i32, %c16_i32 : i32
    %c1_i32_21 = arith.constant 1 : i32
    %63:2 = scf.for %arg15 = %c0_i32 to %62 step %c1_i32_21 iter_args(%arg16 = %59, %arg17 = %61) -> (vector<3x2048xf32>, vector<3x2048xf32>)  : i32 {
      %cst_164 = arith.constant 0.000000e+00 : f32
      %425 = vector.broadcast %cst_164 : f32 to vector<3x2048xf32>
      %426 = arith.cmpf ogt, %arg16, %425 : vector<3x2048xf32>
      %cst_165 = arith.constant 0.00999999977 : f32
      %427 = vector.broadcast %cst_165 : f32 to vector<3x2048xf32>
      %428 = arith.mulf %427, %arg16 : vector<3x2048xf32>
      %429 = arith.select %426, %arg16, %428 : vector<3x2048xi1>, vector<3x2048xf32>
      %c33_i32_166 = arith.constant 33 : i32
      %430 = tpu.dynamic_rotate %429 by %c33_i32_166 dim 1 : vector<3x2048xf32>, i32 -> vector<3x2048xf32>
      %c0_167 = arith.constant 0 : index
      %c0_168 = arith.constant 0 : index
      %431 = vector.load %arg14[%c0_167, %c0_168] : memref<8x2048xf32, #tpu.memory_space<vmem>>, vector<1x2048xf32>
      %432 = vector.broadcast %431 : vector<1x2048xf32> to vector<3x2048xf32>
      %433 = arith.mulf %430, %432 : vector<3x2048xf32>
      %c0_169 = arith.constant 0 : index
      %c0_170 = arith.constant 0 : index
      %434 = vector.load %arg13[%c0_169, %c0_170] : memref<48x2048xf32, #tpu.memory_space<vmem>>, vector<3x2048xf32>
      tpu.vector_store %arg13[%c0_169, %c0_170], %433 {strides = array<i32>} : memref<48x2048xf32, #tpu.memory_space<vmem>>, vector<3x2048xf32>,
      %c32_i32_171 = arith.constant 32 : i32
      %435 = tpu.dynamic_rotate %429 by %c32_i32_171 dim 1 : vector<3x2048xf32>, i32 -> vector<3x2048xf32>
      %c1_172 = arith.constant 1 : index
      %c0_173 = arith.constant 0 : index
      %436 = vector.load %arg14[%c1_172, %c0_173] : memref<8x2048xf32, #tpu.memory_space<vmem>>, vector<1x2048xf32>
      %437 = vector.broadcast %436 : vector<1x2048xf32> to vector<3x2048xf32>
      %438 = arith.mulf %435, %437 : vector<3x2048xf32>
      %c3_174 = arith.constant 3 : index
      %c0_175 = arith.constant 0 : index
      %439 = vector.load %arg13[%c3_174, %c0_175] : memref<48x2048xf32, #tpu.memory_space<vmem>>, vector<3x2048xf32>
      tpu.vector_store %arg13[%c3_174, %c0_175], %438 {strides = array<i32>} : memref<48x2048xf32, #tpu.memory_space<vmem>>, vector<3x2048xf32>,
      %c31_i32_176 = arith.constant 31 : i32
      %440 = tpu.dynamic_rotate %429 by %c31_i32_176 dim 1 : vector<3x2048xf32>, i32 -> vector<3x2048xf32>
      %c2_177 = arith.constant 2 : index
      %c0_178 = arith.constant 0 : index
      %441 = vector.load %arg14[%c2_177, %c0_178] : memref<8x2048xf32, #tpu.memory_space<vmem>>, vector<1x2048xf32>
      %442 = vector.broadcast %441 : vector<1x2048xf32> to vector<3x2048xf32>
      %443 = arith.mulf %440, %442 : vector<3x2048xf32>
      %c6_179 = arith.constant 6 : index
      %c0_180 = arith.constant 0 : index
      %444 = vector.load %arg13[%c6_179, %c0_180] : memref<48x2048xf32, #tpu.memory_space<vmem>>, vector<3x2048xf32>
      tpu.vector_store %arg13[%c6_179, %c0_180], %443 {strides = array<i32>} : memref<48x2048xf32, #tpu.memory_space<vmem>>, vector<3x2048xf32>,
      %c1_i32_181 = arith.constant 1 : i32
      %445 = tpu.dynamic_rotate %429 by %c1_i32_181 dim 1 : vector<3x2048xf32>, i32 -> vector<3x2048xf32>
      %c3_182 = arith.constant 3 : index
      %c0_183 = arith.constant 0 : index
      %446 = vector.load %arg14[%c3_182, %c0_183] : memref<8x2048xf32, #tpu.memory_space<vmem>>, vector<1x2048xf32>
      %447 = vector.broadcast %446 : vector<1x2048xf32> to vector<3x2048xf32>
      %448 = arith.mulf %445, %447 : vector<3x2048xf32>
      %c9_184 = arith.constant 9 : index
      %c0_185 = arith.constant 0 : index
      %449 = vector.load %arg13[%c9_184, %c0_185] : memref<48x2048xf32, #tpu.memory_space<vmem>>, vector<3x2048xf32>
      tpu.vector_store %arg13[%c9_184, %c0_185], %448 {strides = array<i32>} : memref<48x2048xf32, #tpu.memory_space<vmem>>, vector<3x2048xf32>,
      %c12_186 = arith.constant 12 : index
      %c0_187 = arith.constant 0 : index
      %450 = vector.load %arg13[%c12_186, %c0_187] : memref<48x2048xf32, #tpu.memory_space<vmem>>, vector<3x2048xf32>
      tpu.vector_store %arg13[%c12_186, %c0_187], %429 {strides = array<i32>} : memref<48x2048xf32, #tpu.memory_space<vmem>>, vector<3x2048xf32>,
      %c2047_i32_188 = arith.constant 2047 : i32
      %451 = tpu.dynamic_rotate %429 by %c2047_i32_188 dim 1 : vector<3x2048xf32>, i32 -> vector<3x2048xf32>
      %c4_189 = arith.constant 4 : index
      %c0_190 = arith.constant 0 : index
      %452 = vector.load %arg14[%c4_189, %c0_190] : memref<8x2048xf32, #tpu.memory_space<vmem>>, vector<1x2048xf32>
      %453 = vector.broadcast %452 : vector<1x2048xf32> to vector<3x2048xf32>
      %454 = arith.mulf %451, %453 : vector<3x2048xf32>
      %c15_191 = arith.constant 15 : index
      %c0_192 = arith.constant 0 : index
      %455 = vector.load %arg13[%c15_191, %c0_192] : memref<48x2048xf32, #tpu.memory_space<vmem>>, vector<3x2048xf32>
      tpu.vector_store %arg13[%c15_191, %c0_192], %454 {strides = array<i32>} : memref<48x2048xf32, #tpu.memory_space<vmem>>, vector<3x2048xf32>,
      %c2017_i32_193 = arith.constant 2017 : i32
      %456 = tpu.dynamic_rotate %429 by %c2017_i32_193 dim 1 : vector<3x2048xf32>, i32 -> vector<3x2048xf32>
      %c5_194 = arith.constant 5 : index
      %c0_195 = arith.constant 0 : index
      %457 = vector.load %arg14[%c5_194, %c0_195] : memref<8x2048xf32, #tpu.memory_space<vmem>>, vector<1x2048xf32>
      %458 = vector.broadcast %457 : vector<1x2048xf32> to vector<3x2048xf32>
      %459 = arith.mulf %456, %458 : vector<3x2048xf32>
      %c18_196 = arith.constant 18 : index
      %c0_197 = arith.constant 0 : index
      %460 = vector.load %arg13[%c18_196, %c0_197] : memref<48x2048xf32, #tpu.memory_space<vmem>>, vector<3x2048xf32>
      tpu.vector_store %arg13[%c18_196, %c0_197], %459 {strides = array<i32>} : memref<48x2048xf32, #tpu.memory_space<vmem>>, vector<3x2048xf32>,
      %c2016_i32_198 = arith.constant 2016 : i32
      %461 = tpu.dynamic_rotate %429 by %c2016_i32_198 dim 1 : vector<3x2048xf32>, i32 -> vector<3x2048xf32>
      %c6_199 = arith.constant 6 : index
      %c0_200 = arith.constant 0 : index
      %462 = vector.load %arg14[%c6_199, %c0_200] : memref<8x2048xf32, #tpu.memory_space<vmem>>, vector<1x2048xf32>
      %463 = vector.broadcast %462 : vector<1x2048xf32> to vector<3x2048xf32>
      %464 = arith.mulf %461, %463 : vector<3x2048xf32>
      %c21_201 = arith.constant 21 : index
      %c0_202 = arith.constant 0 : index
      %465 = vector.load %arg13[%c21_201, %c0_202] : memref<48x2048xf32, #tpu.memory_space<vmem>>, vector<3x2048xf32>
      tpu.vector_store %arg13[%c21_201, %c0_202], %464 {strides = array<i32>} : memref<48x2048xf32, #tpu.memory_space<vmem>>, vector<3x2048xf32>,
      %c2015_i32_203 = arith.constant 2015 : i32
      %466 = tpu.dynamic_rotate %429 by %c2015_i32_203 dim 1 : vector<3x2048xf32>, i32 -> vector<3x2048xf32>
      %c7_204 = arith.constant 7 : index
      %c0_205 = arith.constant 0 : index
      %467 = vector.load %arg14[%c7_204, %c0_205] : memref<8x2048xf32, #tpu.memory_space<vmem>>, vector<1x2048xf32>
      %468 = vector.broadcast %467 : vector<1x2048xf32> to vector<3x2048xf32>
      %469 = arith.mulf %466, %468 : vector<3x2048xf32>
      %c24_206 = arith.constant 24 : index
      %c0_207 = arith.constant 0 : index
      %470 = vector.load %arg13[%c24_206, %c0_207] : memref<48x2048xf32, #tpu.memory_space<vmem>>, vector<3x2048xf32>
      tpu.vector_store %arg13[%c24_206, %c0_207], %469 {strides = array<i32>} : memref<48x2048xf32, #tpu.memory_space<vmem>>, vector<3x2048xf32>,
      %471 = arith.index_cast %arg15 : i32 to index
      %c0_208 = arith.constant 0 : index
      %c0_209 = arith.constant 0 : index
      %472 = vector.load %arg1[%471, %c0_208, %c0_209] : memref<16x3x32xf32, #tpu.memory_space<vmem>>, vector<1x3x32xf32>
      %473 = vector.shape_cast %472 : vector<1x3x32xf32> to vector<3x32xf32>
      %c0_210 = arith.constant 0 : index
      %c0_211 = arith.constant 0 : index
      %474 = vector.load %arg13[%c0_210, %c0_211] : memref<48x2048xf32, #tpu.memory_space<vmem>>, vector<32x2048xf32>
      %cst_212 = arith.constant dense<0.000000e+00> : vector<3x2048xf32>
      %475 = tpu.matmul %473, %474, %cst_212 {dimension_numbers = #tpu.dot_dimension_numbers<[1], [0], [0], [1], [0, 0, 1, 1], [], []>} : vector<3x32xf32>, vector<32x2048xf32>, vector<3x2048xf32> -> vector<3x2048xf32>
      %476 = arith.index_cast %arg15 : i32 to index
      %c0_213 = arith.constant 0 : index
      %c0_214 = arith.constant 0 : index
      %477 = vector.load %arg2[%476, %c0_213, %c0_214] : memref<16x3x1xf32, #tpu.memory_space<vmem>>, vector<1x3x1xf32>
      %478 = vector.shape_cast %477 : vector<1x3x1xf32> to vector<3x1xf32>
      %479 = vector.broadcast %478 : vector<3x1xf32> to vector<3x2048xf32>
      %480 = arith.addf %475, %479 : vector<3x2048xf32>
      %481 = arith.addf %480, %arg17 : vector<3x2048xf32>
      %482 = arith.addf %arg17, %481 : vector<3x2048xf32>
      %cst_215 = arith.constant 5.000000e-01 : f32
      %483 = vector.broadcast %cst_215 : f32 to vector<3x2048xf32>
      %484 = arith.mulf %482, %483 : vector<3x2048xf32>
      scf.yield %481, %484 : vector<3x2048xf32>, vector<3x2048xf32>
    }
    %c16_i32_22 = arith.constant 16 : i32
    %cst_23 = arith.constant 0.000000e+00 : f32
    %64 = vector.broadcast %cst_23 : f32 to vector<3x2048xf32>
    %65 = arith.cmpf ogt, %63#0, %64 : vector<3x2048xf32>
    %cst_24 = arith.constant 0.00999999977 : f32
    %66 = vector.broadcast %cst_24 : f32 to vector<3x2048xf32>
    %67 = arith.mulf %66, %63#0 : vector<3x2048xf32>
    %68 = arith.select %65, %63#0, %67 : vector<3x2048xi1>, vector<3x2048xf32>
    %c33_i32 = arith.constant 33 : i32
    %69 = tpu.dynamic_rotate %68 by %c33_i32 dim 1 : vector<3x2048xf32>, i32 -> vector<3x2048xf32>
    %c32_i32_25 = arith.constant 32 : i32
    %70 = vector.broadcast %c32_i32_25 : i32 to vector<1x2048xi32>
    %71 = arith.cmpi sge, %6, %70 : vector<1x2048xi32>
    %c1_i32_26 = arith.constant 1 : i32
    %72 = vector.broadcast %c1_i32_26 : i32 to vector<1x2048xi32>
    %73 = arith.cmpi sge, %4, %72 : vector<1x2048xi32>
    %74 = arith.andi %71, %73 : vector<1x2048xi1>
    %75 = arith.extui %74 : vector<1x2048xi1> to vector<1x2048xi32>
    %76 = arith.sitofp %75 : vector<1x2048xi32> to vector<1x2048xf32>
    %77 = vector.broadcast %76 : vector<1x2048xf32> to vector<3x2048xf32>
    %78 = arith.mulf %69, %77 : vector<3x2048xf32>
    %c0_27 = arith.constant 0 : index
    %c0_28 = arith.constant 0 : index
    %79 = vector.load %arg13[%c0_27, %c0_28] : memref<48x2048xf32, #tpu.memory_space<vmem>>, vector<3x2048xf32>
    tpu.vector_store %arg13[%c0_27, %c0_28], %78 {strides = array<i32>} : memref<48x2048xf32, #tpu.memory_space<vmem>>, vector<3x2048xf32>,
    %c32_i32_29 = arith.constant 32 : i32
    %80 = tpu.dynamic_rotate %68 by %c32_i32_29 dim 1 : vector<3x2048xf32>, i32 -> vector<3x2048xf32>
    %c32_i32_30 = arith.constant 32 : i32
    %81 = vector.broadcast %c32_i32_30 : i32 to vector<1x2048xi32>
    %82 = arith.cmpi sge, %6, %81 : vector<1x2048xi32>
    %83 = arith.extui %82 : vector<1x2048xi1> to vector<1x2048xi32>
    %84 = arith.sitofp %83 : vector<1x2048xi32> to vector<1x2048xf32>
    %85 = vector.broadcast %84 : vector<1x2048xf32> to vector<3x2048xf32>
    %86 = arith.mulf %80, %85 : vector<3x2048xf32>
    %c3_31 = arith.constant 3 : index
    %c0_32 = arith.constant 0 : index
    %87 = vector.load %arg13[%c3_31, %c0_32] : memref<48x2048xf32, #tpu.memory_space<vmem>>, vector<3x2048xf32>
    tpu.vector_store %arg13[%c3_31, %c0_32], %86 {strides = array<i32>} : memref<48x2048xf32, #tpu.memory_space<vmem>>, vector<3x2048xf32>,
    %c31_i32_33 = arith.constant 31 : i32
    %88 = tpu.dynamic_rotate %68 by %c31_i32_33 dim 1 : vector<3x2048xf32>, i32 -> vector<3x2048xf32>
    %c32_i32_34 = arith.constant 32 : i32
    %89 = vector.broadcast %c32_i32_34 : i32 to vector<1x2048xi32>
    %90 = arith.cmpi sge, %6, %89 : vector<1x2048xi32>
    %c30_i32_35 = arith.constant 30 : i32
    %91 = vector.broadcast %c30_i32_35 : i32 to vector<1x2048xi32>
    %92 = arith.cmpi sle, %4, %91 : vector<1x2048xi32>
    %93 = arith.andi %90, %92 : vector<1x2048xi1>
    %94 = arith.extui %93 : vector<1x2048xi1> to vector<1x2048xi32>
    %95 = arith.sitofp %94 : vector<1x2048xi32> to vector<1x2048xf32>
    %96 = vector.broadcast %95 : vector<1x2048xf32> to vector<3x2048xf32>
    %97 = arith.mulf %88, %96 : vector<3x2048xf32>
    %c6_36 = arith.constant 6 : index
    %c0_37 = arith.constant 0 : index
    %98 = vector.load %arg13[%c6_36, %c0_37] : memref<48x2048xf32, #tpu.memory_space<vmem>>, vector<3x2048xf32>
    tpu.vector_store %arg13[%c6_36, %c0_37], %97 {strides = array<i32>} : memref<48x2048xf32, #tpu.memory_space<vmem>>, vector<3x2048xf32>,
    %c30_i32_38 = arith.constant 30 : i32
    %99 = tpu.dynamic_rotate %68 by %c30_i32_38 dim 1 : vector<3x2048xf32>, i32 -> vector<3x2048xf32>
    %c32_i32_39 = arith.constant 32 : i32
    %100 = vector.broadcast %c32_i32_39 : i32 to vector<1x2048xi32>
    %101 = arith.cmpi sge, %6, %100 : vector<1x2048xi32>
    %c29_i32 = arith.constant 29 : i32
    %102 = vector.broadcast %c29_i32 : i32 to vector<1x2048xi32>
    %103 = arith.cmpi sle, %4, %102 : vector<1x2048xi32>
    %104 = arith.andi %101, %103 : vector<1x2048xi1>
    %105 = arith.extui %104 : vector<1x2048xi1> to vector<1x2048xi32>
    %106 = arith.sitofp %105 : vector<1x2048xi32> to vector<1x2048xf32>
    %107 = vector.broadcast %106 : vector<1x2048xf32> to vector<3x2048xf32>
    %108 = arith.mulf %99, %107 : vector<3x2048xf32>
    %c9 = arith.constant 9 : index
    %c0_40 = arith.constant 0 : index
    %109 = vector.load %arg13[%c9, %c0_40] : memref<48x2048xf32, #tpu.memory_space<vmem>>, vector<3x2048xf32>
    tpu.vector_store %arg13[%c9, %c0_40], %108 {strides = array<i32>} : memref<48x2048xf32, #tpu.memory_space<vmem>>, vector<3x2048xf32>,
    %c1_i32_41 = arith.constant 1 : i32
    %110 = tpu.dynamic_rotate %68 by %c1_i32_41 dim 1 : vector<3x2048xf32>, i32 -> vector<3x2048xf32>
    %c1_i32_42 = arith.constant 1 : i32
    %111 = vector.broadcast %c1_i32_42 : i32 to vector<1x2048xi32>
    %112 = arith.cmpi sge, %4, %111 : vector<1x2048xi32>
    %113 = arith.extui %112 : vector<1x2048xi1> to vector<1x2048xi32>
    %114 = arith.sitofp %113 : vector<1x2048xi32> to vector<1x2048xf32>
    %115 = vector.broadcast %114 : vector<1x2048xf32> to vector<3x2048xf32>
    %116 = arith.mulf %110, %115 : vector<3x2048xf32>
    %c12 = arith.constant 12 : index
    %c0_43 = arith.constant 0 : index
    %117 = vector.load %arg13[%c12, %c0_43] : memref<48x2048xf32, #tpu.memory_space<vmem>>, vector<3x2048xf32>
    tpu.vector_store %arg13[%c12, %c0_43], %116 {strides = array<i32>} : memref<48x2048xf32, #tpu.memory_space<vmem>>, vector<3x2048xf32>,
    %c15 = arith.constant 15 : index
    %c0_44 = arith.constant 0 : index
    %118 = vector.load %arg13[%c15, %c0_44] : memref<48x2048xf32, #tpu.memory_space<vmem>>, vector<3x2048xf32>
    tpu.vector_store %arg13[%c15, %c0_44], %68 {strides = array<i32>} : memref<48x2048xf32, #tpu.memory_space<vmem>>, vector<3x2048xf32>,
    %c2047_i32 = arith.constant 2047 : i32
    %119 = tpu.dynamic_rotate %68 by %c2047_i32 dim 1 : vector<3x2048xf32>, i32 -> vector<3x2048xf32>
    %c30_i32_45 = arith.constant 30 : i32
    %120 = vector.broadcast %c30_i32_45 : i32 to vector<1x2048xi32>
    %121 = arith.cmpi sle, %4, %120 : vector<1x2048xi32>
    %122 = arith.extui %121 : vector<1x2048xi1> to vector<1x2048xi32>
    %123 = arith.sitofp %122 : vector<1x2048xi32> to vector<1x2048xf32>
    %124 = vector.broadcast %123 : vector<1x2048xf32> to vector<3x2048xf32>
    %125 = arith.mulf %119, %124 : vector<3x2048xf32>
    %c18 = arith.constant 18 : index
    %c0_46 = arith.constant 0 : index
    %126 = vector.load %arg13[%c18, %c0_46] : memref<48x2048xf32, #tpu.memory_space<vmem>>, vector<3x2048xf32>
    tpu.vector_store %arg13[%c18, %c0_46], %125 {strides = array<i32>} : memref<48x2048xf32, #tpu.memory_space<vmem>>, vector<3x2048xf32>,
    %c2046_i32 = arith.constant 2046 : i32
    %127 = tpu.dynamic_rotate %68 by %c2046_i32 dim 1 : vector<3x2048xf32>, i32 -> vector<3x2048xf32>
    %c29_i32_47 = arith.constant 29 : i32
    %128 = vector.broadcast %c29_i32_47 : i32 to vector<1x2048xi32>
    %129 = arith.cmpi sle, %4, %128 : vector<1x2048xi32>
    %130 = arith.extui %129 : vector<1x2048xi1> to vector<1x2048xi32>
    %131 = arith.sitofp %130 : vector<1x2048xi32> to vector<1x2048xf32>
    %132 = vector.broadcast %131 : vector<1x2048xf32> to vector<3x2048xf32>
    %133 = arith.mulf %127, %132 : vector<3x2048xf32>
    %c21 = arith.constant 21 : index
    %c0_48 = arith.constant 0 : index
    %134 = vector.load %arg13[%c21, %c0_48] : memref<48x2048xf32, #tpu.memory_space<vmem>>, vector<3x2048xf32>
    tpu.vector_store %arg13[%c21, %c0_48], %133 {strides = array<i32>} : memref<48x2048xf32, #tpu.memory_space<vmem>>, vector<3x2048xf32>,
    %c2017_i32 = arith.constant 2017 : i32
    %135 = tpu.dynamic_rotate %68 by %c2017_i32 dim 1 : vector<3x2048xf32>, i32 -> vector<3x2048xf32>
    %c992_i32_49 = arith.constant 992 : i32
    %136 = vector.broadcast %c992_i32_49 : i32 to vector<1x2048xi32>
    %137 = arith.cmpi slt, %6, %136 : vector<1x2048xi32>
    %c1_i32_50 = arith.constant 1 : i32
    %138 = vector.broadcast %c1_i32_50 : i32 to vector<1x2048xi32>
    %139 = arith.cmpi sge, %4, %138 : vector<1x2048xi32>
    %140 = arith.andi %137, %139 : vector<1x2048xi1>
    %141 = arith.extui %140 : vector<1x2048xi1> to vector<1x2048xi32>
    %142 = arith.sitofp %141 : vector<1x2048xi32> to vector<1x2048xf32>
    %143 = vector.broadcast %142 : vector<1x2048xf32> to vector<3x2048xf32>
    %144 = arith.mulf %135, %143 : vector<3x2048xf32>
    %c24 = arith.constant 24 : index
    %c0_51 = arith.constant 0 : index
    %145 = vector.load %arg13[%c24, %c0_51] : memref<48x2048xf32, #tpu.memory_space<vmem>>, vector<3x2048xf32>
    tpu.vector_store %arg13[%c24, %c0_51], %144 {strides = array<i32>} : memref<48x2048xf32, #tpu.memory_space<vmem>>, vector<3x2048xf32>,
    %c2016_i32 = arith.constant 2016 : i32
    %146 = tpu.dynamic_rotate %68 by %c2016_i32 dim 1 : vector<3x2048xf32>, i32 -> vector<3x2048xf32>
    %c992_i32_52 = arith.constant 992 : i32
    %147 = vector.broadcast %c992_i32_52 : i32 to vector<1x2048xi32>
    %148 = arith.cmpi slt, %6, %147 : vector<1x2048xi32>
    %149 = arith.extui %148 : vector<1x2048xi1> to vector<1x2048xi32>
    %150 = arith.sitofp %149 : vector<1x2048xi32> to vector<1x2048xf32>
    %151 = vector.broadcast %150 : vector<1x2048xf32> to vector<3x2048xf32>
    %152 = arith.mulf %146, %151 : vector<3x2048xf32>
    %c27 = arith.constant 27 : index
    %c0_53 = arith.constant 0 : index
    %153 = vector.load %arg13[%c27, %c0_53] : memref<48x2048xf32, #tpu.memory_space<vmem>>, vector<3x2048xf32>
    tpu.vector_store %arg13[%c27, %c0_53], %152 {strides = array<i32>} : memref<48x2048xf32, #tpu.memory_space<vmem>>, vector<3x2048xf32>,
    %c2015_i32 = arith.constant 2015 : i32
    %154 = tpu.dynamic_rotate %68 by %c2015_i32 dim 1 : vector<3x2048xf32>, i32 -> vector<3x2048xf32>
    %c992_i32_54 = arith.constant 992 : i32
    %155 = vector.broadcast %c992_i32_54 : i32 to vector<1x2048xi32>
    %156 = arith.cmpi slt, %6, %155 : vector<1x2048xi32>
    %c30_i32_55 = arith.constant 30 : i32
    %157 = vector.broadcast %c30_i32_55 : i32 to vector<1x2048xi32>
    %158 = arith.cmpi sle, %4, %157 : vector<1x2048xi32>
    %159 = arith.andi %156, %158 : vector<1x2048xi1>
    %160 = arith.extui %159 : vector<1x2048xi1> to vector<1x2048xi32>
    %161 = arith.sitofp %160 : vector<1x2048xi32> to vector<1x2048xf32>
    %162 = vector.broadcast %161 : vector<1x2048xf32> to vector<3x2048xf32>
    %163 = arith.mulf %154, %162 : vector<3x2048xf32>
    %c30 = arith.constant 30 : index
    %c0_56 = arith.constant 0 : index
    %164 = vector.load %arg13[%c30, %c0_56] : memref<48x2048xf32, #tpu.memory_space<vmem>>, vector<3x2048xf32>
    tpu.vector_store %arg13[%c30, %c0_56], %163 {strides = array<i32>} : memref<48x2048xf32, #tpu.memory_space<vmem>>, vector<3x2048xf32>,
    %c2014_i32 = arith.constant 2014 : i32
    %165 = tpu.dynamic_rotate %68 by %c2014_i32 dim 1 : vector<3x2048xf32>, i32 -> vector<3x2048xf32>
    %c992_i32_57 = arith.constant 992 : i32
    %166 = vector.broadcast %c992_i32_57 : i32 to vector<1x2048xi32>
    %167 = arith.cmpi slt, %6, %166 : vector<1x2048xi32>
    %c29_i32_58 = arith.constant 29 : i32
    %168 = vector.broadcast %c29_i32_58 : i32 to vector<1x2048xi32>
    %169 = arith.cmpi sle, %4, %168 : vector<1x2048xi32>
    %170 = arith.andi %167, %169 : vector<1x2048xi1>
    %171 = arith.extui %170 : vector<1x2048xi1> to vector<1x2048xi32>
    %172 = arith.sitofp %171 : vector<1x2048xi32> to vector<1x2048xf32>
    %173 = vector.broadcast %172 : vector<1x2048xf32> to vector<3x2048xf32>
    %174 = arith.mulf %165, %173 : vector<3x2048xf32>
    %c33 = arith.constant 33 : index
    %c0_59 = arith.constant 0 : index
    %175 = vector.load %arg13[%c33, %c0_59] : memref<48x2048xf32, #tpu.memory_space<vmem>>, vector<3x2048xf32>
    tpu.vector_store %arg13[%c33, %c0_59], %174 {strides = array<i32>} : memref<48x2048xf32, #tpu.memory_space<vmem>>, vector<3x2048xf32>,
    %c1985_i32 = arith.constant 1985 : i32
    %176 = tpu.dynamic_rotate %68 by %c1985_i32 dim 1 : vector<3x2048xf32>, i32 -> vector<3x2048xf32>
    %c960_i32 = arith.constant 960 : i32
    %177 = vector.broadcast %c960_i32 : i32 to vector<1x2048xi32>
    %178 = arith.cmpi slt, %6, %177 : vector<1x2048xi32>
    %c1_i32_60 = arith.constant 1 : i32
    %179 = vector.broadcast %c1_i32_60 : i32 to vector<1x2048xi32>
    %180 = arith.cmpi sge, %4, %179 : vector<1x2048xi32>
    %181 = arith.andi %178, %180 : vector<1x2048xi1>
    %182 = arith.extui %181 : vector<1x2048xi1> to vector<1x2048xi32>
    %183 = arith.sitofp %182 : vector<1x2048xi32> to vector<1x2048xf32>
    %184 = vector.broadcast %183 : vector<1x2048xf32> to vector<3x2048xf32>
    %185 = arith.mulf %176, %184 : vector<3x2048xf32>
    %c36 = arith.constant 36 : index
    %c0_61 = arith.constant 0 : index
    %186 = vector.load %arg13[%c36, %c0_61] : memref<48x2048xf32, #tpu.memory_space<vmem>>, vector<3x2048xf32>
    tpu.vector_store %arg13[%c36, %c0_61], %185 {strides = array<i32>} : memref<48x2048xf32, #tpu.memory_space<vmem>>, vector<3x2048xf32>,
    %c1984_i32 = arith.constant 1984 : i32
    %187 = tpu.dynamic_rotate %68 by %c1984_i32 dim 1 : vector<3x2048xf32>, i32 -> vector<3x2048xf32>
    %c960_i32_62 = arith.constant 960 : i32
    %188 = vector.broadcast %c960_i32_62 : i32 to vector<1x2048xi32>
    %189 = arith.cmpi slt, %6, %188 : vector<1x2048xi32>
    %190 = arith.extui %189 : vector<1x2048xi1> to vector<1x2048xi32>
    %191 = arith.sitofp %190 : vector<1x2048xi32> to vector<1x2048xf32>
    %192 = vector.broadcast %191 : vector<1x2048xf32> to vector<3x2048xf32>
    %193 = arith.mulf %187, %192 : vector<3x2048xf32>
    %c39 = arith.constant 39 : index
    %c0_63 = arith.constant 0 : index
    %194 = vector.load %arg13[%c39, %c0_63] : memref<48x2048xf32, #tpu.memory_space<vmem>>, vector<3x2048xf32>
    tpu.vector_store %arg13[%c39, %c0_63], %193 {strides = array<i32>} : memref<48x2048xf32, #tpu.memory_space<vmem>>, vector<3x2048xf32>,
    %c1983_i32 = arith.constant 1983 : i32
    %195 = tpu.dynamic_rotate %68 by %c1983_i32 dim 1 : vector<3x2048xf32>, i32 -> vector<3x2048xf32>
    %c960_i32_64 = arith.constant 960 : i32
    %196 = vector.broadcast %c960_i32_64 : i32 to vector<1x2048xi32>
    %197 = arith.cmpi slt, %6, %196 : vector<1x2048xi32>
    %c30_i32_65 = arith.constant 30 : i32
    %198 = vector.broadcast %c30_i32_65 : i32 to vector<1x2048xi32>
    %199 = arith.cmpi sle, %4, %198 : vector<1x2048xi32>
    %200 = arith.andi %197, %199 : vector<1x2048xi1>
    %201 = arith.extui %200 : vector<1x2048xi1> to vector<1x2048xi32>
    %202 = arith.sitofp %201 : vector<1x2048xi32> to vector<1x2048xf32>
    %203 = vector.broadcast %202 : vector<1x2048xf32> to vector<3x2048xf32>
    %204 = arith.mulf %195, %203 : vector<3x2048xf32>
    %c42 = arith.constant 42 : index
    %c0_66 = arith.constant 0 : index
    %205 = vector.load %arg13[%c42, %c0_66] : memref<48x2048xf32, #tpu.memory_space<vmem>>, vector<3x2048xf32>
    tpu.vector_store %arg13[%c42, %c0_66], %204 {strides = array<i32>} : memref<48x2048xf32, #tpu.memory_space<vmem>>, vector<3x2048xf32>,
    %c1982_i32 = arith.constant 1982 : i32
    %206 = tpu.dynamic_rotate %68 by %c1982_i32 dim 1 : vector<3x2048xf32>, i32 -> vector<3x2048xf32>
    %c960_i32_67 = arith.constant 960 : i32
    %207 = vector.broadcast %c960_i32_67 : i32 to vector<1x2048xi32>
    %208 = arith.cmpi slt, %6, %207 : vector<1x2048xi32>
    %c29_i32_68 = arith.constant 29 : i32
    %209 = vector.broadcast %c29_i32_68 : i32 to vector<1x2048xi32>
    %210 = arith.cmpi sle, %4, %209 : vector<1x2048xi32>
    %211 = arith.andi %208, %210 : vector<1x2048xi1>
    %212 = arith.extui %211 : vector<1x2048xi1> to vector<1x2048xi32>
    %213 = arith.sitofp %212 : vector<1x2048xi32> to vector<1x2048xf32>
    %214 = vector.broadcast %213 : vector<1x2048xf32> to vector<3x2048xf32>
    %215 = arith.mulf %206, %214 : vector<3x2048xf32>
    %c45 = arith.constant 45 : index
    %c0_69 = arith.constant 0 : index
    %216 = vector.load %arg13[%c45, %c0_69] : memref<48x2048xf32, #tpu.memory_space<vmem>>, vector<3x2048xf32>
    tpu.vector_store %arg13[%c45, %c0_69], %215 {strides = array<i32>} : memref<48x2048xf32, #tpu.memory_space<vmem>>, vector<3x2048xf32>,
    %c0_70 = arith.constant 0 : index
    %c0_71 = arith.constant 0 : index
    %217 = vector.load %arg3[%c0_70, %c0_71] : memref<3x48xf32, #tpu.memory_space<vmem>>, vector<3x48xf32>
    %c0_72 = arith.constant 0 : index
    %c0_73 = arith.constant 0 : index
    %218 = vector.load %arg13[%c0_72, %c0_73] : memref<48x2048xf32, #tpu.memory_space<vmem>>, vector<48x2048xf32>
    %cst_74 = arith.constant dense<0.000000e+00> : vector<3x2048xf32>
    %219 = tpu.matmul %217, %218, %cst_74 {dimension_numbers = #tpu.dot_dimension_numbers<[1], [0], [0], [1], [0, 0, 1, 1], [], []>} : vector<3x48xf32>, vector<48x2048xf32>, vector<3x2048xf32> -> vector<3x2048xf32>
    %c0_75 = arith.constant 0 : index
    %c0_76 = arith.constant 0 : index
    %220 = vector.load %arg4[%c0_75, %c0_76] : memref<3x1xf32, #tpu.memory_space<vmem>>, vector<3x1xf32>
    %221 = vector.broadcast %220 : vector<3x1xf32> to vector<3x2048xf32>
    %222 = arith.addf %219, %221 : vector<3x2048xf32>
    %cst_77 = arith.constant 0.000000e+00 : f32
    %223 = vector.broadcast %cst_77 : f32 to vector<3x2048xf32>
    %224 = arith.cmpf ogt, %222, %223 : vector<3x2048xf32>
    %cst_78 = arith.constant 0.00999999977 : f32
    %225 = vector.broadcast %cst_78 : f32 to vector<3x2048xf32>
    %226 = arith.mulf %225, %222 : vector<3x2048xf32>
    %227 = arith.select %224, %222, %226 : vector<3x2048xi1>, vector<3x2048xf32>
    %c66_i32 = arith.constant 66 : i32
    %228 = tpu.dynamic_rotate %227 by %c66_i32 dim 1 : vector<3x2048xf32>, i32 -> vector<3x2048xf32>
    %c64_i32 = arith.constant 64 : i32
    %229 = vector.broadcast %c64_i32 : i32 to vector<1x2048xi32>
    %230 = arith.cmpi sge, %6, %229 : vector<1x2048xi32>
    %c2_i32 = arith.constant 2 : i32
    %231 = vector.broadcast %c2_i32 : i32 to vector<1x2048xi32>
    %232 = arith.cmpi sge, %4, %231 : vector<1x2048xi32>
    %233 = arith.andi %230, %232 : vector<1x2048xi1>
    %234 = arith.extui %233 : vector<1x2048xi1> to vector<1x2048xi32>
    %235 = arith.sitofp %234 : vector<1x2048xi32> to vector<1x2048xf32>
    %236 = vector.broadcast %235 : vector<1x2048xf32> to vector<3x2048xf32>
    %237 = arith.mulf %228, %236 : vector<3x2048xf32>
    %c0_79 = arith.constant 0 : index
    %c0_80 = arith.constant 0 : index
    %238 = vector.load %arg13[%c0_79, %c0_80] : memref<48x2048xf32, #tpu.memory_space<vmem>>, vector<3x2048xf32>
    tpu.vector_store %arg13[%c0_79, %c0_80], %237 {strides = array<i32>} : memref<48x2048xf32, #tpu.memory_space<vmem>>, vector<3x2048xf32>,
    %c64_i32_81 = arith.constant 64 : i32
    %239 = tpu.dynamic_rotate %227 by %c64_i32_81 dim 1 : vector<3x2048xf32>, i32 -> vector<3x2048xf32>
    %c64_i32_82 = arith.constant 64 : i32
    %240 = vector.broadcast %c64_i32_82 : i32 to vector<1x2048xi32>
    %241 = arith.cmpi sge, %6, %240 : vector<1x2048xi32>
    %242 = arith.extui %241 : vector<1x2048xi1> to vector<1x2048xi32>
    %243 = arith.sitofp %242 : vector<1x2048xi32> to vector<1x2048xf32>
    %244 = vector.broadcast %243 : vector<1x2048xf32> to vector<3x2048xf32>
    %245 = arith.mulf %239, %244 : vector<3x2048xf32>
    %c3_83 = arith.constant 3 : index
    %c0_84 = arith.constant 0 : index
    %246 = vector.load %arg13[%c3_83, %c0_84] : memref<48x2048xf32, #tpu.memory_space<vmem>>, vector<3x2048xf32>
    tpu.vector_store %arg13[%c3_83, %c0_84], %245 {strides = array<i32>} : memref<48x2048xf32, #tpu.memory_space<vmem>>, vector<3x2048xf32>,
    %c62_i32 = arith.constant 62 : i32
    %247 = tpu.dynamic_rotate %227 by %c62_i32 dim 1 : vector<3x2048xf32>, i32 -> vector<3x2048xf32>
    %c64_i32_85 = arith.constant 64 : i32
    %248 = vector.broadcast %c64_i32_85 : i32 to vector<1x2048xi32>
    %249 = arith.cmpi sge, %6, %248 : vector<1x2048xi32>
    %c29_i32_86 = arith.constant 29 : i32
    %250 = vector.broadcast %c29_i32_86 : i32 to vector<1x2048xi32>
    %251 = arith.cmpi sle, %4, %250 : vector<1x2048xi32>
    %252 = arith.andi %249, %251 : vector<1x2048xi1>
    %253 = arith.extui %252 : vector<1x2048xi1> to vector<1x2048xi32>
    %254 = arith.sitofp %253 : vector<1x2048xi32> to vector<1x2048xf32>
    %255 = vector.broadcast %254 : vector<1x2048xf32> to vector<3x2048xf32>
    %256 = arith.mulf %247, %255 : vector<3x2048xf32>
    %c6_87 = arith.constant 6 : index
    %c0_88 = arith.constant 0 : index
    %257 = vector.load %arg13[%c6_87, %c0_88] : memref<48x2048xf32, #tpu.memory_space<vmem>>, vector<3x2048xf32>
    tpu.vector_store %arg13[%c6_87, %c0_88], %256 {strides = array<i32>} : memref<48x2048xf32, #tpu.memory_space<vmem>>, vector<3x2048xf32>,
    %c60_i32 = arith.constant 60 : i32
    %258 = tpu.dynamic_rotate %227 by %c60_i32 dim 1 : vector<3x2048xf32>, i32 -> vector<3x2048xf32>
    %c64_i32_89 = arith.constant 64 : i32
    %259 = vector.broadcast %c64_i32_89 : i32 to vector<1x2048xi32>
    %260 = arith.cmpi sge, %6, %259 : vector<1x2048xi32>
    %c27_i32 = arith.constant 27 : i32
    %261 = vector.broadcast %c27_i32 : i32 to vector<1x2048xi32>
    %262 = arith.cmpi sle, %4, %261 : vector<1x2048xi32>
    %263 = arith.andi %260, %262 : vector<1x2048xi1>
    %264 = arith.extui %263 : vector<1x2048xi1> to vector<1x2048xi32>
    %265 = arith.sitofp %264 : vector<1x2048xi32> to vector<1x2048xf32>
    %266 = vector.broadcast %265 : vector<1x2048xf32> to vector<3x2048xf32>
    %267 = arith.mulf %258, %266 : vector<3x2048xf32>
    %c9_90 = arith.constant 9 : index
    %c0_91 = arith.constant 0 : index
    %268 = vector.load %arg13[%c9_90, %c0_91] : memref<48x2048xf32, #tpu.memory_space<vmem>>, vector<3x2048xf32>
    tpu.vector_store %arg13[%c9_90, %c0_91], %267 {strides = array<i32>} : memref<48x2048xf32, #tpu.memory_space<vmem>>, vector<3x2048xf32>,
    %c2_i32_92 = arith.constant 2 : i32
    %269 = tpu.dynamic_rotate %227 by %c2_i32_92 dim 1 : vector<3x2048xf32>, i32 -> vector<3x2048xf32>
    %c2_i32_93 = arith.constant 2 : i32
    %270 = vector.broadcast %c2_i32_93 : i32 to vector<1x2048xi32>
    %271 = arith.cmpi sge, %4, %270 : vector<1x2048xi32>
    %272 = arith.extui %271 : vector<1x2048xi1> to vector<1x2048xi32>
    %273 = arith.sitofp %272 : vector<1x2048xi32> to vector<1x2048xf32>
    %274 = vector.broadcast %273 : vector<1x2048xf32> to vector<3x2048xf32>
    %275 = arith.mulf %269, %274 : vector<3x2048xf32>
    %c12_94 = arith.constant 12 : index
    %c0_95 = arith.constant 0 : index
    %276 = vector.load %arg13[%c12_94, %c0_95] : memref<48x2048xf32, #tpu.memory_space<vmem>>, vector<3x2048xf32>
    tpu.vector_store %arg13[%c12_94, %c0_95], %275 {strides = array<i32>} : memref<48x2048xf32, #tpu.memory_space<vmem>>, vector<3x2048xf32>,
    %c15_96 = arith.constant 15 : index
    %c0_97 = arith.constant 0 : index
    %277 = vector.load %arg13[%c15_96, %c0_97] : memref<48x2048xf32, #tpu.memory_space<vmem>>, vector<3x2048xf32>
    tpu.vector_store %arg13[%c15_96, %c0_97], %227 {strides = array<i32>} : memref<48x2048xf32, #tpu.memory_space<vmem>>, vector<3x2048xf32>,
    %c2046_i32_98 = arith.constant 2046 : i32
    %278 = tpu.dynamic_rotate %227 by %c2046_i32_98 dim 1 : vector<3x2048xf32>, i32 -> vector<3x2048xf32>
    %c29_i32_99 = arith.constant 29 : i32
    %279 = vector.broadcast %c29_i32_99 : i32 to vector<1x2048xi32>
    %280 = arith.cmpi sle, %4, %279 : vector<1x2048xi32>
    %281 = arith.extui %280 : vector<1x2048xi1> to vector<1x2048xi32>
    %282 = arith.sitofp %281 : vector<1x2048xi32> to vector<1x2048xf32>
    %283 = vector.broadcast %282 : vector<1x2048xf32> to vector<3x2048xf32>
    %284 = arith.mulf %278, %283 : vector<3x2048xf32>
    %c18_100 = arith.constant 18 : index
    %c0_101 = arith.constant 0 : index
    %285 = vector.load %arg13[%c18_100, %c0_101] : memref<48x2048xf32, #tpu.memory_space<vmem>>, vector<3x2048xf32>
    tpu.vector_store %arg13[%c18_100, %c0_101], %284 {strides = array<i32>} : memref<48x2048xf32, #tpu.memory_space<vmem>>, vector<3x2048xf32>,
    %c2044_i32 = arith.constant 2044 : i32
    %286 = tpu.dynamic_rotate %227 by %c2044_i32 dim 1 : vector<3x2048xf32>, i32 -> vector<3x2048xf32>
    %c27_i32_102 = arith.constant 27 : i32
    %287 = vector.broadcast %c27_i32_102 : i32 to vector<1x2048xi32>
    %288 = arith.cmpi sle, %4, %287 : vector<1x2048xi32>
    %289 = arith.extui %288 : vector<1x2048xi1> to vector<1x2048xi32>
    %290 = arith.sitofp %289 : vector<1x2048xi32> to vector<1x2048xf32>
    %291 = vector.broadcast %290 : vector<1x2048xf32> to vector<3x2048xf32>
    %292 = arith.mulf %286, %291 : vector<3x2048xf32>
    %c21_103 = arith.constant 21 : index
    %c0_104 = arith.constant 0 : index
    %293 = vector.load %arg13[%c21_103, %c0_104] : memref<48x2048xf32, #tpu.memory_space<vmem>>, vector<3x2048xf32>
    tpu.vector_store %arg13[%c21_103, %c0_104], %292 {strides = array<i32>} : memref<48x2048xf32, #tpu.memory_space<vmem>>, vector<3x2048xf32>,
    %c1986_i32 = arith.constant 1986 : i32
    %294 = tpu.dynamic_rotate %227 by %c1986_i32 dim 1 : vector<3x2048xf32>, i32 -> vector<3x2048xf32>
    %c960_i32_105 = arith.constant 960 : i32
    %295 = vector.broadcast %c960_i32_105 : i32 to vector<1x2048xi32>
    %296 = arith.cmpi slt, %6, %295 : vector<1x2048xi32>
    %c2_i32_106 = arith.constant 2 : i32
    %297 = vector.broadcast %c2_i32_106 : i32 to vector<1x2048xi32>
    %298 = arith.cmpi sge, %4, %297 : vector<1x2048xi32>
    %299 = arith.andi %296, %298 : vector<1x2048xi1>
    %300 = arith.extui %299 : vector<1x2048xi1> to vector<1x2048xi32>
    %301 = arith.sitofp %300 : vector<1x2048xi32> to vector<1x2048xf32>
    %302 = vector.broadcast %301 : vector<1x2048xf32> to vector<3x2048xf32>
    %303 = arith.mulf %294, %302 : vector<3x2048xf32>
    %c24_107 = arith.constant 24 : index
    %c0_108 = arith.constant 0 : index
    %304 = vector.load %arg13[%c24_107, %c0_108] : memref<48x2048xf32, #tpu.memory_space<vmem>>, vector<3x2048xf32>
    tpu.vector_store %arg13[%c24_107, %c0_108], %303 {strides = array<i32>} : memref<48x2048xf32, #tpu.memory_space<vmem>>, vector<3x2048xf32>,
    %c1984_i32_109 = arith.constant 1984 : i32
    %305 = tpu.dynamic_rotate %227 by %c1984_i32_109 dim 1 : vector<3x2048xf32>, i32 -> vector<3x2048xf32>
    %c960_i32_110 = arith.constant 960 : i32
    %306 = vector.broadcast %c960_i32_110 : i32 to vector<1x2048xi32>
    %307 = arith.cmpi slt, %6, %306 : vector<1x2048xi32>
    %308 = arith.extui %307 : vector<1x2048xi1> to vector<1x2048xi32>
    %309 = arith.sitofp %308 : vector<1x2048xi32> to vector<1x2048xf32>
    %310 = vector.broadcast %309 : vector<1x2048xf32> to vector<3x2048xf32>
    %311 = arith.mulf %305, %310 : vector<3x2048xf32>
    %c27_111 = arith.constant 27 : index
    %c0_112 = arith.constant 0 : index
    %312 = vector.load %arg13[%c27_111, %c0_112] : memref<48x2048xf32, #tpu.memory_space<vmem>>, vector<3x2048xf32>
    tpu.vector_store %arg13[%c27_111, %c0_112], %311 {strides = array<i32>} : memref<48x2048xf32, #tpu.memory_space<vmem>>, vector<3x2048xf32>,
    %c1982_i32_113 = arith.constant 1982 : i32
    %313 = tpu.dynamic_rotate %227 by %c1982_i32_113 dim 1 : vector<3x2048xf32>, i32 -> vector<3x2048xf32>
    %c960_i32_114 = arith.constant 960 : i32
    %314 = vector.broadcast %c960_i32_114 : i32 to vector<1x2048xi32>
    %315 = arith.cmpi slt, %6, %314 : vector<1x2048xi32>
    %c29_i32_115 = arith.constant 29 : i32
    %316 = vector.broadcast %c29_i32_115 : i32 to vector<1x2048xi32>
    %317 = arith.cmpi sle, %4, %316 : vector<1x2048xi32>
    %318 = arith.andi %315, %317 : vector<1x2048xi1>
    %319 = arith.extui %318 : vector<1x2048xi1> to vector<1x2048xi32>
    %320 = arith.sitofp %319 : vector<1x2048xi32> to vector<1x2048xf32>
    %321 = vector.broadcast %320 : vector<1x2048xf32> to vector<3x2048xf32>
    %322 = arith.mulf %313, %321 : vector<3x2048xf32>
    %c30_116 = arith.constant 30 : index
    %c0_117 = arith.constant 0 : index
    %323 = vector.load %arg13[%c30_116, %c0_117] : memref<48x2048xf32, #tpu.memory_space<vmem>>, vector<3x2048xf32>
    tpu.vector_store %arg13[%c30_116, %c0_117], %322 {strides = array<i32>} : memref<48x2048xf32, #tpu.memory_space<vmem>>, vector<3x2048xf32>,
    %c1980_i32 = arith.constant 1980 : i32
    %324 = tpu.dynamic_rotate %227 by %c1980_i32 dim 1 : vector<3x2048xf32>, i32 -> vector<3x2048xf32>
    %c960_i32_118 = arith.constant 960 : i32
    %325 = vector.broadcast %c960_i32_118 : i32 to vector<1x2048xi32>
    %326 = arith.cmpi slt, %6, %325 : vector<1x2048xi32>
    %c27_i32_119 = arith.constant 27 : i32
    %327 = vector.broadcast %c27_i32_119 : i32 to vector<1x2048xi32>
    %328 = arith.cmpi sle, %4, %327 : vector<1x2048xi32>
    %329 = arith.andi %326, %328 : vector<1x2048xi1>
    %330 = arith.extui %329 : vector<1x2048xi1> to vector<1x2048xi32>
    %331 = arith.sitofp %330 : vector<1x2048xi32> to vector<1x2048xf32>
    %332 = vector.broadcast %331 : vector<1x2048xf32> to vector<3x2048xf32>
    %333 = arith.mulf %324, %332 : vector<3x2048xf32>
    %c33_120 = arith.constant 33 : index
    %c0_121 = arith.constant 0 : index
    %334 = vector.load %arg13[%c33_120, %c0_121] : memref<48x2048xf32, #tpu.memory_space<vmem>>, vector<3x2048xf32>
    tpu.vector_store %arg13[%c33_120, %c0_121], %333 {strides = array<i32>} : memref<48x2048xf32, #tpu.memory_space<vmem>>, vector<3x2048xf32>,
    %c1922_i32 = arith.constant 1922 : i32
    %335 = tpu.dynamic_rotate %227 by %c1922_i32 dim 1 : vector<3x2048xf32>, i32 -> vector<3x2048xf32>
    %c896_i32 = arith.constant 896 : i32
    %336 = vector.broadcast %c896_i32 : i32 to vector<1x2048xi32>
    %337 = arith.cmpi slt, %6, %336 : vector<1x2048xi32>
    %c2_i32_122 = arith.constant 2 : i32
    %338 = vector.broadcast %c2_i32_122 : i32 to vector<1x2048xi32>
    %339 = arith.cmpi sge, %4, %338 : vector<1x2048xi32>
    %340 = arith.andi %337, %339 : vector<1x2048xi1>
    %341 = arith.extui %340 : vector<1x2048xi1> to vector<1x2048xi32>
    %342 = arith.sitofp %341 : vector<1x2048xi32> to vector<1x2048xf32>
    %343 = vector.broadcast %342 : vector<1x2048xf32> to vector<3x2048xf32>
    %344 = arith.mulf %335, %343 : vector<3x2048xf32>
    %c36_123 = arith.constant 36 : index
    %c0_124 = arith.constant 0 : index
    %345 = vector.load %arg13[%c36_123, %c0_124] : memref<48x2048xf32, #tpu.memory_space<vmem>>, vector<3x2048xf32>
    tpu.vector_store %arg13[%c36_123, %c0_124], %344 {strides = array<i32>} : memref<48x2048xf32, #tpu.memory_space<vmem>>, vector<3x2048xf32>,
    %c1920_i32 = arith.constant 1920 : i32
    %346 = tpu.dynamic_rotate %227 by %c1920_i32 dim 1 : vector<3x2048xf32>, i32 -> vector<3x2048xf32>
    %c896_i32_125 = arith.constant 896 : i32
    %347 = vector.broadcast %c896_i32_125 : i32 to vector<1x2048xi32>
    %348 = arith.cmpi slt, %6, %347 : vector<1x2048xi32>
    %349 = arith.extui %348 : vector<1x2048xi1> to vector<1x2048xi32>
    %350 = arith.sitofp %349 : vector<1x2048xi32> to vector<1x2048xf32>
    %351 = vector.broadcast %350 : vector<1x2048xf32> to vector<3x2048xf32>
    %352 = arith.mulf %346, %351 : vector<3x2048xf32>
    %c39_126 = arith.constant 39 : index
    %c0_127 = arith.constant 0 : index
    %353 = vector.load %arg13[%c39_126, %c0_127] : memref<48x2048xf32, #tpu.memory_space<vmem>>, vector<3x2048xf32>
    tpu.vector_store %arg13[%c39_126, %c0_127], %352 {strides = array<i32>} : memref<48x2048xf32, #tpu.memory_space<vmem>>, vector<3x2048xf32>,
    %c1918_i32 = arith.constant 1918 : i32
    %354 = tpu.dynamic_rotate %227 by %c1918_i32 dim 1 : vector<3x2048xf32>, i32 -> vector<3x2048xf32>
    %c896_i32_128 = arith.constant 896 : i32
    %355 = vector.broadcast %c896_i32_128 : i32 to vector<1x2048xi32>
    %356 = arith.cmpi slt, %6, %355 : vector<1x2048xi32>
    %c29_i32_129 = arith.constant 29 : i32
    %357 = vector.broadcast %c29_i32_129 : i32 to vector<1x2048xi32>
    %358 = arith.cmpi sle, %4, %357 : vector<1x2048xi32>
    %359 = arith.andi %356, %358 : vector<1x2048xi1>
    %360 = arith.extui %359 : vector<1x2048xi1> to vector<1x2048xi32>
    %361 = arith.sitofp %360 : vector<1x2048xi32> to vector<1x2048xf32>
    %362 = vector.broadcast %361 : vector<1x2048xf32> to vector<3x2048xf32>
    %363 = arith.mulf %354, %362 : vector<3x2048xf32>
    %c42_130 = arith.constant 42 : index
    %c0_131 = arith.constant 0 : index
    %364 = vector.load %arg13[%c42_130, %c0_131] : memref<48x2048xf32, #tpu.memory_space<vmem>>, vector<3x2048xf32>
    tpu.vector_store %arg13[%c42_130, %c0_131], %363 {strides = array<i32>} : memref<48x2048xf32, #tpu.memory_space<vmem>>, vector<3x2048xf32>,
    %c1916_i32 = arith.constant 1916 : i32
    %365 = tpu.dynamic_rotate %227 by %c1916_i32 dim 1 : vector<3x2048xf32>, i32 -> vector<3x2048xf32>
    %c896_i32_132 = arith.constant 896 : i32
    %366 = vector.broadcast %c896_i32_132 : i32 to vector<1x2048xi32>
    %367 = arith.cmpi slt, %6, %366 : vector<1x2048xi32>
    %c27_i32_133 = arith.constant 27 : i32
    %368 = vector.broadcast %c27_i32_133 : i32 to vector<1x2048xi32>
    %369 = arith.cmpi sle, %4, %368 : vector<1x2048xi32>
    %370 = arith.andi %367, %369 : vector<1x2048xi1>
    %371 = arith.extui %370 : vector<1x2048xi1> to vector<1x2048xi32>
    %372 = arith.sitofp %371 : vector<1x2048xi32> to vector<1x2048xf32>
    %373 = vector.broadcast %372 : vector<1x2048xf32> to vector<3x2048xf32>
    %374 = arith.mulf %365, %373 : vector<3x2048xf32>
    %c45_134 = arith.constant 45 : index
    %c0_135 = arith.constant 0 : index
    %375 = vector.load %arg13[%c45_134, %c0_135] : memref<48x2048xf32, #tpu.memory_space<vmem>>, vector<3x2048xf32>
    tpu.vector_store %arg13[%c45_134, %c0_135], %374 {strides = array<i32>} : memref<48x2048xf32, #tpu.memory_space<vmem>>, vector<3x2048xf32>,
    %c0_136 = arith.constant 0 : index
    %c0_137 = arith.constant 0 : index
    %376 = vector.load %arg5[%c0_136, %c0_137] : memref<3x48xf32, #tpu.memory_space<vmem>>, vector<3x48xf32>
    %c0_138 = arith.constant 0 : index
    %c0_139 = arith.constant 0 : index
    %377 = vector.load %arg13[%c0_138, %c0_139] : memref<48x2048xf32, #tpu.memory_space<vmem>>, vector<48x2048xf32>
    %cst_140 = arith.constant dense<0.000000e+00> : vector<3x2048xf32>
    %378 = tpu.matmul %376, %377, %cst_140 {dimension_numbers = #tpu.dot_dimension_numbers<[1], [0], [0], [1], [0, 0, 1, 1], [], []>} : vector<3x48xf32>, vector<48x2048xf32>, vector<3x2048xf32> -> vector<3x2048xf32>
    %c0_141 = arith.constant 0 : index
    %c0_142 = arith.constant 0 : index
    %379 = vector.load %arg6[%c0_141, %c0_142] : memref<3x1xf32, #tpu.memory_space<vmem>>, vector<3x1xf32>
    %380 = vector.broadcast %379 : vector<3x1xf32> to vector<3x2048xf32>
    %381 = arith.addf %378, %380 : vector<3x2048xf32>
    %cst_143 = arith.constant 0.000000e+00 : f32
    %382 = vector.broadcast %cst_143 : f32 to vector<3x2048xf32>
    %383 = arith.cmpf ogt, %381, %382 : vector<3x2048xf32>
    %cst_144 = arith.constant 0.00999999977 : f32
    %384 = vector.broadcast %cst_144 : f32 to vector<3x2048xf32>
    %385 = arith.mulf %384, %381 : vector<3x2048xf32>
    %386 = arith.select %383, %381, %385 : vector<3x2048xi1>, vector<3x2048xf32>
    %c0_145 = arith.constant 0 : index
    %c0_146 = arith.constant 0 : index
    %387 = vector.load %arg7[%c0_145, %c0_146] : memref<2048x128xf32, #tpu.memory_space<vmem>>, vector<2048x128xf32>
    %cst_147 = arith.constant dense<0.000000e+00> : vector<3x128xf32>
    %388 = tpu.matmul %386, %387, %cst_147 {dimension_numbers = #tpu.dot_dimension_numbers<[1], [0], [0], [1], [0, 0, 1, 1], [], []>} : vector<3x2048xf32>, vector<2048x128xf32>, vector<3x128xf32> -> vector<3x128xf32>
    %389 = vector.extract_strided_slice %388 {offsets = [0, 0], sizes = [1, 64], strides = [1, 1]} : vector<3x128xf32> to vector<1x64xf32>
    %390 = vector.extract_strided_slice %388 {offsets = [1, 0], sizes = [1, 64], strides = [1, 1]} : vector<3x128xf32> to vector<1x64xf32>
    %391 = vector.extract_strided_slice %388 {offsets = [2, 0], sizes = [1, 64], strides = [1, 1]} : vector<3x128xf32> to vector<1x64xf32>
    %392 = tpu.concatenate %389, %390, %391 in 1 : vector<1x64xf32>, vector<1x64xf32>, vector<1x64xf32> -> vector<1x192xf32>
    %393 = vector.extract_strided_slice %388 {offsets = [0, 64], sizes = [1, 64], strides = [1, 1]} : vector<3x128xf32> to vector<1x64xf32>
    %394 = vector.extract_strided_slice %388 {offsets = [1, 64], sizes = [1, 64], strides = [1, 1]} : vector<3x128xf32> to vector<1x64xf32>
    %395 = vector.extract_strided_slice %388 {offsets = [2, 64], sizes = [1, 64], strides = [1, 1]} : vector<3x128xf32> to vector<1x64xf32>
    %396 = tpu.concatenate %393, %394, %395 in 1 : vector<1x64xf32>, vector<1x64xf32>, vector<1x64xf32> -> vector<1x192xf32>
    %397 = tpu.concatenate %392, %396 in 0 : vector<1x192xf32>, vector<1x192xf32> -> vector<2x192xf32>
    %c0_148 = arith.constant 0 : index
    %c0_149 = arith.constant 0 : index
    %398 = vector.load %arg8[%c0_148, %c0_149] : memref<192x100xf32, #tpu.memory_space<vmem>>, vector<192x100xf32>
    %cst_150 = arith.constant dense<0.000000e+00> : vector<2x100xf32>
    %399 = tpu.matmul %397, %398, %cst_150 {dimension_numbers = #tpu.dot_dimension_numbers<[1], [0], [0], [1], [0, 0, 1, 1], [], []>} : vector<2x192xf32>, vector<192x100xf32>, vector<2x100xf32> -> vector<2x100xf32>
    %c0_151 = arith.constant 0 : index
    %c0_152 = arith.constant 0 : index
    %400 = vector.load %arg9[%c0_151, %c0_152] : memref<1x100xf32, #tpu.memory_space<vmem>>, vector<1x100xf32>
    %401 = vector.broadcast %400 : vector<1x100xf32> to vector<2x100xf32>
    %402 = arith.addf %399, %401 : vector<2x100xf32>
    %cst_153 = arith.constant 0.000000e+00 : f32
    %403 = vector.broadcast %cst_153 : f32 to vector<2x100xf32>
    %404 = arith.cmpf ogt, %402, %403 : vector<2x100xf32>
    %cst_154 = arith.constant 0.00999999977 : f32
    %405 = vector.broadcast %cst_154 : f32 to vector<2x100xf32>
    %406 = arith.mulf %405, %402 : vector<2x100xf32>
    %407 = arith.select %404, %402, %406 : vector<2x100xi1>, vector<2x100xf32>
    %c0_155 = arith.constant 0 : index
    %c0_156 = arith.constant 0 : index
    %408 = vector.load %arg10[%c0_155, %c0_156] : memref<100x10xf32, #tpu.memory_space<vmem>>, vector<100x10xf32>
    %cst_157 = arith.constant dense<0.000000e+00> : vector<2x10xf32>
    %409 = tpu.matmul %407, %408, %cst_157 {dimension_numbers = #tpu.dot_dimension_numbers<[1], [0], [0], [1], [0, 0, 1, 1], [], []>} : vector<2x100xf32>, vector<100x10xf32>, vector<2x10xf32> -> vector<2x10xf32>
    %c0_158 = arith.constant 0 : index
    %c0_159 = arith.constant 0 : index
    %410 = vector.load %arg11[%c0_158, %c0_159] : memref<1x10xf32, #tpu.memory_space<vmem>>, vector<1x10xf32>
    %411 = vector.broadcast %410 : vector<1x10xf32> to vector<2x10xf32>
    %412 = arith.addf %409, %411 : vector<2x10xf32>
    %cst_160 = arith.constant dense<0xFF800000> : vector<10xf32>
    %413 = vector.multi_reduction <maximumf>, %412, %cst_160 [0] : vector<2x10xf32> to vector<10xf32>
    %414 = vector.shape_cast %413 : vector<10xf32> to vector<1x10xf32>
    %415 = vector.broadcast %414 : vector<1x10xf32> to vector<2x10xf32>
    %416 = arith.subf %412, %415 : vector<2x10xf32>
    %417 = math.exp %416 : vector<2x10xf32>
    %cst_161 = arith.constant dense<0.000000e+00> : vector<10xf32>
    %418 = vector.multi_reduction <add>, %417, %cst_161 [0] : vector<2x10xf32> to vector<10xf32>
    %419 = vector.shape_cast %418 : vector<10xf32> to vector<1x10xf32>
    %420 = math.log %419 : vector<1x10xf32>
    %421 = arith.addf %420, %414 : vector<1x10xf32>
    %422 = vector.broadcast %421 : vector<1x10xf32> to vector<2x10xf32>
    %423 = arith.subf %412, %422 : vector<2x10xf32>
    %c0_162 = arith.constant 0 : index
    %c0_163 = arith.constant 0 : index
    %424 = vector.load %arg12[%c0_162, %c0_163] : memref<2x10xf32, #tpu.memory_space<vmem>>, vector<2x10xf32>
    tpu.vector_store %arg12[%c0_162, %c0_163], %423 {strides = array<i32>} : memref<2x10xf32, #tpu.memory_space<vmem>>, vector<2x10xf32>,
    return
  }
}

</mosaic_0001>

<bundles_post_ra>
// kernel: reinforce_net_forward.1
= control target key start
LH: loop header
LB: loop body
LE: loop exit
PB: predicated region body
PF: predicated region fallthrough
CT: control target
= control target key end

     0   :  { %17 = vsyncpa [#allocation5], 0  ;;  %v18708_v1 = vmov 0.0   ;;  %v138_v12 = vlaneseq  ;;  %v12423_v27 = vmov 1966171168   ;;  %v18686_v30 = vmov 1.0   ;;  %s18671_s0 = inlined_call_operand.vmem [shape: f32[3,2048], index: 0, kind: input, shape index: {}]   ;;  %s18672_s1 = inlined_call_operand.vmem [shape: f32[16,3,32], index: 1, kind: input, shape index: {}]   ;;  %s18673_s2 = inlined_call_operand.vmem [shape: f32[16,3,1], index: 2, kind: input, shape index: {}]   ;;  %s18674_s3 = inlined_call_operand.vmem [shape: f32[3,48], index: 3, kind: input, shape index: {}]   ;;  %s18675_s4 = inlined_call_operand.vmem [shape: f32[3,1], index: 4, kind: input, shape index: {}]   ;;  %s18676_s5 = inlined_call_operand.vmem [shape: f32[3,48], index: 5, kind: input, shape index: {}]   ;;  %s18677_s6 = inlined_call_operand.vmem [shape: f32[3,1], index: 6, kind: input, shape index: {}]   ;;  %s18678_s7 = inlined_call_operand.vmem [shape: f32[2048,128], index: 7, kind: input, shape index: {}]   ;;  %s18679_s8 = inlined_call_operand.vmem [shape: f32[192,100], index: 8, kind: input, shape index: {}]   ;;  %s18680_s9 = inlined_call_operand.vmem [shape: f32[1,100], index: 9, kind: input, shape index: {}]   ;;  %s18681_s10 = inlined_call_operand.vmem [shape: f32[100,10], index: 10, kind: input, shape index: {}]   ;;  %s18682_s11 = inlined_call_operand.vmem [shape: f32[1,10], index: 11, kind: input, shape index: {}]   ;;  %s18683_s12 = inlined_call_operand.hbm [shape: f32[2,10], index: 12, kind: output, shape index: {}]  }
   0x1   :  { %v12525_v0 = vld [vmem:[%s18671_s0] sm:$0x77]   ;;  %42 = vst [vmem:[#allocation2 + $0x2b0] sm:$0xff] %v18708_v1  ;;  %43 = vst [vmem:[#allocation2 + $0xd0] sm:$0xff] %v18708_v1  ;;  %v12626_v2 = vld [vmem:[%s18671_s0 + $0x8] sm:$0x77]   ;;  %v288_v28 = vunpack.c.l.s4 %v12423_v27  ;;  %v12704_v31 = vcombine.low %v18686_v30, %v18686_v30 }
   0x2   :  { %44 = vst [vmem:[#allocation2 + $0x10] sm:$0xff] %v18708_v1  ;;  %45 = vst [vmem:[#allocation2 + $0x48] sm:$0xff] %v18708_v1  ;;  %v12631_v3 = vld [vmem:[%s18671_s0 + $0x10] sm:$0x77]   ;;  %v12636_v4 = vld [vmem:[%s18671_s0 + $0x18] sm:$0x77]  }
   0x3   :  { %46 = vst [vmem:[#allocation2 + $0x30] sm:$0xff] %v18708_v1  ;;  %47 = vst [vmem:[#allocation2 + $0xf0] sm:$0xff] %v18708_v1  ;;  %v12643_v6 = vld [vmem:[%s18671_s0 + $0x20] sm:$0x77]   ;;  %v12648_v7 = vld [vmem:[%s18671_s0 + $0x28] sm:$0x77]   ;;  %v289_v61 = vunpack.c.0.s8 %v288_v28 }
   0x4   :  { %48 = vst [vmem:[#allocation2 + $0xf8] sm:$0xff] %v18708_v1  ;;  %49 = vst [vmem:[#allocation2 + $0x78] sm:$0xff] %v18708_v1  ;;  %v12653_v8 = vld [vmem:[%s18671_s0 + $0x30] sm:$0x77]   ;;  %v12664_v13 = vld [vmem:[%s18671_s0 + $0x38] sm:$0x77]  }
   0x5   :  { %50 = vst [vmem:[#allocation2 + $0x128] sm:$0xff] %v18708_v1  ;;  %51 = vst [vmem:[#allocation2 + $0xe0] sm:$0xff] %v18708_v1  ;;  %v12667_v14 = vmul.f32 0.5, %v12525_v0   ;;  %v12670_v15 = vmul.f32 0.5, %v12626_v2   ;;  %v12673_v16 = vmul.f32 0.5, %v12631_v3   ;;  %v12676_v17 = vmul.f32 0.5, %v12636_v4  }
   0x6   :  { %52 = vst [vmem:[#allocation2 + $0x2f8] sm:$0xff] %v18708_v1  ;;  %53 = vst [vmem:[#allocation2 + $0x2b8] sm:$0xff] %v18708_v1  ;;  %v12679_v18 = vmul.f32 0.5, %v12643_v6   ;;  %v12682_v19 = vmul.f32 0.5, %v12648_v7   ;;  %v12685_v20 = vmul.f32 0.5, %v12653_v8   ;;  %v12688_v21 = vmul.f32 0.5, %v12664_v13  }
   0x7   :  { %54 = vst [vmem:[#allocation2 + $0x2a0] sm:$0xff] %v18708_v1  ;;  %55 = vst [vmem:[#allocation2 + $0x168] sm:$0xff] %v18708_v1  ;;  %v12698_v26 = vand.u32 127, %v138_v12  ;;  %v12700_v29 = vshrl.u32 %v138_v12, 7  ;;  %v18900_v48 = vmov 0  ;;  %s13271_s0 = smov 0  }
   0x8   :  { %56 = vst [vmem:[#allocation2 + $0x178] sm:$0xff] %v18708_v1  ;;  %57 = vst [vmem:[#allocation2 + $0x40] sm:$0xff] %v18708_v1 }
   0x9   :  { %58 = vst [vmem:[#allocation2] sm:$0xff] %v18708_v1  ;;  %59 = vst [vmem:[#allocation2 + $0x248] sm:$0xff] %v18708_v1  ;;  %v140_v32 = vadd.s32 128, %v12698_v26  ;;  %v141_v33 = vadd.s32 256, %v12698_v26  ;;  %v142_v34 = vadd.s32 384, %v12698_v26  ;;  %v143_v35 = vadd.s32 512, %v12698_v26 }
   0xa   :  { %60 = vst [vmem:[#allocation2 + $0xe8] sm:$0xff] %v18708_v1  ;;  %61 = vst [vmem:[#allocation2 + $0x68] sm:$0xff] %v18708_v1  ;;  %v144_v36 = vadd.s32 640, %v12698_v26  ;;  %v145_v37 = vadd.s32 768, %v12698_v26  ;;  %v12713_v38 = vadd.s32 896, %v12698_v26  ;;  %v12716_v39 = vand.u32 31, %v12698_v26 }
   0xb   :  { %62 = vst [vmem:[#allocation2 + $0x228] sm:$0xff] %v18708_v1  ;;  %63 = vst [vmem:[#allocation2 + $0xa8] sm:$0xff] %v18708_v1  ;;  %v12718_v40 = vand.u32 31, %v140_v32  ;;  %v12720_v41 = vand.u32 31, %v141_v33  ;;  %v12722_v42 = vand.u32 31, %v142_v34  ;;  %v12724_v43 = vand.u32 31, %v143_v35 }
   0xc   :  { %64 = vst [vmem:[#allocation2 + $0x20] sm:$0xff] %v18708_v1  ;;  %65 = vst [vmem:[#allocation2 + $0x1b0] sm:$0xff] %v18708_v1  ;;  %v12726_v44 = vand.u32 31, %v144_v36  ;;  %v12728_v45 = vand.u32 31, %v145_v37  ;;  %v12731_v46 = vand.u32 31, %v12713_v38  ;;  %v18684_v47 = vand.u32 1023, %v12698_v26 }
   0xd   :  { %66 = vst [vmem:[#allocation2 + $0x220] sm:$0xff] %v18708_v1  ;;  %67 = vst [vmem:[#allocation2 + $0x258] sm:$0xff] %v18708_v1  ;;  %vm203_vm0 = vcmp.ge.s32.totalorder %v12716_v39, 1  ;;  %vm204_vm1 = vcmp.ge.s32.totalorder %v12718_v40, 1  ;;  %vm205_vm2 = vcmp.ge.s32.totalorder %v12720_v41, 1  ;;  %vm206_vm3 = vcmp.ge.s32.totalorder %v12722_v42, 1 }
   0xe   :  { %68 = vst [vmem:[#allocation2 + $0x238] sm:$0xff] %v18708_v1  ;;  %69 = vst [vmem:[#allocation2 + $0x130] sm:$0xff] %v18708_v1  ;;  %vm12740_vm4 = vcmp.ge.s32.totalorder %v18684_v47, 32  ;;  %vm207_vm5 = vcmp.ge.s32.totalorder %v12724_v43, 1  ;;  %vm208_vm6 = vcmp.ge.s32.totalorder %v12726_v44, 1  ;;  %vm209_vm7 = vcmp.ge.s32.totalorder %v12728_v45, 1 }
   0xf   :  { %70 = vst [vmem:[#allocation2 + $0x158] sm:$0xff] %v18708_v1  ;;  %71 = vst [vmem:[#allocation2 + $0x98] sm:$0xff] %v18708_v1  ;;  %v18901_v48 = vsel %vm12740_vm4, 4294967295, %v18900_v48  ;;  %vm18811_vm8 = vcmp.ge.s32.totalorder %v12731_v46, 1  ;;  %v12753_v49 = vsel %vm204_vm1, 1.0, %v18708_v1  ;;  %v12756_v50 = vsel %vm205_vm2, 1.0, %v18708_v1 }
  0x10   :  { %72 = vst [vmem:[#allocation2 + $0x2e0] sm:$0xff] %v18708_v1  ;;  %73 = vst [vmem:[#allocation2 + $0x1a8] sm:$0xff] %v18708_v1  ;;  %v12759_v51 = vsel %vm206_vm3, 1.0, %v18708_v1  ;;  %v12765_v53 = vsel %vm207_vm5, 1.0, %v18708_v1  ;;  %v12768_v54 = vsel %vm208_vm6, 1.0, %v18708_v1  ;;  %v12771_v55 = vsel %vm209_vm7, 1.0, %v18708_v1 }
  0x11   :  { %74 = vst [vmem:[#allocation2 + $0x1b8] sm:$0xff] %v18708_v1  ;;  %75 = vst [vmem:[#allocation2 + $0x80] sm:$0xff] %v18708_v1  ;;  %v12776_v56 = vsel %vm18811_vm8, 1.0, %v18708_v1  ;;  %v284_v58 = vcombine.low %v12756_v50, %v12759_v51  ;;  %v285_v59 = vcombine.low %v12765_v53, %v12768_v54  ;;  %v12787_v62 = vadd.s32 1024, %v12698_v26 }
  0x12   :  { %76 = vst [vmem:[#allocation2 + $0x188] sm:$0xff] %v18708_v1  ;;  %77 = vst [vmem:[#allocation2 + $0x208] sm:$0xff] %v18708_v1  ;;  %v286_v60 = vcombine.low %v12771_v55, %v12776_v56  ;;  %v148_v63 = vadd.s32 1152, %v12698_v26  ;;  %v149_v12 = vadd.s32 1280, %v12698_v26  ;;  %v150_v27 = vadd.s32 1408, %v12698_v26 }
  0x13   :  { %78 = vst [vmem:[#allocation2 + $0x38] sm:$0xff] %v18708_v1  ;;  %79 = vst [vmem:[#allocation2 + $0x190] sm:$0xff] %v18708_v1  ;;  %v151_v32 = vadd.s32 1536, %v12698_v26  ;;  %v152_v33 = vadd.s32 1664, %v12698_v26  ;;  %v12795_v34 = vsub.s32 %v289_v61, %v12700_v29  ;;  %v153_v35 = vadd.s32 1792, %v12698_v26 }
  0x14   :  { %80 = vst [vmem:[#allocation2 + $0x218] sm:$0xff] %v18708_v1  ;;  %81 = vst [vmem:[#allocation2 + $0x250] sm:$0xff] %v18708_v1  ;;  %v12799_v28 = vadd.s32 1920, %v12698_v26  ;;  %v12802_v36 = vand.u32 31, %v12787_v62  ;;  %v12804_v37 = vand.u32 31, %v148_v63  ;;  %v12806_v47 = vand.u32 31, %v149_v12 }
  0x15   :  { %82 = vst [vmem:[#allocation2 + $0x1c8] sm:$0xff] %v18708_v1  ;;  %83 = vst [vmem:[#allocation2 + $0x280] sm:$0xff] %v18708_v1  ;;  %v12808_v5 = vand.u32 31, %v150_v27  ;;  %v12810_v9 = vand.u32 31, %v151_v32  ;;  %v12814_v61 = vrot.slane %v284_v58, %v12795_v34  ;;  %v12817_v11 = vrot.slane %v285_v59, %v12795_v34 }
  0x16   :  { %84 = vst [vmem:[#allocation2 + $0x100] sm:$0xff] %v18708_v1  ;;  %85 = vst [vmem:[#allocation2 + $0xb8] sm:$0xff] %v18708_v1  ;;  %v314_v22 = vrot.slane %v286_v60, %v12795_v34  ;;  %v12820_v23 = vand.u32 31, %v152_v33  ;;  %v12822_v63 = vand.u32 31, %v153_v35  ;;  %v12825_v12 = vand.u32 31, %v12799_v28 }
  0x17   :  { %86 = vst [vmem:[#allocation2 + $0x288] sm:$0xff] %v18708_v1  ;;  %87 = vst [vmem:[#allocation2 + $0x60] sm:$0xff] %v18708_v1  ;;  %v18685_v27 = vand.u32 1023, %v12787_v62  ;;  %vm211_vm10 = vcmp.ge.s32.totalorder %v12802_v36, 1  ;;  %vm212_vm11 = vcmp.ge.s32.totalorder %v12804_v37, 1  ;;  %v18921_v58 = vmov 0 }
  0x18   :  { %88 = vst [vmem:[#allocation2 + $0x210] sm:$0xff] %v18708_v1  ;;  %89 = vst [vmem:[#allocation2 + $0x50] sm:$0xff] %v18708_v1  ;;  %vm213_vm13 = vcmp.ge.s32.totalorder %v12806_v47, 1  ;;  %vm214_vm14 = vcmp.ge.s32.totalorder %v12808_v5, 1  ;;  %vm215_vm15 = vcmp.ge.s32.totalorder %v12810_v9, 1  ;;  %vm216_vm1 = vcmp.ge.s32.totalorder %v12820_v23, 1 }
  0x19   :  { %90 = vst [vmem:[#allocation2 + $0x1e8] sm:$0xff] %v18708_v1  ;;  %91 = vst [vmem:[#allocation2 + $0x2d0] sm:$0xff] %v18708_v1  ;;  %vm12834_vm12 = vcmp.ge.s32.totalorder %v18685_v27, 32  ;;  %vm217_vm2 = vcmp.ge.s32.totalorder %v12822_v63, 1  ;;  %vm18809_vm5 = vcmp.ge.s32.totalorder %v12825_v12, 1  ;;  %v12856_v60 = vsel %vm212_vm11, 1.0, %v18708_v1 }
  0x1a   :  { %92 = vst [vmem:[#allocation2 + $0x1f0] sm:$0xff] %v18708_v1  ;;  %93 = vst [vmem:[#allocation2 + $0x28] sm:$0xff] %v18708_v1  ;;  %v18922_v58 = vsel %vm12834_vm12, 4294967295, %v18921_v58  ;;  %v12859_v33 = vsel %vm213_vm13, 1.0, %v18708_v1  ;;  %v12869_v27 = vsel %vm216_vm1, 1.0, %v18708_v1  ;;  %v12872_v24 = vsel %vm217_vm2, 1.0, %v18708_v1 }
  0x1b   :  { %94 = vst [vmem:[#allocation2 + $0x138] sm:$0xff] %v18708_v1  ;;  %95 = vst [vmem:[#allocation2 + $0xc8] sm:$0xff] %v18708_v1  ;;  %v12877_v25 = vsel %vm18809_vm5, 1.0, %v18708_v1  ;;  %vm542_vm6 = vcmp.le.s32.totalorder %v12716_v39, 30  ;;  %vm543_vm7 = vcmp.le.s32.totalorder %v12718_v40, 30  ;;  %vm545_vm13 = vcmp.le.s32.totalorder %v12722_v42, 30 }
  0x1c   :  { %96 = vst [vmem:[#allocation2 + $0x58] sm:$0xff] %v18708_v1  ;;  %97 = vst [vmem:[#allocation2 + $0x1c0] sm:$0xff] %v18708_v1  ;;  %vm548_vm1 = vcmp.le.s32.totalorder %v12728_v45, 30  ;;  %vm18728_vm2 = vcmp.le.s32.totalorder %v12731_v46, 30 }
  0x1d   :  { %98 = vst [vmem:[#allocation2 + $0x298] sm:$0xff] %v18708_v1  ;;  %99 = vst [vmem:[#allocation2 + $0x70] sm:$0xff] %v18708_v1 }
  0x1e   :  { %100 = vst [vmem:[#allocation2 + $0x18] sm:$0xff] %v18708_v1  ;;  %101 = vst [vmem:[#allocation2 + $0x120] sm:$0xff] %v18708_v1 }
  0x1f   :  { %102 = vst [vmem:[#allocation2 + $0x240] sm:$0xff] %v18708_v1  ;;  %103 = vst [vmem:[#allocation2 + $0x180] sm:$0xff] %v18708_v1 }
  0x20   :  { %104 = vst [vmem:[#allocation2 + $0x1f8] sm:$0xff] %v18708_v1  ;;  %105 = vst [vmem:[#allocation2 + $0x1a0] sm:$0xff] %v18708_v1 }
  0x21   :  { %106 = vst [vmem:[#allocation2 + $0xa0] sm:$0xff] %v18708_v1  ;;  %107 = vst [vmem:[#allocation2 + $0x278] sm:$0xff] %v18708_v1 }
  0x22   :  { %108 = vst [vmem:[#allocation2 + $0x8] sm:$0xff] %v18708_v1  ;;  %109 = vst [vmem:[#allocation2 + $0x2c0] sm:$0xff] %v18708_v1 }
  0x23   :  { %110 = vst [vmem:[#allocation2 + $0x270] sm:$0xff] %v18708_v1  ;;  %111 = vst [vmem:[#allocation2 + $0x290] sm:$0xff] %v18708_v1 }
  0x24   :  { %112 = vst [vmem:[#allocation2 + $0x2a8] sm:$0xff] %v18708_v1  ;;  %113 = vst [vmem:[#allocation2 + $0x2f0] sm:$0xff] %v18708_v1 }
  0x25   :  { %114 = vst [vmem:[#allocation2 + $0x1e0] sm:$0xff] %v18708_v1  ;;  %115 = vst [vmem:[#allocation2 + $0x150] sm:$0xff] %v18708_v1 }
  0x26   :  { %116 = vst [vmem:[#allocation2 + $0x2c8] sm:$0xff] %v18708_v1  ;;  %117 = vst [vmem:[#allocation2 + $0x1d0] sm:$0xff] %v18708_v1 }
  0x27   :  { %118 = vst [vmem:[#allocation2 + $0x140] sm:$0xff] %v18708_v1  ;;  %119 = vst [vmem:[#allocation2 + $0x230] sm:$0xff] %v18708_v1 }
  0x28   :  { %120 = vst [vmem:[#allocation2 + $0x160] sm:$0xff] %v18708_v1  ;;  %121 = vst [vmem:[#allocation2 + $0x2d8] sm:$0xff] %v18708_v1 }
  0x29   :  { %122 = vst [vmem:[#allocation2 + $0xc0] sm:$0xff] %v18708_v1  ;;  %123 = vst [vmem:[#allocation2 + $0x170] sm:$0xff] %v18708_v1 }
  0x2a   :  { %124 = vst [vmem:[#allocation2 + $0x90] sm:$0xff] %v18708_v1  ;;  %125 = vst [vmem:[#allocation2 + $0xb0] sm:$0xff] %v18708_v1 }
  0x2b   :  { %126 = vst [vmem:[#allocation2 + $0x200] sm:$0xff] %v18708_v1  ;;  %127 = vst [vmem:[#allocation2 + $0xd8] sm:$0xff] %v18708_v1 }
  0x2c   :  { %128 = vst [vmem:[#allocation2 + $0x1d8] sm:$0xff] %v18708_v1  ;;  %129 = vst [vmem:[#allocation2 + $0x2e8] sm:$0xff] %v18708_v1 }
  0x2d   :  { %130 = vst [vmem:[#allocation2 + $0x260] sm:$0xff] %v18708_v1  ;;  %131 = vst [vmem:[#allocation2 + $0x268] sm:$0xff] %v18708_v1 }
  0x2e   :  { %132 = vst [vmem:[#allocation2 + $0x88] sm:$0xff] %v18708_v1  ;;  %133 = vst [vmem:[#allocation2 + $0x110] sm:$0xff] %v18708_v1 }
  0x2f   :  { %134 = vst [vmem:[#allocation2 + $0x108] sm:$0xff] %v18708_v1  ;;  %135 = vst [vmem:[#allocation2 + $0x198] sm:$0xff] %v18708_v1 }
  0x30   :  { %136 = vst [vmem:[#allocation2 + $0x148] sm:$0xff] %v18708_v1  ;;  %137 = vst [vmem:[#allocation2 + $0x118] sm:$0xff] %v18708_v1 }
  0x31   :  { %18890 = vst [vmem:[#allocation7_spill] sm:$0xff] %v12700_v29  ;;  %18891 = vst [vmem:[#allocation8_spill] sm:$0xff] %v12713_v38 }
  0x32   :  { %18892 = vst [vmem:[#allocation9_spill] sm:$0xff] %v12716_v39  ;;  %18893 = vst [vmem:[#allocation10_spill] sm:$0xff] %v12718_v40 }
  0x33   :  { %18894 = vst [vmem:[#allocation11_spill] sm:$0xff] %v12720_v41  ;;  %18895 = vst [vmem:[#allocation12_spill] sm:$0xff] %v12722_v42 }
  0x34   :  { %18896 = vst [vmem:[#allocation13_spill] sm:$0xff] %v12724_v43  ;;  %18897 = vst [vmem:[#allocation14_spill] sm:$0xff] %v12726_v44 }
  0x35   :  { %18898 = vst [vmem:[#allocation15_spill] sm:$0xff] %v12728_v45  ;;  %18899 = vst [vmem:[#allocation16_spill] sm:$0xff] %v12731_v46 }
  0x36   :  { %18902 = vst [vmem:[#allocation17_spill] sm:$0xff] %v18901_v48  ;;  %vm219_vm9 = vmand %vm12740_vm4, %vm203_vm0  ;;  %v18771_v48 = vand.u32 1023, %v12799_v28 }
  0x37   :  { %18903 = vst [vmem:[#allocation18_spill] sm:$0xff] %v12753_v49  ;;  %18904 = vst [vmem:[#allocation19_spill] sm:$0xff] %v12756_v50  ;;  %v12762_v52 = vsel %vm219_vm9, 1.0, %v18708_v1  ;;  %vm544_vm9 = vcmp.le.s32.totalorder %v12720_v41, 30 }
  0x38   :  { %18905 = vst [vmem:[#allocation20_spill] sm:$0xff] %v12759_v51  ;;  %18906 = vst [vmem:[#allocation21_spill] sm:$0xff] %v12762_v52  ;;  %v283_v57 = vcombine.low %v12762_v52, %v12753_v49 }
  0x39   :  { %18907 = vst [vmem:[#allocation22_spill] sm:$0xff] %v12765_v53  ;;  %18908 = vst [vmem:[#allocation23_spill] sm:$0xff] %v12768_v54  ;;  %v335_v54 = vcombine.low %v12872_v24, %v12877_v25  ;;  %v12890_v53 = vsel %vm12740_vm4, 1.0, %v18708_v1 }
  0x3a   :  { %18909 = vst [vmem:[#allocation24_spill] sm:$0xff] %v12771_v55  ;;  %18910 = vst [vmem:[#allocation25_spill] sm:$0xff] %v12776_v56  ;;  %v293_v10 = vrot.slane %v283_v57, %v12795_v34  ;;  %v316_v57 = vcombine.low %v12817_v11, %v314_v22  ;;  %v12894_v56 = vrot.slane %v12704_v31, %v12795_v34 }
  0x3b   :  { %18911 = vst [vmem:[#allocation26_spill] sm:$0xff] %v12787_v62  ;;  %18912 = vst [vmem:[#allocation27_spill] sm:$0xff] %v12799_v28 }
  0x3c   :  { %18913 = vst [vmem:[#allocation28_spill] sm:$0xff] %v12802_v36  ;;  %18914 = vst [vmem:[#allocation29_spill] sm:$0xff] %v12804_v37  ;;  %v315_v32 = vcombine.low %v293_v10, %v12814_v61  ;;  %v12843_v22 = vrot.slane %v316_v57, %v12795_v34  ;;  %v12866_v57 = vsel %vm215_vm15, 1.0, %v18708_v1  ;;  %v469_v31 = vcombine.low %v12894_v56, %v12894_v56 }
  0x3d   :  { %18915 = vst [vmem:[#allocation30_spill] sm:$0xff] %v12806_v47  ;;  %18916 = vst [vmem:[#allocation31_spill] sm:$0xff] %v12808_v5  ;;  %v334_v62 = vcombine.low %v12866_v57, %v12869_v27  ;;  %vm547_vm15 = vcmp.le.s32.totalorder %v12726_v44, 30 }
  0x3e   :  { %18917 = vst [vmem:[#allocation32_spill] sm:$0xff] %v12810_v9  ;;  %18918 = vst [vmem:[#allocation33_spill] sm:$0xff] %v12820_v23  ;;  %v323_v10 = vrot.slane %v315_v32, %v12795_v34  ;;  %v12863_v32 = vsel %vm214_vm14, 1.0, %v18708_v1  ;;  %vm546_vm14 = vcmp.le.s32.totalorder %v12724_v43, 30 }
  0x3f   :  { %18919 = vst [vmem:[#allocation34_spill] sm:$0xff] %v12822_v63  ;;  %18920 = vst [vmem:[#allocation35_spill] sm:$0xff] %v12825_v12  ;;  %v333_v30 = vcombine.low %v12859_v33, %v12863_v32 }
  0x40   :  { %18923 = vst [vmem:[#allocation36_spill] sm:$0xff] %v18922_v58  ;;  %vm227_vm3 = vmand %vm12834_vm12, %vm211_vm10  ;;  %v331_v35 = vcombine.low %v323_v10, %v12843_v22 }
  0x41   :  { %v12853_v59 = vsel %vm227_vm3, 1.0, %v18708_v1  ;;  %18925 = vst [vmem:[#allocation38_spill] sm:$0xff] %v12856_v60  ;;  %18926 = vst [vmem:[#allocation39_spill] sm:$0xff] %v12859_v33  ;;  %v12898_v33 = vrot.slane %v333_v30, %v12795_v34  ;;  %vm550_vm3 = vcmp.le.s32.totalorder %v12802_v36, 30 }
  0x42   :  { %18924 = vst [vmem:[#allocation37_spill] sm:$0xff] %v12853_v59  ;;  %18927 = vst [vmem:[#allocation40_spill] sm:$0xff] %v12863_v32  ;;  %v332_v10 = vcombine.low %v12853_v59, %v12856_v60  ;;  %v363_v32 = vrot.slane %v335_v54, %v12795_v34 }
  0x43   :  { %18928 = vst [vmem:[#allocation41_spill] sm:$0xff] %v12866_v57  ;;  %18929 = vst [vmem:[#allocation42_spill] sm:$0xff] %v12869_v27  ;;  %v12905_v57 = vsel %vm12834_vm12, 1.0, %v18708_v1 }
  0x44   :  { %18930 = vst [vmem:[#allocation43_spill] sm:$0xff] %v12872_v24  ;;  %18931 = vst [vmem:[#allocation44_spill] sm:$0xff] %v12877_v25  ;;  %v342_v59 = vrot.slane %v332_v10, %v12795_v34  ;;  %v12908_v25 = vrot.slane %v334_v62, %v12795_v34  ;;  %v12921_v62 = vrot.slane %v469_v31, %v12795_v34 }
  0x45   :  { %383 = vst [vmem:[#allocation3] ss:$8 sm:$0xf] %v331_v35  ;;  %384 = vst [vmem:[#allocation3] ss:$8 sm:$0xf0] %v331_v35 }
  0x46   :  { %18932 = vst [vmem:[#allocation45_spill] sm:$0xff] %v12890_v53  ;;  %v18933_v35 = vmov 1.0   ;;  %18934 = vst [vmem:[#allocation46_spill] sm:$0xff] %v12905_v57  ;;  %v364_v10 = vcombine.low %v342_v59, %v12898_v33  ;;  %v365_v1 = vcombine.low %v12908_v25, %v363_v32 }
  0x47   :  { %v436_v27 = vcombine.low %v12890_v53, %v18933_v35  ;;  %v485_v30 = vcombine.low %v12905_v57, %v18933_v35  ;;  %vm558_vm11 = vmand %vm12740_vm4, %vm542_vm6 }
  0x48   :  { %v12934_v32 = vrot.slane %v365_v1, %v12795_v34 }
  0x49   :  { %v446_v51 = vrot.slane %v436_v27, %v12795_v34  ;;  %v495_v54 = vrot.slane %v485_v30, %v12795_v34  ;;  %v372_v27 = vrot.slane %v364_v10, %v12795_v34  ;;  %v18935_v10 = vmov 0.0  }
  0x4a   :  { %v12942_v57 = vsel %vm558_vm11, 1.0, %v18935_v10  ;;  %v12954_v44 = vsel %vm544_vm9, 1.0, %v18935_v10  ;;  %v12961_v45 = vsel %vm546_vm14, 1.0, %v18935_v10  ;;  %v12964_v50 = vsel %vm547_vm15, 1.0, %v18935_v10 }
  0x4b   :  { %v468_v59 = vcombine.low %v446_v51, %v12894_v56  ;;  %v517_v31 = vcombine.low %v495_v54, %v12894_v56  ;;  %18936 = vst [vmem:[#allocation47_spill] sm:$0xff] %v12942_v57  ;;  %v12947_v51 = vsel %vm543_vm7, 1.0, %v18935_v10  ;;  %v380_v1 = vcombine.low %v372_v27, %v12934_v32  ;;  %18938 = vst [vmem:[#allocation49_spill] sm:$0xff] %v12954_v44 }
  0x4c   :  { %18937 = vst [vmem:[#allocation48_spill] sm:$0xff] %v12947_v51  ;;  %18940 = vst [vmem:[#allocation51_spill] sm:$0xff] %v12961_v45  ;;  %v12967_v27 = vsel %vm548_vm1, 1.0, %v18935_v10  ;;  %v12973_v52 = vsel %vm18728_vm2, 1.0, %v18935_v10  ;;  %v624_v41 = vcombine.low %v12961_v45, %v12964_v50  ;;  %vm551_vm7 = vcmp.le.s32.totalorder %v12804_v37, 30 }
  0x4d   :  { %v476_v30 = vrot.slane %v468_v59, %v12795_v34  ;;  %v525_v54 = vrot.slane %v517_v31, %v12795_v34  ;;  %v12957_v59 = vsel %vm545_vm13, 1.0, %v18935_v10  ;;  %18941 = vst [vmem:[#allocation52_spill] sm:$0xff] %v12964_v50  ;;  %18942 = vst [vmem:[#allocation53_spill] sm:$0xff] %v12967_v27  ;;  %vm552_vm9 = vcmp.le.s32.totalorder %v12806_v47, 30 }
  0x4e   :  { %18939 = vst [vmem:[#allocation50_spill] sm:$0xff] %v12957_v59  ;;  %386 = vst [vmem:[#allocation3 + $0x40] ss:$8 sm:$0xf] %v380_v1  ;;  %v623_v42 = vcombine.low %v12954_v44, %v12957_v59  ;;  %vm553_vm11 = vcmp.le.s32.totalorder %v12808_v5, 30  ;;  %vm554_vm14 = vcmp.le.s32.totalorder %v12810_v9, 30 }
  0x4f   :  { %v484_v43 = vcombine.low %v476_v30, %v12921_v62  ;;  %387 = vst [vmem:[#allocation3 + $0x40] ss:$8 sm:$0xf0] %v380_v1  ;;  %v533_v31 = vcombine.low %v525_v54, %v12921_v62  ;;  %18943 = vst [vmem:[#allocation54_spill] sm:$0xff] %v12973_v52  ;;  %v622_v30 = vcombine.low %v12942_v57, %v12947_v51  ;;  %vm555_vm15 = vcmp.le.s32.totalorder %v12820_v23, 30 }
  0x50   :  { %v625_v1 = vcombine.low %v12967_v27, %v12973_v52  ;;  %v12987_v53 = vrot.slane %v623_v42, %v12795_v34  ;;  %vm566_vm13 = vmand %vm12834_vm12, %vm550_vm3  ;;  %vm556_vm1 = vcmp.le.s32.totalorder %v12822_v63, 30  ;;  %vm18810_vm2 = vcmp.le.s32.totalorder %v12825_v12, 30 }
  0x51   :  { %537 = vst [vmem:[#allocation3 + $0x1] ss:$8 sm:$0xf] %v484_v43  ;;  %538 = vst [vmem:[#allocation3 + $0x1] ss:$8 sm:$0xf0] %v484_v43  ;;  %v632_v54 = vrot.slane %v622_v30, %v12795_v34  ;;  %v12996_v43 = vrot.slane %v624_v41, %v12795_v34 }
  0x52   :  { %540 = vst [vmem:[#allocation3 + $0x41] ss:$8 sm:$0xf] %v533_v31  ;;  %541 = vst [vmem:[#allocation3 + $0x41] ss:$8 sm:$0xf0] %v533_v31  ;;  %v653_v50 = vrot.slane %v625_v1, %v12795_v34 }
  0x53   :  { %v654_v42 = vcombine.low %v632_v54, %v12987_v53  ;;  %v13005_v31 = vsel %vm566_vm13, 1.0, %v18935_v10  ;;  %v13011_v41 = vsel %vm551_vm7, 1.0, %v18935_v10  ;;  %v13014_v1 = vsel %vm552_vm9, 1.0, %v18935_v10 }
  0x54   :  { %18944 = vst [vmem:[#allocation55_spill] sm:$0xff] %v13005_v31  ;;  %v655_v30 = vcombine.low %v12996_v43, %v653_v50  ;;  %18945 = vst [vmem:[#allocation56_spill] sm:$0xff] %v13011_v41  ;;  %v13017_v23 = vsel %vm553_vm11, 1.0, %v18935_v10  ;;  %v13021_v9 = vsel %vm554_vm14, 1.0, %v18935_v10  ;;  %v13024_v58 = vsel %vm555_vm15, 1.0, %v18935_v10 }
  0x55   :  { %18946 = vst [vmem:[#allocation57_spill] sm:$0xff] %v13014_v1  ;;  %18947 = vst [vmem:[#allocation58_spill] sm:$0xff] %v13017_v23  ;;  %v662_v54 = vrot.slane %v654_v42, %v12795_v34  ;;  %v13027_v50 = vsel %vm556_vm1, 1.0, %v18935_v10  ;;  %v13033_v63 = vsel %vm18810_vm2, 1.0, %v18935_v10  ;;  %v671_v45 = vcombine.low %v13005_v31, %v13011_v41 }
  0x56   :  { %18948 = vst [vmem:[#allocation59_spill] sm:$0xff] %v13021_v9  ;;  %18949 = vst [vmem:[#allocation60_spill] sm:$0xff] %v13024_v58  ;;  %v669_v37 = vrot.slane %v655_v30, %v12795_v34  ;;  %v672_v42 = vcombine.low %v13014_v1, %v13017_v23  ;;  %v673_v47 = vcombine.low %v13021_v9, %v13024_v58  ;;  %v13046_v30 = vsel %vm203_vm0, 1.0, %v18935_v10 }
  0x57   :  { %18950 = vst [vmem:[#allocation61_spill] sm:$0xff] %v13027_v50  ;;  %18951 = vst [vmem:[#allocation62_spill] sm:$0xff] %v13033_v63  ;;  %v674_v5 = vcombine.low %v13027_v50, %v13033_v63  ;;  %v13051_v52 = vsel %vm211_vm10, 1.0, %v18935_v10  ;;  %v681_v59 = vrot.slane %v671_v45, %v12795_v34  ;;  %v776_v58 = vcombine.low %v13046_v30, %v12753_v49 }
  0x58   :  { %18952 = vst [vmem:[#allocation63_spill] sm:$0xff] %v13046_v30  ;;  %18953 = vst [vmem:[#allocation64_spill] sm:$0xff] %v13051_v52  ;;  %v670_v31 = vcombine.low %v662_v54, %v669_v37  ;;  %v688_v1 = vrot.slane %v672_v42, %v12795_v34  ;;  %v13058_v9 = vrot.slane %v673_v47, %v12795_v34  ;;  %v13066_v44 = vsel %vm542_vm6, 1.0, %v18935_v10 }
  0x59   :  { %v702_v63 = vrot.slane %v674_v5, %v12795_v34  ;;  %v825_v23 = vcombine.low %v13051_v52, %v12856_v60  ;;  %18954 = vst [vmem:[#allocation65_spill] sm:$0xff] %v13066_v44  ;;  %v786_v54 = vrot.slane %v776_v58, %v12795_v34  ;;  %v930_v42 = vcombine.low %v13066_v44, %v12947_v51 }
  0x5a   :  { %723 = vst [vmem:[#allocation3 + $0x2] ss:$8 sm:$0xf] %v670_v31  ;;  %724 = vst [vmem:[#allocation3 + $0x2] ss:$8 sm:$0xf0] %v670_v31  ;;  %v703_v45 = vcombine.low %v681_v59, %v688_v1 }
  0x5b   :  { %v13074_v5 = vsel %vm550_vm3, 1.0, %v18935_v10  ;;  %v704_v47 = vcombine.low %v13058_v9, %v702_v63  ;;  %v835_v60 = vrot.slane %v825_v23, %v12795_v34  ;;  %v18772_v31 = vand.u32 1023, %v12713_v38 }
  0x5c   :  { %18955 = vst [vmem:[#allocation66_spill] sm:$0xff] %v13074_v5  ;;  %v979_v52 = vcombine.low %v13074_v5, %v13011_v41  ;;  %v711_v59 = vrot.slane %v703_v45, %v12795_v34  ;;  %v808_v58 = vcombine.low %v786_v54, %v12814_v61  ;;  %v940_v57 = vrot.slane %v930_v42, %v12795_v34 }
  0x5d   :  { %v718_v36 = vrot.slane %v704_v47, %v12795_v34  ;;  %v857_v30 = vcombine.low %v835_v60, %v12898_v33  ;;  %vm13090_vm0 = vcmp.lt.s32.totalorder %v18772_v31, 992  ;;  %v18956_v23 = vmov 0 }
  0x5e   :  { %v989_v63 = vrot.slane %v979_v52, %v12795_v34  ;;  %v18957_v23 = vsel %vm13090_vm0, 4294967295, %v18956_v23  ;;  %v816_v45 = vrot.slane %v808_v58, %v12795_v34  ;;  %v962_v61 = vcombine.low %v940_v57, %v12987_v53  ;;  %vm1059_vm10 = vmand %vm13090_vm0, %vm18811_vm8 }
  0x5f   :  { %18958 = vst [vmem:[#allocation67_spill] sm:$0xff] %v18957_v23  ;;  %vm13102_vm6 = vcmp.lt.s32.totalorder %v18771_v48, 992  ;;  %v18959_v60 = vmov 0  ;;  %v13109_v52 = vsel %vm13090_vm0, 1.0, %v18935_v10  ;;  %v719_v33 = vcombine.low %v711_v59, %v718_v36 }
  0x60   :  { %v18960_v60 = vsel %vm13102_vm6, 4294967295, %v18959_v60  ;;  %18962 = vst [vmem:[#allocation69_spill] sm:$0xff] %v13109_v52  ;;  %v865_v54 = vrot.slane %v857_v30, %v12795_v34  ;;  %v1011_v53 = vcombine.low %v989_v63, %v688_v1  ;;  %v13113_v57 = vsel %vm1059_vm10, 1.0, %v18935_v10  ;;  %vm1067_vm3 = vmand %vm13102_vm6, %vm18809_vm5 }
  0x61   :  { %18961 = vst [vmem:[#allocation68_spill] sm:$0xff] %v18960_v60  ;;  %18963 = vst [vmem:[#allocation70_spill] sm:$0xff] %v13113_v57  ;;  %v824_v42 = vcombine.low %v816_v45, %v12843_v22  ;;  %v970_v47 = vrot.slane %v962_v61, %v12795_v34  ;;  %v1119_v58 = vcombine.low %v12771_v55, %v13113_v57  ;;  %v13124_v59 = vsel %vm1067_vm3, 1.0, %v18935_v10 }
  0x62   :  { %18964 = vst [vmem:[#allocation71_spill] sm:$0xff] %v13124_v59  ;;  %vm18965_vm7 = vcmp.le.s32.totalorder %v12731_v46, 30  ;;  %726 = vst [vmem:[#allocation3 + $0x42] ss:$8 sm:$0xf] %v719_v33  ;;  %v873_v1 = vcombine.low %v865_v54, %v12934_v32  ;;  %v1019_v30 = vrot.slane %v1011_v53, %v12795_v34  ;;  %v1168_v22 = vcombine.low %v12872_v24, %v13124_v59 }
  0x63   :  { %vm1383_vm9 = vmand %vm13090_vm0, %vm18965_vm7  ;;  %727 = vst [vmem:[#allocation3 + $0x42] ss:$8 sm:$0xf0] %v719_v33  ;;  %v1273_v63 = vcombine.low %v18933_v35, %v13109_v52  ;;  %v978_v33 = vcombine.low %v970_v47, %v669_v37  ;;  %v1147_v32 = vrot.slane %v1119_v58, %v12795_v34  ;;  %v13148_v53 = vsel %vm13102_vm6, 1.0, %v18935_v10 }
  0x64   :  { %vm13140_vm11 = vmand %vm13102_vm6, %vm18810_vm2  ;;  %877 = vst [vmem:[#allocation3 + $0x3] ss:$8 sm:$0xf] %v824_v42  ;;  %v13151_v48 = vsel %vm1383_vm9, 1.0, %v18935_v10  ;;  %v1027_v31 = vcombine.low %v1019_v30, %v718_v36  ;;  %v1196_v41 = vrot.slane %v1168_v22, %v12795_v34  ;;  %v1322_v37 = vcombine.low %v18933_v35, %v13148_v53 }
  0x65   :  { %878 = vst [vmem:[#allocation3 + $0x3] ss:$8 sm:$0xf0] %v824_v42  ;;  %18968 = vst [vmem:[#allocation72_spill] sm:$0xff] %v13148_v53  ;;  %v1301_v5 = vrot.slane %v1273_v63, %v12795_v34  ;;  %v1149_v42 = vcombine.low %v12817_v11, %v1147_v32  ;;  %v1443_v58 = vcombine.low %v12967_v27, %v13151_v48  ;;  %v13163_v59 = vsel %vm13140_vm11, 1.0, %v18935_v10 }
  0x66   :  { %18969 = vst [vmem:[#allocation73_spill] sm:$0xff] %v13151_v48  ;;  %880 = vst [vmem:[#allocation3 + $0x43] ss:$8 sm:$0xf] %v873_v1  ;;  %v1198_v36 = vcombine.low %v12908_v25, %v1196_v41  ;;  %v1350_v35 = vrot.slane %v1322_v37, %v12795_v34  ;;  %v1492_v22 = vcombine.low %v13027_v50, %v13163_v59 }
  0x67   :  { %881 = vst [vmem:[#allocation3 + $0x43] ss:$8 sm:$0xf0] %v873_v1  ;;  %1031 = vst [vmem:[#allocation3 + $0x4] ss:$8 sm:$0xf] %v978_v33  ;;  %v1303_v1 = vcombine.low %v12894_v56, %v1301_v5  ;;  %v1163_v11 = vrot.slane %v1149_v42, %v12795_v34  ;;  %v1471_v63 = vrot.slane %v1443_v58, %v12795_v34 }
  0x68   :  { %1032 = vst [vmem:[#allocation3 + $0x4] ss:$8 sm:$0xf0] %v978_v33  ;;  %18970 = vst [vmem:[#allocation74_spill] sm:$0xff] %v13163_v59  ;;  %v1212_v33 = vrot.slane %v1198_v36, %v12795_v34  ;;  %v1352_v61 = vcombine.low %v12894_v56, %v1350_v35  ;;  %v18976_v36 = vcombine.high %v12631_v3, %v12631_v3  }
  0x69   :  { %1034 = vst [vmem:[#allocation3 + $0x44] ss:$8 sm:$0xf] %v1027_v31  ;;  %1035 = vst [vmem:[#allocation3 + $0x44] ss:$8 sm:$0xf0] %v1027_v31  ;;  %v1317_v10 = vrot.slane %v1303_v1, %v12795_v34  ;;  %v1520_v31 = vrot.slane %v1492_v22, %v12795_v34  ;;  %v1164_v25 = vcombine.low %v816_v45, %v1163_v11 }
  0x6a   :  { %v1473_v41 = vcombine.low %v12996_v43, %v1471_v63  ;;  %v1213_v5 = vcombine.low %v865_v54, %v1212_v33  ;;  %v1366_v37 = vrot.slane %v1352_v61, %v12795_v34  ;;  %v18977_v1 = vcombine.high %v12626_v2, %v12626_v2  }
  0x6b   :  { %v1318_v32 = vcombine.low %v12921_v62, %v1317_v10  ;;  %v1522_v42 = vcombine.low %v13058_v9, %v1520_v31  ;;  %1217 = vst [vmem:[#allocation3 + $0x5] ss:$8 sm:$0xf] %v1164_v25  ;;  %1218 = vst [vmem:[#allocation3 + $0x5] ss:$8 sm:$0xf0] %v1164_v25  ;;  %v18971_v9 = vcombine.high %v12664_v13, %v12664_v13  }
  0x6c   :  { %v1487_v58 = vrot.slane %v1473_v41, %v12795_v34  ;;  %1220 = vst [vmem:[#allocation3 + $0x45] ss:$8 sm:$0xf] %v1213_v5  ;;  %1221 = vst [vmem:[#allocation3 + $0x45] ss:$8 sm:$0xf0] %v1213_v5  ;;  %v1367_v56 = vcombine.low %v12921_v62, %v1366_v37  ;;  %v18973_v62 = vcombine.high %v12648_v7, %v12648_v7  }
  0x6d   :  { %1371 = vst [vmem:[#allocation3 + $0x6] ss:$8 sm:$0xf] %v1318_v32  ;;  %1372 = vst [vmem:[#allocation3 + $0x6] ss:$8 sm:$0xf0] %v1318_v32  ;;  %v1536_v45 = vrot.slane %v1522_v42, %v12795_v34  ;;  %v18972_v34 = vcombine.high %v12653_v8, %v12653_v8   ;;  %v18978_v35 = vcombine.high %v12525_v0, %v12525_v0  }
  0x6e   :  { %v1488_v43 = vcombine.low %v970_v47, %v1487_v58  ;;  %1374 = vst [vmem:[#allocation3 + $0x46] ss:$8 sm:$0xf] %v1367_v56  ;;  %1375 = vst [vmem:[#allocation3 + $0x46] ss:$8 sm:$0xf0] %v1367_v56  ;;  %v18974_v47 = vcombine.high %v12643_v6, %v12643_v6  }
  0x6f   :  { %v1537_v54 = vcombine.low %v1019_v30, %v1536_v45  ;;  %v18975_v30 = vcombine.high %v12636_v4, %v12636_v4  }
  0x70   :  { %1541 = vst [vmem:[#allocation3 + $0x7] ss:$8 sm:$0xf] %v1488_v43  ;;  %1542 = vst [vmem:[#allocation3 + $0x7] ss:$8 sm:$0xf0] %v1488_v43 }
  0x71   :  { %1544 = vst [vmem:[#allocation3 + $0x47] ss:$8 sm:$0xf] %v1537_v54  ;;  %1545 = vst [vmem:[#allocation3 + $0x47] ss:$8 sm:$0xf0] %v1537_v54 }
  0x72 LB: > { %v18979_v29 = vld [vmem:[#allocation7_spill] sm:$0xff]  ;;  %vm1617_vm13 = vcmp.gt.f32.partialorder %v12412_v35, 0.0  ;;  %v1633_v22 = vmul.f32 0.01, %v12412_v35  ;;  %vm1619_vm14 = vcmp.gt.f32.partialorder %v12404_v1, 0.0  ;;  %vm1618_vm15 = vcmp.gt.f32.partialorder %v12408_v2, 0.0  ;;  %v12324_v21 = vphi %v12688_v21, %v4133_v21   ;;  %s12420_s0 = sphi %s13271_s0, %s1591_s0   ;;  %v12416_v0 = vphi %v12525_v0, %v19012_v0   ;;  %v12412_v35 = vphi %v18978_v35, %v19011_v35   ;;  %v12408_v2 = vphi %v12626_v2, %v19010_v2   ;;  %v12404_v1 = vphi %v18977_v1, %v19009_v1   ;;  %v12400_v3 = vphi %v12631_v3, %v19008_v3   ;;  %v12396_v36 = vphi %v18976_v36, %v19007_v36   ;;  %v12392_v4 = vphi %v12636_v4, %v19006_v4   ;;  %v12388_v30 = vphi %v18975_v30, %v19005_v30   ;;  %v12384_v6 = vphi %v12643_v6, %v19004_v6   ;;  %v12380_v47 = vphi %v18974_v47, %v19003_v47   ;;  %v12376_v7 = vphi %v12648_v7, %v19002_v7   ;;  %v12372_v62 = vphi %v18973_v62, %v19001_v62   ;;  %v12368_v8 = vphi %v12653_v8, %v19000_v8   ;;  %v12364_v34 = vphi %v18972_v34, %v18999_v34   ;;  %v12360_v13 = vphi %v12664_v13, %v18998_v13   ;;  %v12356_v9 = vphi %v18971_v9, %v18997_v9   ;;  %v12352_v14 = vphi %v12667_v14, %v14439_v14   ;;  %v12348_v15 = vphi %v12670_v15, %v14441_v15   ;;  %v12344_v16 = vphi %v12673_v16, %v4128_v16   ;;  %v12340_v17 = vphi %v12676_v17, %v4129_v17   ;;  %v12336_v18 = vphi %v12679_v18, %v4130_v18   ;;  %v12332_v19 = vphi %v12682_v19, %v4131_v19   ;;  %v12328_v20 = vphi %v12685_v20, %v4132_v20  }
  0x73   : > { %v1635_v11 = vmul.f32 0.01, %v12404_v1  ;;  %v1634_v63 = vmul.f32 0.01, %v12408_v2  ;;  %vm1620_vm1 = vcmp.gt.f32.partialorder %v12400_v3, 0.0  ;;  %s12425_s19 = smov 127  }
  0x74   : > { %v1636_v33 = vmul.f32 0.01, %v12400_v3  ;;  %v1649_v10 = vsel %vm1617_vm13, %v12412_v35, %v1633_v22  ;;  %s12426_s20 = smov 97   ;;  %s12427_s21 = smov 96   ;;  %vm1616_vm10 = vcmp.gt.f32.partialorder %v12416_v0, 0.0  ;;  %vm1631_vm3 = vcmp.gt.f32.partialorder %v12356_v9, 0.0 }
  0x75   : > { %v13338_v61 = vsel %vm1619_vm14, %v12404_v1, %v1635_v11  ;;  %2566 = vrot.lane.b32.xlu0 %v1649_v10, %s12425_s19  ;;  %v1650_v31 = vsel %vm1618_vm15, %v12408_v2, %v1634_v63  ;;  %s12428_s22 = smov 95   ;;  %v1632_v2 = vmul.f32 0.01, %v12416_v0  ;;  %v2517_v41 = vrot.slane %v1649_v10, 4  ;;  %s12429_s23 = smov 31  }
  0x76   : > { %2570 = vrot.lane.b32.xlu1 %v13338_v61, %s12425_s19  ;;  %v13343_v25 = vsel %vm1620_vm1, %v12400_v3, %v1636_v33  ;;  %v2519_v5 = vrot.slane %v13338_v61, 4  ;;  %v2518_v32 = vrot.slane %v1650_v31, 4  ;;  %s12430_s24 = smov 1   ;;  %v1647_v37 = vmul.f32 0.01, %v12356_v9  ;;  %s12431_s25 = smov 32  }
  0x77   : > { %v1648_v3 = vsel %vm1616_vm10, %v12416_v0, %v1632_v2  ;;  %2549 = vst [vmem:[#allocation2 + $0x248] sm:$0x70] %v2517_v41  ;;  %s12432_s26 = smov 33   ;;  %v1638_v58 = vmul.f32 0.01, %v12392_v4  ;;  %vm1622_vm7 = vcmp.gt.f32.partialorder %v12392_v4, 0.0 }
  0x78   : > { %2551 = vst [vmem:[#allocation2 + $0x68] sm:$0x70] %v2519_v5  ;;  %2550 = vst [vmem:[#allocation2 + $0xe8] sm:$0x70] %v2518_v32  ;;  %v2516_v0 = vrot.slane %v1648_v3, 4  ;;  %v13384_v42 = vsel %vm1631_vm3, %v12356_v9, %v1647_v37  ;;  %vm1621_vm9 = vcmp.gt.f32.partialorder %v12396_v36, 0.0 }
  0x79   : > { %2568 = vrot.lane.b32.xlu0 %v1650_v31, %s12425_s19  ;;  %v1637_v56 = vmul.f32 0.01, %v12396_v36  ;;  %v13409_v45 = vsel %vm1622_vm7, %v12392_v4, %v1638_v58  ;;  %v1640_v54 = vmul.f32 0.01, %v12384_v6  ;;  %v1639_v9 = vmul.f32 0.01, %v12388_v30 }
  0x7a   : > { %2572 = vrot.lane.b32.xlu1 %v13343_v25, %s12425_s19  ;;  %2548 = vst [vmem:[#allocation2] sm:$0x70] %v2516_v0  ;;  %vm1624_vm11 = vcmp.gt.f32.partialorder %v12384_v6, 0.0  ;;  %vm1623_vm13 = vcmp.gt.f32.partialorder %v12388_v30, 0.0  ;;  %v2520_v11 = vrot.slane %v13343_v25, 4  ;;  %v13465_v63 = vsub.s32 1, %v18979_v29 }
  0x7b   : > { %v13412_v43 = vsel %vm1621_vm9, %v12396_v36, %v1637_v56  ;;  %v13423_v4 = vsel %vm1624_vm11, %v12384_v6, %v1640_v54  ;;  %v13426_v36 = vsel %vm1623_vm13, %v12388_v30, %v1639_v9  ;;  %v18778_v6 = vmov 0.0   ;;  %v2613_v30 = vld [vmem:[#allocation3 + $0x4] ss:$8 sm:$0xf]  ;;  %s11341_s27 = sshll.u32 %s12420_s0, 2  ;;  %s1591_s0 = sadd.s32 1, %s12420_s0  }
  0x7c   : > { %3542 = vmatprep.mubr.f32.mxu0 %v18778_v6  ;;  %3613 = vmatprep.mubr.f32.mxu1 %v18778_v6  ;;  %v2614_v1 = vld [vmem:[#allocation3 + $0x4] ss:$8 sm:$0xf0]  ;;  %v2846_v35 = vld [vmem:[#allocation3 + $0x5] ss:$8 sm:$0xf]  ;;  %s13837_s30 = scalar_lea.vmem %s18672_s1, %s11341_s27  ;;  %s3467_s15 = scalar_lea.vmem %s18673_s2, %s11341_s27 }
  0x7d   : > { %2799 = vrot.lane.b32.xlu0 %v1649_v10, %s12426_s20  ;;  %v2521_v22 = vrot.slane %v13412_v43, 4  ;;  %v13468_v33 = vsub.s32 2, %v18979_v29  ;;  %2552 = vst [vmem:[#allocation2 + $0x228] sm:$0x70] %v2520_v11  ;;  %v2523_v5 = vrot.slane %v13426_v36, 4  ;;  %v2522_v32 = vrot.slane %v13409_v45, 4 }
  0x7e   : > { %2801 = vrot.lane.b32.xlu1 %v1650_v31, %s12426_s20  ;;  %vm2596_vm14 = vcmp.lt.s32.totalorder %v12698_v26, 127  ;;  %vm2829_vm15 = vcmp.lt.s32.totalorder %v12698_v26, 97  ;;  %vm18816_vm1 = vcmp.lt.s32.totalorder %v12698_v26, 96  ;;  %vm3263_vm10 = vcmp.lt.s32.totalorder %v12698_v26, 95  ;;  %p14516_p0 = scmp.ge.s32.totalorder %s1591_s0, 16  }
  0x7f   : > { %2553 = vst [vmem:[#allocation2 + $0xa8] sm:$0x70] %v2521_v22  ;;  %2555 = vst [vmem:[#allocation2 + $0x1b0] sm:$0x70] %v2523_v5  ;;  %vm1626_vm3 = vcmp.gt.f32.partialorder %v12376_v7, 0.0  ;;  %vm1625_vm7 = vcmp.gt.f32.partialorder %v12380_v47, 0.0 }
  0x80   : > { %2554 = vst [vmem:[#allocation2 + $0x20] sm:$0x70] %v2522_v32  ;;  %v3063_v5 = vld [vmem:[#allocation3 + $0x6] ss:$8 sm:$0xf]  ;;  %vm1628_vm9 = vcmp.gt.f32.partialorder %v12368_v8, 0.0 }
  0x81   : > { %2803 = vrot.lane.b32.xlu0 %v13338_v61, %s12426_s20  ;;  %v3064_v32 = vld [vmem:[#allocation3 + $0x6] ss:$8 sm:$0xf0]  ;;  %vm1627_vm11 = vcmp.gt.f32.partialorder %v12372_v62, 0.0  ;;  %vm18828_vm13 = vcmp.lt.s32.totalorder %v12698_v26, 31  ;;  %vm1630_vm5 = vcmp.gt.f32.partialorder %v12360_v13, 0.0 }
  0x82   : > { %2805 = vrot.lane.b32.xlu1 %v13343_v25, %s12426_s20  ;;  %v2100_v60 = vld [vmem:[#allocation3 + $0x2] ss:$8 sm:$0xf0]  ;;  %vm1629_vm2 = vcmp.gt.f32.partialorder %v12364_v34, 0.0  ;;  %s12435_s17 = smov (%p14516_p0), 62   ;;  %s12436_s18 = smov (%p14516_p0), 63  }
  0x83   :  { %s12437_s1 = smov (%p14516_p0), 95   ;;  %s12438_s2 = smov (%p14516_p0), 94   ;;  %vm18817_vm8 = vcmp.le.s32.totalorder (%p14516_p0), %v12716_v39, 29 }
  0x84   :  { %s12439_s0 = smov (%p14516_p0), 65   ;;  %s12448_s27 = smov (%p14516_p0), 32  }
  0x85   : > { %3016 = vrot.lane.b32.xlu0 %v1649_v10, %s12427_s21  ;;  %s12449_s28 = smov (%p14516_p0), 33  }
  0x86   : > { %3018 = vrot.lane.b32.xlu1 %v1650_v31, %s12427_s21 }
  0x89   : > { %3020 = vrot.lane.b32.xlu0 %v13338_v61, %s12427_s21 }
  0x8a   : > { %3022 = vrot.lane.b32.xlu1 %v13343_v25, %s12427_s21 }
  0x8d   : > { %3233 = vrot.lane.b32.xlu0 %v1649_v10, %s12428_s22 }
  0x8e   : > { %3235 = vrot.lane.b32.xlu1 %v1650_v31, %s12428_s22 }
  0x91   : > { %3237 = vrot.lane.b32.xlu0 %v13338_v61, %s12428_s22 }
  0x92   : > { %3239 = vrot.lane.b32.xlu1 %v13343_v25, %s12428_s22 }
  0x95   : > { %2564 = vrot.lane.b32.xlu0 %v1648_v3, %s12425_s19 }
  0x96   : > { %2797 = vrot.lane.b32.xlu1 %v1648_v3, %s12426_s20 }
  0x99   : > { %3014 = vrot.lane.b32.xlu0 %v1648_v3, %s12427_s21 }
  0x9a   : > { %3231 = vrot.lane.b32.xlu1 %v1648_v3, %s12428_s22 }
  0x9d   : > { %2050 = vrot.lane.b32.xlu0 %v1648_v3, %s12429_s23 }
  0x9e   : > { %2052 = vrot.lane.b32.xlu1 %v1649_v10, %s12429_s23 }
  0xa1   : > { %2054 = vrot.lane.b32.xlu0 %v1650_v31, %s12429_s23 }
  0xa2   : > { %2056 = vrot.lane.b32.xlu1 %v13338_v61, %s12429_s23 }
  0xa5   : > { %2283 = vrot.lane.b32.xlu0 %v1648_v3, %s12430_s24 }
  0xa6   : > { %2285 = vrot.lane.b32.xlu1 %v1649_v10, %s12430_s24 }
  0xa9   : > { %2287 = vrot.lane.b32.xlu0 %v1650_v31, %s12430_s24 }
  0xaa   : > { %2289 = vrot.lane.b32.xlu1 %v13338_v61, %s12430_s24 }
  0xad   : > { %2080 = vrot.lane.b32.xlu0 %v13384_v42, %s12429_s23 }
  0xae   : > { %2313 = vrot.lane.b32.xlu1 %v13384_v42, %s12430_s24 }
  0xb1   : > { %1833 = vrot.lane.b32.xlu0 %v1648_v3, %s12431_s25 }
  0xb2   : > { %1835 = vrot.lane.b32.xlu1 %v1649_v10, %s12431_s25 }
  0xb5   : > { %1837 = vrot.lane.b32.xlu0 %v1650_v31, %s12431_s25 }
  0xb6   : > { %1839 = vrot.lane.b32.xlu1 %v13338_v61, %s12431_s25 }
  0xb9   : > { %1863 = vrot.lane.b32.xlu0 %v13384_v42, %s12431_s25 }
  0xba   : > { %1664 = vrot.lane.b32.xlu1 %v1648_v3, %s12432_s26 }
  0xbd   : > { %1666 = vrot.lane.b32.xlu0 %v1649_v10, %s12432_s26  ;;  %v13470_v10 = vor.u32 %v2614_v1, %v2613_v30 }
  0xbe   : > { %1668 = vrot.lane.b32.xlu1 %v1650_v31, %s12432_s26  ;;  %v2847_v31 = vld [vmem:[#allocation3 + $0x5] ss:$8 sm:$0xf0] }
  0xbf   : > { %v13477_v41 = vor.u32 %v2847_v31, %v2846_v35  ;;  %v2628_v0 = vrot.slane %v13470_v10, %v13465_v63  ;;  %v2632_v37 = vrot.slane %v13470_v10, %v13468_v33 }
  0xc1   : > { %1670 = vrot.lane.b32.xlu0 %v13338_v61, %s12432_s26  ;;  %v13473_v61 = vsub.s32 3, %v18979_v29  ;;  %v2861_v35 = vrot.slane %v13477_v41, %v13465_v63 }
  0xc2   : > { %1694 = vrot.lane.b32.xlu1 %v13384_v42, %s12432_s26 }
  0xc3   : > { %v2636_v58 = vrot.slane %v13470_v10, %v13473_v61 }
  0xc5   : > { %2574 = vrot.lane.b32.xlu0 %v13412_v43, %s12425_s19 }
  0xc6   : > { %2576 = vrot.lane.b32.xlu1 %v13409_v45, %s12425_s19 }
  0xc9   : > { %2578 = vrot.lane.b32.xlu0 %v13426_v36, %s12425_s19 }
  0xca   : > { %2580 = vrot.lane.b32.xlu1 %v13423_v4, %s12425_s19 }
  0xcd   : > { %2807 = vrot.lane.b32.xlu0 %v13412_v43, %s12426_s20 }
  0xce   : > { %2809 = vrot.lane.b32.xlu1 %v13409_v45, %s12426_s20 }
  0xd1   : > { %2811 = vrot.lane.b32.xlu0 %v13426_v36, %s12426_s20 }
  0xd2   : > { %2813 = vrot.lane.b32.xlu1 %v13423_v4, %s12426_s20 }
  0xd5   : > { %3024 = vrot.lane.b32.xlu0 %v13412_v43, %s12427_s21 }
  0xd6   : > { %3026 = vrot.lane.b32.xlu1 %v13409_v45, %s12427_s21 }
  0xd9   : > { %3028 = vrot.lane.b32.xlu0 %v13426_v36, %s12427_s21 }
  0xda   : > { %3030 = vrot.lane.b32.xlu1 %v13423_v4, %s12427_s21 }
  0xdd   : > { %3241 = vrot.lane.b32.xlu0 %v13412_v43, %s12428_s22 }
  0xde   : > { %3243 = vrot.lane.b32.xlu1 %v13409_v45, %s12428_s22 }
  0xe1   : > { %3245 = vrot.lane.b32.xlu0 %v13426_v36, %s12428_s22 }
  0xe2   : > { %3247 = vrot.lane.b32.xlu1 %v13423_v4, %s12428_s22 }
  0xe5   : > { %2058 = vrot.lane.b32.xlu0 %v13343_v25, %s12429_s23 }
  0xe6   : > { %2060 = vrot.lane.b32.xlu1 %v13412_v43, %s12429_s23 }
  0xe7   : > { %v13475_v2 = vpop.permute.xlu0 %2566 }
  0xe8   : > { %v2571_v3 = vpop.permute.xlu1 %2570 }
  0xe9   : > { %2062 = vrot.lane.b32.xlu0 %v13409_v45, %s12429_s23 }
  0xea   : > { %2064 = vrot.lane.b32.xlu1 %v13426_v36, %s12429_s23 }
  0xeb   : > { %v2569_v56 = vpop.permute.xlu0 %2568 }
  0xec   : > { %v13492_v54 = vpop.permute.xlu1 %2572  ;;  %v2609_v9 = vsel %vm2596_vm14, %v2569_v56, %v2571_v3  ;;  %v2610_v30 = vsel %vm2596_vm14, %v13475_v2, %v2569_v56 }
  0xed   : > { %v2608_v1 = vsel %vm2596_vm14, %v2571_v3, %v13492_v54  ;;  %v2702_v22 = vmul.f32 %v2628_v0, %v2610_v30  ;;  %v2703_v11 = vmul.f32 %v2632_v37, %v2609_v9  ;;  %2291 = vrot.lane.b32.xlu0 %v13343_v25, %s12430_s24  ;;  %v2865_v37 = vrot.slane %v13477_v41, %v13468_v33 }
  0xee   : > { %v2704_v31 = vmul.f32 %v2636_v58, %v2608_v1  ;;  %2293 = vrot.lane.b32.xlu1 %v13412_v43, %s12430_s24  ;;  %v2869_v9 = vrot.slane %v13477_v41, %v13473_v61  ;;  %v13522_v30 = vor.u32 %v3064_v32, %v3063_v5 }
  0xef   : > { %v2734_v56 = vrot.slane %v2702_v22, 1  ;;  %v2735_v6 = vrot.slane %v2703_v11, 1  ;;  %v13509_v3 = vpop.permute.xlu0 %2799 }
  0xf0   : > { %v2736_v53 = vrot.slane %v2704_v31, 1  ;;  %v2802_v24 = vpop.permute.xlu1 %2801  ;;  %v3078_v5 = vrot.slane %v13522_v30, %v13465_v63 }
  0xf1   : > { %v2843_v0 = vsel %vm2829_vm15, %v13509_v3, %v2802_v24  ;;  %2766 = vst [vmem:[#allocation2 + $0x80] ss:$460 sps:$4 sm:$0x83] %v2734_v56   ;;  %2767 = vst [vmem:[#allocation2 + $0x188] ss:$-156 sps:$4 sm:$0x83] %v2735_v6   ;;  %2295 = vrot.lane.b32.xlu0 %v13409_v45, %s12430_s24 }
  0xf2   : > { %2768 = vst [vmem:[#allocation2 + $0x208] ss:$-412 sps:$4 sm:$0x83] %v2736_v53   ;;  %v2935_v58 = vmul.f32 %v2861_v35, %v2843_v0  ;;  %2297 = vrot.lane.b32.xlu1 %v13426_v36, %s12430_s24  ;;  %v3280_v35 = vld [vmem:[#allocation3 + $0x7] ss:$8 sm:$0xf] }
  0xf3   : > { %v2804_v22 = vpop.permute.xlu0 %2803 }
  0xf4   : > { %v2967_v1 = vrot.slane %v2935_v58, 6  ;;  %v13524_v11 = vpop.permute.xlu1 %2805  ;;  %v2842_v6 = vsel %vm2829_vm15, %v2802_v24, %v2804_v22  ;;  %v3281_v24 = vld [vmem:[#allocation3 + $0x7] ss:$8 sm:$0xf0] }
  0xf5   : > { %v2841_v53 = vsel %vm2829_vm15, %v2804_v22, %v13524_v11  ;;  %v2936_v31 = vmul.f32 %v2865_v37, %v2842_v6  ;;  %1841 = vrot.lane.b32.xlu0 %v13343_v25, %s12431_s25  ;;  %v3082_v6 = vrot.slane %v13522_v30, %v13468_v33 }
  0xf6   : > { %2999 = vst [vmem:[#allocation2 + $0x80] sm:$0x1c] %v2967_v1  ;;  %v2937_v56 = vmul.f32 %v2869_v9, %v2841_v53  ;;  %1843 = vrot.lane.b32.xlu1 %v13412_v43, %s12431_s25  ;;  %v13543_v9 = vor.u32 %v3281_v24, %v3280_v35  ;;  %v3086_v53 = vrot.slane %v13522_v30, %v13473_v61 }
  0xf7   : > { %v2968_v32 = vrot.slane %v2936_v31, 6  ;;  %v13538_v58 = vpop.permute.xlu0 %3016 }
  0xf8   : > { %v2969_v0 = vrot.slane %v2937_v56, 6  ;;  %v3019_v22 = vpop.permute.xlu1 %3018 }
  0xf9   : > { %v3060_v37 = vsel %vm18816_vm1, %v13538_v58, %v3019_v22  ;;  %3000 = vst [vmem:[#allocation2 + $0x188] sm:$0x1c] %v2968_v32  ;;  %1845 = vrot.lane.b32.xlu0 %v13409_v45, %s12431_s25 }
  0xfa   : > { %3001 = vst [vmem:[#allocation2 + $0x208] sm:$0x1c] %v2969_v0  ;;  %v3152_v1 = vmul.f32 %v3078_v5, %v3060_v37  ;;  %1847 = vrot.lane.b32.xlu1 %v13426_v36, %s12431_s25  ;;  %v3295_v0 = vrot.slane %v13543_v9, %v13465_v63  ;;  %v1641_v37 = vmul.f32 0.01, %v12380_v47 }
  0xfb   : > { %v3021_v56 = vpop.permute.xlu0 %3020 }
  0xfc   : > { %v3184_v31 = vrot.slane %v3152_v1, 3  ;;  %v13553_v59 = vpop.permute.xlu1 %3022  ;;  %v3059_v35 = vsel %vm18816_vm1, %v3019_v22, %v3021_v56  ;;  %v1642_v22 = vmul.f32 0.01, %v12376_v7 }
  0xfd   : > { %v3058_v5 = vsel %vm18816_vm1, %v3021_v56, %v13553_v59  ;;  %v3153_v24 = vmul.f32 %v3082_v6, %v3059_v35  ;;  %1672 = vrot.lane.b32.xlu0 %v13343_v25, %s12432_s26  ;;  %v3299_v35 = vrot.slane %v13543_v9, %v13468_v33 }
  0xfe   : > { %3216 = vst [vmem:[#allocation2 + $0x80] sm:$0xe0] %v3184_v31  ;;  %v3154_v32 = vmul.f32 %v3086_v53, %v3058_v5  ;;  %1674 = vrot.lane.b32.xlu1 %v13412_v43, %s12432_s26  ;;  %v13574_v31 = vsub.s32 0, %v18979_v29  ;;  %v3303_v5 = vrot.slane %v13543_v9, %v13473_v61 }
  0xff   : > { %v3185_v1 = vrot.slane %v3153_v24, 3  ;;  %v3234_v53 = vpop.permute.xlu0 %3233  ;;  %v13587_v24 = vsel %vm1626_vm3, %v12376_v7, %v1642_v22  ;;  %vm18825_vm3 = vcmp.lt.s32.totalorder %v12698_v26, 1 }
 0x100   : > { %v3186_v6 = vrot.slane %v3154_v32, 3  ;;  %v3236_v43 = vpop.permute.xlu1 %3235  ;;  %v13592_v32 = vsel %vm1625_vm7, %v12380_v47, %v1641_v37  ;;  %v2624_v22 = vrot.slane %v13470_v10, %v13574_v31  ;;  %vm18818_vm7 = vcmp.lt.s32.totalorder %v12698_v26, 32 }
 0x101   : > { %v3277_v25 = vsel %vm3263_vm10, %v3234_v53, %v3236_v43  ;;  %3217 = vst [vmem:[#allocation2 + $0x188] sm:$0xe0] %v3185_v1  ;;  %1676 = vrot.lane.b32.xlu0 %v13409_v45, %s12432_s26  ;;  %v1643_v45 = vmul.f32 0.01, %v12372_v62  ;;  %v2526_v44 = vrot.slane %v13587_v24, 4 }
 0x102   : > { %3218 = vst [vmem:[#allocation2 + $0x208] sm:$0xe0] %v3186_v6  ;;  %v3369_v56 = vmul.f32 %v3295_v0, %v3277_v25  ;;  %1678 = vrot.lane.b32.xlu1 %v13426_v36, %s12432_s26  ;;  %v1644_v36 = vmul.f32 0.01, %v12368_v8  ;;  %v2857_v25 = vrot.slane %v13477_v41, %v13574_v31 }
 0x103   : > { %v3238_v0 = vpop.permute.xlu0 %3237  ;;  %2558 = vst [vmem:[#allocation2 + $0x238] sm:$0x70] %v2526_v44 }
 0x104   : > { %3385 = vst [vmem:[#allocation2 + $0x2d0] sm:$0x7] %v3369_v56  ;;  %v13596_v1 = vpop.permute.xlu1 %3239  ;;  %v3276_v7 = vsel %vm3263_vm10, %v3236_v43, %v3238_v0  ;;  %v13614_v43 = vsel %vm1628_vm9, %v12368_v8, %v1644_v36  ;;  %v13617_v56 = vsel %vm1627_vm11, %v12372_v62, %v1643_v45  ;;  %v3074_v62 = vrot.slane %v13522_v30, %v13574_v31 }
 0x105   : > { %v3275_v47 = vsel %vm3263_vm10, %v3238_v0, %v13596_v1  ;;  %v3370_v37 = vmul.f32 %v3299_v35, %v3276_v7  ;;  %2582 = vrot.lane.b32.xlu0 %v13592_v32, %s12425_s19  ;;  %v2099_v0 = vld [vmem:[#allocation3 + $0x2] ss:$8 sm:$0xf]  ;;  %v3291_v36 = vrot.slane %v13543_v9, %v13574_v31  ;;  %v2527_v49 = vrot.slane %v13617_v56, 4 }
 0x106   : > { %v3371_v6 = vmul.f32 %v3303_v5, %v3275_v47  ;;  %2584 = vrot.lane.b32.xlu1 %v13587_v24, %s12425_s19  ;;  %vm18814_vm9 = vcmp.lt.s32.totalorder %v12698_v26, 33  ;;  %vm3474_vm11 = vcmask 261120  }
 0x107   : > { %3386 = vst [vmem:[#allocation2 + $0x1f0] sm:$0x7] %v3370_v37  ;;  %v13619_v35 = vpop.permute.xlu0 %2564  ;;  %2559 = vst [vmem:[#allocation2 + $0x130] sm:$0x70] %v2527_v49 }
 0x108   : > { %3387 = vst [vmem:[#allocation2 + $0x28] sm:$0x7] %v3371_v6  ;;  %v13621_v5 = vpop.permute.xlu1 %2797  ;;  %v2611_v7 = vsel %vm2596_vm14, %v13619_v35, %v13475_v2  ;;  %v13639_v2 = vor.u32 %v2100_v60, %v2099_v0 }
 0x109   : > { %v2844_v8 = vsel %vm2829_vm15, %v13621_v5, %v13509_v3  ;;  %v2701_v45 = vmul.f32 %v2624_v22, %v2611_v7  ;;  %2586 = vrot.lane.b32.xlu0 %v13617_v56, %s12425_s19 }
 0x10a   : > { %v2934_v47 = vmul.f32 %v2857_v25, %v2844_v8  ;;  %2588 = vrot.lane.b32.xlu1 %v13614_v43, %s12425_s19  ;;  %v2114_v7 = vrot.slane %v13639_v2, %v13465_v63 }
 0x10b   : > { %v3452_v37 = vld [vmem:[#allocation2 + $0x2d0] sm:$0xff]  ;;  %v2733_v6 = vrot.slane %v2701_v45, 1  ;;  %v13641_v3 = vpop.permute.xlu0 %3014 }
 0x10c   : > { %v2966_v50 = vrot.slane %v2934_v47, 6  ;;  %3502 = vmatprep.subr.mxu0 %v3452_v37  ;;  %v13643_v12 = vpop.permute.xlu1 %3231  ;;  %v3061_v22 = vsel %vm18816_vm1, %v13641_v3, %v13538_v58  ;;  %v2332_v58 = vld [vmem:[#allocation3 + $0x3] ss:$8 sm:$0xf] }
 0x10d   : > { %v3278_v25 = vsel %vm3263_vm10, %v13643_v12, %v3234_v53  ;;  %2765 = vst [vmem:[#allocation2 + $0x1b8] ss:$-436 sps:$4 sm:$0x83] %v2733_v6   ;;  %v3151_v60 = vmul.f32 %v3074_v62, %v3061_v22  ;;  %2815 = vrot.lane.b32.xlu0 %v13592_v32, %s12426_s20  ;;  %v2333_v47 = vld [vmem:[#allocation3 + $0x3] ss:$8 sm:$0xf0]  ;;  %v2118_v6 = vrot.slane %v13639_v2, %v13468_v33 }
 0x10e   : > { %2998 = vst [vmem:[#allocation2 + $0x1b8] sm:$0x1c] %v2966_v50  ;;  %v3368_v0 = vmul.f32 %v3291_v36, %v3278_v25  ;;  %2817 = vrot.lane.b32.xlu1 %v13587_v24, %s12426_s20  ;;  %v3453_v45 = vld [vmem:[#allocation2 + $0x1f0] sm:$0xff]  ;;  %v3438_v37 = vld [vmem:[#allocation2 + $0x208] sm:$0xff] }
 0x10f   : > { %v3454_v8 = vld [vmem:[#allocation2 + $0x28] sm:$0xff]  ;;  %v3183_v53 = vrot.slane %v3151_v60, 3  ;;  %v13659_v50 = vpop.permute.xlu0 %2050  ;;  %v2122_v60 = vrot.slane %v13639_v2, %v13473_v61 }
 0x110   : > { %3384 = vst [vmem:[#allocation2 + $0x1e8] sm:$0x7] %v3368_v0  ;;  %3573 = vmatprep.subr.mxu1 %v3454_v8  ;;  %v2053_v62 = vpop.permute.xlu1 %2052  ;;  %v3437_v25 = vld [vmem:[#allocation2 + $0x188] sm:$0xff]  ;;  %v13670_v0 = vor.u32 %v2333_v47, %v2332_v58 }
 0x111   : > { %v2097_v36 = vsel %vm18828_vm13, %v13659_v50, %v2053_v62  ;;  %3574 = vmatpush1.msra.mxu1 %v3453_v45  ;;  %3215 = vst [vmem:[#allocation2 + $0x1b8] sm:$0xe0] %v3183_v53  ;;  %2819 = vrot.lane.b32.xlu0 %v13617_v56, %s12426_s20 }
 0x112   : > { %v2188_v22 = vmul.f32 %v2114_v7, %v2097_v36  ;;  %3575 = vmatprep.subr.mxu1 %v3438_v37  ;;  %2821 = vrot.lane.b32.xlu1 %v13614_v43, %s12426_s20  ;;  %v2347_v58 = vrot.slane %v13670_v0, %v13465_v63 }
 0x113   : > { %3576 = vmatpush1.msra.mxu1 %v3437_v25  ;;  %v2055_v45 = vpop.permute.xlu0 %2054 }
 0x114   : > { %v2220_v8 = vrot.slane %v2188_v22, 2  ;;  %v13674_v28 = vpop.permute.xlu1 %2056  ;;  %v2096_v7 = vsel %vm18828_vm13, %v2053_v62, %v2055_v45 }
 0x115   : > { %v2095_v53 = vsel %vm18828_vm13, %v2055_v45, %v13674_v28  ;;  %v2189_v36 = vmul.f32 %v2118_v6, %v2096_v7  ;;  %3032 = vrot.lane.b32.xlu0 %v13592_v32, %s12427_s21 }
 0x116   : > { %2252 = vst [vmem:[#allocation2 + $0x248] ss:$-372 sps:$4 sm:$0xc1] %v2220_v8   ;;  %v2190_v37 = vmul.f32 %v2122_v60, %v2095_v53  ;;  %3034 = vrot.lane.b32.xlu1 %v13587_v24, %s12427_s21  ;;  %v3436_v8 = vld [vmem:[#allocation2 + $0x80] sm:$0xff]  ;;  %v2351_v53 = vrot.slane %v13670_v0, %v13468_v33 }
 0x117   : > { %v3451_v47 = vld [vmem:[#allocation2 + $0x1e8] sm:$0xff]  ;;  %v2221_v62 = vrot.slane %v2189_v36, 2  ;;  %v2284_v25 = vpop.permute.xlu0 %2283  ;;  %v2355_v36 = vrot.slane %v13670_v0, %v13473_v61 }
 0x118   : > { %v2222_v22 = vrot.slane %v2190_v37, 2  ;;  %3503 = vmatpush1.msra.mxu0 %v3451_v47  ;;  %v2286_v45 = vpop.permute.xlu1 %2285  ;;  %v3435_v60 = vld [vmem:[#allocation2 + $0x1b8] sm:$0xff] }
 0x119   : > { %v2330_v6 = vsel %vm18825_vm3, %v2284_v25, %v2286_v45  ;;  %3504 = vmatprep.subr.mxu0 %v3436_v8  ;;  %2253 = vst [vmem:[#allocation2 + $0xe8] ss:$-212 sps:$4 sm:$0xc1] %v2221_v62   ;;  %3036 = vrot.lane.b32.xlu0 %v13617_v56, %s12427_s21  ;;  %v1882_v37 = vld [vmem:[#allocation3 + $0x1] ss:$8 sm:$0xf] }
 0x11a   : > { %2254 = vst [vmem:[#allocation2 + $0x68] ss:$-28 sps:$4 sm:$0xc1] %v2222_v22   ;;  %v2421_v7 = vmul.f32 %v2347_v58, %v2330_v6  ;;  %3505 = vmatpush1.msra.mxu0 %v3435_v60  ;;  %3038 = vrot.lane.b32.xlu1 %v13614_v43, %s12427_s21  ;;  %v1883_v47 = vld [vmem:[#allocation3 + $0x1] ss:$8 sm:$0xf0]  ;;  %v2343_v6 = vrot.slane %v13670_v0, %v13574_v31 }
 0x11b   : > { %v2288_v57 = vpop.permute.xlu0 %2287  ;;  %v13711_v55 = vor.u32 %v1883_v47, %v1882_v37 }
 0x11c   : > { %v2453_v8 = vrot.slane %v2421_v7, 7  ;;  %v13698_v62 = vpop.permute.xlu1 %2289  ;;  %v2329_v58 = vsel %vm18825_vm3, %v2286_v45, %v2288_v57  ;;  %v2110_v7 = vrot.slane %v13639_v2, %v13574_v31 }
 0x11d   : > { %v2328_v22 = vsel %vm18825_vm3, %v2288_v57, %v13698_v62  ;;  %v2422_v60 = vmul.f32 %v2351_v53, %v2329_v58  ;;  %3249 = vrot.lane.b32.xlu0 %v13592_v32, %s12428_s22  ;;  %v1893_v46 = vrot.slane %v13711_v55, %v13574_v31 }
 0x11e   : > { %2485 = vst [vmem:[#allocation2 + $0x248] sm:$0xe] %v2453_v8  ;;  %v2423_v52 = vmul.f32 %v2355_v36, %v2328_v22  ;;  %3251 = vrot.lane.b32.xlu1 %v13587_v24, %s12428_s22 }
 0x11f   : > { %v2454_v45 = vrot.slane %v2422_v60, 7  ;;  %v13717_v23 = vpop.permute.xlu0 %2080 }
 0x120   : > { %v2455_v48 = vrot.slane %v2423_v52, 7  ;;  %v13715_v57 = vpop.permute.xlu1 %2313  ;;  %v2098_v36 = vsel %vm18828_vm13, %v13717_v23, %v13659_v50  ;;  %v1897_v52 = vrot.slane %v13711_v55, %v13465_v63 }
 0x121   : > { %v2331_v53 = vsel %vm18825_vm3, %v13715_v57, %v2284_v25  ;;  %2486 = vst [vmem:[#allocation2 + $0xe8] sm:$0xe] %v2454_v45  ;;  %v2187_v47 = vmul.f32 %v2110_v7, %v2098_v36  ;;  %3253 = vrot.lane.b32.xlu0 %v13617_v56, %s12428_s22  ;;  %v1901_v7 = vrot.slane %v13711_v55, %v13468_v33  ;;  %v1714_v36 = vld [vmem:[#allocation3] ss:$8 sm:$0xf0] }
 0x122   : > { %2487 = vst [vmem:[#allocation2 + $0x68] sm:$0xe] %v2455_v48  ;;  %v2420_v37 = vmul.f32 %v2343_v6, %v2331_v53  ;;  %3255 = vrot.lane.b32.xlu1 %v13614_v43, %s12428_s22  ;;  %v2525_v6 = vrot.slane %v13592_v32, 4  ;;  %v1905_v45 = vrot.slane %v13711_v55, %v13473_v61  ;;  %v1713_v53 = vld [vmem:[#allocation3] ss:$8 sm:$0xf] }
 0x123   : > { %v2219_v8 = vrot.slane %v2187_v47, 2  ;;  %v1834_v22 = vpop.permute.xlu0 %1833  ;;  %v13754_v38 = vor.u32 %v1714_v36, %v1713_v53 }
 0x124   : > { %v2452_v25 = vrot.slane %v2420_v37, 7  ;;  %v1836_v58 = vpop.permute.xlu1 %1835  ;;  %2557 = vst [vmem:[#allocation2 + $0x258] sm:$0x70] %v2525_v6  ;;  %v2524_v37 = vrot.slane %v13423_v4, 4 }
 0x125   : > { %v1880_v48 = vsel %vm18818_vm7, %v1834_v22, %v1836_v58  ;;  %v3420_v50 = vld [vmem:[#allocation2 + $0x248] sm:$0xff]  ;;  %2251 = vst [vmem:[#allocation2] ss:$692 sps:$4 sm:$0xc1] %v2219_v8   ;;  %2066 = vrot.lane.b32.xlu0 %v13423_v4, %s12429_s23  ;;  %v1732_v44 = vrot.slane %v13754_v38, %v13468_v33 }
 0x126   : > { %2484 = vst [vmem:[#allocation2] sm:$0xe] %v2452_v25  ;;  %v1971_v60 = vmul.f32 %v1897_v52, %v1880_v48  ;;  %3506 = vmatprep.subr.mxu0 %v3420_v50  ;;  %2068 = vrot.lane.b32.xlu1 %v13592_v32, %s12429_s23  ;;  %2556 = vst [vmem:[#allocation2 + $0x220] sm:$0x70] %v2524_v37 }
 0x127   : > { %v1838_v25 = vpop.permute.xlu0 %1837 }
 0x128   : > { %v2003_v47 = vrot.slane %v1971_v60, 5  ;;  %v13745_v52 = vpop.permute.xlu1 %1839  ;;  %v1879_v48 = vsel %vm18818_vm7, %v1836_v58, %v1838_v25  ;;  %v3421_v27 = vld [vmem:[#allocation2 + $0xe8] sm:$0xff] }
 0x129   : > { %v1878_v8 = vsel %vm18818_vm7, %v1838_v25, %v13745_v52  ;;  %v3422_v50 = vld [vmem:[#allocation2 + $0x68] sm:$0xff]  ;;  %v1972_v6 = vmul.f32 %v1901_v7, %v1879_v48  ;;  %2070 = vrot.lane.b32.xlu0 %v13587_v24, %s12429_s23  ;;  %v1724_v48 = vrot.slane %v13754_v38, %v13574_v31 }
 0x12a   : > { %2035 = vst [vmem:[#allocation2 + $0xd0] sm:$0x38] %v2003_v47  ;;  %v1973_v60 = vmul.f32 %v1905_v45, %v1878_v8  ;;  %3577 = vmatprep.subr.mxu1 %v3422_v50  ;;  %2072 = vrot.lane.b32.xlu1 %v13617_v56, %s12429_s23  ;;  %v13783_v50 = vsub.s32 4, %v18979_v29 }
 0x12b   : > { %3578 = vmatpush1.msra.mxu1 %v3421_v27  ;;  %v2004_v58 = vrot.slane %v1972_v6, 5  ;;  %v13762_v36 = vpop.permute.xlu0 %1863  ;;  %v1728_v27 = vrot.slane %v13754_v38, %v13465_v63 }
 0x12c   : > { %v2005_v25 = vrot.slane %v1973_v60, 5  ;;  %v1665_v53 = vpop.permute.xlu1 %1664  ;;  %v1881_v7 = vsel %vm18818_vm7, %v13762_v36, %v1834_v22 }
 0x12d   : > { %v3419_v45 = vld [vmem:[#allocation2] sm:$0xff]  ;;  %2036 = vst [vmem:[#allocation2 + $0x10] sm:$0x38] %v2004_v58  ;;  %v1970_v37 = vmul.f32 %v1893_v46, %v1881_v7  ;;  %2299 = vrot.lane.b32.xlu0 %v13423_v4, %s12430_s24  ;;  %v1736_v58 = vrot.slane %v13754_v38, %v13473_v61 }
 0x12e   : > { %2037 = vst [vmem:[#allocation2 + $0x48] sm:$0x38] %v2005_v25  ;;  %2301 = vrot.lane.b32.xlu1 %v13592_v32, %s12430_s24  ;;  %3507 = vmatpush1.msra.mxu0 %v3419_v45  ;;  %v13790_v25 = vsub.s32 5, %v18979_v29 }
 0x12f   : > { %v2002_v49 = vrot.slane %v1970_v37, 5  ;;  %v1667_v47 = vpop.permute.xlu0 %1666 }
 0x130   : > { %v1669_v22 = vpop.permute.xlu1 %1668  ;;  %v1711_v8 = vsel %vm18814_vm9, %v1665_v53, %v1667_v47 }
 0x131   : > { %v1710_v46 = vsel %vm18814_vm9, %v1667_v47, %v1669_v22  ;;  %2034 = vst [vmem:[#allocation2 + $0x2b0] sm:$0x38] %v2002_v49  ;;  %v1802_v6 = vmul.f32 %v1728_v27, %v1711_v8  ;;  %2303 = vrot.lane.b32.xlu0 %v13587_v24, %s12430_s24  ;;  %v13807_v49 = vsub.s32 6, %v18979_v29  ;;  %v2644_v8 = vrot.slane %v13470_v10, %v13790_v25 }
 0x132   : > { %v1803_v60 = vmul.f32 %v1732_v44, %v1710_v46  ;;  %2305 = vrot.lane.b32.xlu1 %v13617_v56, %s12430_s24  ;;  %v2640_v44 = vrot.slane %v13470_v10, %v13783_v50 }
 0x133   : > { %1818 = vst [vmem:[#allocation2 + $0xd0] sm:$0x7] %v1802_v6  ;;  %v13796_v45 = vpop.permute.xlu0 %1670 }
 0x134   : > { %1819 = vst [vmem:[#allocation2 + $0x10] sm:$0x7] %v1803_v60  ;;  %v13794_v7 = vpop.permute.xlu1 %1694  ;;  %v1709_v27 = vsel %vm18814_vm9, %v1669_v22, %v13796_v45 }
 0x135   : > { %v1712_v37 = vsel %vm18814_vm9, %v13794_v7, %v1665_v53  ;;  %v1804_v46 = vmul.f32 %v1736_v58, %v1709_v27  ;;  %v13814_v53 = vsub.s32 7, %v18979_v29  ;;  %1849 = vrot.lane.b32.xlu0 %v13423_v4, %s12431_s25  ;;  %v2648_v58 = vrot.slane %v13470_v10, %v13807_v49 }
 0x136   : > { %v1801_v47 = vmul.f32 %v1724_v48, %v1712_v37  ;;  %1851 = vrot.lane.b32.xlu1 %v13592_v32, %s12431_s25 }
 0x137   : > { %1820 = vst [vmem:[#allocation2 + $0x48] sm:$0x7] %v1804_v46  ;;  %v2575_v6 = vpop.permute.xlu0 %2574 }
 0x138   : > { %1817 = vst [vmem:[#allocation2 + $0x2b0] sm:$0x7] %v1801_v47  ;;  %v2577_v22 = vpop.permute.xlu1 %2576  ;;  %v2607_v60 = vsel %vm2596_vm14, %v13492_v54, %v2575_v6  ;;  %v2652_v47 = vrot.slane %v13470_v10, %v13814_v53 }
 0x139   : > { %v2606_v48 = vsel %vm2596_vm14, %v2575_v6, %v2577_v22  ;;  %v2705_v37 = vmul.f32 %v2640_v44, %v2607_v60  ;;  %1853 = vrot.lane.b32.xlu0 %v13587_v24, %s12431_s25  ;;  %v2873_v60 = vrot.slane %v13477_v41, %v13783_v50 }
 0x13a   : > { %v2706_v27 = vmul.f32 %v2644_v8, %v2606_v48  ;;  %1855 = vrot.lane.b32.xlu1 %v13617_v56, %s12431_s25  ;;  %v3404_v46 = vld [vmem:[#allocation2 + $0xd0] sm:$0xff] }
 0x13b   : > { %v2737_v54 = vrot.slane %v2705_v37, 1  ;;  %3508 = vmatprep.subr.mxu0 %v3404_v46  ;;  %v2579_v6 = vpop.permute.xlu0 %2578  ;;  %v2877_v37 = vrot.slane %v13477_v41, %v13790_v25 }
 0x13c   : > { %v2738_v44 = vrot.slane %v2706_v27, 1  ;;  %v13839_v8 = vpop.permute.xlu1 %2580  ;;  %v2605_v48 = vsel %vm2596_vm14, %v2577_v22, %v2579_v6  ;;  %v13853_v27 = vld [vmem:[%s13837_s30] sm:$0x7] }
 0x13d   : > { %v2604_v10 = vsel %vm2596_vm14, %v2579_v6, %v13839_v8  ;;  %2769 = vst [vmem:[#allocation2 + $0x38] ss:$500 sps:$4 sm:$0x83] %v2737_v54   ;;  %v2707_v29 = vmul.f32 %v2648_v58, %v2605_v48  ;;  %1680 = vrot.lane.b32.xlu0 %v13423_v4, %s12432_s26  ;;  %v1646_v6 = vmul.f32 0.01, %v12360_v13 }
 0x13e   : > { %2770 = vst [vmem:[#allocation2 + $0x190] ss:$-228 sps:$4 sm:$0x83] %v2738_v44   ;;  %v2708_v51 = vmul.f32 %v2652_v47, %v2604_v10  ;;  %1682 = vrot.lane.b32.xlu1 %v13592_v32, %s12432_s26  ;;  %v3406_v46 = vld [vmem:[#allocation2 + $0x48] sm:$0xff]  ;;  %v3405_v32 = vld [vmem:[#allocation2 + $0x10] sm:$0xff] }
 0x13f   : > { %v3403_v22 = vld [vmem:[#allocation2 + $0x2b0] sm:$0xff]  ;;  %v2739_v54 = vrot.slane %v2707_v29, 1  ;;  %3579 = vmatprep.subr.mxu1 %v3406_v46  ;;  %v2808_v47 = vpop.permute.xlu0 %2807  ;;  %v1645_v10 = vmul.f32 0.01, %v12364_v34  ;;  %v2881_v29 = vrot.slane %v13477_v41, %v13807_v49  ;;  %v2885_v46 = vrot.slane %v13477_v41, %v13814_v53 }
 0x140   : > { %v2740_v44 = vrot.slane %v2708_v51, 1  ;;  %v2810_v58 = vpop.permute.xlu1 %2809  ;;  %3509 = vmatpush1.msra.mxu0 %v3403_v22  ;;  %v2840_v4 = vsel %vm2829_vm15, %v13524_v11, %v2808_v47  ;;  %3580 = vmatpush1.msra.mxu1 %v3405_v32  ;;  %v13881_v11 = vsel %vm1630_vm5, %v12360_v13, %v1646_v6  ;;  %v3094_v32 = vrot.slane %v13522_v30, %v13790_v25 }
 0x141   : > { %v2839_v48 = vsel %vm2829_vm15, %v2808_v47, %v2810_v58  ;;  %11342 = vmatmul.mubr.msk.f32.vlgmr.msra.gmra.mxu0 %vm3474_vm11, %v13853_v27  ;;  %2771 = vst [vmem:[#allocation2 + $0x218] ss:$-500 sps:$4 sm:$0x83] %v2739_v54   ;;  %v2938_v51 = vmul.f32 %v2873_v60, %v2840_v4  ;;  %11343 = vmatmul.mubr.msk.f32.vlgmr.msra.gmra.mxu1 %vm3474_vm11, %v13853_v27  ;;  %v18980_v54 = vmov 0.0  }
 0x142   : > { %2772 = vst [vmem:[#allocation2 + $0x250] ss:$-156 sps:$4 sm:$0x83] %v2740_v44   ;;  %v2939_v22 = vmul.f32 %v2877_v37, %v2839_v48  ;;  %1686 = vrot.lane.b32.xlu1 %v13617_v56, %s12432_s26  ;;  %1684 = vrot.lane.b32.xlu0 %v13587_v24, %s12432_s26  ;;  %v13889_v41 = vsel %vm1629_vm2, %v12364_v34, %v1645_v10 }
 0x143   : > { %3684 = vmatprep.mubr.f32.mxu0 %v18980_v54  ;;  %v2970_v60 = vrot.slane %v2938_v51, 6  ;;  %v2812_v56 = vpop.permute.xlu0 %2811  ;;  %3755 = vmatprep.mubr.f32.mxu1 %v18980_v54  ;;  %v3090_v34 = vrot.slane %v13522_v30, %v13783_v50 }
 0x144   : > { %v2971_v37 = vrot.slane %v2939_v22, 6  ;;  %v13884_v44 = vpop.permute.xlu1 %2813  ;;  %v2838_v13 = vsel %vm2829_vm15, %v2810_v58, %v2812_v56 }
 0x145   : > { %v2837_v24 = vsel %vm2829_vm15, %v2812_v56, %v13884_v44  ;;  %3002 = vst [vmem:[#allocation2 + $0x38] sm:$0x1c] %v2970_v60  ;;  %v2940_v6 = vmul.f32 %v2881_v29, %v2838_v13  ;;  %v3098_v60 = vrot.slane %v13522_v30, %v13807_v49 }
 0x146   : > { %3003 = vst [vmem:[#allocation2 + $0x190] sm:$0x1c] %v2971_v37  ;;  %v2941_v47 = vmul.f32 %v2885_v46, %v2837_v24  ;;  %2592 = vrot.lane.b32.xlu1 %v13881_v11, %s12425_s19  ;;  %2590 = vrot.lane.b32.xlu0 %v13889_v41, %s12425_s19  ;;  %v3102_v37 = vrot.slane %v13522_v30, %v13814_v53 }
 0x147   : > { %v2972_v10 = vrot.slane %v2940_v6, 6  ;;  %v3025_v58 = vpop.permute.xlu0 %3024  ;;  %v3307_v30 = vrot.slane %v13543_v9, %v13783_v50 }
 0x148   : > { %v2973_v48 = vrot.slane %v2941_v47, 6  ;;  %v3027_v4 = vpop.permute.xlu1 %3026  ;;  %v3057_v51 = vsel %vm18816_vm1, %v13553_v59, %v3025_v58 }
 0x149   : > { %v3056_v29 = vsel %vm18816_vm1, %v3025_v58, %v3027_v4  ;;  %3004 = vst [vmem:[#allocation2 + $0x218] sm:$0x1c] %v2972_v10  ;;  %v3155_v22 = vmul.f32 %v3090_v34, %v3057_v51  ;;  %v3311_v10 = vrot.slane %v13543_v9, %v13790_v25 }
 0x14a   : > { %3005 = vst [vmem:[#allocation2 + $0x250] sm:$0x1c] %v2973_v48  ;;  %v3156_v46 = vmul.f32 %v3094_v32, %v3056_v29  ;;  %2823 = vrot.lane.b32.xlu1 %v13889_v41, %s12426_s20  ;;  %2594 = vrot.lane.b32.xlu0 %v13384_v42, %s12425_s19  ;;  %s12440_s19 = smov (%p14516_p0), 64  }
 0x14b   : > { %v3187_v56 = vrot.slane %v3155_v22, 3  ;;  %v3029_v59 = vpop.permute.xlu0 %3028 }
 0x14c   : > { %v3188_v24 = vrot.slane %v3156_v46, 3  ;;  %v13918_v13 = vpop.permute.xlu1 %3030  ;;  %v3055_v47 = vsel %vm18816_vm1, %v3027_v4, %v3029_v59 }
 0x14d   : > { %v3054_v6 = vsel %vm18816_vm1, %v3029_v59, %v13918_v13  ;;  %3219 = vst [vmem:[#allocation2 + $0x38] sm:$0xe0] %v3187_v56  ;;  %v3157_v34 = vmul.f32 %v3098_v60, %v3055_v47  ;;  %v3319_v56 = vrot.slane %v13543_v9, %v13814_v53 }
 0x14e   : > { %3220 = vst [vmem:[#allocation2 + $0x190] sm:$0xe0] %v3188_v24  ;;  %v3158_v32 = vmul.f32 %v3102_v37, %v3054_v6  ;;  %2827 = vrot.lane.b32.xlu1 %v13384_v42, %s12426_s20  ;;  %2825 = vrot.lane.b32.xlu0 %v13881_v11, %s12426_s20  ;;  %v3315_v37 = vrot.slane %v13543_v9, %v13807_v49  ;;  %s12441_s20 = smov (%p14516_p0), 127  }
 0x14f   : > { %v3189_v48 = vrot.slane %v3157_v34, 3  ;;  %v3242_v4 = vpop.permute.xlu0 %3241  ;;  %v2126_v9 = vrot.slane %v13639_v2, %v13783_v50 }
 0x150   : > { %v3190_v58 = vrot.slane %v3158_v32, 3  ;;  %v3244_v29 = vpop.permute.xlu1 %3243  ;;  %v3274_v22 = vsel %vm3263_vm10, %v13596_v1, %v3242_v4  ;;  %v2130_v32 = vrot.slane %v13639_v2, %v13790_v25 }
 0x151   : > { %v3273_v51 = vsel %vm3263_vm10, %v3242_v4, %v3244_v29  ;;  %3221 = vst [vmem:[#allocation2 + $0x218] sm:$0xe0] %v3189_v48  ;;  %v3372_v46 = vmul.f32 %v3307_v30, %v3274_v22  ;;  %v2138_v22 = vrot.slane %v13639_v2, %v13814_v53 }
 0x152   : > { %3222 = vst [vmem:[#allocation2 + $0x250] sm:$0xe0] %v3190_v58  ;;  %v3373_v60 = vmul.f32 %v3311_v10, %v3273_v51  ;;  %3042 = vrot.lane.b32.xlu1 %v13881_v11, %s12427_s21  ;;  %3040 = vrot.lane.b32.xlu0 %v13889_v41, %s12427_s21 }
 0x153   : > { %3388 = vst [vmem:[#allocation2 + $0x138] sm:$0x7] %v3372_v46  ;;  %v3246_v1 = vpop.permute.xlu0 %3245  ;;  %v2528_v46 = vrot.slane %v13614_v43, 4 }
 0x154   : > { %3389 = vst [vmem:[#allocation2 + $0xc8] sm:$0x7] %v3373_v60  ;;  %v13946_v24 = vpop.permute.xlu1 %3247  ;;  %v3272_v6 = vsel %vm3263_vm10, %v3244_v29, %v3246_v1  ;;  %v2134_v29 = vrot.slane %v13639_v2, %v13807_v49 }
 0x155   : > { %v3271_v59 = vsel %vm3263_vm10, %v3246_v1, %v13946_v24  ;;  %v3374_v47 = vmul.f32 %v3315_v37, %v3272_v6  ;;  %2560 = vst [vmem:[#allocation2 + $0x158] sm:$0x70] %v2528_v46  ;;  %v2530_v46 = vrot.slane %v13881_v11, 4 }
 0x156   : > { %v3375_v34 = vmul.f32 %v3319_v56, %v3271_v59  ;;  %3257 = vrot.lane.b32.xlu1 %v13889_v41, %s12428_s22  ;;  %3044 = vrot.lane.b32.xlu0 %v13384_v42, %s12427_s21  ;;  %s12442_s21 = smov (%p14516_p0), 126  }
 0x157   : > { %3390 = vst [vmem:[#allocation2 + $0x58] sm:$0x7] %v3374_v47  ;;  %v2059_v10 = vpop.permute.xlu0 %2058  ;;  %v3440_v47 = vld [vmem:[#allocation2 + $0x190] sm:$0xff]  ;;  %2562 = vst [vmem:[#allocation2 + $0x2e0] sm:$0x70] %v2530_v46 }
 0x158   : > { %3391 = vst [vmem:[#allocation2 + $0x1c0] sm:$0x7] %v3375_v34  ;;  %v2061_v30 = vpop.permute.xlu1 %2060  ;;  %v2094_v58 = vsel %vm18828_vm13, %v13674_v28, %v2059_v10  ;;  %v2359_v34 = vrot.slane %v13670_v0, %v13783_v50 }
 0x159   : > { %v2093_v48 = vsel %vm18828_vm13, %v2059_v10, %v2061_v30  ;;  %v2191_v4 = vmul.f32 %v2126_v9, %v2094_v58  ;;  %v2363_v9 = vrot.slane %v13670_v0, %v13790_v25  ;;  %v2529_v58 = vrot.slane %v13889_v41, 4 }
 0x15a   : > { %v2192_v51 = vmul.f32 %v2130_v32, %v2093_v48  ;;  %3261 = vrot.lane.b32.xlu1 %v13384_v42, %s12428_s22  ;;  %3259 = vrot.lane.b32.xlu0 %v13881_v11, %s12428_s22  ;;  %v3455_v37 = vld [vmem:[#allocation2 + $0x138] sm:$0xff]  ;;  %s12443_s22 = smov (%p14516_p0), 97  }
 0x15b   : > { %v3456_v60 = vld [vmem:[#allocation2 + $0xc8] sm:$0xff]  ;;  %v2223_v56 = vrot.slane %v2191_v4, 2  ;;  %v2063_v59 = vpop.permute.xlu0 %2062  ;;  %v3439_v48 = vld [vmem:[#allocation2 + $0x38] sm:$0xff]  ;;  %2561 = vst [vmem:[#allocation2 + $0x98] sm:$0x70] %v2529_v58 }
 0x15c   : > { %v2224_v28 = vrot.slane %v2192_v51, 2  ;;  %v13975_v1 = vpop.permute.xlu1 %2064  ;;  %3644 = vmatprep.subr.mxu0 %v3456_v60  ;;  %v2092_v2 = vsel %vm18828_vm13, %v2061_v30, %v2063_v59  ;;  %v2531_v30 = vrot.slane %v13384_v42, 4 }
 0x15d   : > { %v2091_v6 = vsel %vm18828_vm13, %v2063_v59, %v13975_v1  ;;  %3645 = vmatpush1.msra.mxu0 %v3455_v37  ;;  %2255 = vst [vmem:[#allocation2 + $0x228] ss:$-500 sps:$4 sm:$0xc1] %v2223_v56   ;;  %v2193_v32 = vmul.f32 %v2134_v29, %v2092_v2  ;;  %v2367_v59 = vrot.slane %v13670_v0, %v13807_v49 }
 0x15e   : > { %2256 = vst [vmem:[#allocation2 + $0xa8] ss:$76 sps:$4 sm:$0xc1] %v2224_v28   ;;  %v2194_v10 = vmul.f32 %v2138_v22, %v2091_v6  ;;  %2076 = vrot.lane.b32.xlu1 %v13889_v41, %s12429_s23  ;;  %3646 = vmatprep.subr.mxu0 %v3440_v47  ;;  %v3457_v51 = vld [vmem:[#allocation2 + $0x58] sm:$0xff]  ;;  %2563 = vst [vmem:[#allocation2 + $0x1a8] sm:$0x70] %v2531_v30 }
 0x15f   : > { %2074 = vrot.lane.b32.xlu0 %v13614_v43, %s12429_s23  ;;  %3647 = vmatpush1.msra.mxu0 %v3439_v48  ;;  %v3458_v4 = vld [vmem:[#allocation2 + $0x1c0] sm:$0xff]  ;;  %v2225_v60 = vrot.slane %v2193_v32, 2  ;;  %v2292_v37 = vpop.permute.xlu0 %2291  ;;  %v3442_v28 = vld [vmem:[#allocation2 + $0x250] sm:$0xff]  ;;  %v3441_v47 = vld [vmem:[#allocation2 + $0x218] sm:$0xff]  ;;  %v2371_v32 = vrot.slane %v13670_v0, %v13814_v53 }
 0x160   : > { %v2226_v29 = vrot.slane %v2194_v10, 2  ;;  %v2294_v22 = vpop.permute.xlu1 %2293  ;;  %3715 = vmatprep.subr.mxu1 %v3458_v4  ;;  %v2327_v42 = vsel %vm18825_vm3, %v13698_v62, %v2292_v37  ;;  %v1909_v4 = vrot.slane %v13711_v55, %v13783_v50 }
 0x161   : > { %v2326_v56 = vsel %vm18825_vm3, %v2292_v37, %v2294_v22  ;;  %3716 = vmatpush1.msra.mxu1 %v3457_v51  ;;  %2257 = vst [vmem:[#allocation2 + $0x20] ss:$220 sps:$4 sm:$0xc1] %v2225_v60   ;;  %v2424_v6 = vmul.f32 %v2359_v34, %v2327_v42  ;;  %v1913_v51 = vrot.slane %v13711_v55, %v13790_v25 }
 0x162   : > { %2258 = vst [vmem:[#allocation2 + $0x1b0] ss:$-308 sps:$4 sm:$0xc1] %v2226_v29   ;;  %v2425_v2 = vmul.f32 %v2363_v9, %v2326_v56  ;;  %2307 = vrot.lane.b32.xlu1 %v13614_v43, %s12430_s24  ;;  %3717 = vmatprep.subr.mxu1 %v3442_v28 }
 0x163   : > { %2078 = vrot.lane.b32.xlu0 %v13881_v11, %s12429_s23  ;;  %3718 = vmatpush1.msra.mxu1 %v3441_v47  ;;  %v2456_v62 = vrot.slane %v2424_v6, 7  ;;  %v2296_v58 = vpop.permute.xlu0 %2295  ;;  %v1921_v6 = vrot.slane %v13711_v55, %v13814_v53  ;;  %s12444_s23 = smov (%p14516_p0), 96  }
 0x164   : > { %v2457_v10 = vrot.slane %v2425_v2, 7  ;;  %v14006_v48 = vpop.permute.xlu1 %2297  ;;  %v2325_v9 = vsel %vm18825_vm3, %v2294_v22, %v2296_v58 }
 0x165   : > { %v2324_v34 = vsel %vm18825_vm3, %v2296_v58, %v14006_v48  ;;  %2488 = vst [vmem:[#allocation2 + $0x228] sm:$0xe] %v2456_v62  ;;  %v2426_v30 = vmul.f32 %v2367_v59, %v2325_v9  ;;  %v1917_v59 = vrot.slane %v13711_v55, %v13807_v49  ;;  %v1740_v55 = vrot.slane %v13754_v38, %v13783_v50 }
 0x166   : > { %2489 = vst [vmem:[#allocation2 + $0xa8] sm:$0xe] %v2457_v10  ;;  %v2427_v0 = vmul.f32 %v2371_v32, %v2324_v34  ;;  %2311 = vrot.lane.b32.xlu1 %v13881_v11, %s12430_s24 }
 0x167   : > { %2309 = vrot.lane.b32.xlu0 %v13889_v41, %s12430_s24  ;;  %v2458_v46 = vrot.slane %v2426_v30, 7  ;;  %v1842_v22 = vpop.permute.xlu0 %1841  ;;  %s12445_s24 = smov (%p14516_p0), 31  }
 0x168   : > { %v2459_v60 = vrot.slane %v2427_v0, 7  ;;  %v1844_v29 = vpop.permute.xlu1 %1843  ;;  %v1877_v56 = vsel %vm18818_vm7, %v13745_v52, %v1842_v22  ;;  %v1744_v0 = vrot.slane %v13754_v38, %v13790_v25 }
 0x169   : > { %v1876_v37 = vsel %vm18818_vm7, %v1842_v22, %v1844_v29  ;;  %2490 = vst [vmem:[#allocation2 + $0x20] sm:$0xe] %v2458_v46  ;;  %v1974_v42 = vmul.f32 %v1909_v4, %v1877_v56  ;;  %v2616_v4 = vld [vmem:[#allocation3 + $0x44] ss:$8 sm:$0xf] }
 0x16a   : > { %2491 = vst [vmem:[#allocation2 + $0x1b0] sm:$0xe] %v2459_v60  ;;  %v1975_v28 = vmul.f32 %v1913_v51, %v1876_v37  ;;  %1859 = vrot.lane.b32.xlu1 %v13889_v41, %s12431_s25  ;;  %v2617_v51 = vld [vmem:[#allocation3 + $0x44] ss:$8 sm:$0xf0] }
 0x16b   : > { %1857 = vrot.lane.b32.xlu0 %v13614_v43, %s12431_s25  ;;  %v2006_v2 = vrot.slane %v1974_v42, 5  ;;  %v1846_v52 = vpop.permute.xlu0 %1845 }
 0x16c   : > { %v2007_v47 = vrot.slane %v1975_v28, 5  ;;  %v14034_v32 = vpop.permute.xlu1 %1847  ;;  %v1875_v10 = vsel %vm18818_vm7, %v1844_v29, %v1846_v52  ;;  %v3423_v34 = vld [vmem:[#allocation2 + $0x228] sm:$0xff]  ;;  %v1748_v28 = vrot.slane %v13754_v38, %v13807_v49 }
 0x16d   : > { %v1874_v62 = vsel %vm18818_vm7, %v1846_v52, %v14034_v32  ;;  %v3424_v58 = vld [vmem:[#allocation2 + $0xa8] sm:$0xff]  ;;  %2038 = vst [vmem:[#allocation2 + $0x30] sm:$0x38] %v2006_v2  ;;  %v1976_v9 = vmul.f32 %v1917_v59, %v1875_v10  ;;  %v1752_v59 = vrot.slane %v13754_v38, %v13814_v53  ;;  %v12434_v52 = vmov 0  }
 0x16e   : > { %2039 = vst [vmem:[#allocation2 + $0xf0] sm:$0x38] %v2007_v47  ;;  %v1977_v30 = vmul.f32 %v1921_v6, %v1874_v62  ;;  %1688 = vrot.lane.b32.xlu1 %v13614_v43, %s12432_s26  ;;  %3648 = vmatprep.subr.mxu0 %v3424_v58  ;;  %v14060_v47 = vor.u32 %v2617_v51, %v2616_v4 }
 0x16f   : > { %1861 = vrot.lane.b32.xlu0 %v13881_v11, %s12431_s25  ;;  %3649 = vmatpush1.msra.mxu0 %v3423_v34  ;;  %v2008_v46 = vrot.slane %v1976_v9, 5  ;;  %v1673_v22 = vpop.permute.xlu0 %1672  ;;  %v2849_v9 = vld [vmem:[#allocation3 + $0x45] ss:$8 sm:$0xf]  ;;  %s12446_s25 = smov (%p14516_p0), 30  }
 0x170   : > { %v2009_v60 = vrot.slane %v1977_v30, 5  ;;  %v1675_v29 = vpop.permute.xlu1 %1674  ;;  %v1708_v43 = vsel %vm18814_vm9, %v13796_v45, %v1673_v22  ;;  %v3425_v42 = vld [vmem:[#allocation2 + $0x20] sm:$0xff]  ;;  %12191 = vset.pattern.permute.xlu0 %v12434_v52  ;;  %v2656_v34 = vrot.slane %v14060_v47, %v13574_v31 }
 0x171   : > { %v1707_v37 = vsel %vm18814_vm9, %v1673_v22, %v1675_v29  ;;  %v3426_v56 = vld [vmem:[#allocation2 + $0x1b0] sm:$0xff]  ;;  %2040 = vst [vmem:[#allocation2 + $0xf8] sm:$0x38] %v2008_v46  ;;  %v1805_v6 = vmul.f32 %v1740_v55, %v1708_v43  ;;  %v2660_v55 = vrot.slane %v14060_v47, %v13465_v63 }
 0x172   : > { %2041 = vst [vmem:[#allocation2 + $0x78] sm:$0x38] %v2009_v60  ;;  %v1806_v2 = vmul.f32 %v1744_v0, %v1707_v37  ;;  %1692 = vrot.lane.b32.xlu1 %v13881_v11, %s12432_s26  ;;  %3719 = vmatprep.subr.mxu1 %v3426_v56  ;;  %v3468_v11 = vld [vmem:[%s3467_s15] sm:$0x7]  ;;  %v2664_v60 = vrot.slane %v14060_v47, %v13468_v33 }
 0x173   : > { %1690 = vrot.lane.b32.xlu0 %v13889_v41, %s12432_s26  ;;  %3720 = vmatpush1.msra.mxu1 %v3425_v42  ;;  %1821 = vst [vmem:[#allocation2 + $0x30] sm:$0x7] %v1805_v6  ;;  %v1677_v45 = vpop.permute.xlu0 %1676  ;;  %v2850_v30 = vld [vmem:[#allocation3 + $0x45] ss:$8 sm:$0xf0]  ;;  %v2668_v37 = vrot.slane %v14060_v47, %v13473_v61  ;;  %s12447_s26 = smov (%p14516_p0), 1  }
 0x174   : > { %1822 = vst [vmem:[#allocation2 + $0xf0] sm:$0x7] %v1806_v2  ;;  %v14069_v38 = vpop.permute.xlu1 %1678  ;;  %v1706_v41 = vsel %vm18814_vm9, %v1675_v29, %v1677_v45  ;;  %v14089_v43 = vor.u32 %v2850_v30, %v2849_v9 }
 0x175   : > { %v1705_v62 = vsel %vm18814_vm9, %v1677_v45, %v14069_v38  ;;  %v1807_v10 = vmul.f32 %v1748_v28, %v1706_v41 }
 0x176   : > { %v1808_v58 = vmul.f32 %v1752_v59, %v1705_v62  ;;  %v2889_v62 = vrot.slane %v14089_v43, %v13574_v31  ;;  %v2893_v41 = vrot.slane %v14089_v43, %v13465_v63 }
 0x177   : > { %3471 = vperm.xlu0 %12191, %v3468_v11   ;;  %1823 = vst [vmem:[#allocation2 + $0xf8] sm:$0x7] %v1807_v10  ;;  %v2583_v4 = vpop.permute.xlu0 %2582 }
 0x178   : > { %1824 = vst [vmem:[#allocation2 + $0x78] sm:$0x7] %v1808_v58  ;;  %v2585_v0 = vpop.permute.xlu1 %2584  ;;  %v2603_v46 = vsel %vm2596_vm14, %v13839_v8, %v2583_v4 }
 0x179   : > { %v2602_v51 = vsel %vm2596_vm14, %v2583_v4, %v2585_v0  ;;  %v2709_v29 = vmul.f32 %v2656_v34, %v2603_v46  ;;  %v3066_v34 = vld [vmem:[#allocation3 + $0x46] ss:$8 sm:$0xf] }
 0x17a   : > { %v2710_v22 = vmul.f32 %v2660_v55, %v2602_v51  ;;  %v3407_v42 = vld [vmem:[#allocation2 + $0x30] sm:$0xff] }
 0x17b   : > { %v3408_v56 = vld [vmem:[#allocation2 + $0xf0] sm:$0xff]  ;;  %v2741_v28 = vrot.slane %v2709_v29, 1  ;;  %v2587_v2 = vpop.permute.xlu0 %2586 }
 0x17c   : > { %v2742_v59 = vrot.slane %v2710_v22, 1  ;;  %v14091_v6 = vpop.permute.xlu1 %2588  ;;  %3650 = vmatprep.subr.mxu0 %v3408_v56  ;;  %v2601_v45 = vsel %vm2596_vm14, %v2585_v0, %v2587_v2  ;;  %v3067_v4 = vld [vmem:[#allocation3 + $0x46] ss:$8 sm:$0xf0]  ;;  %v2897_v22 = vrot.slane %v14089_v43, %v13468_v33 }
 0x17d   : > { %v2600_v8 = vsel %vm2596_vm14, %v2587_v2, %v14091_v6  ;;  %3651 = vmatpush1.msra.mxu0 %v3407_v42  ;;  %2773 = vst [vmem:[#allocation2 + $0x1c8] ss:$92 sps:$4 sm:$0x83] %v2741_v28   ;;  %v2711_v52 = vmul.f32 %v2664_v60, %v2601_v45  ;;  %v14116_v56 = vor.u32 %v3067_v4, %v3066_v34 }
 0x17e   : > { %2774 = vst [vmem:[#allocation2 + $0x280] ss:$-36 sps:$4 sm:$0x83] %v2742_v59   ;;  %v2712_v11 = vmul.f32 %v2668_v37, %v2600_v8  ;;  %11344 = vmatmul.mubr.msk.f32.vlgmr.msra.gmra.mxu0 %vm3474_vm11, %v13853_v27  ;;  %v3409_v58 = vld [vmem:[#allocation2 + $0xf8] sm:$0xff]  ;;  %v2901_v37 = vrot.slane %v14089_v43, %v13473_v61 }
 0x17f   : > { %v3410_v10 = vld [vmem:[#allocation2 + $0x78] sm:$0xff]  ;;  %3826 = vmatprep.mubr.f32.mxu0 %v18980_v54  ;;  %v2743_v55 = vrot.slane %v2711_v52, 1  ;;  %v2816_v0 = vpop.permute.xlu0 %2815  ;;  %v3106_v52 = vrot.slane %v14116_v56, %v13574_v31 }
 0x180   : > { %v2744_v9 = vrot.slane %v2712_v11, 1  ;;  %v2818_v30 = vpop.permute.xlu1 %2817  ;;  %3721 = vmatprep.subr.mxu1 %v3410_v10  ;;  %v2836_v46 = vsel %vm2829_vm15, %v13884_v44, %v2816_v0  ;;  %v3110_v11 = vrot.slane %v14116_v56, %v13465_v63  ;;  %v3284_v10 = vld [vmem:[#allocation3 + $0x47] ss:$8 sm:$0xf0] }
 0x181   : > { %v2835_v51 = vsel %vm2829_vm15, %v2816_v0, %v2818_v30  ;;  %3722 = vmatpush1.msra.mxu1 %v3409_v58  ;;  %2775 = vst [vmem:[#allocation2 + $0x100] ss:$316 sps:$4 sm:$0x83] %v2743_v55   ;;  %v2942_v60 = vmul.f32 %v2889_v62, %v2836_v46  ;;  %v3114_v0 = vrot.slane %v14116_v56, %v13468_v33 }
 0x182   : > { %2776 = vst [vmem:[#allocation2 + $0xb8] ss:$124 sps:$4 sm:$0x83] %v2744_v9   ;;  %v2943_v29 = vmul.f32 %v2893_v41, %v2835_v51  ;;  %11345 = vmatmul.mubr.msk.f32.vlgmr.msra.gmra.mxu1 %vm3474_vm11, %v13853_v27  ;;  %v3283_v41 = vld [vmem:[#allocation3 + $0x47] ss:$8 sm:$0xf]  ;;  %v3118_v46 = vrot.slane %v14116_v56, %v13473_v61 }
 0x183   : > { %3897 = vmatprep.mubr.f32.mxu1 %v18980_v54  ;;  %v2974_v42 = vrot.slane %v2942_v60, 6  ;;  %v2820_v59 = vpop.permute.xlu0 %2819  ;;  %v14139_v60 = vor.u32 %v3284_v10, %v3283_v41 }
 0x184   : > { %v2975_v44 = vrot.slane %v2943_v29, 6  ;;  %v14119_v28 = vpop.permute.xlu1 %2821  ;;  %v2834_v2 = vsel %vm2829_vm15, %v2818_v30, %v2820_v59 }
 0x185   : > { %3006 = vst [vmem:[#allocation2 + $0x1c8] sm:$0x1c] %v2974_v42  ;;  %v2833_v27 = vsel %vm2829_vm15, %v2820_v59, %v14119_v28  ;;  %v2944_v8 = vmul.f32 %v2897_v22, %v2834_v2  ;;  %v3323_v2 = vrot.slane %v14139_v60, %v13574_v31 }
 0x186   : > { %3007 = vst [vmem:[#allocation2 + $0x280] sm:$0x1c] %v2975_v44  ;;  %v2945_v45 = vmul.f32 %v2901_v37, %v2833_v27 }
 0x187   : > { %v2976_v58 = vrot.slane %v2944_v8, 6  ;;  %v3033_v55 = vpop.permute.xlu0 %3032  ;;  %v3327_v8 = vrot.slane %v14139_v60, %v13465_v63 }
 0x188   : > { %v3035_v62 = vpop.permute.xlu1 %3034  ;;  %v2977_v34 = vrot.slane %v2945_v45, 6  ;;  %v3053_v30 = vsel %vm18816_vm1, %v13918_v13, %v3033_v55 }
 0x189   : > { %v3052_v9 = vsel %vm18816_vm1, %v3033_v55, %v3035_v62  ;;  %3008 = vst [vmem:[#allocation2 + $0x100] sm:$0x1c] %v2976_v58  ;;  %v3159_v4 = vmul.f32 %v3106_v52, %v3053_v30  ;;  %v2102_v52 = vld [vmem:[#allocation3 + $0x42] ss:$8 sm:$0xf]  ;;  %v3331_v55 = vrot.slane %v14139_v60, %v13468_v33 }
 0x18a   : > { %3009 = vst [vmem:[#allocation2 + $0xb8] sm:$0x1c] %v2977_v34  ;;  %v3160_v51 = vmul.f32 %v3110_v11, %v3052_v9  ;;  %v2103_v11 = vld [vmem:[#allocation3 + $0x42] ss:$8 sm:$0xf0] }
 0x18b   : > { %v3191_v22 = vrot.slane %v3159_v4, 3  ;;  %v3037_v42 = vpop.permute.xlu0 %3036  ;;  %v14161_v4 = vor.u32 %v2103_v11, %v2102_v52 }
 0x18c   : > { %v14141_v29 = vpop.permute.xlu1 %3038  ;;  %v3192_v37 = vrot.slane %v3160_v51, 3  ;;  %v3051_v44 = vsel %vm18816_vm1, %v3035_v62, %v3037_v42 }
 0x18d   : > { %v3050_v13 = vsel %vm18816_vm1, %v3037_v42, %v14141_v29  ;;  %3223 = vst [vmem:[#allocation2 + $0x1c8] sm:$0xe0] %v3191_v22  ;;  %v3161_v59 = vmul.f32 %v3114_v0, %v3051_v44  ;;  %v3335_v0 = vrot.slane %v14139_v60, %v13473_v61  ;;  %v2146_v44 = vrot.slane %v14161_v4, %v13465_v63 }
 0x18e   : > { %3224 = vst [vmem:[#allocation2 + $0x280] sm:$0xe0] %v3192_v37  ;;  %v3162_v27 = vmul.f32 %v3118_v46, %v3050_v13  ;;  %v2142_v13 = vrot.slane %v14161_v4, %v13574_v31  ;;  %v2150_v11 = vrot.slane %v14161_v4, %v13468_v33 }
 0x18f   : > { %v3193_v41 = vrot.slane %v3161_v59, 3  ;;  %v3250_v58 = vpop.permute.xlu0 %3249 }
 0x190   : > { %v3252_v45 = vpop.permute.xlu1 %3251  ;;  %v3194_v10 = vrot.slane %v3162_v27, 3  ;;  %v3270_v62 = vsel %vm3263_vm10, %v13946_v24, %v3250_v58  ;;  %v2335_v27 = vld [vmem:[#allocation3 + $0x43] ss:$8 sm:$0xf] }
 0x191   : > { %v3269_v34 = vsel %vm3263_vm10, %v3250_v58, %v3252_v45  ;;  %3225 = vst [vmem:[#allocation2 + $0x100] sm:$0xe0] %v3193_v41  ;;  %v3376_v9 = vmul.f32 %v3323_v2, %v3270_v62  ;;  %v2336_v2 = vld [vmem:[#allocation3 + $0x43] ss:$8 sm:$0xf0]  ;;  %v2154_v58 = vrot.slane %v14161_v4, %v13473_v61 }
 0x192   : > { %3226 = vst [vmem:[#allocation2 + $0xb8] sm:$0xe0] %v3194_v10  ;;  %v3377_v30 = vmul.f32 %v3327_v8, %v3269_v34  ;;  %v14183_v34 = vor.u32 %v2336_v2, %v2335_v27  ;;  %v1885_v2 = vld [vmem:[#allocation3 + $0x41] ss:$8 sm:$0xf] }
 0x193   : > { %3392 = vst [vmem:[#allocation2 + $0x298] sm:$0x7] %v3376_v9  ;;  %v3254_v46 = vpop.permute.xlu0 %3253 }
 0x194   : > { %v14163_v51 = vpop.permute.xlu1 %3255  ;;  %3393 = vst [vmem:[#allocation2 + $0x70] sm:$0x7] %v3377_v30  ;;  %v3268_v22 = vsel %vm3263_vm10, %v3252_v45, %v3254_v46  ;;  %v2379_v27 = vrot.slane %v14183_v34, %v13465_v63 }
 0x195   : > { %v3267_v24 = vsel %vm3263_vm10, %v3254_v46, %v14163_v51  ;;  %v3378_v37 = vmul.f32 %v3331_v55, %v3268_v22  ;;  %v3444_v22 = vld [vmem:[#allocation2 + $0x280] sm:$0xff] }
 0x196   : > { %v3379_v42 = vmul.f32 %v3335_v0, %v3267_v24 }
 0x197   : > { %3394 = vst [vmem:[#allocation2 + $0x18] sm:$0x7] %v3378_v37  ;;  %v2067_v8 = vpop.permute.xlu0 %2066 }
 0x198   : > { %v2069_v59 = vpop.permute.xlu1 %2068  ;;  %3395 = vst [vmem:[#allocation2 + $0x120] sm:$0x7] %v3379_v42  ;;  %v2090_v45 = vsel %vm18828_vm13, %v13975_v1, %v2067_v8 }
 0x199   : > { %v2089_v52 = vsel %vm18828_vm13, %v2067_v8, %v2069_v59  ;;  %v2195_v41 = vmul.f32 %v2142_v13, %v2090_v45  ;;  %v3443_v13 = vld [vmem:[#allocation2 + $0x1c8] sm:$0xff] }
 0x19a   : > { %v2196_v10 = vmul.f32 %v2146_v44, %v2089_v52  ;;  %v3459_v9 = vld [vmem:[#allocation2 + $0x298] sm:$0xff]  ;;  %v2375_v44 = vrot.slane %v14183_v34, %v13574_v31 }
 0x19b   : > { %v3460_v55 = vld [vmem:[#allocation2 + $0x70] sm:$0xff]  ;;  %v2227_v30 = vrot.slane %v2195_v41, 2  ;;  %v2071_v46 = vpop.permute.xlu0 %2070 }
 0x19c   : > { %v14185_v62 = vpop.permute.xlu1 %2072  ;;  %v2228_v0 = vrot.slane %v2196_v10, 2  ;;  %3786 = vmatprep.subr.mxu0 %v3460_v55  ;;  %v2088_v24 = vsel %vm18828_vm13, %v2069_v59, %v2071_v46  ;;  %v1886_v59 = vld [vmem:[#allocation3 + $0x41] ss:$8 sm:$0xf0] }
 0x19d   : > { %v2087_v1 = vsel %vm18828_vm13, %v2071_v46, %v14185_v62  ;;  %3787 = vmatpush1.msra.mxu0 %v3459_v9  ;;  %2259 = vst [vmem:[#allocation2 + $0x220] ss:$-244 sps:$4 sm:$0xc1] %v2227_v30   ;;  %v2197_v37 = vmul.f32 %v2150_v11, %v2088_v24  ;;  %v3446_v9 = vld [vmem:[#allocation2 + $0xb8] sm:$0xff]  ;;  %v2383_v30 = vrot.slane %v14183_v34, %v13468_v33 }
 0x19e   : > { %2260 = vst [vmem:[#allocation2 + $0x258] ss:$-372 sps:$4 sm:$0xc1] %v2228_v0   ;;  %v2198_v42 = vmul.f32 %v2154_v58, %v2087_v1  ;;  %3788 = vmatprep.subr.mxu0 %v3444_v22  ;;  %v3461_v45 = vld [vmem:[#allocation2 + $0x18] sm:$0xff]  ;;  %v3445_v1 = vld [vmem:[#allocation2 + $0x100] sm:$0xff]  ;;  %v2387_v24 = vrot.slane %v14183_v34, %v13473_v61  ;;  %v14205_v22 = vor.u32 %v1886_v59, %v1885_v2 }
 0x19f   : > { %3789 = vmatpush1.msra.mxu0 %v3443_v13  ;;  %v3462_v52 = vld [vmem:[#allocation2 + $0x120] sm:$0xff]  ;;  %v2229_v41 = vrot.slane %v2197_v37, 2  ;;  %v2300_v55 = vpop.permute.xlu0 %2299 }
 0x1a0   : > { %v2302_v8 = vpop.permute.xlu1 %2301  ;;  %v2230_v10 = vrot.slane %v2198_v42, 2  ;;  %3857 = vmatprep.subr.mxu1 %v3462_v52  ;;  %v2323_v58 = vsel %vm18825_vm3, %v14006_v48, %v2300_v55  ;;  %v1925_v2 = vrot.slane %v14205_v22, %v13574_v31  ;;  %v1929_v59 = vrot.slane %v14205_v22, %v13465_v63 }
 0x1a1   : > { %v2322_v11 = vsel %vm18825_vm3, %v2300_v55, %v2302_v8  ;;  %3858 = vmatpush1.msra.mxu1 %v3461_v45  ;;  %2261 = vst [vmem:[#allocation2 + $0x238] ss:$196 sps:$4 sm:$0xc1] %v2229_v41   ;;  %v2428_v0 = vmul.f32 %v2375_v44, %v2323_v58  ;;  %v1717_v55 = vld [vmem:[#allocation3 + $0x40] ss:$8 sm:$0xf0] }
 0x1a2   : > { %2262 = vst [vmem:[#allocation2 + $0x130] ss:$396 sps:$4 sm:$0xc1] %v2230_v10   ;;  %v2429_v46 = vmul.f32 %v2379_v27, %v2322_v11  ;;  %3859 = vmatprep.subr.mxu1 %v3446_v9  ;;  %v1716_v10 = vld [vmem:[#allocation3 + $0x40] ss:$8 sm:$0xf] }
 0x1a3   : > { %3860 = vmatpush1.msra.mxu1 %v3445_v1  ;;  %v2460_v48 = vrot.slane %v2428_v0, 7  ;;  %v2304_v13 = vpop.permute.xlu0 %2303 }
 0x1a4   : > { %v14207_v37 = vpop.permute.xlu1 %2305  ;;  %v2461_v42 = vrot.slane %v2429_v46, 7  ;;  %v2321_v44 = vsel %vm18825_vm3, %v2302_v8, %v2304_v13 }
 0x1a5   : > { %v2320_v52 = vsel %vm18825_vm3, %v2304_v13, %v14207_v37  ;;  %2492 = vst [vmem:[#allocation2 + $0x220] sm:$0xe] %v2460_v48  ;;  %v2430_v27 = vmul.f32 %v2383_v30, %v2321_v44  ;;  %v1933_v30 = vrot.slane %v14205_v22, %v13468_v33  ;;  %v14227_v48 = vor.u32 %v1717_v55, %v1716_v10 }
 0x1a6   : > { %2493 = vst [vmem:[#allocation2 + $0x258] sm:$0xe] %v2461_v42  ;;  %v2431_v45 = vmul.f32 %v2387_v24, %v2320_v52  ;;  %v1937_v24 = vrot.slane %v14205_v22, %v13473_v61 }
 0x1a7   : > { %v2462_v11 = vrot.slane %v2430_v27, 7  ;;  %v1850_v9 = vpop.permute.xlu0 %1849  ;;  %v1756_v10 = vrot.slane %v14227_v48, %v13574_v31  ;;  %v1760_v55 = vrot.slane %v14227_v48, %v13465_v63  ;;  %v1764_v63 = vrot.slane %v14227_v48, %v13468_v33 }
 0x1a8   : > { %v1852_v41 = vpop.permute.xlu1 %1851  ;;  %v2463_v58 = vrot.slane %v2431_v45, 7  ;;  %v1873_v8 = vsel %vm18818_vm7, %v14034_v32, %v1850_v9  ;;  %v2672_v33 = vrot.slane %v14060_v47, %v13783_v50 }
 0x1a9   : > { %v1872_v0 = vsel %vm18818_vm7, %v1850_v9, %v1852_v41  ;;  %2494 = vst [vmem:[#allocation2 + $0x238] sm:$0xe] %v2462_v11  ;;  %v1978_v46 = vmul.f32 %v1925_v2, %v1873_v8 }
 0x1aa   : > { %2495 = vst [vmem:[#allocation2 + $0x130] sm:$0xe] %v2463_v58  ;;  %v1979_v1 = vmul.f32 %v1929_v59, %v1872_v0 }
 0x1ab   : > { %v2010_v13 = vrot.slane %v1978_v46, 5  ;;  %v1854_v44 = vpop.permute.xlu0 %1853 }
 0x1ac   : > { %v14229_v42 = vpop.permute.xlu1 %1855  ;;  %v2011_v52 = vrot.slane %v1979_v1, 5  ;;  %v1871_v27 = vsel %vm18818_vm7, %v1852_v41, %v1854_v44  ;;  %v3427_v2 = vld [vmem:[#allocation2 + $0x220] sm:$0xff] }
 0x1ad   : > { %v1870_v32 = vsel %vm18818_vm7, %v1854_v44, %v14229_v42  ;;  %v3428_v45 = vld [vmem:[#allocation2 + $0x258] sm:$0xff]  ;;  %2042 = vst [vmem:[#allocation2 + $0x128] sm:$0x38] %v2010_v13  ;;  %v1980_v59 = vmul.f32 %v1933_v30, %v1871_v27  ;;  %v1768_v13 = vrot.slane %v14227_v48, %v13473_v61  ;;  %v2676_v61 = vrot.slane %v14060_v47, %v13790_v25 }
 0x1ae   : > { %2043 = vst [vmem:[#allocation2 + $0xe0] sm:$0x38] %v2011_v52  ;;  %v1981_v11 = vmul.f32 %v1937_v24, %v1870_v32  ;;  %3790 = vmatprep.subr.mxu0 %v3428_v45 }
 0x1af   : > { %3791 = vmatpush1.msra.mxu0 %v3427_v2  ;;  %v2012_v9 = vrot.slane %v1980_v59, 5  ;;  %v1681_v8 = vpop.permute.xlu0 %1680 }
 0x1b0   : > { %v1683_v58 = vpop.permute.xlu1 %1682  ;;  %v2013_v0 = vrot.slane %v1981_v11, 5  ;;  %v1704_v30 = vsel %vm18814_vm9, %v14069_v38, %v1681_v8  ;;  %v3429_v1 = vld [vmem:[#allocation2 + $0x238] sm:$0xff] }
 0x1b1   : > { %v1703_v41 = vsel %vm18814_vm9, %v1681_v8, %v1683_v58  ;;  %v3430_v46 = vld [vmem:[#allocation2 + $0x130] sm:$0xff]  ;;  %2044 = vst [vmem:[#allocation2 + $0x2f8] sm:$0x38] %v2012_v9  ;;  %v1809_v31 = vmul.f32 %v1756_v10, %v1704_v30  ;;  %v2684_v8 = vrot.slane %v14060_v47, %v13814_v53 }
 0x1b2   : > { %2045 = vst [vmem:[#allocation2 + $0x2b8] sm:$0x38] %v2013_v0  ;;  %v1810_v24 = vmul.f32 %v1760_v55, %v1703_v41  ;;  %3861 = vmatprep.subr.mxu1 %v3430_v46  ;;  %v2905_v55 = vrot.slane %v14089_v43, %v13783_v50  ;;  %v2680_v0 = vrot.slane %v14060_v47, %v13807_v49 }
 0x1b3   : > { %3862 = vmatpush1.msra.mxu1 %v3429_v1  ;;  %1825 = vst [vmem:[#allocation2 + $0x128] sm:$0x7] %v1809_v31 }
 0x1b4   : > { %v14249_v52 = vpop.permute.xlu1 %1686  ;;  %1826 = vst [vmem:[#allocation2 + $0xe0] sm:$0x7] %v1810_v24  ;;  %v1685_v44 = vpop.permute.xlu0 %1684 }
 0x1b5   : > { %v1701_v38 = vsel %vm18814_vm9, %v1685_v44, %v14249_v52  ;;  %v1702_v32 = vsel %vm18814_vm9, %v1683_v58, %v1685_v44  ;;  %v2917_v44 = vrot.slane %v14089_v43, %v13814_v53 }
 0x1b6   : > { %v1811_v27 = vmul.f32 %v1764_v63, %v1702_v32  ;;  %v1812_v45 = vmul.f32 %v1768_v13, %v1701_v38 }
 0x1b8   : > { %v2593_v2 = vpop.permute.xlu1 %2592  ;;  %1827 = vst [vmem:[#allocation2 + $0x2f8] sm:$0x7] %v1811_v27  ;;  %1828 = vst [vmem:[#allocation2 + $0x2b8] sm:$0x7] %v1812_v45  ;;  %v2591_v59 = vpop.permute.xlu0 %2590  ;;  %v2913_v27 = vrot.slane %v14089_v43, %v13807_v49  ;;  %v14286_v45 = vld [vmem:[%s13837_s30] sm:$0x7] }
 0x1b9   : > { %v2598_v11 = vsel %vm2596_vm14, %v2591_v59, %v2593_v2  ;;  %v2599_v10 = vsel %vm2596_vm14, %v14091_v6, %v2591_v59 }
 0x1ba   : > { %v2713_v58 = vmul.f32 %v2672_v33, %v2599_v10  ;;  %v2714_v9 = vmul.f32 %v2676_v61, %v2598_v11  ;;  %v3411_v46 = vld [vmem:[#allocation2 + $0x128] sm:$0xff] }
 0x1bb   : > { %v3412_v30 = vld [vmem:[#allocation2 + $0xe0] sm:$0xff] }
 0x1bc   : > { %v2824_v41 = vpop.permute.xlu1 %2823  ;;  %v2745_v1 = vrot.slane %v2713_v58, 1  ;;  %v2746_v31 = vrot.slane %v2714_v9, 1  ;;  %3792 = vmatprep.subr.mxu0 %v3412_v30  ;;  %v2595_v24 = vpop.permute.xlu0 %2594  ;;  %v3122_v30 = vrot.slane %v14116_v56, %v13783_v50 }
 0x1bd   : > { %v2832_v6 = vsel %vm2829_vm15, %v14119_v28, %v2824_v41  ;;  %v2597_v13 = vsel %vm2596_vm14, %v2593_v2, %v2595_v24  ;;  %v2612_v47 = vsel %vm2596_vm14, %v2595_v24, %v13619_v35  ;;  %3793 = vmatpush1.msra.mxu0 %v3411_v46  ;;  %v2909_v28 = vrot.slane %v14089_v43, %v13790_v25 }
 0x1be   : > { %v2946_v63 = vmul.f32 %v2905_v55, %v2832_v6  ;;  %2777 = vst [vmem:[#allocation2 + $0x288] ss:$-300 sps:$4 sm:$0x83] %v2745_v1   ;;  %2778 = vst [vmem:[#allocation2 + $0x60] ss:$60 sps:$4 sm:$0x83] %v2746_v31   ;;  %v2715_v38 = vmul.f32 %v2680_v0, %v2597_v13  ;;  %v2716_v32 = vmul.f32 %v2684_v8, %v2612_v47  ;;  %11346 = vmatmul.mubr.msk.f32.vlgmr.msra.gmra.mxu0 %vm3474_vm11, %v14286_v45 }
 0x1bf   : > { %v3414_v61 = vld [vmem:[#allocation2 + $0x2b8] sm:$0xff]  ;;  %3968 = vmatprep.mubr.f32.mxu0 %v18980_v54  ;;  %v3339_v13 = vrot.slane %v14139_v60, %v13783_v50 }
 0x1c0   : > { %v2978_v35 = vrot.slane %v2946_v63, 6  ;;  %v2828_v33 = vpop.permute.xlu1 %2827  ;;  %v3413_v2 = vld [vmem:[#allocation2 + $0x2f8] sm:$0xff]  ;;  %v2747_v59 = vrot.slane %v2715_v38, 1  ;;  %v2748_v11 = vrot.slane %v2716_v32, 1  ;;  %3863 = vmatprep.subr.mxu1 %v3414_v61  ;;  %v2826_v55 = vpop.permute.xlu0 %2825  ;;  %v3134_v38 = vrot.slane %v14116_v56, %v13814_v53 }
 0x1c1   : > { %v2845_v10 = vsel %vm2829_vm15, %v2828_v33, %v13621_v5  ;;  %v2830_v58 = vsel %vm2829_vm15, %v2826_v55, %v2828_v33  ;;  %v2831_v9 = vsel %vm2829_vm15, %v2824_v41, %v2826_v55  ;;  %3864 = vmatpush1.msra.mxu1 %v3413_v2  ;;  %v3126_v5 = vrot.slane %v14116_v56, %v13790_v25 }
 0x1c2   : > { %3010 = vst [vmem:[#allocation2 + $0x288] sm:$0x1c] %v2978_v35  ;;  %v2949_v43 = vmul.f32 %v2917_v44, %v2845_v10  ;;  %2779 = vst [vmem:[#allocation2 + $0x210] ss:$212 sps:$4 sm:$0x83] %v2747_v59   ;;  %v2947_v0 = vmul.f32 %v2909_v28, %v2831_v9  ;;  %v2948_v8 = vmul.f32 %v2913_v27, %v2830_v58  ;;  %11347 = vmatmul.mubr.msk.f32.vlgmr.msra.gmra.mxu1 %vm3474_vm11, %v14286_v45 }
 0x1c3   : > { %2780 = vst [vmem:[#allocation2 + $0x50] ss:$348 sps:$4 sm:$0x83] %v2748_v11   ;;  %4039 = vmatprep.mubr.f32.mxu1 %v18980_v54  ;;  %v3130_v54 = vrot.slane %v14116_v56, %v13807_v49  ;;  %v3351_v59 = vrot.slane %v14139_v60, %v13814_v53  ;;  %v3343_v10 = vrot.slane %v14139_v60, %v13790_v25 }
 0x1c4   : > { %v2981_v46 = vrot.slane %v2949_v43, 6  ;;  %v3043_v1 = vpop.permute.xlu1 %3042  ;;  %v2979_v31 = vrot.slane %v2947_v0, 6  ;;  %v2980_v41 = vrot.slane %v2948_v8, 6  ;;  %v3041_v6 = vpop.permute.xlu0 %3040 }
 0x1c5   : > { %v3048_v24 = vsel %vm18816_vm1, %v3041_v6, %v3043_v1  ;;  %v3049_v63 = vsel %vm18816_vm1, %v14141_v29, %v3041_v6 }
 0x1c6   : > { %3013 = vst [vmem:[#allocation2 + $0x50] sm:$0x1c] %v2981_v46  ;;  %3011 = vst [vmem:[#allocation2 + $0x60] sm:$0x1c] %v2979_v31  ;;  %v3163_v47 = vmul.f32 %v3122_v30, %v3049_v63  ;;  %v3164_v44 = vmul.f32 %v3126_v5, %v3048_v24  ;;  %v2158_v46 = vrot.slane %v14161_v4, %v13783_v50 }
 0x1c7   : > { %3012 = vst [vmem:[#allocation2 + $0x210] sm:$0x1c] %v2980_v41  ;;  %v2391_v24 = vrot.slane %v14183_v34, %v13783_v50 }
 0x1c8   : > { %v3258_v32 = vpop.permute.xlu1 %3257  ;;  %v3195_v28 = vrot.slane %v3163_v47, 3  ;;  %v3196_v27 = vrot.slane %v3164_v44, 3  ;;  %v3045_v35 = vpop.permute.xlu0 %3044  ;;  %v2166_v47 = vrot.slane %v14161_v4, %v13807_v49  ;;  %v2170_v44 = vrot.slane %v14161_v4, %v13814_v53 }
 0x1c9   : > { %v3266_v29 = vsel %vm3263_vm10, %v14163_v51, %v3258_v32  ;;  %v3047_v61 = vsel %vm18816_vm1, %v3043_v1, %v3045_v35  ;;  %v3062_v2 = vsel %vm18816_vm1, %v3045_v35, %v13641_v3  ;;  %v3347_v51 = vrot.slane %v14139_v60, %v13807_v49 }
 0x1ca   : > { %v3380_v33 = vmul.f32 %v3339_v13, %v3266_v29  ;;  %3227 = vst [vmem:[#allocation2 + $0x288] sm:$0xe0] %v3195_v28  ;;  %3228 = vst [vmem:[#allocation2 + $0x60] sm:$0xe0] %v3196_v27  ;;  %v3165_v56 = vmul.f32 %v3130_v54, %v3047_v61  ;;  %v3166_v11 = vmul.f32 %v3134_v38, %v3062_v2 }
 0x1cb   : > { %v2162_v1 = vrot.slane %v14161_v4, %v13790_v25 }
 0x1cc   : > { %3396 = vst [vmem:[#allocation2 + $0x240] sm:$0x7] %v3380_v33  ;;  %v3262_v55 = vpop.permute.xlu1 %3261  ;;  %v3197_v43 = vrot.slane %v3165_v56, 3  ;;  %v3198_v58 = vrot.slane %v3166_v11, 3  ;;  %v3260_v9 = vpop.permute.xlu0 %3259  ;;  %v2403_v33 = vrot.slane %v14183_v34, %v13814_v53 }
 0x1cd   : > { %v3279_v3 = vsel %vm3263_vm10, %v3262_v55, %v13643_v12  ;;  %v3264_v8 = vsel %vm3263_vm10, %v3260_v9, %v3262_v55  ;;  %v3265_v30 = vsel %vm3263_vm10, %v3258_v32, %v3260_v9 }
 0x1ce   : > { %v3383_v0 = vmul.f32 %v3351_v59, %v3279_v3  ;;  %3229 = vst [vmem:[#allocation2 + $0x210] sm:$0xe0] %v3197_v43  ;;  %3230 = vst [vmem:[#allocation2 + $0x50] sm:$0xe0] %v3198_v58  ;;  %v3381_v5 = vmul.f32 %v3343_v10, %v3265_v30  ;;  %v3382_v60 = vmul.f32 %v3347_v51, %v3264_v8 }
 0x1cf   : > { %v2399_v59 = vrot.slane %v14183_v34, %v13807_v49 }
 0x1d0   : > { %3399 = vst [vmem:[#allocation2 + $0x1a0] sm:$0x7] %v3383_v0  ;;  %v2077_v12 = vpop.permute.xlu1 %2076  ;;  %3397 = vst [vmem:[#allocation2 + $0x180] sm:$0x7] %v3381_v5  ;;  %v1941_v0 = vrot.slane %v14205_v22, %v13783_v50 }
 0x1d1   : > { %3398 = vst [vmem:[#allocation2 + $0x1f8] sm:$0x7] %v3382_v60  ;;  %v2075_v31 = vpop.permute.xlu0 %2074  ;;  %v3448_v5 = vld [vmem:[#allocation2 + $0x60] sm:$0xff] }
 0x1d2   : > { %v2085_v41 = vsel %vm18828_vm13, %v2075_v31, %v2077_v12  ;;  %v2086_v6 = vsel %vm18828_vm13, %v14185_v62, %v2075_v31 }
 0x1d3   : > { %v2199_v63 = vmul.f32 %v2158_v46, %v2086_v6  ;;  %v2200_v13 = vmul.f32 %v2162_v1, %v2085_v41  ;;  %v3463_v3 = vld [vmem:[#allocation2 + $0x240] sm:$0xff]  ;;  %v3447_v1 = vld [vmem:[#allocation2 + $0x288] sm:$0xff] }
 0x1d4   : > { %v2308_v54 = vpop.permute.xlu1 %2307 }
 0x1d5   : > { %v2231_v38 = vrot.slane %v2199_v63, 2  ;;  %v2232_v32 = vrot.slane %v2200_v13, 2  ;;  %v2319_v28 = vsel %vm18825_vm3, %v14207_v37, %v2308_v54  ;;  %v2079_v27 = vpop.permute.xlu0 %2078  ;;  %v2395_v37 = vrot.slane %v14183_v34, %v13790_v25  ;;  %v3450_v9 = vld [vmem:[#allocation2 + $0x50] sm:$0xff] }
 0x1d6   : > { %v2432_v62 = vmul.f32 %v2391_v24, %v2319_v28  ;;  %v2083_v29 = vsel %vm18828_vm13, %v2079_v27, %v13717_v23  ;;  %v2084_v35 = vsel %vm18828_vm13, %v2077_v12, %v2079_v27  ;;  %v1945_v12 = vrot.slane %v14205_v22, %v13790_v25 }
 0x1d7   : > { %2263 = vst [vmem:[#allocation2 + $0x158] ss:$332 sps:$4 sm:$0xc1] %v2231_v38   ;;  %2264 = vst [vmem:[#allocation2 + $0x98] ss:$212 sps:$4 sm:$0xc1] %v2232_v32   ;;  %v2201_v4 = vmul.f32 %v2166_v47, %v2084_v35  ;;  %v2202_v61 = vmul.f32 %v2170_v44, %v2083_v29  ;;  %v1772_v44 = vrot.slane %v14227_v48, %v13783_v50 }
 0x1d8   : > { %v3466_v2 = vld [vmem:[#allocation2 + $0x1a0] sm:$0xff]  ;;  %v2464_v56 = vrot.slane %v2432_v62, 7  ;;  %v2312_v11 = vpop.permute.xlu1 %2311  ;;  %v3465_v10 = vld [vmem:[#allocation2 + $0x1f8] sm:$0xff]  ;;  %v1949_v32 = vrot.slane %v14205_v22, %v13807_v49  ;;  %v1953_v28 = vrot.slane %v14205_v22, %v13814_v53 }
 0x1d9   : > { %v3464_v23 = vld [vmem:[#allocation2 + $0x180] sm:$0xff]  ;;  %3999 = vmatprep.subr.mxu1 %v3466_v2  ;;  %v2233_v51 = vrot.slane %v2201_v4, 2  ;;  %v2234_v55 = vrot.slane %v2202_v61, 2  ;;  %v2316_v43 = vsel %vm18825_vm3, %v2312_v11, %v13715_v57  ;;  %v2310_v58 = vpop.permute.xlu0 %2309  ;;  %v3449_v57 = vld [vmem:[#allocation2 + $0x210] sm:$0xff]  ;;  %v1784_v61 = vrot.slane %v14227_v48, %v13814_v53 }
 0x1da   : > { %3928 = vmatprep.subr.mxu0 %v3464_v23  ;;  %4000 = vmatpush1.msra.mxu1 %v3465_v10  ;;  %2496 = vst [vmem:[#allocation2 + $0x158] sm:$0xe] %v2464_v56  ;;  %v2435_v34 = vmul.f32 %v2403_v33, %v2316_v43  ;;  %v2317_v8 = vsel %vm18825_vm3, %v2310_v58, %v2312_v11 }
 0x1db   : > { %v2318_v30 = vsel %vm18825_vm3, %v2308_v54, %v2310_v58  ;;  %3929 = vmatpush1.msra.mxu0 %v3463_v3  ;;  %4001 = vmatprep.subr.mxu1 %v3450_v9  ;;  %2265 = vst [vmem:[#allocation2 + $0x2e0] ss:$-356 sps:$4 sm:$0xc1] %v2233_v51   ;;  %2266 = vst [vmem:[#allocation2 + $0x1a8] ss:$-356 sps:$4 sm:$0xc1] %v2234_v55   ;;  %v2434_v46 = vmul.f32 %v2399_v59, %v2317_v8 }
 0x1dc   : > { %v2433_v60 = vmul.f32 %v2395_v37, %v2318_v30  ;;  %3930 = vmatprep.subr.mxu0 %v3448_v5  ;;  %4002 = vmatpush1.msra.mxu1 %v3449_v57  ;;  %v2467_v31 = vrot.slane %v2435_v34, 7  ;;  %v1860_v41 = vpop.permute.xlu1 %1859  ;;  %v1776_v37 = vrot.slane %v14227_v48, %v13790_v25  ;;  %v4054_v57 = vcombine.high %v12352_v14, %v12352_v14 }
 0x1dd   : > { %3931 = vmatpush1.msra.mxu0 %v3447_v1  ;;  %v2466_v24 = vrot.slane %v2434_v46, 7  ;;  %v1858_v63 = vpop.permute.xlu0 %1857  ;;  %v4055_v1 = vcombine.high %v12348_v15, %v12348_v15 }
 0x1de   : > { %v2465_v6 = vrot.slane %v2433_v60, 7  ;;  %2499 = vst [vmem:[#allocation2 + $0x1a8] sm:$0xe] %v2467_v31  ;;  %v1868_v13 = vsel %vm18818_vm7, %v1858_v63, %v1860_v41  ;;  %v1869_v47 = vsel %vm18818_vm7, %v14229_v42, %v1858_v63 }
 0x1df   : > { %2498 = vst [vmem:[#allocation2 + $0x2e0] sm:$0xe] %v2466_v24  ;;  %v1982_v54 = vmul.f32 %v1941_v0, %v1869_v47  ;;  %v1983_v38 = vmul.f32 %v1945_v12, %v1868_v13 }
 0x1e0   : > { %2497 = vst [vmem:[#allocation2 + $0x98] sm:$0xe] %v2465_v6  ;;  %v1689_v27 = vpop.permute.xlu1 %1688 }
 0x1e1   : > { %v2014_v62 = vrot.slane %v1982_v54, 5  ;;  %v2015_v29 = vrot.slane %v1983_v38, 5  ;;  %v1700_v42 = vsel %vm18814_vm9, %v14249_v52, %v1689_v27  ;;  %v1862_v35 = vpop.permute.xlu0 %1861  ;;  %v1780_v52 = vrot.slane %v14227_v48, %v13807_v49  ;;  %v3431_v58 = vld [vmem:[#allocation2 + $0x158] sm:$0xff] }
 0x1e2   : > { %v1813_v33 = vmul.f32 %v1772_v44, %v1700_v42  ;;  %v1866_v50 = vsel %vm18818_vm7, %v1862_v35, %v13762_v36  ;;  %v1867_v4 = vsel %vm18818_vm7, %v1860_v41, %v1862_v35 }
 0x1e3   : > { %2046 = vst [vmem:[#allocation2 + $0x2a0] sm:$0x38] %v2014_v62  ;;  %2047 = vst [vmem:[#allocation2 + $0x168] sm:$0x38] %v2015_v29  ;;  %v1984_v22 = vmul.f32 %v1949_v32, %v1867_v4  ;;  %v1985_v2 = vmul.f32 %v1953_v28, %v1866_v50  ;;  %v4056_v28 = vcombine.high %v12344_v16, %v12344_v16 }
 0x1e4   : > { %1829 = vst [vmem:[#allocation2 + $0x2a0] sm:$0x7] %v1813_v33  ;;  %v1693_v59 = vpop.permute.xlu1 %1692  ;;  %v4057_v50 = vcombine.high %v12340_v17, %v12340_v17 }
 0x1e5   : > { %v2016_v56 = vrot.slane %v1984_v22, 5  ;;  %v2017_v36 = vrot.slane %v1985_v2, 5  ;;  %v1697_v11 = vsel %vm18814_vm9, %v1693_v59, %v13794_v7  ;;  %v1691_v23 = vpop.permute.xlu0 %1690  ;;  %v3434_v53 = vld [vmem:[#allocation2 + $0x1a8] sm:$0xff] }
 0x1e6   : > { %v1816_v10 = vmul.f32 %v1784_v61, %v1697_v11  ;;  %v1698_v51 = vsel %vm18814_vm9, %v1691_v23, %v1693_v59  ;;  %v1699_v25 = vsel %vm18814_vm9, %v1689_v27, %v1691_v23  ;;  %4003 = vmatprep.subr.mxu1 %v3434_v53  ;;  %v3433_v49 = vld [vmem:[#allocation2 + $0x2e0] sm:$0xff]  ;;  %v4058_v23 = vcombine.high %v12336_v18, %v12336_v18 }
 0x1e7   : > { %v3432_v55 = vld [vmem:[#allocation2 + $0x98] sm:$0xff]  ;;  %2048 = vst [vmem:[#allocation2 + $0x178] sm:$0x38] %v2016_v56  ;;  %2049 = vst [vmem:[#allocation2 + $0x40] sm:$0x38] %v2017_v36  ;;  %v1814_v48 = vmul.f32 %v1776_v37, %v1699_v25  ;;  %v1815_v43 = vmul.f32 %v1780_v52, %v1698_v51  ;;  %4004 = vmatpush1.msra.mxu1 %v3433_v49 }
 0x1e8   : > { %3932 = vmatprep.subr.mxu0 %v3432_v55  ;;  %1832 = vst [vmem:[#allocation2 + $0x40] sm:$0x7] %v1816_v10 }
 0x1e9   : > { %3933 = vmatpush1.msra.mxu0 %v3431_v58  ;;  %1830 = vst [vmem:[#allocation2 + $0x168] sm:$0x7] %v1814_v48  ;;  %1831 = vst [vmem:[#allocation2 + $0x178] sm:$0x7] %v1815_v43  ;;  %v4059_v48 = vcombine.high %v12332_v19, %v12332_v19 }
 0x1eb   : > { %v3415_v0 = vld [vmem:[#allocation2 + $0x2a0] sm:$0xff] }
 0x1ef   : > { %v3418_v7 = vld [vmem:[#allocation2 + $0x40] sm:$0xff] }
 0x1f0   : > { %v3416_v3 = vld [vmem:[#allocation2 + $0x168] sm:$0xff]  ;;  %4005 = vmatprep.subr.mxu1 %v3418_v7  ;;  %v3417_v9 = vld [vmem:[#allocation2 + $0x178] sm:$0xff] }
 0x1f1   : > { %3934 = vmatprep.subr.mxu0 %v3416_v3  ;;  %4006 = vmatpush1.msra.mxu1 %v3417_v9 }
 0x1f2   : > { %3935 = vmatpush1.msra.mxu0 %v3415_v0  ;;  %11349 = vmatmul.mubr.msk.f32.vlgmr.msra.gmra.mxu1 %vm3474_vm11, %v14286_v45  ;;  %v14413_v34 = vpop.permute.xlu0 %3471 }
 0x1f3   : > { %11348 = vmatmul.mubr.msk.f32.vlgmr.msra.gmra.mxu0 %vm3474_vm11, %v14286_v45 }
 0x201   : > { %v3544_v8 = vpop.f32.mrf.mxu0  ;;  %v3615_v30 = vpop.f32.mrf.mxu1 }
 0x202   : > { %v3545_v5 = vadd.f32 %v3544_v8, %v14413_v34  ;;  %v3616_v46 = vadd.f32 %v3615_v30, %v14413_v34 }
 0x203   : > { %v3546_v60 = vpop.f32.mrf.mxu0  ;;  %v3617_v12 = vpop.f32.mrf.mxu1 }
 0x204   : > { %v3547_v31 = vadd.f32 %v3546_v60, %v14413_v34  ;;  %v14423_v0 = vadd.f32 %v12352_v14, %v3545_v5   ;;  %v3618_v41 = vadd.f32 %v3617_v12, %v14413_v34  ;;  %v14427_v2 = vadd.f32 %v12348_v15, %v3616_v46  }
 0x205   : > { %v4061_v46 = vcombine.high %v12324_v21, %v12324_v21  ;;  %v4060_v12 = vcombine.high %v12328_v20, %v12328_v20 }
 0x206   : > { %v18981_v45 = vmov %v14423_v0  ;;  %v18982_v24 = vmov %v14427_v2  ;;  %v14429_v35 = vadd.f32 %v4054_v57, %v3547_v31   ;;  %v14431_v1 = vadd.f32 %v4055_v1, %v3618_v41  }
 0x207   :  { %vm4136_vm2 = vcmp.gt.f32.partialorder (%p14516_p0), %v18982_v24, 0.0  ;;  %vm4134_vm11 = vcmp.gt.f32.partialorder (%p14516_p0), %v18981_v45, 0.0 }
 0x208   : > { %v18983_v63 = vmov %v14429_v35  ;;  %v18984_v44 = vmov %v14431_v1 }
 0x209   : > { %v4102_v6 = vcombine.low %v18981_v45, %v18983_v63  ;;  %v4103_v13 = vcombine.low %v18982_v24, %v18984_v44  ;;  %vm4135_vm5 = vcmp.gt.f32.partialorder (%p14516_p0), %v18983_v63, 0.0 }
 0x20b   : > { %v4118_v47 = vadd.f32 %v12352_v14, %v4102_v6  ;;  %v4119_v54 = vadd.f32 %v12348_v15, %v4103_v13 }
 0x20d   : > { %v14439_v14 = vmul.f32 0.5, %v4118_v47   ;;  %v14441_v15 = vmul.f32 0.5, %v4119_v54  }
 0x20e   :  { %v4150_v15 = vmul.f32 (%p14516_p0), 0.01, %v18981_v45 }
 0x23e   : > { %v3686_v38 = vpop.f32.mrf.mxu0 }
 0x23f   : > { %v3687_v32 = vadd.f32 %v3686_v38, %v14413_v34 }
 0x240   : > { %v3688_v27 = vpop.f32.mrf.mxu0 }
 0x241   : > { %v14447_v3 = vadd.f32 %v12344_v16, %v3687_v32   ;;  %v3689_v62 = vadd.f32 %v3688_v27, %v14413_v34 }
 0x242   : > { %v3757_v42 = vpop.f32.mrf.mxu1 }
 0x243   : > { %v18985_v29 = vmov %v14447_v3  ;;  %v3758_v35 = vadd.f32 %v3757_v42, %v14413_v34  ;;  %v14451_v36 = vadd.f32 %v4056_v28, %v3689_v62  }
 0x244   : > { %v3759_v4 = vpop.f32.mrf.mxu1 }
 0x245   : > { %v18986_v33 = vmov %v14451_v36  ;;  %v14456_v61 = vadd.f32 %v12340_v17, %v3758_v35   ;;  %v3760_v2 = vadd.f32 %v3759_v4, %v14413_v34 }
 0x246   : > { %v4104_v22 = vcombine.low %v18985_v29, %v18986_v33 }
 0x247   : > { %v14462_v30 = vadd.f32 %v4057_v50, %v3760_v2   ;;  %v19006_v4 = vmov %v14456_v61  ;;  %v19010_v2 = vmov %v18982_v24  ;;  %v4151_v50 = vmul.f32 (%p14516_p0), 0.01, %v18983_v63 }
 0x248   : > { %v4120_v37 = vadd.f32 %v12344_v16, %v4104_v22  ;;  %v19013_v22 = vmov (%p14516_p0), 0.0  }
 0x249   : > { %v18987_v52 = vmov %v14462_v30  ;;  %6656 = vmatprep.mubr.f32.mxu1 (%p14516_p0), %v19013_v22  ;;  %6798 = vmatprep.mubr.f32.mxu0 (%p14516_p0), %v19013_v22 }
 0x24a   : > { %v4128_v16 = vmul.f32 0.5, %v4120_v37   ;;  %v4105_v59 = vcombine.low %v14456_v61, %v18987_v52  ;;  %v4152_v37 = vmul.f32 (%p14516_p0), 0.01, %v18982_v24  ;;  %vm4141_vm9 = vcmp.gt.f32.partialorder (%p14516_p0), %v18987_v52, 0.0 }
 0x24b   :  { %v4166_v16 = vsel (%p14516_p0), %vm4134_vm11, %v18981_v45, %v4150_v15  ;;  %vm4137_vm11 = vcmp.gt.f32.partialorder (%p14516_p0), %v18984_v44, 0.0 }
 0x24c   : > { %v4121_v56 = vadd.f32 %v12340_v17, %v4105_v59  ;;  %v14597_v59 = vsel (%p14516_p0), %vm4135_vm5, %v18983_v63, %v4151_v50  ;;  %v14604_v14 = vsel (%p14516_p0), %vm4136_vm2, %v18982_v24, %v4152_v37  ;;  %vm4138_vm2 = vcmp.gt.f32.partialorder (%p14516_p0), %v18985_v29, 0.0  ;;  %v19018_v37 = vld [vmem:[#allocation18_spill] sm:$0xff] (%p14516_p0) }
 0x24d   :  { %6310 = vrot.lane.b32.xlu1 (%p14516_p0), %v14597_v59, %s12435_s17  ;;  %6133 = vrot.lane.b32.xlu0 (%p14516_p0), %v14597_v59, %s12436_s18 }
 0x24e   : > { %v4129_v17 = vmul.f32 0.5, %v4121_v56  }
 0x24f   :  { %v4876_v17 = vrot.slane (%p14516_p0), %v14597_v59, 1 }
 0x251   :  { %6312 = vrot.lane.b32.xlu1 (%p14516_p0), %v14604_v14, %s12435_s17  ;;  %6135 = vrot.lane.b32.xlu0 (%p14516_p0), %v14604_v14, %s12436_s18  ;;  %4924 = vst [vmem:[#allocation2 + $0x80] ss:$460 sps:$4 sm:$0x83] (%p14516_p0), %v4876_v17  }
 0x255   :  { %6308 = vrot.lane.b32.xlu1 (%p14516_p0), %v4166_v16, %s12435_s17  ;;  %6131 = vrot.lane.b32.xlu0 (%p14516_p0), %v4166_v16, %s12436_s18 }
 0x259   :  { %5443 = vrot.lane.b32.xlu1 (%p14516_p0), %v14604_v14, %s12437_s1  ;;  %5441 = vrot.lane.b32.xlu0 (%p14516_p0), %v14597_v59, %s12437_s1 }
 0x25d   :  { %5588 = vrot.lane.b32.xlu1 (%p14516_p0), %v14604_v14, %s12438_s2  ;;  %5586 = vrot.lane.b32.xlu0 (%p14516_p0), %v14597_v59, %s12438_s2 }
 0x261   :  { %5765 = vrot.lane.b32.xlu1 (%p14516_p0), %v14604_v14, %s12439_s0  ;;  %5763 = vrot.lane.b32.xlu0 (%p14516_p0), %v14597_v59, %s12439_s0 }
 0x265   :  { %5958 = vrot.lane.b32.xlu1 (%p14516_p0), %v14604_v14, %s12440_s19  ;;  %5956 = vrot.lane.b32.xlu0 (%p14516_p0), %v14597_v59, %s12440_s19 }
 0x269   :  { %5584 = vrot.lane.b32.xlu1 (%p14516_p0), %v4166_v16, %s12438_s2  ;;  %5439 = vrot.lane.b32.xlu0 (%p14516_p0), %v4166_v16, %s12437_s1 }
 0x26d   :  { %5954 = vrot.lane.b32.xlu1 (%p14516_p0), %v4166_v16, %s12440_s19  ;;  %5761 = vrot.lane.b32.xlu0 (%p14516_p0), %v4166_v16, %s12439_s0 }
 0x271   :  { %4943 = vrot.lane.b32.xlu1 (%p14516_p0), %v14604_v14, %s12441_s20  ;;  %4941 = vrot.lane.b32.xlu0 (%p14516_p0), %v14597_v59, %s12441_s20 }
 0x275   :  { %5072 = vrot.lane.b32.xlu1 (%p14516_p0), %v14604_v14, %s12442_s21  ;;  %5070 = vrot.lane.b32.xlu0 (%p14516_p0), %v14597_v59, %s12442_s21 }
 0x279   :  { %5233 = vrot.lane.b32.xlu1 (%p14516_p0), %v14604_v14, %s12443_s22  ;;  %5231 = vrot.lane.b32.xlu0 (%p14516_p0), %v14597_v59, %s12443_s22 }
 0x27d   :  { %5314 = vrot.lane.b32.xlu1 (%p14516_p0), %v14604_v14, %s12444_s23  ;;  %5312 = vrot.lane.b32.xlu0 (%p14516_p0), %v14597_v59, %s12444_s23 }
 0x27e   : > { %v3828_v36 = vpop.f32.mrf.mxu0 }
 0x27f   : > { %v3829_v11 = vadd.f32 %v3828_v36, %v14413_v34  ;;  %v19007_v36 = vmov %v18986_v33 }
 0x280   : > { %v3830_v53 = vpop.f32.mrf.mxu0 }
 0x281   : > { %v14471_v6 = vadd.f32 %v12336_v18, %v3829_v11   ;;  %v3831_v51 = vadd.f32 %v3830_v53, %v14413_v34  ;;  %5068 = vrot.lane.b32.xlu1 (%p14516_p0), %v4166_v16, %s12442_s21  ;;  %4939 = vrot.lane.b32.xlu0 (%p14516_p0), %v4166_v16, %s12441_s20 }
 0x282   : > { %v3899_v25 = vpop.f32.mrf.mxu1 }
 0x283   : > { %v18988_v10 = vmov %v14471_v6  ;;  %v3900_v55 = vadd.f32 %v3899_v25, %v14413_v34  ;;  %v14475_v47 = vadd.f32 %v4058_v23, %v3831_v51   ;;  %v19015_v51 = vld [vmem:[#allocation48_spill] sm:$0xff] (%p14516_p0) }
 0x284   : > { %v3901_v43 = vpop.f32.mrf.mxu1 }
 0x285   : > { %v18989_v49 = vmov %v14475_v47  ;;  %v14480_v7 = vadd.f32 %v12332_v19, %v3900_v55   ;;  %v3902_v9 = vadd.f32 %v3901_v43, %v14413_v34  ;;  %5310 = vrot.lane.b32.xlu1 (%p14516_p0), %v4166_v16, %s12444_s23  ;;  %5229 = vrot.lane.b32.xlu0 (%p14516_p0), %v4166_v16, %s12443_s22  ;;  %v14754_v55 = vsel (%p14516_p0), %vm18817_vm8, 1.0, %v19013_v22 }
 0x286   : > { %v4106_v3 = vcombine.low %v18988_v10, %v18989_v49  ;;  %19016 = vst [vmem:[#allocation48_spill] sm:$0xff] (%p14516_p0), %v14754_v55 }
 0x287   : > { %v18990_v58 = vmov %v14480_v7  ;;  %v14486_v62 = vadd.f32 %v4059_v48, %v3902_v9  }
 0x288   : > { %v4122_v0 = vadd.f32 %v12336_v18, %v4106_v3  ;;  %v19008_v3 = vmov %v18985_v29 }
 0x289   : > { %v18991_v5 = vmov %v14486_v62  ;;  %4394 = vrot.lane.b32.xlu1 (%p14516_p0), %v14597_v59, %s12445_s24  ;;  %4392 = vrot.lane.b32.xlu0 (%p14516_p0), %v4166_v16, %s12445_s24 }
 0x28a   : > { %v4130_v18 = vmul.f32 0.5, %v4122_v0   ;;  %v4107_v8 = vcombine.low %v18990_v58, %v18991_v5  ;;  %v19012_v0 = vmov %v18981_v45 }
 0x28b   :  { %v4875_v18 = vrot.slane (%p14516_p0), %v4166_v16, 1 }
 0x28c   : > { %v4123_v30 = vadd.f32 %v12332_v19, %v4107_v8 }
 0x28d   :  { %4923 = vst [vmem:[#allocation2 + $0x1b8] ss:$-436 sps:$4 sm:$0x83] (%p14516_p0), %v4875_v18   ;;  %4539 = vrot.lane.b32.xlu1 (%p14516_p0), %v14597_v59, %s12446_s25  ;;  %4537 = vrot.lane.b32.xlu0 (%p14516_p0), %v4166_v16, %s12446_s25 }
 0x28e   : > { %v4131_v19 = vmul.f32 0.5, %v4123_v30   ;;  %v19005_v30 = vmov %v18987_v52 }
 0x291   :  { %4732 = vrot.lane.b32.xlu1 (%p14516_p0), %v14597_v59, %s12447_s26  ;;  %4730 = vrot.lane.b32.xlu0 (%p14516_p0), %v4166_v16, %s12447_s26 }
 0x2b2   : > { %v4041_v57 = vpop.f32.mrf.mxu1 }
 0x2b3   : > { %v3970_v60 = vpop.f32.mrf.mxu0  ;;  %v4042_v7 = vadd.f32 %v4041_v57, %v14413_v34  ;;  %v19017_v57 = vld [vmem:[#allocation65_spill] sm:$0xff] (%p14516_p0) }
 0x2b4   : > { %v3971_v1 = vadd.f32 %v3970_v60, %v14413_v34  ;;  %v4043_v31 = vpop.f32.mrf.mxu1 }
 0x2b5   : > { %v3972_v41 = vpop.f32.mrf.mxu0  ;;  %v4044_v6 = vadd.f32 %v4043_v31, %v14413_v34  ;;  %v14500_v47 = vadd.f32 %v12324_v21, %v4042_v7   ;;  %v19002_v7 = vmov %v18990_v58 }
 0x2b6   : > { %v3973_v13 = vadd.f32 %v3972_v41, %v14413_v34  ;;  %v14505_v8 = vadd.f32 %v12328_v20, %v3971_v1   ;;  %v19009_v1 = vmov %v18984_v44 }
 0x2b7   : > { %v18992_v54 = vmov %v14500_v47  ;;  %v14502_v9 = vadd.f32 %v4061_v46, %v4044_v6   ;;  %v19003_v47 = vmov %v18989_v49  ;;  %v19004_v6 = vmov %v18988_v10 }
 0x2b8   : > { %v18994_v32 = vmov %v14505_v8  ;;  %v14507_v34 = vadd.f32 %v4060_v12, %v3973_v13   ;;  %v18998_v13 = vmov %v18992_v54 }
 0x2b9   : > { %v18993_v38 = vmov %v14502_v9  ;;  %v19000_v8 = vmov %v18994_v32 }
 0x2ba   : > { %v18995_v28 = vmov %v14507_v34  ;;  %v4109_v27 = vcombine.low %v18992_v54, %v18993_v38  ;;  %v18997_v9 = vmov %v18993_v38  ;;  %v4165_v19 = vmul.f32 (%p14516_p0), 0.01, %v18993_v38 }
 0x2bb   : > { %v4108_v62 = vcombine.low %v18994_v32, %v18995_v28  ;;  %v18999_v34 = vmov %v18995_v28  ;;  %1590 = sbr.rel (!%p14516_p0) target bundleno = 114 (0x72), region = 92  ;;  %vm4149_vm5 = vcmp.gt.f32.partialorder (%p14516_p0), %v18993_v38, 0.0 }
 0x2bc   : > { %v4125_v42 = vadd.f32 %v12324_v21, %v4109_v27  ;;  %v4153_v34 = vmul.f32 (%p14516_p0), 0.01, %v18984_v44 }
 0x2bd   : > { %v4124_v35 = vadd.f32 %v12328_v20, %v4108_v62  ;;  %v19001_v62 = vmov %v18991_v5 }
 0x2be   : > { %v4133_v21 = vmul.f32 0.5, %v4125_v42   ;;  %v14692_v24 = vsel (%p14516_p0), %vm4137_vm11, %v18984_v44, %v4153_v34  ;;  %vm18813_vm11 = vcmp.lt.s32.totalorder (%p14516_p0), %v12698_v26, 63 }
 0x2bf   : > { %v4132_v20 = vmul.f32 0.5, %v4124_v35   ;;  %v19011_v35 = vmov %v18983_v63  ;;  %v4154_v21 = vmul.f32 (%p14516_p0), 0.01, %v18985_v29  ;;  %v4877_v63 = vrot.slane (%p14516_p0), %v14604_v14, 1  ;;  %v6134_v4 = vpop.permute.xlu0 (%p14516_p0), %6133 }
 0x2c0   :  { %v14668_v20 = vsel %vm4149_vm5, %v18993_v38, %v4165_v19  ;;  %v4878_v44 = vrot.slane %v14692_v24, 1  ;;  %vm4587_vm5 = vcmp.le.s32.totalorder %v12718_v40, 29 }
 0x2c1   :  { %4567 = vrot.lane.b32.xlu1 %v14668_v20, %s12446_s25  ;;  %4422 = vrot.lane.b32.xlu0 %v14668_v20, %s12445_s24  ;;  %v14689_v45 = vsel %vm4138_vm2, %v18985_v29, %v4154_v21  ;;  %4925 = vst [vmem:[#allocation2 + $0x188] ss:$-156 sps:$4 sm:$0x83] %v4877_v63   ;;  %v6311_v29 = vpop.permute.xlu1 %6310  ;;  %vm18812_vm2 = vcmp.lt.s32.totalorder %v12698_v26, 62  ;;  %v14732_v2 = vsel %vm4587_vm5, 1.0, %v19013_v22  ;;  %vm18815_vm5 = vcmp.lt.s32.totalorder %v12698_v26, 94 }
 0x2c2   :  { %4926 = vst [vmem:[#allocation2 + $0x208] ss:$-412 sps:$4 sm:$0x83] %v4878_v44   ;;  %19014 = vst [vmem:[#allocation7_spill] sm:$0xff] %v14732_v2  ;;  %v4157_v21 = vmul.f32 0.01, %v18987_v52 }
 0x2c3   :  { %v14736_v36 = vpop.permute.xlu0 %6135 }
 0x2c4   :  { %v6177_v23 = vsel %vm18813_vm11, %v6134_v4, %v14736_v36 }
 0x2c5   :  { %4263 = vrot.lane.b32.xlu1 %v4166_v16, %s12448_s27  ;;  %4760 = vrot.lane.b32.xlu0 %v14668_v20, %s12447_s26  ;;  %v14734_v56 = vpop.permute.xlu1 %6312  ;;  %v6229_v25 = vmul.f32 %v19015_v51, %v6177_v23  ;;  %v14833_v23 = vsel %vm4141_vm9, %v18987_v52, %v4157_v21  ;;  %vm5100_vm9 = vcmp.lt.s32.totalorder %v12698_v26, 126 }
 0x2c6   :  { %v6354_v11 = vsel %vm18812_vm2, %v6311_v29, %v14734_v56 }
 0x2c7   :  { %v6406_v53 = vmul.f32 %v14732_v2, %v6354_v11  ;;  %v6261_v43 = vrot.slane %v6229_v25, 6  ;;  %v14758_v9 = vpop.permute.xlu0 %6131 }
 0x2c8   :  { %v6178_v8 = vsel %vm18813_vm11, %v14758_v9, %v6134_v4  ;;  %vm5986_vm11 = vcmp.lt.s32.totalorder %v12698_v26, 64 }
 0x2c9   :  { %4182 = vrot.lane.b32.xlu1 %v4166_v16, %s12449_s28  ;;  %4293 = vrot.lane.b32.xlu0 %v14668_v20, %s12448_s27  ;;  %v6438_v48 = vrot.slane %v6406_v53, 3  ;;  %v14756_v3 = vpop.permute.xlu1 %6308  ;;  %6293 = vst [vmem:[#allocation2 + $0x170] sm:$0x1c] %v6261_v43  ;;  %v6228_v60 = vmul.f32 %v19017_v57, %v6178_v8  ;;  %v4158_v53 = vmul.f32 0.01, %v18988_v10 }
 0x2ca   :  { %v6355_v0 = vsel %vm18812_vm2, %v14756_v3, %v6311_v29  ;;  %vm5793_vm2 = vcmp.lt.s32.totalorder %v12698_v26, 65 }
 0x2cb   :  { %6470 = vst [vmem:[#allocation2 + $0x170] sm:$0xe0] %v6438_v48  ;;  %v6405_v30 = vmul.f32 %v14754_v55, %v6355_v0  ;;  %v6260_v46 = vrot.slane %v6228_v60, 6  ;;  %v5442_v12 = vpop.permute.xlu0 %5441 }
 0x2cd   :  { %4265 = vrot.lane.b32.xlu1 %v14597_v59, %s12448_s27  ;;  %4184 = vrot.lane.b32.xlu0 %v14597_v59, %s12449_s28  ;;  %v6437_v7 = vrot.slane %v6405_v30, 3  ;;  %v14772_v1 = vpop.permute.xlu1 %5443  ;;  %6292 = vst [vmem:[#allocation2 + $0xc0] sm:$0x1c] %v6260_v46  ;;  %v19019_v30 = vld [vmem:[#allocation63_spill] sm:$0xff] }
 0x2ce   :  { %v5485_v31 = vsel %vm3263_vm10, %v5442_v12, %v14772_v1 }
 0x2cf   :  { %6469 = vst [vmem:[#allocation2 + $0xc0] sm:$0xe0] %v6437_v7  ;;  %v5489_v41 = vmul.f32 %v19015_v51, %v5485_v31  ;;  %v5587_v47 = vpop.permute.xlu0 %5586 }
 0x2d1   :  { %6139 = vrot.lane.b32.xlu1 %v14689_v45, %s12436_s18  ;;  %6137 = vrot.lane.b32.xlu0 %v14692_v24, %s12436_s18  ;;  %v5521_v6 = vrot.slane %v5489_v41, 2  ;;  %v14783_v13 = vpop.permute.xlu1 %5588 }
 0x2d2   :  { %v5630_v38 = vsel %vm18815_vm5, %v5587_v47, %v14783_v13 }
 0x2d3   :  { %5553 = vst [vmem:[#allocation2 + $0x278] ss:$92 sps:$4 sm:$0xc1] %v5521_v6   ;;  %v5682_v27 = vmul.f32 %v14732_v2, %v5630_v38  ;;  %v5764_v35 = vpop.permute.xlu0 %5763 }
 0x2d5   :  { %6316 = vrot.lane.b32.xlu1 %v14689_v45, %s12435_s17  ;;  %6314 = vrot.lane.b32.xlu0 %v14692_v24, %s12435_s17  ;;  %v5714_v62 = vrot.slane %v5682_v27, 7  ;;  %v14794_v42 = vpop.permute.xlu1 %5765 }
 0x2d6   :  { %v5807_v50 = vsel %vm5793_vm2, %v5764_v35, %v14794_v42 }
 0x2d7   :  { %5746 = vst [vmem:[#allocation2 + $0x278] sm:$0xe] %v5714_v62  ;;  %v5875_v59 = vmul.f32 %v19018_v37, %v5807_v50  ;;  %v5957_v17 = vpop.permute.xlu0 %5956 }
 0x2d9   :  { %5445 = vrot.lane.b32.xlu1 %v14692_v24, %s12437_s1  ;;  %4212 = vrot.lane.b32.xlu0 %v14668_v20, %s12449_s28  ;;  %v5907_v15 = vrot.slane %v5875_v59, 4  ;;  %v14805_v16 = vpop.permute.xlu1 %5958 }
 0x2da   :  { %v6000_v18 = vsel %vm5986_vm11, %v5957_v17, %v14805_v16 }
 0x2db   :  { %5939 = vst [vmem:[#allocation2 + $0x278] sm:$0x70] %v5907_v15  ;;  %v6068_v19 = vrot.slane %v6000_v18, 1  ;;  %v14817_v63 = vpop.permute.xlu0 %5439 }
 0x2dc   :  { %v5486_v29 = vsel %vm3263_vm10, %v14817_v63, %v5442_v12 }
 0x2dd   :  { %5590 = vrot.lane.b32.xlu1 %v14692_v24, %s12438_s2  ;;  %5447 = vrot.lane.b32.xlu0 %v14689_v45, %s12437_s1  ;;  %6100 = vst [vmem:[#allocation2 + $0x170] ss:$268 sps:$4 sm:$0x83] %v6068_v19   ;;  %v14815_v34 = vpop.permute.xlu1 %5584  ;;  %v5488_v11 = vmul.f32 %v19017_v57, %v5486_v29 }
 0x2de   :  { %v5631_v44 = vsel %vm18815_vm5, %v14815_v34, %v5587_v47  ;;  %vm4142_vm5 = vcmp.gt.f32.partialorder %v18988_v10, 0.0 }
 0x2df   :  { %v5681_v4 = vmul.f32 %v14754_v55, %v5631_v44  ;;  %v5520_v48 = vrot.slane %v5488_v11, 2  ;;  %v14838_v0 = vpop.permute.xlu0 %5761  ;;  %v14853_v46 = vsel %vm4142_vm5, %v18988_v10, %v4158_v53  ;;  %v4156_v10 = vmul.f32 0.01, %v14456_v61 }
 0x2e0   :  { %v5808_v8 = vsel %vm5793_vm2, %v14838_v0, %v5764_v35  ;;  %vm4140_vm5 = vcmp.gt.f32.partialorder %v14456_v61, 0.0 }
 0x2e1   :  { %5767 = vrot.lane.b32.xlu1 %v14692_v24, %s12439_s0  ;;  %5592 = vrot.lane.b32.xlu0 %v14689_v45, %s12438_s2  ;;  %v5713_v25 = vrot.slane %v5681_v4, 7  ;;  %v14836_v43 = vpop.permute.xlu1 %5954  ;;  %5552 = vst [vmem:[#allocation2 + $0xa0] ss:$332 sps:$4 sm:$0xc1] %v5520_v48   ;;  %v5874_v60 = vmul.f32 %v19019_v30, %v5808_v8  ;;  %v14879_v59 = vsel %vm4140_vm5, %v14456_v61, %v4156_v10  ;;  %vm18826_vm5 = vcmp.lt.s32.totalorder %v12698_v26, 30 }
 0x2e3   :  { %5745 = vst [vmem:[#allocation2 + $0xa0] sm:$0xe] %v5713_v25  ;;  %v5906_v12 = vrot.slane %v5874_v60, 4  ;;  %v4942_v41 = vpop.permute.xlu0 %4941 }
 0x2e4   :  { %v6567_v7 = vld [vmem:[#allocation2 + $0x170] sm:$0xff]  ;;  %v6551_v19 = vld [vmem:[#allocation2 + $0x278] sm:$0xff] }
 0x2e5   :  { %5960 = vrot.lane.b32.xlu1 %v14692_v24, %s12440_s19  ;;  %5769 = vrot.lane.b32.xlu0 %v14689_v45, %s12439_s0  ;;  %v14855_v31 = vpop.permute.xlu1 %4943  ;;  %5938 = vst [vmem:[#allocation2 + $0xa0] sm:$0x70] %v5906_v12 }
 0x2e6   :  { %6612 = vmatprep.subr.mxu1 %v6567_v7  ;;  %v4985_v6 = vsel %vm2596_vm14, %v4942_v41, %v14855_v31 }
 0x2e7   :  { %v4989_v47 = vmul.f32 %v19015_v51, %v4985_v6  ;;  %v5071_v27 = vpop.permute.xlu0 %5070 }
 0x2e9   :  { %4945 = vrot.lane.b32.xlu1 %v14692_v24, %s12441_s20  ;;  %5962 = vrot.lane.b32.xlu0 %v14689_v45, %s12440_s19  ;;  %v14867_v38 = vpop.permute.xlu1 %5072 }
 0x2ea   :  { %v5114_v62 = vsel %vm5100_vm9, %v5071_v27, %v14867_v38 }
 0x2eb   :  { %v5150_v35 = vmul.f32 %v14732_v2, %v5114_v62  ;;  %v5232_v18 = vpop.permute.xlu0 %5231 }
 0x2ed   :  { %5074 = vrot.lane.b32.xlu1 %v14692_v24, %s12442_s21  ;;  %4947 = vrot.lane.b32.xlu0 %v14689_v45, %s12441_s20  ;;  %v5182_v15 = vrot.slane %v5150_v35, 3 }
 0x2ef   :  { %5214 = vst [vmem:[#allocation2 + $0x80] sm:$0xe0] %v5182_v15  ;;  %v5313_v4 = vpop.permute.xlu0 %5312 }
 0x2f1   :  { %5235 = vrot.lane.b32.xlu1 %v14692_v24, %s12443_s22  ;;  %5076 = vrot.lane.b32.xlu0 %v14689_v45, %s12442_s21 }
 0x2f3   :  { %v14902_v48 = vpop.permute.xlu0 %4939 }
 0x2f4   :  { %v4986_v8 = vsel %vm2596_vm14, %v14902_v48, %v4942_v41 }
 0x2f5   :  { %5316 = vrot.lane.b32.xlu1 %v14692_v24, %s12444_s23  ;;  %5237 = vrot.lane.b32.xlu0 %v14689_v45, %s12443_s22  ;;  %v4988_v60 = vmul.f32 %v19017_v57, %v4986_v8 }
 0x2f7   :  { %v5020_v12 = vrot.slane %v4988_v60, 6 }
 0x2f9   :  { %4396 = vrot.lane.b32.xlu1 %v14604_v14, %s12445_s24  ;;  %5318 = vrot.lane.b32.xlu0 %v14689_v45, %s12444_s23  ;;  %5052 = vst [vmem:[#allocation2 + $0x1b8] sm:$0x1c] %v5020_v12 }
 0x2fd   :  { %4541 = vrot.lane.b32.xlu1 %v14604_v14, %s12446_s25  ;;  %4398 = vrot.lane.b32.xlu0 %v14692_v24, %s12445_s24 }
 0x301   :  { %4734 = vrot.lane.b32.xlu1 %v14604_v14, %s12447_s26  ;;  %4543 = vrot.lane.b32.xlu0 %v14692_v24, %s12446_s25 }
 0x305   :  { %4186 = vrot.lane.b32.xlu1 %v14604_v14, %s12449_s28  ;;  %4736 = vrot.lane.b32.xlu0 %v14692_v24, %s12447_s26 }
 0x309   :  { %4267 = vrot.lane.b32.xlu1 %v14604_v14, %s12448_s27  ;;  %4188 = vrot.lane.b32.xlu0 %v14692_v24, %s12449_s28  ;;  %v6001_v14 = vsel %vm5986_vm11, %v14836_v43, %v5957_v17  ;;  %v14881_v17 = vpop.permute.xlu1 %5233 }
 0x30a   :  { %v6067_v52 = vrot.slane %v6001_v14, 1  ;;  %v5275_v21 = vsel %vm2829_vm15, %v5232_v18, %v14881_v17 }
 0x30b   :  { %v5279_v29 = vmul.f32 %v19018_v37, %v5275_v21 }
 0x30c   :  { %6099 = vst [vmem:[#allocation2 + $0xc0] ss:$-28 sps:$4 sm:$0x83] %v6067_v52  }
 0x30d   :  { %5968 = vrot.lane.b32.xlu1 %v14833_v23, %s12440_s19  ;;  %4269 = vrot.lane.b32.xlu0 %v14692_v24, %s12448_s27  ;;  %v5021_v24 = vrot.slane %v4989_v47, 6  ;;  %5295 = vst [vmem:[#allocation2 + $0x2d0] sm:$0x7] %v5279_v29  ;;  %v14891_v61 = vpop.permute.xlu1 %5314  ;;  %v14918_v47 = vpop.permute.xlu0 %5229 }
 0x30e   :  { %v5356_v11 = vsel %vm18816_vm1, %v5313_v4, %v14891_v61  ;;  %19021 = vst [vmem:[#allocation18_spill] sm:$0xff] %v14918_v47  ;;  %v5276_v57 = vsel %vm2829_vm15, %v14918_v47, %v5232_v18 }
 0x30f   :  { %5053 = vst [vmem:[#allocation2 + $0x80] sm:$0x1c] %v5021_v24  ;;  %v5392_v53 = vrot.slane %v5356_v11, 5  ;;  %v5278_v24 = vmul.f32 %v19019_v30, %v5276_v57 }
 0x311   :  { %6145 = vrot.lane.b32.xlu1 %v14833_v23, %s12436_s18  ;;  %5970 = vrot.lane.b32.xlu0 %v14853_v46, %s12440_s19  ;;  %5424 = vst [vmem:[#allocation2 + $0x2d0] sm:$0x38] %v5392_v53  ;;  %v14900_v25 = vpop.permute.xlu1 %5068  ;;  %5294 = vst [vmem:[#allocation2 + $0x1e8] sm:$0x7] %v5278_v24  ;;  %v4393_v35 = vpop.permute.xlu0 %4392 }
 0x312   :  { %19020 = vst [vmem:[#allocation65_spill] sm:$0xff] %v14900_v25  ;;  %v5115_v14 = vsel %vm5100_vm9, %v14900_v25, %v5071_v27 }
 0x313   :  { %v6566_v50 = vld [vmem:[#allocation2 + $0xc0] sm:$0xff]  ;;  %v5149_v52 = vmul.f32 %v14754_v55, %v5115_v14 }
 0x314   :  { %6613 = vmatpush1.msra.mxu1 %v6566_v50  ;;  %v6550_v44 = vld [vmem:[#allocation2 + $0xa0] sm:$0xff] }
 0x315   :  { %6322 = vrot.lane.b32.xlu1 %v14833_v23, %s12435_s17  ;;  %6147 = vrot.lane.b32.xlu0 %v14853_v46, %s12436_s18  ;;  %v5181_v7 = vrot.slane %v5149_v52, 3  ;;  %v14916_v6 = vpop.permute.xlu1 %5310  ;;  %v4538_v21 = vpop.permute.xlu0 %4537 }
 0x316   :  { %6614 = vmatprep.subr.mxu1 %v6551_v19  ;;  %v5357_v41 = vsel %vm18816_vm1, %v14916_v6, %v5313_v4  ;;  %v6519_v14 = vld [vmem:[#allocation2 + $0x80] sm:$0xff]  ;;  %vm4602_vm1 = vmand %vm12740_vm4, %vm18817_vm8  ;;  %vm19029_vm4 = vcmp.lt.s32.totalorder %v12698_v26, 33 }
 0x317   :  { %6615 = vmatpush1.msra.mxu1 %v6550_v44  ;;  %5213 = vst [vmem:[#allocation2 + $0x1b8] sm:$0xe0] %v5181_v7  ;;  %v5391_v10 = vrot.slane %v5357_v41, 5  ;;  %v11350_v12 = vsel %vm4602_vm1, 1.0, %v19013_v22 }
 0x318   :  { %v6535_v27 = vld [vmem:[#allocation2 + $0x2d0] sm:$0xff] }
 0x319   :  { %6143 = vrot.lane.b32.xlu1 %v14879_v59, %s12436_s18  ;;  %6324 = vrot.lane.b32.xlu0 %v14853_v46, %s12435_s17  ;;  %5423 = vst [vmem:[#allocation2 + $0x1e8] sm:$0x38] %v5391_v10  ;;  %v14931_v62 = vpop.permute.xlu1 %4394  ;;  %v4731_v53 = vpop.permute.xlu0 %4730 }
 0x31a   :  { %6616 = vmatprep.subr.mxu1 %v6535_v27  ;;  %v4439_v50 = vsel %vm18828_vm13, %v4393_v35, %v14931_v62 }
 0x31b   :  { %v4442_v15 = vmul.f32 %v19015_v51, %v4439_v50  ;;  %v4882_v50 = vrot.slane %v14833_v23, 1 }
 0x31d   :  { %5453 = vrot.lane.b32.xlu1 %v14833_v23, %s12437_s1  ;;  %6320 = vrot.lane.b32.xlu0 %v14879_v59, %s12435_s17  ;;  %v4474_v18 = vrot.slane %v4442_v15, 2  ;;  %v14942_v19 = vpop.permute.xlu1 %4539  ;;  %4930 = vst [vmem:[#allocation2 + $0x250] ss:$-156 sps:$4 sm:$0x83] %v4882_v50  }
 0x31e   :  { %v4584_v44 = vsel %vm18826_vm5, %v4538_v21, %v14942_v19  ;;  %v6518_v7 = vld [vmem:[#allocation2 + $0x1b8] sm:$0xff] }
 0x31f   :  { %4506 = vst [vmem:[#allocation2 + $0x248] ss:$-372 sps:$4 sm:$0xc1] %v4474_v18   ;;  %v4651_v29 = vmul.f32 %v14732_v2, %v4584_v44  ;;  %v19025_v18 = vld [vmem:[#allocation47_spill] sm:$0xff] }
 0x320   :  { %v6534_v51 = vld [vmem:[#allocation2 + $0x1e8] sm:$0xff] }
 0x321   :  { %5598 = vrot.lane.b32.xlu1 %v14833_v23, %s12438_s2  ;;  %5455 = vrot.lane.b32.xlu0 %v14853_v46, %s12437_s1  ;;  %v4683_v4 = vrot.slane %v4651_v29, 7  ;;  %v14952_v11 = vpop.permute.xlu1 %4732 }
 0x322   :  { %6617 = vmatpush1.msra.mxu1 %v6534_v51  ;;  %v4777_v52 = vsel %vm18825_vm3, %v4731_v53, %v14952_v11 }
 0x323   :  { %6618 = vmatprep.subr.mxu1 %v6519_v14  ;;  %4715 = vst [vmem:[#allocation2 + $0x248] sm:$0xe] %v4683_v4  ;;  %v4780_v60 = vmul.f32 %v19018_v37, %v4777_v52 }
 0x324   :  { %6619 = vmatpush1.msra.mxu1 %v6518_v7 }
 0x325   :  { %5775 = vrot.lane.b32.xlu1 %v14833_v23, %s12439_s0  ;;  %5600 = vrot.lane.b32.xlu0 %v14853_v46, %s12438_s2  ;;  %v4812_v41 = vrot.slane %v4780_v60, 4 }
 0x327   :  { %4844 = vst [vmem:[#allocation2 + $0x248] sm:$0x70] %v4812_v41  ;;  %v19028_v41 = vld [vmem:[#allocation45_spill] sm:$0xff] }
 0x329   :  { %5451 = vrot.lane.b32.xlu1 %v14879_v59, %s12437_s1  ;;  %5777 = vrot.lane.b32.xlu0 %v14853_v46, %s12439_s0 }
 0x32d   :  { %5773 = vrot.lane.b32.xlu1 %v14879_v59, %s12439_s0  ;;  %5596 = vrot.lane.b32.xlu0 %v14879_v59, %s12438_s2 }
 0x331   :  { %5324 = vrot.lane.b32.xlu1 %v14833_v23, %s12444_s23  ;;  %5966 = vrot.lane.b32.xlu0 %v14879_v59, %s12440_s19 }
 0x333   :  { %v14967_v57 = vpop.permute.xlu1 %4567  ;;  %v14969_v10 = vpop.permute.xlu0 %4422 }
 0x334   :  { %19023 = vst [vmem:[#allocation63_spill] sm:$0xff] %v14967_v57  ;;  %19024 = vst [vmem:[#allocation17_spill] sm:$0xff] %v14969_v10  ;;  %v4585_v24 = vsel %vm18826_vm5, %v14967_v57, %v4538_v21  ;;  %v4440_v27 = vsel %vm18828_vm13, %v14969_v10, %v4393_v35 }
 0x335   :  { %v4650_v15 = vmul.f32 %v11350_v12, %v4585_v24  ;;  %v4441_v44 = vmul.f32 %v19025_v18, %v4440_v27  ;;  %4953 = vrot.lane.b32.xlu1 %v14833_v23, %s12441_s20  ;;  %5326 = vrot.lane.b32.xlu0 %v14853_v46, %s12444_s23  ;;  %v6503_v12 = vld [vmem:[#allocation2 + $0x248] sm:$0xff] }
 0x336   :  { %6620 = vmatprep.subr.mxu1 %v6503_v12  ;;  %v19034_v12 = vld [vmem:[#allocation49_spill] sm:$0xff] }
 0x337   :  { %v4682_v29 = vrot.slane %v4650_v15, 7  ;;  %v4473_v51 = vrot.slane %v4441_v44, 2  ;;  %v4264_v21 = vpop.permute.xlu1 %4263  ;;  %v14983_v4 = vpop.permute.xlu0 %4760 }
 0x338   :  { %19026 = vst [vmem:[#allocation47_spill] sm:$0xff] %v14983_v4  ;;  %v4778_v35 = vsel %vm18825_vm3, %v14983_v4, %v4731_v53  ;;  %v4881_v53 = vrot.slane %v14879_v59, 1 }
 0x339   :  { %4714 = vst [vmem:[#allocation2] sm:$0xe] %v4682_v29  ;;  %4505 = vst [vmem:[#allocation2] ss:$692 sps:$4 sm:$0xc1] %v4473_v51   ;;  %v4779_v14 = vmul.f32 %v19019_v30, %v4778_v35  ;;  %5082 = vrot.lane.b32.xlu1 %v14833_v23, %s12442_s21  ;;  %4955 = vrot.lane.b32.xlu0 %v14853_v46, %s12441_s20 }
 0x33a   :  { %4929 = vst [vmem:[#allocation2 + $0x218] ss:$-500 sps:$4 sm:$0x83] %v4881_v53  }
 0x33b   :  { %v4811_v8 = vrot.slane %v4779_v14, 4  ;;  %v4183_v52 = vpop.permute.xlu1 %4182  ;;  %v14993_v60 = vpop.permute.xlu0 %4293  ;;  %v19031_v14 = vld [vmem:[#allocation12_spill] sm:$0xff] }
 0x33c   :  { %19027 = vst [vmem:[#allocation75_spill] sm:$0xff] %v14993_v60  ;;  %v4311_v7 = vsel %vm18818_vm7, %v14993_v60, %v4264_v21  ;;  %vm4589_vm8 = vcmp.le.s32.totalorder %v19031_v14, 29 }
 0x33d   :  { %4843 = vst [vmem:[#allocation2] sm:$0x70] %v4811_v8  ;;  %v4312_v30 = vmul.f32 %v19028_v41, %v4311_v7  ;;  %5243 = vrot.lane.b32.xlu1 %v14833_v23, %s12443_s22  ;;  %5084 = vrot.lane.b32.xlu0 %v14853_v46, %s12442_s21  ;;  %v19035_v41 = vld [vmem:[#allocation50_spill] sm:$0xff] }
 0x33f   :  { %v4344_v24 = vrot.slane %v4312_v30, 5  ;;  %v15004_v27 = vpop.permute.xlu1 %4265  ;;  %v15006_v50 = vpop.permute.xlu0 %4184 }
 0x340   :  { %v4310_v15 = vsel %vm18818_vm7, %v4264_v21, %v15004_v27  ;;  %v4229_v18 = vsel %vm19029_vm4, %v4183_v52, %v15006_v50  ;;  %v19030_v21 = vld [vmem:[#allocation11_spill] sm:$0xff]  ;;  %vm19032_vm4 = vcmp.lt.s32.totalorder %v12698_v26, 63 }
 0x341   :  { %4376 = vst [vmem:[#allocation2 + $0x2b0] sm:$0x38] %v4344_v24  ;;  %v4345_v44 = vrot.slane %v4310_v15, 5  ;;  %v4232_v29 = vmul.f32 %v19018_v37, %v4229_v18  ;;  %4951 = vrot.lane.b32.xlu1 %v14879_v59, %s12441_s20  ;;  %5245 = vrot.lane.b32.xlu0 %v14853_v46, %s12443_s22  ;;  %vm4588_vm1 = vcmp.le.s32.totalorder %v19030_v21, 29  ;;  %vm19033_vm7 = vmmov %vm19032_vm4  ;;  %v15039_v15 = vsel %vm4589_vm8, 1.0, %v19013_v22 }
 0x342   :  { %v15036_v24 = vsel %vm4588_vm1, 1.0, %v19013_v22  ;;  %19037 = vst [vmem:[#allocation49_spill] sm:$0xff] %v15039_v15  ;;  %vm19041_vm8 = vcmp.lt.s32.totalorder %v12698_v26, 33  ;;  %vm4139_vm1 = vcmp.gt.f32.partialorder %v18986_v33, 0.0 }
 0x343   :  { %4377 = vst [vmem:[#allocation2 + $0xd0] sm:$0x38] %v4345_v44  ;;  %4248 = vst [vmem:[#allocation2 + $0xd0] sm:$0x7] %v4232_v29  ;;  %v15019_v51 = vpop.permute.xlu1 %6139  ;;  %v6138_v35 = vpop.permute.xlu0 %6137 }
 0x344   :  { %v6175_v8 = vsel %vm19032_vm4, %v6138_v35, %v15019_v51  ;;  %v6176_v37 = vsel %vm19033_vm7, %v14736_v36, %v6138_v35  ;;  %v6502_v7 = vld [vmem:[#allocation2] sm:$0xff]  ;;  %19036 = vst [vmem:[#allocation45_spill] sm:$0xff] %v15036_v24  ;;  %vm19038_vm7 = vcmp.lt.s32.totalorder %v12698_v26, 62 }
 0x345   :  { %v6230_v53 = vmul.f32 %v19034_v12, %v6176_v37  ;;  %v6231_v30 = vmul.f32 %v19035_v41, %v6175_v8  ;;  %5241 = vrot.lane.b32.xlu1 %v14879_v59, %s12443_s22  ;;  %5080 = vrot.lane.b32.xlu0 %v14879_v59, %s12442_s21  ;;  %vm19039_vm4 = vmmov %vm19038_vm7 }
 0x346   :  { %6621 = vmatpush1.msra.mxu1 %v6502_v7 }
 0x347   :  { %v6262_v18 = vrot.slane %v6230_v53, 6  ;;  %v6263_v36 = vrot.slane %v6231_v30, 6  ;;  %v15041_v44 = vpop.permute.xlu1 %6316  ;;  %v6315_v29 = vpop.permute.xlu0 %6314 }
 0x348   :  { %v6352_v35 = vsel %vm19038_vm7, %v6315_v29, %v15041_v44  ;;  %v6353_v8 = vsel %vm19039_vm4, %v14734_v56, %v6315_v29  ;;  %v19042_v29 = vld [vmem:[#allocation21_spill] sm:$0xff]  ;;  %vm19043_vm7 = vcmp.lt.s32.totalorder %v12698_v26, 94 }
 0x349   :  { %6294 = vst [vmem:[#allocation2 + $0x90] sm:$0x1c] %v6262_v18  ;;  %6295 = vst [vmem:[#allocation2 + $0xb0] sm:$0x1c] %v6263_v36  ;;  %v6407_v37 = vmul.f32 %v15036_v24, %v6353_v8  ;;  %v6408_v7 = vmul.f32 %v15039_v15, %v6352_v35  ;;  %4404 = vrot.lane.b32.xlu1 %v14879_v59, %s12445_s24  ;;  %5322 = vrot.lane.b32.xlu0 %v14879_v59, %s12444_s23  ;;  %v4155_v8 = vmul.f32 0.01, %v18986_v33 }
 0x34a   :  { %v6487_v53 = vld [vmem:[#allocation2 + $0xd0] sm:$0xff]  ;;  %vm19044_vm4 = vmmov %vm19043_vm7 }
 0x34b   :  { %v6439_v30 = vrot.slane %v6407_v37, 3  ;;  %v6440_v14 = vrot.slane %v6408_v7, 3  ;;  %v5446_v39 = vpop.permute.xlu1 %5445  ;;  %v15055_v55 = vpop.permute.xlu0 %4212  ;;  %6622 = vmatprep.subr.mxu1 %v6487_v53 }
 0x34c   :  { %19040 = vst [vmem:[#allocation50_spill] sm:$0xff] %v15055_v55  ;;  %v5484_v56 = vsel %vm3263_vm10, %v14772_v1, %v5446_v39  ;;  %v4230_v18 = vsel %vm19041_vm8, %v15055_v55, %v4183_v52  ;;  %vm6588_vm8 = vcmask 392192  }
 0x34d   :  { %6471 = vst [vmem:[#allocation2 + $0x90] sm:$0xe0] %v6439_v30  ;;  %6472 = vst [vmem:[#allocation2 + $0xb0] sm:$0xe0] %v6440_v14  ;;  %v5490_v36 = vmul.f32 %v19034_v12, %v5484_v56  ;;  %v4231_v35 = vmul.f32 %v19042_v29, %v4230_v18  ;;  %4549 = vrot.lane.b32.xlu1 %v14879_v59, %s12446_s25  ;;  %4406 = vrot.lane.b32.xlu0 %v14833_v23, %s12445_s24 }
 0x34e   :  { %v15086_v56 = vsel %vm4139_vm1, %v18986_v33, %v4155_v8  ;;  %vm4146_vm1 = vcmp.gt.f32.partialorder %v18994_v32, 0.0 }
 0x34f   :  { %v5522_v37 = vrot.slane %v5490_v36, 2  ;;  %4247 = vst [vmem:[#allocation2 + $0x2b0] sm:$0x7] %v4231_v35  ;;  %v5591_v1 = vpop.permute.xlu1 %5590  ;;  %v15070_v7 = vpop.permute.xlu0 %5447 }
 0x350   :  { %v5629_v52 = vsel %vm19043_vm7, %v14783_v13, %v5591_v1  ;;  %v5483_v14 = vsel %vm3263_vm10, %v5446_v39, %v15070_v7  ;;  %vm4145_vm7 = vcmp.gt.f32.partialorder %v18991_v5, 0.0 }
 0x351   :  { %5554 = vst [vmem:[#allocation2 + $0x8] ss:$492 sps:$4 sm:$0xc1] %v5522_v37   ;;  %v5683_v53 = vmul.f32 %v15036_v24, %v5629_v52  ;;  %v5491_v30 = vmul.f32 %v19035_v41, %v5483_v14  ;;  %4742 = vrot.lane.b32.xlu1 %v14879_v59, %s12447_s26  ;;  %4551 = vrot.lane.b32.xlu0 %v14833_v23, %s12446_s25  ;;  %v19045_v37 = vld [vmem:[#allocation19_spill] sm:$0xff] }
 0x353   :  { %v5715_v18 = vrot.slane %v5683_v53, 7  ;;  %v5523_v13 = vrot.slane %v5491_v30, 2  ;;  %v5768_v36 = vpop.permute.xlu1 %5767  ;;  %v15088_v29 = vpop.permute.xlu0 %5592 }
 0x354   :  { %v5806_v39 = vsel %vm5793_vm2, %v14794_v42, %v5768_v36  ;;  %v5628_v35 = vsel %vm19044_vm4, %v5591_v1, %v15088_v29  ;;  %v15105_v42 = vld [vmem:[%s18674_s3] sm:$0x7]  ;;  %vm19047_vm4 = vcmp.lt.s32.totalorder %v12698_v26, 96 }
 0x355   :  { %5747 = vst [vmem:[#allocation2 + $0x8] sm:$0xe] %v5715_v18  ;;  %5555 = vst [vmem:[#allocation2 + $0x2c0] ss:$-660 sps:$4 sm:$0xc1] %v5523_v13   ;;  %v5876_v52 = vmul.f32 %v19045_v37, %v5806_v39  ;;  %v5684_v33 = vmul.f32 %v15039_v15, %v5628_v35  ;;  %4402 = vrot.lane.b32.xlu1 %v15086_v56, %s12445_s24  ;;  %4744 = vrot.lane.b32.xlu0 %v14833_v23, %s12447_s26  ;;  %v19046_v35 = vld [vmem:[#allocation20_spill] sm:$0xff] }
 0x356   :  { %v6486_v8 = vld [vmem:[#allocation2 + $0x2b0] sm:$0xff] }
 0x357   :  { %v5908_v1 = vrot.slane %v5876_v52, 4  ;;  %v5716_v14 = vrot.slane %v5684_v33, 7  ;;  %v5961_v53 = vpop.permute.xlu1 %5960  ;;  %v15107_v30 = vpop.permute.xlu0 %5769  ;;  %6623 = vmatpush1.msra.mxu1 %v6486_v8 }
 0x358   :  { %v5999_v18 = vsel %vm5986_vm11, %v14805_v16, %v5961_v53  ;;  %v5805_v13 = vsel %vm5793_vm2, %v5768_v36, %v15107_v30  ;;  %11448 = vmatmul.mubr.msk.f32.vlgmr.msra.gmra.mxu1 %vm6588_vm8, %v15105_v42 }
 0x359   :  { %5940 = vst [vmem:[#allocation2 + $0x8] sm:$0x70] %v5908_v1  ;;  %5748 = vst [vmem:[#allocation2 + $0x2c0] sm:$0xe] %v5716_v14  ;;  %v6069_v39 = vrot.slane %v5999_v18, 1  ;;  %v5877_v52 = vmul.f32 %v19046_v35, %v5805_v13  ;;  %4740 = vrot.lane.b32.xlu1 %v15086_v56, %s12447_s26  ;;  %4547 = vrot.lane.b32.xlu0 %v15086_v56, %s12446_s25 }
 0x35a   :  { %6727 = vmatprep.mubr.f32.mxu1 %v19013_v22  ;;  %v4162_v13 = vmul.f32 0.01, %v18994_v32 }
 0x35b   :  { %6101 = vst [vmem:[#allocation2 + $0x90] ss:$-132 sps:$4 sm:$0x83] %v6069_v39   ;;  %v5909_v16 = vrot.slane %v5877_v52, 4  ;;  %v4946_v33 = vpop.permute.xlu1 %4945  ;;  %v15123_v36 = vpop.permute.xlu0 %5962  ;;  %v4161_v39 = vmul.f32 0.01, %v18991_v5 }
 0x35c   :  { %v4984_v8 = vsel %vm2596_vm14, %v14855_v31, %v4946_v33  ;;  %v5998_v1 = vsel %vm5986_vm11, %v5961_v53, %v15123_v36 }
 0x35d   :  { %5941 = vst [vmem:[#allocation2 + $0x2c0] sm:$0x70] %v5909_v16  ;;  %v4990_v14 = vmul.f32 %v19034_v12, %v4984_v8  ;;  %v6070_v18 = vrot.slane %v5998_v1, 1  ;;  %4196 = vrot.lane.b32.xlu1 %v14833_v23, %s12449_s28  ;;  %4194 = vrot.lane.b32.xlu0 %v14879_v59, %s12449_s28 }
 0x35f   :  { %v5022_v52 = vrot.slane %v4990_v14, 6  ;;  %6102 = vst [vmem:[#allocation2 + $0xb0] ss:$532 sps:$4 sm:$0x83] %v6070_v18   ;;  %v5075_v31 = vpop.permute.xlu1 %5074  ;;  %v15138_v2 = vpop.permute.xlu0 %4947  ;;  %v15155_v14 = vsel %vm4146_vm1, %v18994_v32, %v4162_v13  ;;  %vm4144_vm1 = vcmp.gt.f32.partialorder %v18990_v58, 0.0 }
 0x360   :  { %v5113_v53 = vsel %vm5100_vm9, %v14867_v38, %v5075_v31  ;;  %v4983_v16 = vsel %vm2596_vm14, %v4946_v33, %v15138_v2  ;;  %v15158_v38 = vsel %vm4145_vm7, %v18991_v5, %v4161_v39  ;;  %vm19048_vm7 = vmmov %vm19047_vm4 }
 0x361   :  { %5054 = vst [vmem:[#allocation2 + $0x188] sm:$0x1c] %v5022_v52  ;;  %v5151_v8 = vmul.f32 %v15036_v24, %v5113_v53  ;;  %v4991_v1 = vmul.f32 %v19035_v41, %v4983_v16  ;;  %4277 = vrot.lane.b32.xlu1 %v14833_v23, %s12448_s27  ;;  %4275 = vrot.lane.b32.xlu0 %v14879_v59, %s12448_s27 }
 0x363   :  { %v5183_v18 = vrot.slane %v5151_v8, 3  ;;  %v5023_v21 = vrot.slane %v4991_v1, 6  ;;  %v5236_v33 = vpop.permute.xlu1 %5235  ;;  %v15160_v52 = vpop.permute.xlu0 %5076 }
 0x364   :  { %v5274_v53 = vsel %vm2829_vm15, %v14881_v17, %v5236_v33  ;;  %v5112_v23 = vsel %vm5100_vm9, %v5075_v31, %v15160_v52  ;;  %v6568_v31 = vld [vmem:[#allocation2 + $0x90] sm:$0xff] }
 0x365   :  { %5215 = vst [vmem:[#allocation2 + $0x188] sm:$0xe0] %v5183_v18  ;;  %5055 = vst [vmem:[#allocation2 + $0x208] sm:$0x1c] %v5023_v21  ;;  %v5280_v32 = vmul.f32 %v19045_v37, %v5274_v53  ;;  %v5152_v5 = vmul.f32 %v15039_v15, %v5112_v23  ;;  %6155 = vrot.lane.b32.xlu1 %v15155_v14, %s12436_s18  ;;  %6153 = vrot.lane.b32.xlu0 %v15158_v38, %s12436_s18  ;;  %v6552_v53 = vld [vmem:[#allocation2 + $0x8] sm:$0xff] }
 0x366   :  { %v6569_v59 = vld [vmem:[#allocation2 + $0xb0] sm:$0xff]  ;;  %v6553_v18 = vld [vmem:[#allocation2 + $0x2c0] sm:$0xff] }
 0x367   :  { %5296 = vst [vmem:[#allocation2 + $0x1f0] sm:$0x7] %v5280_v32  ;;  %v5184_v13 = vrot.slane %v5152_v5, 3  ;;  %v5317_v17 = vpop.permute.xlu1 %5316  ;;  %v15174_v39 = vpop.permute.xlu0 %5237  ;;  %6683 = vmatprep.subr.mxu1 %v6569_v59 }
 0x368   :  { %v5355_v21 = vsel %vm19047_vm4, %v14891_v61, %v5317_v17  ;;  %v5273_v16 = vsel %vm2829_vm15, %v5236_v33, %v15174_v39  ;;  %6684 = vmatpush1.msra.mxu1 %v6568_v31  ;;  %v4160_v61 = vmul.f32 0.01, %v18990_v58  ;;  %vm19049_vm4 = vcmp.lt.s32.totalorder %v12698_v26, 33 }
 0x369   :  { %5216 = vst [vmem:[#allocation2 + $0x208] sm:$0xe0] %v5184_v13  ;;  %v5393_v8 = vrot.slane %v5355_v21, 5  ;;  %v5281_v1 = vmul.f32 %v19046_v35, %v5273_v16  ;;  %6332 = vrot.lane.b32.xlu1 %v15155_v14, %s12435_s17  ;;  %6330 = vrot.lane.b32.xlu0 %v15158_v38, %s12435_s17 }
 0x36a   :  { %6685 = vmatprep.subr.mxu1 %v6553_v18  ;;  %v15203_v31 = vsel %vm4144_vm1, %v18990_v58, %v4160_v61  ;;  %vm19050_vm1 = vcmp.lt.s32.totalorder %v12698_v26, 32 }
 0x36b   :  { %5425 = vst [vmem:[#allocation2 + $0x1f0] sm:$0x38] %v5393_v8  ;;  %5297 = vst [vmem:[#allocation2 + $0x28] sm:$0x7] %v5281_v1  ;;  %6686 = vmatpush1.msra.mxu1 %v6552_v53  ;;  %v4397_v33 = vpop.permute.xlu1 %4396  ;;  %v15188_v23 = vpop.permute.xlu0 %5318 }
 0x36c   :  { %v4438_v32 = vsel %vm18828_vm13, %v14931_v62, %v4397_v33  ;;  %v5354_v5 = vsel %vm19048_vm7, %v5317_v17, %v15188_v23  ;;  %vm19051_vm7 = vmmov %vm19049_vm4 }
 0x36d   :  { %v4443_v59 = vmul.f32 %v19034_v12, %v4438_v32  ;;  %v5394_v13 = vrot.slane %v5354_v5, 5  ;;  %4273 = vrot.lane.b32.xlu1 %v15086_v56, %s12448_s27  ;;  %4192 = vrot.lane.b32.xlu0 %v15086_v56, %s12449_s28 }
 0x36f   :  { %v4475_v21 = vrot.slane %v4443_v59, 2  ;;  %5426 = vst [vmem:[#allocation2 + $0x28] sm:$0x38] %v5394_v13  ;;  %v4542_v16 = vpop.permute.xlu1 %4541  ;;  %v15205_v62 = vpop.permute.xlu0 %4398 }
 0x370   :  { %v4583_v17 = vsel %vm18826_vm5, %v14942_v19, %v4542_v16  ;;  %v4437_v12 = vsel %vm18828_vm13, %v4397_v33, %v15205_v62  ;;  %vm19068_vm13 = vcmp.lt.s32.totalorder %v12698_v26, 62 }
 0x371   :  { %4507 = vst [vmem:[#allocation2 + $0xe8] ss:$-212 sps:$4 sm:$0xc1] %v4475_v21   ;;  %v4652_v8 = vmul.f32 %v15036_v24, %v4583_v17  ;;  %v4444_v1 = vmul.f32 %v19035_v41, %v4437_v12  ;;  %6328 = vrot.lane.b32.xlu1 %v15203_v31, %s12435_s17  ;;  %6151 = vrot.lane.b32.xlu0 %v15203_v31, %s12436_s18 }
 0x373   :  { %v4684_v58 = vrot.slane %v4652_v8, 7  ;;  %v4476_v18 = vrot.slane %v4444_v1, 2  ;;  %v4735_v53 = vpop.permute.xlu1 %4734  ;;  %v15219_v61 = vpop.permute.xlu0 %4543 }
 0x374   :  { %v4776_v19 = vsel %vm18825_vm3, %v14952_v11, %v4735_v53  ;;  %v4582_v33 = vsel %vm18826_vm5, %v4542_v16, %v15219_v61  ;;  %v6536_v16 = vld [vmem:[#allocation2 + $0x1f0] sm:$0xff]  ;;  %vm19063_vm5 = vcmp.lt.s32.totalorder %v12698_v26, 63 }
 0x375   :  { %4716 = vst [vmem:[#allocation2 + $0xe8] sm:$0xe] %v4684_v58  ;;  %4508 = vst [vmem:[#allocation2 + $0x68] ss:$-28 sps:$4 sm:$0xc1] %v4476_v18   ;;  %v4781_v41 = vmul.f32 %v19045_v37, %v4776_v19  ;;  %v4653_v32 = vmul.f32 %v15039_v15, %v4582_v33  ;;  %5463 = vrot.lane.b32.xlu1 %v15155_v14, %s12437_s1  ;;  %5461 = vrot.lane.b32.xlu0 %v15158_v38, %s12437_s1  ;;  %v6521_v58 = vld [vmem:[#allocation2 + $0x208] sm:$0xff] }
 0x376   :  { %v6537_v5 = vld [vmem:[#allocation2 + $0x28] sm:$0xff] }
 0x377   :  { %v4813_v59 = vrot.slane %v4781_v41, 4  ;;  %v4685_v13 = vrot.slane %v4653_v32, 7  ;;  %v4187_v11 = vpop.permute.xlu1 %4186  ;;  %v15233_v21 = vpop.permute.xlu0 %4736  ;;  %6687 = vmatprep.subr.mxu1 %v6537_v5 }
 0x378   :  { %v4228_v17 = vsel %vm19049_vm4, %v15006_v50, %v4187_v11  ;;  %v4775_v12 = vsel %vm18825_vm3, %v4735_v53, %v15233_v21  ;;  %6688 = vmatpush1.msra.mxu1 %v6536_v16  ;;  %v6520_v50 = vld [vmem:[#allocation2 + $0x188] sm:$0xff] }
 0x379   :  { %4845 = vst [vmem:[#allocation2 + $0xe8] sm:$0x70] %v4813_v59  ;;  %4717 = vst [vmem:[#allocation2 + $0x68] sm:$0xe] %v4685_v13  ;;  %v4233_v8 = vmul.f32 %v19045_v37, %v4228_v17  ;;  %v4782_v1 = vmul.f32 %v19046_v35, %v4775_v12  ;;  %5608 = vrot.lane.b32.xlu1 %v15155_v14, %s12438_s2  ;;  %5606 = vrot.lane.b32.xlu0 %v15158_v38, %s12438_s2 }
 0x37a   :  { %6689 = vmatprep.subr.mxu1 %v6521_v58 }
 0x37b   :  { %4249 = vst [vmem:[#allocation2 + $0x10] sm:$0x7] %v4233_v8  ;;  %v4814_v18 = vrot.slane %v4782_v1, 4  ;;  %6690 = vmatpush1.msra.mxu1 %v6520_v50  ;;  %v4268_v53 = vpop.permute.xlu1 %4267  ;;  %v15247_v19 = vpop.permute.xlu0 %4188  ;;  %v19060_v1 = vld [vmem:[#allocation16_spill] sm:$0xff] }
 0x37c   :  { %v4309_v37 = vsel %vm19050_vm1, %v15004_v27, %v4268_v53  ;;  %v4227_v33 = vsel %vm19051_vm7, %v4187_v11, %v15247_v19  ;;  %v19053_v27 = vld [vmem:[#allocation8_spill] sm:$0xff]  ;;  %v19055_v11 = vmov 0  ;;  %vm19061_vm7 = vcmp.le.s32.totalorder %v19060_v1, 30 }
 0x37d   :  { %4846 = vst [vmem:[#allocation2 + $0x68] sm:$0x70] %v4814_v18  ;;  %v4346_v41 = vrot.slane %v4309_v37, 5  ;;  %v4234_v32 = vmul.f32 %v19046_v35, %v4227_v33  ;;  %5785 = vrot.lane.b32.xlu1 %v15155_v14, %s12439_s0  ;;  %5783 = vrot.lane.b32.xlu0 %v15158_v38, %s12439_s0  ;;  %v19054_v13 = vand.u32 1023, %v19053_v27  ;;  %vm4593_vm3 = vcmp.le.s32.totalorder %v19060_v1, 29 }
 0x37f   :  { %4378 = vst [vmem:[#allocation2 + $0x10] sm:$0x38] %v4346_v41  ;;  %4250 = vst [vmem:[#allocation2 + $0x48] sm:$0x7] %v4234_v32  ;;  %v15260_v5 = vpop.permute.xlu1 %5968  ;;  %v15262_v59 = vpop.permute.xlu0 %4269  ;;  %vm15266_vm4 = vcmp.lt.s32.totalorder %v19054_v13, 960 }
 0x380   :  { %19052 = vst [vmem:[#allocation21_spill] sm:$0xff] %v15262_v59  ;;  %v19056_v11 = vsel %vm15266_vm4, 4294967295, %v19055_v11  ;;  %v4308_v35 = vsel %vm19050_vm1, %v4268_v53, %v15262_v59  ;;  %v15280_v17 = vsel %vm15266_vm4, 1.0, %v19013_v22  ;;  %vm6187_vm1 = vmand %vm15266_vm4, %vm19061_vm7  ;;  %v6504_v53 = vld [vmem:[#allocation2 + $0xe8] sm:$0xff] }
 0x381   :  { %19057 = vst [vmem:[#allocation19_spill] sm:$0xff] %v19056_v11  ;;  %v4347_v16 = vrot.slane %v4308_v35, 5  ;;  %5978 = vrot.lane.b32.xlu1 %v15155_v14, %s12440_s19  ;;  %5976 = vrot.lane.b32.xlu0 %v15158_v38, %s12440_s19  ;;  %19058 = vst [vmem:[#allocation20_spill] sm:$0xff] %v15280_v17  ;;  %v11423_v37 = vsel %vm6187_vm1, 1.0, %v19013_v22  ;;  %vm19067_vm1 = vcmp.lt.s32.totalorder %v12698_v26, 63 }
 0x382   :  { %vm6364_vm7 = vmand %vm15266_vm4, %vm4593_vm3 }
 0x383   :  { %4379 = vst [vmem:[#allocation2 + $0x48] sm:$0x38] %v4347_v16  ;;  %v6146_v12 = vpop.permute.xlu1 %6145  ;;  %v15282_v8 = vpop.permute.xlu0 %5970  ;;  %v15313_v35 = vsel %vm6364_vm7, 1.0, %v19013_v22  ;;  %vm5640_vm7 = vmand %vm13090_vm0, %vm4593_vm3  ;;  %vm19075_vm0 = vcmp.ge.s32.totalorder %v19060_v1, 1 }
 0x384   :  { %19059 = vst [vmem:[#allocation8_spill] sm:$0xff] %v15282_v8  ;;  %v5994_v58 = vsel %vm5986_vm11, %v15260_v5, %v15282_v8  ;;  %v6505_v50 = vld [vmem:[#allocation2 + $0x68] sm:$0xff]  ;;  %19064 = vst [vmem:[#allocation77_spill] sm:$0xff] %v15313_v35 }
 0x385   :  { %v6042_v18 = vmul.f32 %v15280_v17, %v5994_v58  ;;  %5604 = vrot.lane.b32.xlu1 %v15203_v31, %s12438_s2  ;;  %5459 = vrot.lane.b32.xlu0 %v15203_v31, %s12437_s1  ;;  %v19066_v17 = vld [vmem:[#allocation15_spill] sm:$0xff] }
 0x386   :  { %6691 = vmatprep.subr.mxu1 %v6505_v50 }
 0x387   :  { %v6074_v33 = vrot.slane %v6042_v18, 1  ;;  %6692 = vmatpush1.msra.mxu1 %v6504_v53  ;;  %v6323_v41 = vpop.permute.xlu1 %6322  ;;  %v15299_v32 = vpop.permute.xlu0 %6147  ;;  %v6488_v53 = vld [vmem:[#allocation2 + $0x10] sm:$0xff] }
 0x388   :  { %19062 = vst [vmem:[#allocation76_spill] sm:$0xff] %v15299_v32  ;;  %v6171_v27 = vsel %vm19063_vm5, %v6146_v12, %v15299_v32  ;;  %vm4592_vm5 = vcmp.le.s32.totalorder %v19066_v17, 29 }
 0x389   :  { %6106 = vst [vmem:[#allocation2 + $0x2e8] ss:$12 sps:$4 sm:$0x83] %v6074_v33   ;;  %v6235_v13 = vmul.f32 %v11423_v37, %v6171_v27  ;;  %5974 = vrot.lane.b32.xlu1 %v15203_v31, %s12440_s19  ;;  %5781 = vrot.lane.b32.xlu0 %v15203_v31, %s12439_s0  ;;  %v4886_v27 = vrot.slane %v15158_v38, 1 }
 0x38a   :  { %v6489_v16 = vld [vmem:[#allocation2 + $0x48] sm:$0xff] }
 0x38b   :  { %v6267_v58 = vrot.slane %v6235_v13, 6  ;;  %v15315_v50 = vpop.permute.xlu1 %6143  ;;  %v15317_v18 = vpop.permute.xlu0 %6324  ;;  %6693 = vmatprep.subr.mxu1 %v6489_v16  ;;  %v19069_v13 = vld [vmem:[#allocation53_spill] sm:$0xff]  ;;  %4934 = vst [vmem:[#allocation2 + $0xb8] ss:$124 sps:$4 sm:$0x83] %v4886_v27  }
 0x38c   :  { %19065 = vst [vmem:[#allocation78_spill] sm:$0xff] %v15317_v18  ;;  %v6172_v37 = vsel %vm19067_vm1, %v15315_v50, %v6146_v12  ;;  %v6348_v33 = vsel %vm19068_vm13, %v6323_v41, %v15317_v18  ;;  %6694 = vmatpush1.msra.mxu1 %v6488_v53  ;;  %v15334_v12 = vsel %vm4592_vm5, 1.0, %v19013_v22  ;;  %vm5833_vm5 = vmand %vm15266_vm4, %vm19075_vm0  ;;  %vm19076_vm1 = vcmp.lt.s32.totalorder %v12698_v26, 94 }
 0x38d   :  { %6299 = vst [vmem:[#allocation2 + $0x2e8] sm:$0x1c] %v6267_v58  ;;  %v6234_v15 = vmul.f32 %v19069_v13, %v6172_v37  ;;  %v6412_v24 = vmul.f32 %v15313_v35, %v6348_v33  ;;  %6318 = vrot.lane.b32.xlu1 %v15086_v56, %s12435_s17  ;;  %6141 = vrot.lane.b32.xlu0 %v15086_v56, %s12436_s18  ;;  %19070 = vst [vmem:[#allocation53_spill] sm:$0xff] %v15334_v12 }
 0x38e   :  { %11449 = vmatmul.mubr.msk.f32.vlgmr.msra.gmra.mxu1 %vm6588_vm8, %v15105_v42 }
 0x38f   :  { %v6266_v16 = vrot.slane %v6234_v15, 6  ;;  %v6444_v53 = vrot.slane %v6412_v24, 3  ;;  %v5454_v58 = vpop.permute.xlu1 %5453  ;;  %v15338_v17 = vpop.permute.xlu0 %6320  ;;  %6869 = vmatprep.mubr.f32.mxu1 %v19013_v22 }
 0x390   :  { %v6349_v37 = vsel %vm19068_vm13, %v15338_v17, %v6323_v41  ;;  %vm19078_vm13 = vmmov %vm19076_vm1 }
 0x391   :  { %6298 = vst [vmem:[#allocation2 + $0x1d8] sm:$0x1c] %v6266_v16  ;;  %6476 = vst [vmem:[#allocation2 + $0x2e8] sm:$0xe0] %v6444_v53  ;;  %v6411_v33 = vmul.f32 %v15334_v12, %v6349_v37  ;;  %4963 = vrot.lane.b32.xlu1 %v15155_v14, %s12441_s20  ;;  %4961 = vrot.lane.b32.xlu0 %v15158_v38, %s12441_s20  ;;  %v19073_v16 = vld [vmem:[#allocation73_spill] sm:$0xff]  ;;  %v11389_v37 = vsel %vm5640_vm7, 1.0, %v19013_v22 }
 0x392   :  { %vm19081_vm7 = vcmp.lt.s32.totalorder %v12698_v26, 96 }
 0x393   :  { %v6443_v24 = vrot.slane %v6411_v33, 3  ;;  %v5599_v15 = vpop.permute.xlu1 %5598  ;;  %v15349_v27 = vpop.permute.xlu0 %5455  ;;  %vm19089_vm0 = vmmov %vm19081_vm7 }
 0x394   :  { %19071 = vst [vmem:[#allocation79_spill] sm:$0xff] %v15349_v27  ;;  %v5479_v41 = vsel %vm3263_vm10, %v5454_v58, %v15349_v27 }
 0x395   :  { %6475 = vst [vmem:[#allocation2 + $0x1d8] sm:$0xe0] %v6443_v24  ;;  %v5495_v53 = vmul.f32 %v19073_v16, %v5479_v41  ;;  %5092 = vrot.lane.b32.xlu1 %v15155_v14, %s12442_s21  ;;  %5090 = vrot.lane.b32.xlu0 %v15158_v38, %s12442_s21  ;;  %v4885_v41 = vrot.slane %v15203_v31, 1 }
 0x397   :  { %v5527_v33 = vrot.slane %v5495_v53, 2  ;;  %v5776_v40 = vpop.permute.xlu1 %5775  ;;  %v15364_v8 = vpop.permute.xlu0 %5600  ;;  %v11405_v53 = vsel %vm5833_vm5, 1.0, %v19013_v22  ;;  %4933 = vst [vmem:[#allocation2 + $0x100] ss:$316 sps:$4 sm:$0x83] %v4885_v41   ;;  %vm19091_vm5 = vcmp.lt.s32.totalorder %v12698_v26, 31 }
 0x398   :  { %19074 = vst [vmem:[#allocation67_spill] sm:$0xff] %v15364_v8  ;;  %v5624_v35 = vsel %vm19076_vm1, %v5599_v15, %v15364_v8  ;;  %v6573_v24 = vld [vmem:[#allocation2 + $0x2e8] sm:$0xff]  ;;  %vm19093_vm1 = vcmp.lt.s32.totalorder %v12698_v26, 30 }
 0x399   :  { %5559 = vst [vmem:[#allocation2 + $0x2f0] ss:$-300 sps:$4 sm:$0xc1] %v5527_v33   ;;  %v5688_v16 = vmul.f32 %v11389_v37, %v5624_v35  ;;  %5253 = vrot.lane.b32.xlu1 %v15155_v14, %s12443_s22  ;;  %5251 = vrot.lane.b32.xlu0 %v15158_v38, %s12443_s22 }
 0x39a   :  { %6825 = vmatprep.subr.mxu1 %v6573_v24 }
 0x39b   :  { %v5720_v11 = vrot.slane %v5688_v16, 7  ;;  %v15379_v27 = vpop.permute.xlu1 %5451  ;;  %v15381_v32 = vpop.permute.xlu0 %5777 }
 0x39c   :  { %19077 = vst [vmem:[#allocation73_spill] sm:$0xff] %v15381_v32  ;;  %v5480_v33 = vsel %vm3263_vm10, %v15379_v27, %v5454_v58  ;;  %v5801_v37 = vsel %vm5793_vm2, %v5776_v40, %v15381_v32 }
 0x39d   :  { %5752 = vst [vmem:[#allocation2 + $0x2f0] sm:$0xe] %v5720_v11  ;;  %v5494_v35 = vmul.f32 %v19069_v13, %v5480_v33  ;;  %v5881_v24 = vmul.f32 %v11405_v53, %v5801_v37  ;;  %5334 = vrot.lane.b32.xlu1 %v15155_v14, %s12444_s23  ;;  %5332 = vrot.lane.b32.xlu0 %v15158_v38, %s12444_s23  ;;  %v19079_v53 = vld [vmem:[#allocation24_spill] sm:$0xff] }
 0x39f   :  { %v5526_v41 = vrot.slane %v5494_v35, 2  ;;  %v5913_v16 = vrot.slane %v5881_v24, 4  ;;  %v15394_v8 = vpop.permute.xlu1 %5773  ;;  %v15396_v18 = vpop.permute.xlu0 %5596 }
 0x3a0   :  { %v5802_v58 = vsel %vm5793_vm2, %v15394_v8, %v5776_v40  ;;  %v5625_v11 = vsel %vm19078_vm13, %v15396_v18, %v5599_v15  ;;  %vm19095_vm13 = vmmov %vm19091_vm5 }
 0x3a1   :  { %5558 = vst [vmem:[#allocation2 + $0x2a8] ss:$-588 sps:$4 sm:$0xc1] %v5526_v41   ;;  %5945 = vst [vmem:[#allocation2 + $0x2f0] sm:$0x70] %v5913_v16  ;;  %v5880_v33 = vmul.f32 %v19079_v53, %v5802_v58  ;;  %v5687_v37 = vmul.f32 %v15334_v12, %v5625_v11  ;;  %5088 = vrot.lane.b32.xlu1 %v15203_v31, %s12442_s21  ;;  %4959 = vrot.lane.b32.xlu0 %v15203_v31, %s12441_s20 }
 0x3a3   :  { %v5912_v35 = vrot.slane %v5880_v33, 4  ;;  %v5719_v24 = vrot.slane %v5687_v37, 7  ;;  %v15410_v32 = vpop.permute.xlu1 %5324  ;;  %v15412_v40 = vpop.permute.xlu0 %5966  ;;  %v19082_v33 = vld [vmem:[#allocation69_spill] sm:$0xff] }
 0x3a4   :  { %v5995_v15 = vsel %vm5986_vm11, %v15412_v40, %v15260_v5 }
 0x3a5   :  { %5944 = vst [vmem:[#allocation2 + $0x2a8] sm:$0x70] %v5912_v35  ;;  %5751 = vst [vmem:[#allocation2 + $0x2a8] sm:$0xe] %v5719_v24  ;;  %v6073_v41 = vrot.slane %v5995_v15, 1  ;;  %5330 = vrot.lane.b32.xlu1 %v15203_v31, %s12444_s23  ;;  %5249 = vrot.lane.b32.xlu0 %v15203_v31, %s12443_s22 }
 0x3a7   :  { %6105 = vst [vmem:[#allocation2 + $0x1d8] ss:$212 sps:$4 sm:$0x83] %v6073_v41   ;;  %v4954_v16 = vpop.permute.xlu1 %4953  ;;  %v15422_v58 = vpop.permute.xlu0 %5326  ;;  %v19084_v41 = vld [vmem:[#allocation54_spill] sm:$0xff] }
 0x3a8   :  { %19080 = vst [vmem:[#allocation24_spill] sm:$0xff] %v15422_v58  ;;  %v5350_v11 = vsel %vm19081_vm7, %v15410_v32, %v15422_v58  ;;  %vm19096_vm7 = vcmp.lt.s32.totalorder %v12698_v26, 1 }
 0x3a9   :  { %v5366_v5 = vmul.f32 %v19082_v33, %v5350_v11  ;;  %5594 = vrot.lane.b32.xlu1 %v15086_v56, %s12438_s2  ;;  %5449 = vrot.lane.b32.xlu0 %v15086_v56, %s12437_s1  ;;  %v15446_v11 = vsel %vm4593_vm3, 1.0, %v19013_v22  ;;  %vm4143_vm3 = vcmp.gt.f32.partialorder %v18989_v49, 0.0 }
 0x3aa   :  { %19085 = vst [vmem:[#allocation54_spill] sm:$0xff] %v15446_v11 }
 0x3ab   :  { %v5398_v37 = vrot.slane %v5366_v5, 5  ;;  %v5083_v35 = vpop.permute.xlu1 %5082  ;;  %v15433_v24 = vpop.permute.xlu0 %4955 }
 0x3ac   :  { %19083 = vst [vmem:[#allocation69_spill] sm:$0xff] %v15433_v24  ;;  %v4979_v15 = vsel %vm2596_vm14, %v4954_v16, %v15433_v24 }
 0x3ad   :  { %5430 = vst [vmem:[#allocation2 + $0x1c0] sm:$0x38] %v5398_v37  ;;  %v4995_v55 = vmul.f32 %v19084_v41, %v4979_v15  ;;  %5964 = vrot.lane.b32.xlu1 %v15086_v56, %s12440_s19  ;;  %5771 = vrot.lane.b32.xlu0 %v15086_v56, %s12439_s0  ;;  %v6557_v37 = vld [vmem:[#allocation2 + $0x2f0] sm:$0xff] }
 0x3ae   :  { %v6572_v33 = vld [vmem:[#allocation2 + $0x1d8] sm:$0xff] }
 0x3af   :  { %v5027_v5 = vrot.slane %v4995_v55, 6  ;;  %v5244_v58 = vpop.permute.xlu1 %5243  ;;  %v15448_v60 = vpop.permute.xlu0 %5084  ;;  %6826 = vmatpush1.msra.mxu1 %v6572_v33  ;;  %v6556_v55 = vld [vmem:[#allocation2 + $0x2a8] sm:$0xff] }
 0x3b0   :  { %19086 = vst [vmem:[#allocation80_spill] sm:$0xff] %v15448_v60  ;;  %v5108_v15 = vsel %vm5100_vm9, %v5083_v35, %v15448_v60  ;;  %6827 = vmatprep.subr.mxu1 %v6557_v37  ;;  %v19088_v60 = vld [vmem:[#allocation70_spill] sm:$0xff] }
 0x3b1   :  { %5059 = vst [vmem:[#allocation2 + $0x250] sm:$0x1c] %v5027_v5  ;;  %v5156_v24 = vmul.f32 %v15446_v11, %v5108_v15  ;;  %4414 = vrot.lane.b32.xlu1 %v15158_v38, %s12445_s24  ;;  %4412 = vrot.lane.b32.xlu0 %v15203_v31, %s12445_s24 }
 0x3b2   :  { %6828 = vmatpush1.msra.mxu1 %v6556_v55 }
 0x3b3   :  { %v5188_v1 = vrot.slane %v5156_v24, 3  ;;  %v15458_v4 = vpop.permute.xlu1 %4951  ;;  %v15460_v33 = vpop.permute.xlu0 %5245  ;;  %v4159_v24 = vmul.f32 0.01, %v18989_v49 }
 0x3b4   :  { %19087 = vst [vmem:[#allocation81_spill] sm:$0xff] %v15460_v33  ;;  %v4980_v37 = vsel %vm2596_vm14, %v15458_v4, %v4954_v16  ;;  %v5269_v5 = vsel %vm2829_vm15, %v5244_v58, %v15460_v33 }
 0x3b5   :  { %5220 = vst [vmem:[#allocation2 + $0x250] sm:$0xe0] %v5188_v1  ;;  %v4994_v15 = vmul.f32 %v19069_v13, %v4980_v37  ;;  %v5285_v10 = vmul.f32 %v19088_v60, %v5269_v5  ;;  %4559 = vrot.lane.b32.xlu1 %v15158_v38, %s12446_s25  ;;  %4557 = vrot.lane.b32.xlu0 %v15203_v31, %s12446_s25 }
 0x3b7   :  { %v5026_v55 = vrot.slane %v4994_v15, 6  ;;  %5301 = vst [vmem:[#allocation2 + $0x1c0] sm:$0x7] %v5285_v10  ;;  %v15475_v16 = vpop.permute.xlu1 %5241  ;;  %v15477_v57 = vpop.permute.xlu0 %5080  ;;  %v15493_v10 = vsel %vm4143_vm3, %v18989_v49, %v4159_v24  ;;  %vm19098_vm3 = vmmov %vm19096_vm7 }
 0x3b8   :  { %v5270_v60 = vsel %vm2829_vm15, %v15475_v16, %v5244_v58  ;;  %v5109_v1 = vsel %vm5100_vm9, %v15477_v57, %v5083_v35 }
 0x3b9   :  { %5058 = vst [vmem:[#allocation2 + $0x218] sm:$0x1c] %v5026_v55  ;;  %v5284_v37 = vmul.f32 %v19079_v53, %v5270_v60  ;;  %v5155_v5 = vmul.f32 %v15334_v12, %v5109_v1  ;;  %4752 = vrot.lane.b32.xlu1 %v15158_v38, %s12447_s26  ;;  %4750 = vrot.lane.b32.xlu0 %v15203_v31, %s12447_s26  ;;  %v4880_v55 = vrot.slane %v15086_v56, 1  ;;  %v4879_v60 = vrot.slane %v14689_v45, 1 }
 0x3bb   :  { %5300 = vst [vmem:[#allocation2 + $0x58] sm:$0x7] %v5284_v37  ;;  %v5187_v58 = vrot.slane %v5155_v5, 3  ;;  %v4405_v15 = vpop.permute.xlu1 %4404  ;;  %v15495_v33 = vpop.permute.xlu0 %5322  ;;  %4928 = vst [vmem:[#allocation2 + $0x190] ss:$-228 sps:$4 sm:$0x83] %v4880_v55  }
 0x3bc   :  { %v5351_v35 = vsel %vm19089_vm0, %v15495_v33, %v15410_v32  ;;  %4927 = vst [vmem:[#allocation2 + $0x38] ss:$500 sps:$4 sm:$0x83] %v4879_v60   ;;  %vm19099_vm0 = vmmov %vm19093_vm1 }
 0x3bd   :  { %5219 = vst [vmem:[#allocation2 + $0x218] sm:$0xe0] %v5187_v58  ;;  %v5397_v1 = vrot.slane %v5351_v35, 5  ;;  %4555 = vrot.lane.b32.xlu1 %v15493_v10, %s12446_s25  ;;  %4410 = vrot.lane.b32.xlu0 %v15493_v10, %s12445_s24 }
 0x3be   :  { %v6541_v49 = vld [vmem:[#allocation2 + $0x1c0] sm:$0xff] }
 0x3bf   :  { %5429 = vst [vmem:[#allocation2 + $0x58] sm:$0x38] %v5397_v1  ;;  %v4550_v24 = vpop.permute.xlu1 %4549  ;;  %v15507_v37 = vpop.permute.xlu0 %4406  ;;  %6829 = vmatprep.subr.mxu1 %v6541_v49 }
 0x3c0   :  { %19090 = vst [vmem:[#allocation70_spill] sm:$0xff] %v15507_v37  ;;  %v4433_v32 = vsel %vm19091_vm5, %v4405_v15, %v15507_v37  ;;  %v6525_v37 = vld [vmem:[#allocation2 + $0x250] sm:$0xff]  ;;  %vm19101_vm5 = vcmp.lt.s32.totalorder %v12698_v26, 33 }
 0x3c1   :  { %v4448_v5 = vmul.f32 %v19084_v41, %v4433_v32  ;;  %4949 = vrot.lane.b32.xlu1 %v15086_v56, %s12441_s20  ;;  %4748 = vrot.lane.b32.xlu0 %v15493_v10, %s12447_s26 }
 0x3c3   :  { %v4480_v58 = vrot.slane %v4448_v5, 2  ;;  %v4743_v35 = vpop.permute.xlu1 %4742  ;;  %v15517_v55 = vpop.permute.xlu0 %4551 }
 0x3c4   :  { %19092 = vst [vmem:[#allocation82_spill] sm:$0xff] %v15517_v55  ;;  %v4578_v60 = vsel %vm19093_vm1, %v4550_v24, %v15517_v55  ;;  %v19097_v55 = vld [vmem:[#allocation25_spill] sm:$0xff]  ;;  %vm19103_vm1 = vcmp.lt.s32.totalorder %v12698_v26, 32 }
 0x3c5   :  { %4512 = vst [vmem:[#allocation2 + $0x1b0] ss:$-308 sps:$4 sm:$0xc1] %v4480_v58   ;;  %v4657_v1 = vmul.f32 %v15446_v11, %v4578_v60  ;;  %5239 = vrot.lane.b32.xlu1 %v15086_v56, %s12443_s22  ;;  %5078 = vrot.lane.b32.xlu0 %v15086_v56, %s12442_s21 }
 0x3c6   :  { %v6540_v41 = vld [vmem:[#allocation2 + $0x58] sm:$0xff] }
 0x3c7   :  { %v4689_v49 = vrot.slane %v4657_v1, 7  ;;  %v15527_v32 = vpop.permute.xlu1 %4402  ;;  %v15529_v5 = vpop.permute.xlu0 %4744  ;;  %6830 = vmatpush1.msra.mxu1 %v6540_v41  ;;  %v6524_v41 = vld [vmem:[#allocation2 + $0x218] sm:$0xff] }
 0x3c8   :  { %19094 = vst [vmem:[#allocation83_spill] sm:$0xff] %v15529_v5  ;;  %v4434_v58 = vsel %vm19095_vm13, %v15527_v32, %v4405_v15  ;;  %v4771_v60 = vsel %vm19096_vm7, %v4743_v35, %v15529_v5  ;;  %6831 = vmatprep.subr.mxu1 %v6525_v37  ;;  %vm19106_vm7 = vcmp.lt.s32.totalorder %v12698_v26, 63 }
 0x3c9   :  { %4721 = vst [vmem:[#allocation2 + $0x1b0] sm:$0xe] %v4689_v49  ;;  %v4447_v11 = vmul.f32 %v19069_v13, %v4434_v58  ;;  %v4786_v1 = vmul.f32 %v19097_v55, %v4771_v60  ;;  %4202 = vrot.lane.b32.xlu1 %v15203_v31, %s12449_s28  ;;  %5320 = vrot.lane.b32.xlu0 %v15086_v56, %s12444_s23 }
 0x3ca   :  { %6832 = vmatpush1.msra.mxu1 %v6524_v41 }
 0x3cb   :  { %v4479_v25 = vrot.slane %v4447_v11, 2  ;;  %v4818_v15 = vrot.slane %v4786_v1, 4  ;;  %v15543_v47 = vpop.permute.xlu1 %4740  ;;  %v15545_v59 = vpop.permute.xlu0 %4547 }
 0x3cc   :  { %v4772_v13 = vsel %vm19098_vm3, %v15543_v47, %v4743_v35  ;;  %v4579_v37 = vsel %vm19099_vm0, %v15545_v59, %v4550_v24  ;;  %vm4148_vm3 = vcmp.gt.f32.partialorder %v18992_v54, 0.0  ;;  %vm19110_vm0 = vcmp.lt.s32.totalorder %v12698_v26, 62 }
 0x3cd   :  { %4511 = vst [vmem:[#allocation2 + $0x20] ss:$220 sps:$4 sm:$0xc1] %v4479_v25   ;;  %4850 = vst [vmem:[#allocation2 + $0x1b0] sm:$0x70] %v4818_v15  ;;  %v4785_v56 = vmul.f32 %v19079_v53, %v4772_v13  ;;  %v4656_v49 = vmul.f32 %v15334_v12, %v4579_v37  ;;  %4283 = vrot.lane.b32.xlu1 %v15203_v31, %s12448_s27  ;;  %4204 = vrot.lane.b32.xlu0 %v15158_v38, %s12449_s28  ;;  %v19105_v37 = vld [vmem:[#allocation31_spill] sm:$0xff] }
 0x3ce   :  { %vm4597_vm13 = vcmp.le.s32.totalorder %v19105_v37, 29 }
 0x3cf   :  { %v4817_v11 = vrot.slane %v4785_v56, 4  ;;  %v4688_v58 = vrot.slane %v4656_v49, 7  ;;  %v15559_v60 = vpop.permute.xlu1 %4196  ;;  %v4195_v35 = vpop.permute.xlu0 %4194 }
 0x3d0   :  { %19100 = vst [vmem:[#allocation25_spill] sm:$0xff] %v15559_v60  ;;  %v4223_v25 = vsel %vm19101_vm5, %v4195_v35, %v15559_v60 }
 0x3d1   :  { %4849 = vst [vmem:[#allocation2 + $0x20] sm:$0x70] %v4817_v11  ;;  %4720 = vst [vmem:[#allocation2 + $0x20] sm:$0xe] %v4688_v58  ;;  %v4238_v24 = vmul.f32 %v19097_v55, %v4223_v25  ;;  %5984 = vrot.lane.b32.xlu1 %v14668_v20, %s12440_s19  ;;  %4285 = vrot.lane.b32.xlu0 %v15158_v38, %s12448_s27  ;;  %v19107_v11 = vld [vmem:[#allocation58_spill] sm:$0xff]  ;;  %v15590_v25 = vsel %vm4597_vm13, 1.0, %v19013_v22 }
 0x3d2   :  { %19108 = vst [vmem:[#allocation58_spill] sm:$0xff] %v15590_v25  ;;  %vm19113_vm13 = vcmp.lt.s32.totalorder %v12698_v26, 33 }
 0x3d3   :  { %4254 = vst [vmem:[#allocation2 + $0x78] sm:$0x7] %v4238_v24  ;;  %v15569_v31 = vpop.permute.xlu1 %4277  ;;  %v4276_v1 = vpop.permute.xlu0 %4275  ;;  %v4164_v24 = vmul.f32 0.01, %v18992_v54 }
 0x3d4   :  { %19102 = vst [vmem:[#allocation84_spill] sm:$0xff] %v15569_v31  ;;  %v4304_v41 = vsel %vm19103_vm1, %v4276_v1, %v15569_v31  ;;  %v6509_v15 = vld [vmem:[#allocation2 + $0x1b0] sm:$0xff] }
 0x3d5   :  { %v4351_v13 = vrot.slane %v4304_v41, 5  ;;  %6338 = vrot.lane.b32.xlu1 %v14668_v20, %s12435_s17  ;;  %6161 = vrot.lane.b32.xlu0 %v14668_v20, %s12436_s18  ;;  %v12450_v41 = vmov 0  }
 0x3d6   :  { %6833 = vmatprep.subr.mxu1 %v6509_v15  ;;  %12193 = vset.pattern.permute.xlu0 %v12450_v41 }
 0x3d7   :  { %4383 = vst [vmem:[#allocation2 + $0x78] sm:$0x38] %v4351_v13  ;;  %v15578_v55 = vpop.permute.xlu1 %6155  ;;  %v6154_v38 = vpop.permute.xlu0 %6153 }
 0x3d8   :  { %19104 = vst [vmem:[#allocation85_spill] sm:$0xff] %v15578_v55  ;;  %v6167_v56 = vsel %vm19106_vm7, %v6154_v38, %v15578_v55  ;;  %v6508_v49 = vld [vmem:[#allocation2 + $0x20] sm:$0xff]  ;;  %vm19116_vm7 = vmmov %vm19110_vm0 }
 0x3d9   :  { %v6239_v58 = vmul.f32 %v19107_v11, %v6167_v56  ;;  %4281 = vrot.lane.b32.xlu1 %v15493_v10, %s12448_s27  ;;  %4200 = vrot.lane.b32.xlu0 %v15493_v10, %s12449_s28 }
 0x3da   :  { %6834 = vmatpush1.msra.mxu1 %v6508_v49 }
 0x3db   :  { %v6271_v15 = vrot.slane %v6239_v58, 6  ;;  %v15593_v13 = vpop.permute.xlu1 %6332  ;;  %v6331_v37 = vpop.permute.xlu0 %6330  ;;  %v15605_v58 = vsel %vm4148_vm3, %v18992_v54, %v4164_v24  ;;  %vm19117_vm3 = vcmp.lt.s32.totalorder %v12698_v26, 63 }
 0x3dc   :  { %19109 = vst [vmem:[#allocation86_spill] sm:$0xff] %v15593_v13  ;;  %v6344_v56 = vsel %vm19110_vm0, %v6331_v37, %v15593_v13  ;;  %v19112_v13 = vld [vmem:[#allocation30_spill] sm:$0xff]  ;;  %vm19121_vm0 = vcmp.lt.s32.totalorder %v12698_v26, 94 }
 0x3dd   :  { %6303 = vst [vmem:[#allocation2 + $0x110] sm:$0x1c] %v6271_v15  ;;  %v6416_v49 = vmul.f32 %v15590_v25, %v6344_v56  ;;  %4545 = vrot.lane.b32.xlu1 %v14689_v45, %s12446_s25  ;;  %4400 = vrot.lane.b32.xlu0 %v14689_v45, %s12445_s24  ;;  %vm4596_vm5 = vcmp.le.s32.totalorder %v19112_v13, 29 }
 0x3de   :  { %v6493_v41 = vld [vmem:[#allocation2 + $0x78] sm:$0xff]  ;;  %v15624_v24 = vsel %vm4596_vm5, 1.0, %v19013_v22  ;;  %vm19126_vm5 = vmmov %vm19121_vm0 }
 0x3df   :  { %v6448_v12 = vrot.slane %v6416_v49, 3  ;;  %v15607_v60 = vpop.permute.xlu1 %4273  ;;  %v15609_v55 = vpop.permute.xlu0 %4192  ;;  %6835 = vmatprep.subr.mxu1 %v6493_v41  ;;  %v19118_v41 = vld [vmem:[#allocation57_spill] sm:$0xff] }
 0x3e0   :  { %19111 = vst [vmem:[#allocation87_spill] sm:$0xff] %v15607_v60  ;;  %v4305_v15 = vsel %vm19103_vm1, %v15607_v60, %v4276_v1  ;;  %v4224_v56 = vsel %vm19113_vm13, %v15609_v55, %v4195_v35 }
 0x3e1   :  { %6480 = vst [vmem:[#allocation2 + $0x110] sm:$0xe0] %v6448_v12  ;;  %v4350_v5 = vrot.slane %v4305_v15, 5  ;;  %v4237_v54 = vmul.f32 %v19079_v53, %v4224_v56  ;;  %6159 = vrot.lane.b32.xlu1 %v15605_v58, %s12436_s18  ;;  %4738 = vrot.lane.b32.xlu0 %v14689_v45, %s12447_s26 }
 0x3e3   :  { %4382 = vst [vmem:[#allocation2 + $0xf8] sm:$0x38] %v4350_v5  ;;  %4253 = vst [vmem:[#allocation2 + $0xf8] sm:$0x7] %v4237_v54  ;;  %v15626_v1 = vpop.permute.xlu1 %6328  ;;  %v15628_v49 = vpop.permute.xlu0 %6151 }
 0x3e4   :  { %19114 = vst [vmem:[#allocation88_spill] sm:$0xff] %v15626_v1  ;;  %19115 = vst [vmem:[#allocation89_spill] sm:$0xff] %v15628_v49  ;;  %v6345_v12 = vsel %vm19116_vm7, %v15626_v1, %v6331_v37  ;;  %v6168_v53 = vsel %vm19117_vm3, %v15628_v49, %v6154_v38  ;;  %v4890_v49 = vrot.slane %v14668_v20, 1 }
 0x3e5   :  { %v6415_v35 = vmul.f32 %v15624_v24, %v6345_v12  ;;  %v6238_v15 = vmul.f32 %v19118_v41, %v6168_v53  ;;  %5469 = vrot.lane.b32.xlu1 %v14668_v20, %s12437_s1  ;;  %6336 = vrot.lane.b32.xlu0 %v15605_v58, %s12435_s17  ;;  %vm19132_vm3 = vmmov %vm19116_vm7 }
 0x3e6   :  { %4938 = vst [vmem:[#allocation2 + $0x50] ss:$348 sps:$4 sm:$0x83] %v4890_v49  }
 0x3e7   :  { %v6447_v5 = vrot.slane %v6415_v35, 3  ;;  %v6270_v56 = vrot.slane %v6238_v15, 6  ;;  %v15642_v54 = vpop.permute.xlu1 %5463  ;;  %v5462_v13 = vpop.permute.xlu0 %5461 }
 0x3e8   :  { %19119 = vst [vmem:[#allocation57_spill] sm:$0xff] %v15642_v54  ;;  %v5475_v37 = vsel %vm3263_vm10, %v5462_v13, %v15642_v54 }
 0x3e9   :  { %6479 = vst [vmem:[#allocation2 + $0x88] sm:$0xe0] %v6447_v5  ;;  %6302 = vst [vmem:[#allocation2 + $0x88] sm:$0x1c] %v6270_v56  ;;  %v5499_v38 = vmul.f32 %v19107_v11, %v5475_v37  ;;  %5791 = vrot.lane.b32.xlu1 %v14668_v20, %s12439_s0  ;;  %5614 = vrot.lane.b32.xlu0 %v14668_v20, %s12438_s2 }
 0x3ea   :  { %v6492_v12 = vld [vmem:[#allocation2 + $0xf8] sm:$0xff] }
 0x3eb   :  { %v5531_v53 = vrot.slane %v5499_v38, 2  ;;  %v15652_v35 = vpop.permute.xlu1 %5608  ;;  %v5607_v15 = vpop.permute.xlu0 %5606  ;;  %6836 = vmatpush1.msra.mxu1 %v6492_v12 }
 0x3ec   :  { %19120 = vst [vmem:[#allocation90_spill] sm:$0xff] %v15652_v35  ;;  %v5620_v54 = vsel %vm19121_vm0, %v5607_v15, %v15652_v35  ;;  %11451 = vmatmul.mubr.msk.f32.vlgmr.msra.gmra.mxu1 %vm6588_vm8, %v15105_v42  ;;  %v19123_v42 = vld [vmem:[#allocation40_spill] sm:$0xff]  ;;  %vm19133_vm0 = vcmp.lt.s32.totalorder %v12698_v26, 63 }
 0x3ed   :  { %5563 = vst [vmem:[#allocation2 + $0x1d0] ss:$-172 sps:$4 sm:$0xc1] %v5531_v53   ;;  %v5692_v5 = vmul.f32 %v15590_v25, %v5620_v54  ;;  %5612 = vrot.lane.b32.xlu1 %v15605_v58, %s12438_s2  ;;  %5467 = vrot.lane.b32.xlu0 %v15605_v58, %s12437_s1 }
 0x3ee   :  { %7011 = vmatprep.mubr.f32.mxu1 %v19013_v22 }
 0x3ef   :  { %v5724_v56 = vrot.slane %v5692_v5, 7  ;;  %v15665_v37 = vpop.permute.xlu1 %5785  ;;  %v5784_v38 = vpop.permute.xlu0 %5783 }
 0x3f0   :  { %19122 = vst [vmem:[#allocation91_spill] sm:$0xff] %v15665_v37  ;;  %v5797_v12 = vsel %vm5793_vm2, %v5784_v38, %v15665_v37 }
 0x3f1   :  { %5756 = vst [vmem:[#allocation2 + $0x1d0] sm:$0xe] %v5724_v56  ;;  %v5885_v53 = vmul.f32 %v19123_v42, %v5797_v12  ;;  %5982 = vrot.lane.b32.xlu1 %v15605_v58, %s12440_s19  ;;  %5789 = vrot.lane.b32.xlu0 %v15605_v58, %s12439_s0 }
 0x3f3   :  { %v5917_v54 = vrot.slane %v5885_v53, 4  ;;  %v15675_v35 = vpop.permute.xlu1 %5978  ;;  %v5977_v5 = vpop.permute.xlu0 %5976 }
 0x3f4   :  { %19124 = vst [vmem:[#allocation40_spill] sm:$0xff] %v15675_v35  ;;  %v5990_v31 = vsel %vm5986_vm11, %v5977_v5, %v15675_v35 }
 0x3f5   :  { %5949 = vst [vmem:[#allocation2 + $0x1d0] sm:$0x70] %v5917_v54  ;;  %v6078_v56 = vrot.slane %v5990_v31, 1  ;;  %4190 = vrot.lane.b32.xlu1 %v14689_v45, %s12449_s28  ;;  %5340 = vrot.lane.b32.xlu0 %v14668_v20, %s12444_s23 }
 0x3f7   :  { %6110 = vst [vmem:[#allocation2 + $0x110] ss:$196 sps:$4 sm:$0x83] %v6078_v56   ;;  %v15685_v12 = vpop.permute.xlu1 %5604  ;;  %v15687_v53 = vpop.permute.xlu0 %5459 }
 0x3f8   :  { %19125 = vst [vmem:[#allocation92_spill] sm:$0xff] %v15685_v12  ;;  %v5621_v35 = vsel %vm19126_vm5, %v15685_v12, %v5607_v15  ;;  %v5476_v31 = vsel %vm3263_vm10, %v15687_v53, %v5462_v13  ;;  %v19129_v15 = vld [vmem:[#allocation13_spill] sm:$0xff]  ;;  %v19130_v12 = vld [vmem:[#allocation14_spill] sm:$0xff]  ;;  %vm19134_vm5 = vmmov %vm19133_vm0 }
 0x3f9   :  { %v5691_v54 = vmul.f32 %v15624_v24, %v5621_v35  ;;  %v5498_v37 = vmul.f32 %v19118_v41, %v5476_v31  ;;  %4969 = vrot.lane.b32.xlu1 %v14668_v20, %s12441_s20  ;;  %4271 = vrot.lane.b32.xlu0 %v14689_v45, %s12448_s27  ;;  %vm4590_vm1 = vcmp.le.s32.totalorder %v19129_v15, 29  ;;  %vm4591_vm13 = vcmp.le.s32.totalorder %v19130_v12, 29  ;;  %v19135_v15 = vld [vmem:[#allocation51_spill] sm:$0xff] }
 0x3fb   :  { %v5723_v49 = vrot.slane %v5691_v54, 7  ;;  %v5530_v56 = vrot.slane %v5498_v37, 2  ;;  %v15701_v1 = vpop.permute.xlu1 %5974  ;;  %v15703_v60 = vpop.permute.xlu0 %5781  ;;  %v19131_v37 = vld [vmem:[#allocation39_spill] sm:$0xff]  ;;  %v15719_v54 = vsel %vm4590_vm1, 1.0, %v19013_v22  ;;  %vm4147_vm1 = vcmp.gt.f32.partialorder %v18995_v28, 0.0 }
 0x3fc   :  { %19127 = vst [vmem:[#allocation93_spill] sm:$0xff] %v15701_v1  ;;  %19128 = vst [vmem:[#allocation94_spill] sm:$0xff] %v15703_v60  ;;  %v5991_v13 = vsel %vm5986_vm11, %v15701_v1, %v5977_v5  ;;  %v5798_v35 = vsel %vm5793_vm2, %v15703_v60, %v5784_v38  ;;  %v15722_v5 = vsel %vm4591_vm13, 1.0, %v19013_v22  ;;  %vm19141_vm13 = vcmp.lt.s32.totalorder %v12698_v26, 96 }
 0x3fd   :  { %5755 = vst [vmem:[#allocation2 + $0x2c8] sm:$0xe] %v5723_v49  ;;  %5562 = vst [vmem:[#allocation2 + $0x2c8] ss:$-684 sps:$4 sm:$0xc1] %v5530_v56   ;;  %v6077_v45 = vrot.slane %v5991_v13, 1  ;;  %v5884_v31 = vmul.f32 %v19131_v37, %v5798_v35  ;;  %5259 = vrot.lane.b32.xlu1 %v14668_v20, %s12443_s22  ;;  %5098 = vrot.lane.b32.xlu0 %v14668_v20, %s12442_s21 }
 0x3fe   :  { %v6577_v12 = vld [vmem:[#allocation2 + $0x110] sm:$0xff] }
 0x3ff   :  { %6109 = vst [vmem:[#allocation2 + $0x88] ss:$580 sps:$4 sm:$0x83] %v6077_v45   ;;  %v5916_v38 = vrot.slane %v5884_v31, 4  ;;  %v6319_v49 = vpop.permute.xlu1 %6318  ;;  %v6142_v56 = vpop.permute.xlu0 %6141  ;;  %6967 = vmatprep.subr.mxu1 %v6577_v12 }
 0x400   :  { %v6350_v13 = vsel %vm19116_vm7, %v6319_v49, %v15338_v17  ;;  %v6351_v20 = vsel %vm19132_vm3, %v15041_v44, %v6319_v49  ;;  %v6173_v35 = vsel %vm19133_vm0, %v6142_v56, %v15315_v50  ;;  %v6174_v45 = vsel %vm19134_vm5, %v15019_v51, %v6142_v56  ;;  %v19136_v17 = vld [vmem:[#allocation52_spill] sm:$0xff]  ;;  %vm19142_vm7 = vmmov %vm19141_vm13 }
 0x401   :  { %5948 = vst [vmem:[#allocation2 + $0x2c8] sm:$0x70] %v5916_v38  ;;  %v6409_v31 = vmul.f32 %v15719_v54, %v6351_v20  ;;  %v6410_v12 = vmul.f32 %v15722_v5, %v6350_v13  ;;  %v6232_v60 = vmul.f32 %v19135_v15, %v6174_v45  ;;  %v6233_v1 = vmul.f32 %v19136_v17, %v6173_v35 }
 0x402   :  { %5096 = vrot.lane.b32.xlu1 %v15605_v58, %s12442_s21  ;;  %4967 = vrot.lane.b32.xlu0 %v15605_v58, %s12441_s20  ;;  %v4889_v44 = vrot.slane %v15605_v58, 1  ;;  %vm19143_vm3 = vcmp.lt.s32.totalorder %v12698_v26, 94  ;;  %vm19147_vm5 = vcmp.lt.s32.totalorder %v12698_v26, 31 }
 0x403   :  { %v6441_v50 = vrot.slane %v6409_v31, 3  ;;  %v6442_v49 = vrot.slane %v6410_v12, 3  ;;  %v6264_v51 = vrot.slane %v6232_v60, 6  ;;  %v6265_v38 = vrot.slane %v6233_v1, 6  ;;  %v15745_v56 = vpop.permute.xlu1 %4963  ;;  %v4962_v20 = vpop.permute.xlu0 %4961  ;;  %vm19144_vm0 = vmmov %vm19143_vm3 }
 0x404   :  { %19137 = vst [vmem:[#allocation39_spill] sm:$0xff] %v15745_v56  ;;  %v4975_v13 = vsel %vm2596_vm14, %v4962_v20, %v15745_v56  ;;  %4937 = vst [vmem:[#allocation2 + $0x210] ss:$212 sps:$4 sm:$0x83] %v4889_v44   ;;  %v4163_v1 = vmul.f32 0.01, %v18995_v28 }
 0x405   :  { %6473 = vst [vmem:[#allocation2 + $0x200] sm:$0xe0] %v6441_v50  ;;  %6474 = vst [vmem:[#allocation2 + $0xd8] sm:$0xe0] %v6442_v49  ;;  %v4999_v35 = vmul.f32 %v19107_v11, %v4975_v13  ;;  %v6561_v44 = vld [vmem:[#allocation2 + $0x1d0] sm:$0xff] }
 0x406   :  { %6296 = vst [vmem:[#allocation2 + $0x200] sm:$0x1c] %v6264_v51  ;;  %6297 = vst [vmem:[#allocation2 + $0xd8] sm:$0x1c] %v6265_v38  ;;  %5338 = vrot.lane.b32.xlu1 %v15605_v58, %s12444_s23  ;;  %5257 = vrot.lane.b32.xlu0 %v15605_v58, %s12443_s22  ;;  %v6576_v60 = vld [vmem:[#allocation2 + $0x88] sm:$0xff]  ;;  %v15768_v38 = vsel %vm4147_vm1, %v18995_v28, %v4163_v1  ;;  %vm19148_vm1 = vcmp.lt.s32.totalorder %v12698_v26, 30 }
 0x407   :  { %v5031_v45 = vrot.slane %v4999_v35, 6  ;;  %v15756_v31 = vpop.permute.xlu1 %5092  ;;  %v5091_v12 = vpop.permute.xlu0 %5090  ;;  %6968 = vmatpush1.msra.mxu1 %v6576_v60 }
 0x408   :  { %19138 = vst [vmem:[#allocation51_spill] sm:$0xff] %v15756_v31  ;;  %v5104_v50 = vsel %vm5100_vm9, %v5091_v12, %v15756_v31  ;;  %6969 = vmatprep.subr.mxu1 %v6561_v44  ;;  %v6560_v49 = vld [vmem:[#allocation2 + $0x2c8] sm:$0xff] }
 0x409   :  { %5063 = vst [vmem:[#allocation2 + $0xb8] sm:$0x1c] %v5031_v45  ;;  %v5160_v51 = vmul.f32 %v15590_v25, %v5104_v50  ;;  %6970 = vmatpush1.msra.mxu1 %v6560_v49 }
 0x40a   :  { %4565 = vrot.lane.b32.xlu1 %v15605_v58, %s12446_s25  ;;  %4420 = vrot.lane.b32.xlu0 %v15605_v58, %s12445_s24 }
 0x40b   :  { %v5192_v13 = vrot.slane %v5160_v51, 3  ;;  %v15770_v35 = vpop.permute.xlu1 %5253  ;;  %v5252_v60 = vpop.permute.xlu0 %5251 }
 0x40c   :  { %19139 = vst [vmem:[#allocation52_spill] sm:$0xff] %v15770_v35  ;;  %v5265_v45 = vsel %vm2829_vm15, %v5252_v60, %v15770_v35 }
 0x40d   :  { %5224 = vst [vmem:[#allocation2 + $0xb8] sm:$0xe0] %v5192_v13  ;;  %v5289_v44 = vmul.f32 %v19123_v42, %v5265_v45 }
 0x40e   :  { %4418 = vrot.lane.b32.xlu1 %v15768_v38, %s12445_s24  ;;  %4758 = vrot.lane.b32.xlu0 %v15605_v58, %s12447_s26 }
 0x40f   :  { %5305 = vst [vmem:[#allocation2 + $0x120] sm:$0x7] %v5289_v44  ;;  %v15780_v28 = vpop.permute.xlu1 %5334  ;;  %v5333_v1 = vpop.permute.xlu0 %5332 }
 0x410   :  { %19140 = vst [vmem:[#allocation95_spill] sm:$0xff] %v15780_v28  ;;  %v5346_v50 = vsel %vm19141_vm13, %v5333_v1, %v15780_v28  ;;  %vm19149_vm13 = vcmp.lt.s32.totalorder %v12698_v26, 1 }
 0x411   :  { %v5402_v49 = vrot.slane %v5346_v50, 5 }
 0x412   :  { %4756 = vrot.lane.b32.xlu1 %v15768_v38, %s12447_s26  ;;  %4563 = vrot.lane.b32.xlu0 %v15768_v38, %s12446_s25 }
 0x413   :  { %5434 = vst [vmem:[#allocation2 + $0x120] sm:$0x38] %v5402_v49  ;;  %v15789_v51 = vpop.permute.xlu1 %5088  ;;  %v15791_v13 = vpop.permute.xlu0 %4959 }
 0x414   :  { %v5105_v45 = vsel %vm5100_vm9, %v15789_v51, %v5091_v12  ;;  %v4976_v44 = vsel %vm2596_vm14, %v15791_v13, %v4962_v20 }
 0x415   :  { %v5159_v50 = vmul.f32 %v15624_v24, %v5105_v45  ;;  %v4998_v28 = vmul.f32 %v19118_v41, %v4976_v44 }
 0x416   :  { %4291 = vrot.lane.b32.xlu1 %v15605_v58, %s12448_s27  ;;  %4210 = vrot.lane.b32.xlu0 %v15605_v58, %s12449_s28 }
 0x417   :  { %v5191_v49 = vrot.slane %v5159_v50, 3  ;;  %v5030_v31 = vrot.slane %v4998_v28, 6  ;;  %v15805_v35 = vpop.permute.xlu1 %5330  ;;  %v15807_v56 = vpop.permute.xlu0 %5249 }
 0x418   :  { %v5347_v20 = vsel %vm19142_vm7, %v15805_v35, %v5333_v1  ;;  %v5266_v12 = vsel %vm2829_vm15, %v15807_v56, %v5252_v60  ;;  %vm19150_vm7 = vmmov %vm19148_vm1 }
 0x419   :  { %5223 = vst [vmem:[#allocation2 + $0x100] sm:$0xe0] %v5191_v49  ;;  %5062 = vst [vmem:[#allocation2 + $0x100] sm:$0x1c] %v5030_v31  ;;  %v5401_v45 = vrot.slane %v5347_v20, 5  ;;  %v5288_v44 = vmul.f32 %v19131_v37, %v5266_v12 }
 0x41a   :  { %4289 = vrot.lane.b32.xlu1 %v15768_v38, %s12448_s27  ;;  %4208 = vrot.lane.b32.xlu0 %v15768_v38, %s12449_s28  ;;  %v6545_v58 = vld [vmem:[#allocation2 + $0x120] sm:$0xff] }
 0x41b   :  { %5433 = vst [vmem:[#allocation2 + $0x18] sm:$0x38] %v5401_v45  ;;  %5304 = vst [vmem:[#allocation2 + $0x18] sm:$0x7] %v5288_v44  ;;  %v5595_v28 = vpop.permute.xlu1 %5594  ;;  %v5450_v1 = vpop.permute.xlu0 %5449  ;;  %6971 = vmatprep.subr.mxu1 %v6545_v58 }
 0x41c   :  { %v5626_v60 = vsel %vm19143_vm3, %v5595_v28, %v15396_v18  ;;  %v5627_v31 = vsel %vm19144_vm0, %v15088_v29, %v5595_v28  ;;  %v5481_v50 = vsel %vm3263_vm10, %v5450_v1, %v15379_v27  ;;  %v5482_v49 = vsel %vm3263_vm10, %v15070_v7, %v5450_v1  ;;  %vm19151_vm3 = vmmov %vm19147_vm5 }
 0x41d   :  { %v5685_v20 = vmul.f32 %v15719_v54, %v5627_v31  ;;  %v5686_v12 = vmul.f32 %v15722_v5, %v5626_v60  ;;  %v5492_v45 = vmul.f32 %v19135_v15, %v5482_v49  ;;  %v5493_v18 = vmul.f32 %v19136_v17, %v5481_v50  ;;  %vm19152_vm0 = vmmov %vm19149_vm13 }
 0x41e   :  { %6326 = vrot.lane.b32.xlu1 %v15493_v10, %s12435_s17  ;;  %6149 = vrot.lane.b32.xlu0 %v15493_v10, %s12436_s18 }
 0x41f   :  { %v5717_v29 = vrot.slane %v5685_v20, 7  ;;  %v5718_v27 = vrot.slane %v5686_v12, 7  ;;  %v5524_v44 = vrot.slane %v5492_v45, 2  ;;  %v5525_v58 = vrot.slane %v5493_v18, 2  ;;  %v5965_v28 = vpop.permute.xlu1 %5964  ;;  %v5772_v7 = vpop.permute.xlu0 %5771  ;;  %v19145_v12 = vld [vmem:[#allocation22_spill] sm:$0xff]  ;;  %v19146_v45 = vld [vmem:[#allocation23_spill] sm:$0xff] }
 0x420   :  { %v5996_v1 = vsel %vm5986_vm11, %v5965_v28, %v15412_v40  ;;  %v5997_v60 = vsel %vm5986_vm11, %v15123_v36, %v5965_v28  ;;  %v5803_v31 = vsel %vm5793_vm2, %v5772_v7, %v15394_v8  ;;  %v5804_v50 = vsel %vm5793_vm2, %v15107_v30, %v5772_v7  ;;  %v6529_v28 = vld [vmem:[#allocation2 + $0xb8] sm:$0xff] }
 0x421   :  { %5749 = vst [vmem:[#allocation2 + $0x270] sm:$0xe] %v5717_v29  ;;  %5750 = vst [vmem:[#allocation2 + $0x290] sm:$0xe] %v5718_v27  ;;  %v6071_v49 = vrot.slane %v5997_v60, 1  ;;  %v6072_v20 = vrot.slane %v5996_v1, 1  ;;  %v5878_v40 = vmul.f32 %v19145_v12, %v5804_v50  ;;  %v5879_v18 = vmul.f32 %v19146_v45, %v5803_v31 }
 0x422   :  { %5556 = vst [vmem:[#allocation2 + $0x270] ss:$-308 sps:$4 sm:$0xc1] %v5524_v44   ;;  %5557 = vst [vmem:[#allocation2 + $0x290] ss:$-452 sps:$4 sm:$0xc1] %v5525_v58   ;;  %5602 = vrot.lane.b32.xlu1 %v15493_v10, %s12438_s2  ;;  %5457 = vrot.lane.b32.xlu0 %v15493_v10, %s12437_s1 }
 0x423   :  { %v6544_v36 = vld [vmem:[#allocation2 + $0x18] sm:$0xff]  ;;  %v4884_v8 = vrot.slane %v15493_v10, 1  ;;  %v4883_v30 = vrot.slane %v14853_v46, 1  ;;  %6103 = vst [vmem:[#allocation2 + $0x200] ss:$116 sps:$4 sm:$0x83] %v6071_v49   ;;  %v15860_v44 = vpop.permute.xlu1 %4414  ;;  %v4413_v58 = vpop.permute.xlu0 %4412 }
 0x424   :  { %6104 = vst [vmem:[#allocation2 + $0xd8] ss:$444 sps:$4 sm:$0x83] %v6072_v20   ;;  %v5910_v29 = vrot.slane %v5878_v40, 4  ;;  %v5911_v27 = vrot.slane %v5879_v18, 4  ;;  %6972 = vmatpush1.msra.mxu1 %v6544_v36  ;;  %v4429_v7 = vsel %vm19147_vm5, %v4413_v58, %v15860_v44  ;;  %v6528_v1 = vld [vmem:[#allocation2 + $0x100] sm:$0xff] }
 0x425   :  { %6973 = vmatprep.subr.mxu1 %v6529_v28  ;;  %4932 = vst [vmem:[#allocation2 + $0x280] ss:$-36 sps:$4 sm:$0x83] %v4884_v8   ;;  %4931 = vst [vmem:[#allocation2 + $0x1c8] ss:$92 sps:$4 sm:$0x83] %v4883_v30   ;;  %v4452_v60 = vmul.f32 %v19107_v11, %v4429_v7 }
 0x426   :  { %5942 = vst [vmem:[#allocation2 + $0x270] sm:$0x70] %v5910_v29  ;;  %5943 = vst [vmem:[#allocation2 + $0x290] sm:$0x70] %v5911_v27  ;;  %5972 = vrot.lane.b32.xlu1 %v15493_v10, %s12440_s19  ;;  %6974 = vmatpush1.msra.mxu1 %v6528_v1  ;;  %vm19153_vm5 = vcmp.lt.s32.totalorder %v12698_v26, 96 }
 0x427   :  { %5779 = vrot.lane.b32.xlu0 %v15493_v10, %s12439_s0  ;;  %v4484_v31 = vrot.slane %v4452_v60, 2  ;;  %v15870_v50 = vpop.permute.xlu1 %4559  ;;  %v4558_v49 = vpop.permute.xlu0 %4557 }
 0x428   :  { %v4574_v20 = vsel %vm19148_vm1, %v4558_v49, %v15870_v50  ;;  %vm19154_vm1 = vmmov %vm19153_vm5 }
 0x429   :  { %4516 = vst [vmem:[#allocation2 + $0x130] ss:$396 sps:$4 sm:$0xc1] %v4484_v31   ;;  %v4661_v40 = vmul.f32 %v15590_v25, %v4574_v20  ;;  %v19230_v25 = vld [vmem:[#allocation67_spill] sm:$0xff] }
 0x42a   :  { %5086 = vrot.lane.b32.xlu1 %v15493_v10, %s12442_s21  ;;  %v6570_v18 = vld [vmem:[#allocation2 + $0x200] sm:$0xff] }
 0x42b   :  { %4957 = vrot.lane.b32.xlu0 %v15493_v10, %s12441_s20  ;;  %v6571_v11 = vld [vmem:[#allocation2 + $0xd8] sm:$0xff]  ;;  %v4693_v36 = vrot.slane %v4661_v40, 7  ;;  %v15880_v8 = vpop.permute.xlu1 %4752  ;;  %v4751_v30 = vpop.permute.xlu0 %4750 }
 0x42c   :  { %6754 = vmatprep.subr.mxu0 %v6571_v11  ;;  %v4767_v29 = vsel %vm19149_vm13, %v4751_v30, %v15880_v8 }
 0x42d   :  { %6755 = vmatpush1.msra.mxu0 %v6570_v18  ;;  %v6555_v27 = vld [vmem:[#allocation2 + $0x290] sm:$0xff]  ;;  %4725 = vst [vmem:[#allocation2 + $0x130] sm:$0xe] %v4693_v36  ;;  %v4790_v7 = vmul.f32 %v19123_v42, %v4767_v29 }
 0x42e   :  { %v6554_v28 = vld [vmem:[#allocation2 + $0x270] sm:$0xff]  ;;  %5328 = vrot.lane.b32.xlu1 %v15493_v10, %s12444_s23  ;;  %6756 = vmatprep.subr.mxu0 %v6555_v27 }
 0x42f   :  { %5247 = vrot.lane.b32.xlu0 %v15493_v10, %s12443_s22  ;;  %6757 = vmatpush1.msra.mxu0 %v6554_v28  ;;  %v4822_v1 = vrot.slane %v4790_v7, 4  ;;  %v15890_v60 = vpop.permute.xlu1 %4555  ;;  %v15892_v31 = vpop.permute.xlu0 %4410 }
 0x430   :  { %v4575_v20 = vsel %vm19150_vm7, %v15890_v60, %v4558_v49  ;;  %v4430_v40 = vsel %vm19151_vm3, %v15892_v31, %v4413_v58  ;;  %vm19160_vm3 = vcmp.lt.s32.totalorder %v12698_v26, 33 }
 0x431   :  { %4854 = vst [vmem:[#allocation2 + $0x130] sm:$0x70] %v4822_v1  ;;  %v4660_v11 = vmul.f32 %v15624_v24, %v4575_v20  ;;  %v4451_v18 = vmul.f32 %v19118_v41, %v4430_v40 }
 0x432   :  { %4553 = vrot.lane.b32.xlu1 %v14853_v46, %s12446_s25 }
 0x433   :  { %4408 = vrot.lane.b32.xlu0 %v14853_v46, %s12445_s24  ;;  %v4692_v10 = vrot.slane %v4660_v11, 7  ;;  %v4483_v36 = vrot.slane %v4451_v18, 2  ;;  %v4950_v29 = vpop.permute.xlu1 %4949  ;;  %v15906_v27 = vpop.permute.xlu0 %4748 }
 0x434   :  { %v4981_v58 = vsel %vm2596_vm14, %v4950_v29, %v15458_v4  ;;  %v4982_v49 = vsel %vm2596_vm14, %v15138_v2, %v4950_v29  ;;  %v4768_v41 = vsel %vm19152_vm0, %v15906_v27, %v4751_v30 }
 0x435   :  { %4724 = vst [vmem:[#allocation2 + $0x238] sm:$0xe] %v4692_v10  ;;  %4515 = vst [vmem:[#allocation2 + $0x238] ss:$196 sps:$4 sm:$0xc1] %v4483_v36   ;;  %v4992_v28 = vmul.f32 %v19135_v15, %v4982_v49  ;;  %v4993_v7 = vmul.f32 %v19136_v17, %v4981_v58  ;;  %v4789_v1 = vmul.f32 %v19131_v37, %v4768_v41 }
 0x436   :  { %4279 = vrot.lane.b32.xlu1 %v14853_v46, %s12448_s27 }
 0x437   :  { %4746 = vrot.lane.b32.xlu0 %v14853_v46, %s12447_s26  ;;  %v5024_v4 = vrot.slane %v4992_v28, 6  ;;  %v5025_v2 = vrot.slane %v4993_v7, 6  ;;  %v4821_v20 = vrot.slane %v4789_v1, 4  ;;  %v5240_v40 = vpop.permute.xlu1 %5239  ;;  %v5079_v11 = vpop.permute.xlu0 %5078 }
 0x438   :  { %v5271_v30 = vsel %vm2829_vm15, %v5240_v40, %v15475_v16  ;;  %v5272_v18 = vsel %vm2829_vm15, %v15174_v39, %v5240_v40  ;;  %v5110_v10 = vsel %vm5100_vm9, %v5079_v11, %v15477_v57  ;;  %v5111_v36 = vsel %vm5100_vm9, %v15160_v52, %v5079_v11  ;;  %v6513_v29 = vld [vmem:[#allocation2 + $0x130] sm:$0xff] }
 0x439   :  { %5056 = vst [vmem:[#allocation2 + $0x38] sm:$0x1c] %v5024_v4  ;;  %5057 = vst [vmem:[#allocation2 + $0x190] sm:$0x1c] %v5025_v2  ;;  %v5282_v58 = vmul.f32 %v19145_v12, %v5272_v18  ;;  %v5283_v16 = vmul.f32 %v19146_v45, %v5271_v30  ;;  %v5153_v49 = vmul.f32 %v15719_v54, %v5111_v36  ;;  %6975 = vmatprep.subr.mxu1 %v6513_v29 }
 0x43a   :  { %4853 = vst [vmem:[#allocation2 + $0x238] sm:$0x70] %v4821_v20  ;;  %v5154_v39 = vmul.f32 %v15722_v5, %v5110_v10  ;;  %6157 = vrot.lane.b32.xlu1 %v15768_v38, %s12436_s18  ;;  %v4888_v36 = vrot.slane %v15768_v38, 1  ;;  %v4887_v29 = vrot.slane %v15155_v14, 1  ;;  %s12453_s18 = smov 2  }
 0x43b   :  { %4198 = vrot.lane.b32.xlu0 %v14853_v46, %s12449_s28  ;;  %5298 = vst [vmem:[#allocation2 + $0x138] sm:$0x7] %v5282_v58  ;;  %5299 = vst [vmem:[#allocation2 + $0xc8] sm:$0x7] %v5283_v16  ;;  %v5185_v57 = vrot.slane %v5153_v49, 3  ;;  %v15944_v41 = vpop.permute.xlu1 %4202  ;;  %v5321_v28 = vpop.permute.xlu0 %5320 }
 0x43c   :  { %v5186_v52 = vrot.slane %v5154_v39, 3  ;;  %v5352_v7 = vsel %vm19153_vm5, %v5321_v28, %v15495_v33  ;;  %v5353_v1 = vsel %vm19154_vm1, %v15188_v23, %v5321_v28  ;;  %v19155_v33 = vld [vmem:[#allocation27_spill] sm:$0xff]  ;;  %4936 = vst [vmem:[#allocation2 + $0x60] ss:$60 sps:$4 sm:$0x83] %v4888_v36  }
 0x43d   :  { %5217 = vst [vmem:[#allocation2 + $0x38] sm:$0xe0] %v5185_v57  ;;  %v5395_v4 = vrot.slane %v5353_v1, 5  ;;  %v5396_v46 = vrot.slane %v5352_v7, 5  ;;  %v19156_v40 = vand.u32 1023, %v19155_v33  ;;  %v19159_v23 = vld [vmem:[#allocation35_spill] sm:$0xff] }
 0x43e   :  { %5218 = vst [vmem:[#allocation2 + $0x190] sm:$0xe0] %v5186_v52  ;;  %5465 = vrot.lane.b32.xlu1 %v15768_v38, %s12437_s1  ;;  %vm4601_vm7 = vcmp.le.s32.totalorder %v19159_v23, 29  ;;  %vm19161_vm5 = vcmp.le.s32.totalorder %v19159_v23, 30  ;;  %s12454_s1 = smov 66  }
 0x43f   :  { %6334 = vrot.lane.b32.xlu0 %v15768_v38, %s12435_s17  ;;  %5427 = vst [vmem:[#allocation2 + $0x138] sm:$0x38] %v5395_v4  ;;  %5428 = vst [vmem:[#allocation2 + $0xc8] sm:$0x38] %v5396_v46  ;;  %v4284_v2 = vpop.permute.xlu1 %4283  ;;  %v15956_v20 = vpop.permute.xlu0 %4204  ;;  %vm15960_vm13 = vcmp.lt.s32.totalorder %v19156_v40, 960 }
 0x440   :  { %v4219_v30 = vsel %vm19160_vm3, %v15944_v41, %v15956_v20  ;;  %v15979_v58 = vsel %vm15960_vm13, 1.0, %v19013_v22  ;;  %vm6372_vm0 = vmand %vm15960_vm13, %vm4601_vm7  ;;  %4935 = vst [vmem:[#allocation2 + $0x288] ss:$-300 sps:$4 sm:$0x83] %v4887_v29   ;;  %vm19162_vm3 = vcmp.lt.s32.totalorder %v12698_v26, 32 }
 0x441   :  { %v6512_v18 = vld [vmem:[#allocation2 + $0x238] sm:$0xff]  ;;  %v4242_v10 = vmul.f32 %v19123_v42, %v4219_v30  ;;  %vm6195_vm1 = vmand %vm15960_vm13, %vm19161_vm5  ;;  %v16006_v28 = vsel %vm6372_vm0, 1.0, %v19013_v22  ;;  %vm19163_vm5 = vcmp.lt.s32.totalorder %v12698_v26, 62  ;;  %vm19165_vm0 = vcmp.lt.s32.totalorder %v12698_v26, 32 }
 0x442   :  { %5787 = vrot.lane.b32.xlu1 %v15768_v38, %s12439_s0  ;;  %6976 = vmatpush1.msra.mxu1 %v6512_v18  ;;  %v11431_v1 = vsel %vm6195_vm1, 1.0, %v19013_v22  ;;  %vm19166_vm1 = vcmp.lt.s32.totalorder %v12698_v26, 33 }
 0x443   :  { %5610 = vrot.lane.b32.xlu0 %v15768_v38, %s12438_s2  ;;  %4258 = vst [vmem:[#allocation2 + $0x2b8] sm:$0x7] %v4242_v10  ;;  %v15985_v42 = vpop.permute.xlu1 %5984  ;;  %v15987_v16 = vpop.permute.xlu0 %4285 }
 0x444   :  { %v6002_v49 = vsel %vm5986_vm11, %v15985_v42, %v14836_v43  ;;  %v4300_v39 = vsel %vm19162_vm3, %v4284_v2, %v15987_v16  ;;  %vm19164_vm3 = vcmp.lt.s32.totalorder %v12698_v26, 63  ;;  %v6522_v29 = vld [vmem:[#allocation2 + $0x38] sm:$0xff] }
 0x445   :  { %v6050_v57 = vmul.f32 %v15979_v58, %v6002_v49  ;;  %v4355_v52 = vrot.slane %v4300_v39, 5  ;;  %v6523_v18 = vld [vmem:[#allocation2 + $0x190] sm:$0xff] }
 0x446   :  { %4965 = vrot.lane.b32.xlu1 %v15768_v38, %s12441_s20  ;;  %v6539_v7 = vld [vmem:[#allocation2 + $0xc8] sm:$0xff]  ;;  %v6538_v43 = vld [vmem:[#allocation2 + $0x138] sm:$0xff] }
 0x447   :  { %5980 = vrot.lane.b32.xlu0 %v15768_v38, %s12440_s19  ;;  %v6082_v4 = vrot.slane %v6050_v57, 1  ;;  %4387 = vst [vmem:[#allocation2 + $0x2b8] sm:$0x38] %v4355_v52  ;;  %v16009_v46 = vpop.permute.xlu1 %6338  ;;  %6758 = vmatprep.subr.mxu0 %v6539_v7  ;;  %v6162_v33 = vpop.permute.xlu0 %6161 }
 0x448   :  { %v6356_v40 = vsel %vm19163_vm5, %v16009_v46, %v14756_v3  ;;  %v6179_v30 = vsel %vm19164_vm3, %v6162_v33, %v14758_v9  ;;  %6759 = vmatpush1.msra.mxu0 %v6538_v43  ;;  %vm19167_vm5 = vcmp.lt.s32.totalorder %v12698_v26, 30 }
 0x449   :  { %6114 = vst [vmem:[#allocation2 + $0x118] ss:$452 sps:$4 sm:$0x83] %v6082_v4   ;;  %v6420_v10 = vmul.f32 %v16006_v28, %v6356_v40  ;;  %v6243_v36 = vmul.f32 %v11431_v1, %v6179_v30  ;;  %6760 = vmatprep.subr.mxu0 %v6523_v18  ;;  %vm19168_vm3 = vmmov %vm19167_vm5 }
 0x44a   :  { %5255 = vrot.lane.b32.xlu1 %v15768_v38, %s12443_s22  ;;  %6761 = vmatpush1.msra.mxu0 %v6522_v29 }
 0x44b   :  { %5094 = vrot.lane.b32.xlu0 %v15768_v38, %s12442_s21  ;;  %v6452_v3 = vrot.slane %v6420_v10, 3  ;;  %v6275_v49 = vrot.slane %v6243_v36, 6  ;;  %v16023_v39 = vpop.permute.xlu1 %4281  ;;  %v16025_v9 = vpop.permute.xlu0 %4200 }
 0x44c   :  { %v4301_v57 = vsel %vm19165_vm0, %v16023_v39, %v4284_v2  ;;  %v4220_v52 = vsel %vm19166_vm1, %v16025_v9, %v15944_v41  ;;  %vm19169_vm0 = vcmp.lt.s32.totalorder %v12698_v26, 31 }
 0x44d   :  { %6484 = vst [vmem:[#allocation2 + $0x118] sm:$0xe0] %v6452_v3  ;;  %6307 = vst [vmem:[#allocation2 + $0x118] sm:$0x1c] %v6275_v49  ;;  %v4354_v7 = vrot.slane %v4301_v57, 5  ;;  %v4241_v1 = vmul.f32 %v19131_v37, %v4220_v52  ;;  %v19175_v52 = vld [vmem:[#allocation61_spill] sm:$0xff] }
 0x44e   :  { %4416 = vrot.lane.b32.xlu1 %v15155_v14, %s12445_s24  ;;  %v6497_v43 = vld [vmem:[#allocation2 + $0x2b8] sm:$0xff]  ;;  %vm19170_vm1 = vmmov %vm19169_vm0 }
 0x44f   :  { %5336 = vrot.lane.b32.xlu0 %v15768_v38, %s12444_s23  ;;  %4386 = vst [vmem:[#allocation2 + $0x2f8] sm:$0x38] %v4354_v7  ;;  %4257 = vst [vmem:[#allocation2 + $0x2f8] sm:$0x7] %v4241_v1  ;;  %v4546_v2 = vpop.permute.xlu1 %4545  ;;  %v4401_v4 = vpop.permute.xlu0 %4400  ;;  %6977 = vmatprep.subr.mxu1 %v6497_v43 }
 0x450   :  { %v4580_v41 = vsel %vm19167_vm5, %v4546_v2, %v15545_v59  ;;  %v4581_v37 = vsel %vm19168_vm3, %v15219_v61, %v4546_v2  ;;  %v4435_v40 = vsel %vm19169_vm0, %v4401_v4, %v15527_v32  ;;  %v4436_v38 = vsel %vm19170_vm1, %v15205_v62, %v4401_v4  ;;  %v19171_v61 = vld [vmem:[#allocation34_spill] sm:$0xff] }
 0x451   :  { %v4654_v30 = vmul.f32 %v15719_v54, %v4581_v37  ;;  %v4655_v18 = vmul.f32 %v15722_v5, %v4580_v41  ;;  %v4445_v10 = vmul.f32 %v19135_v15, %v4436_v38  ;;  %v4446_v59 = vmul.f32 %v19136_v17, %v4435_v40  ;;  %v6582_v38 = vld [vmem:[%s18675_s4] sm:$0x7]  ;;  %s12452_s4 = smov 60  }
 0x452   :  { %4754 = vrot.lane.b32.xlu1 %v15155_v14, %s12447_s26  ;;  %vm4600_vm5 = vcmp.le.s32.totalorder %v19171_v61, 29  ;;  %vm19172_vm3 = vcmp.lt.s32.totalorder %v12698_v26, 63  ;;  %vm19173_vm0 = vcmp.lt.s32.totalorder %v12698_v26, 1  ;;  %v19228_v61 = vld [vmem:[#allocation92_spill] sm:$0xff] }
 0x453   :  { %4561 = vrot.lane.b32.xlu0 %v15155_v14, %s12446_s25  ;;  %v4686_v32 = vrot.slane %v4654_v30, 7  ;;  %v4687_v36 = vrot.slane %v4655_v18, 7  ;;  %v4477_v29 = vrot.slane %v4445_v10, 2  ;;  %v4478_v62 = vrot.slane %v4446_v59, 2  ;;  %v16060_v3 = vpop.permute.xlu1 %6159  ;;  %v4739_v49 = vpop.permute.xlu0 %4738  ;;  %vm19174_vm1 = vmmov %vm19173_vm0  ;;  %v16110_v59 = vld [vmem:[%s18674_s3] sm:$0x7] }
 0x454   :  { %v6164_v15 = vsel %vm19172_vm3, %v16060_v3, %v6162_v33  ;;  %v4773_v17 = vsel %vm19173_vm0, %v4739_v49, %v15543_v47  ;;  %v4774_v57 = vsel %vm19174_vm1, %v15233_v21, %v4739_v49  ;;  %v16081_v47 = vsel %vm4600_vm5, 1.0, %v19013_v22  ;;  %vm5648_vm5 = vmand %vm13102_vm6, %vm4601_vm7  ;;  %s12451_s3 = smov 124  }
 0x455   :  { %4718 = vst [vmem:[#allocation2 + $0x228] sm:$0xe] %v4686_v32  ;;  %4719 = vst [vmem:[#allocation2 + $0xa8] sm:$0xe] %v4687_v36  ;;  %v6242_v7 = vmul.f32 %v19175_v52, %v6164_v15  ;;  %v4783_v1 = vmul.f32 %v19145_v12, %v4774_v57  ;;  %v4784_v43 = vmul.f32 %v19146_v45, %v4773_v17  ;;  %vm19177_vm3 = vcmp.ge.s32.totalorder %v19159_v23, 1  ;;  %v19182_v32 = vld [vmem:[#allocation74_spill] sm:$0xff] }
 0x456   :  { %4509 = vst [vmem:[#allocation2 + $0x228] ss:$-500 sps:$4 sm:$0xc1] %v4477_v29   ;;  %4510 = vst [vmem:[#allocation2 + $0xa8] ss:$76 sps:$4 sm:$0xc1] %v4478_v62   ;;  %4287 = vrot.lane.b32.xlu1 %v15155_v14, %s12448_s27 }
 0x457   :  { %4206 = vrot.lane.b32.xlu0 %v15155_v14, %s12449_s28  ;;  %19176 = vst [vmem:[#allocation22_spill] sm:$0xff] %v16081_v47  ;;  %v6496_v21 = vld [vmem:[#allocation2 + $0x2f8] sm:$0xff]  ;;  %vm16087_vm0 = vmand %vm15960_vm13, %vm19177_vm3  ;;  %v6274_v2 = vrot.slane %v6242_v7, 6  ;;  %v4815_v4 = vrot.slane %v4783_v1, 4  ;;  %v4816_v41 = vrot.slane %v4784_v43, 4  ;;  %v5470_v37 = vpop.permute.xlu1 %5469  ;;  %v16091_v40 = vpop.permute.xlu0 %6336  ;;  %vm19181_vm1 = vcmp.lt.s32.totalorder %v12698_v26, 62 }
 0x458   :  { %6978 = vmatpush1.msra.mxu1 %v6496_v21  ;;  %v6581_v14 = vld [vmem:[#allocation2 + $0x118] sm:$0xff]  ;;  %v5487_v18 = vsel %vm3263_vm10, %v5470_v37, %v14817_v63  ;;  %v6341_v10 = vsel %vm19181_vm1, %v16091_v40, %v16009_v46  ;;  %v11413_v46 = vsel %vm16087_vm0, 1.0, %v19013_v22  ;;  %v11397_v29 = vsel %vm5648_vm5, 1.0, %v19013_v22 }
 0x459   :  { %7109 = vmatprep.subr.mxu1 %v6581_v14  ;;  %11453 = vmatmul.mubr.msk.f32.vlgmr.msra.gmra.mxu1 %vm6588_vm8, %v16110_v59  ;;  %6306 = vst [vmem:[#allocation2 + $0x148] sm:$0x1c] %v6274_v2  ;;  %4847 = vst [vmem:[#allocation2 + $0x228] sm:$0x70] %v4815_v4  ;;  %v5503_v36 = vmul.f32 %v19182_v32, %v5487_v18  ;;  %v6419_v63 = vmul.f32 %v16081_v47, %v6341_v10  ;;  %vm19183_vm6 = vcmp.lt.s32.totalorder %v12698_v26, 94 }
 0x45a   :  { %4848 = vst [vmem:[#allocation2 + $0xa8] sm:$0x70] %v4816_v41  ;;  %7153 = vmatprep.mubr.f32.mxu1 %v19013_v22  ;;  %vm19184_vm3 = vmmov %vm19183_vm6  ;;  %vm19186_vm0 = vcmp.lt.s32.totalorder %v12698_v26, 33  ;;  %vm19188_vm1 = vcmp.lt.s32.totalorder %v12698_v26, 96 }
 0x45b   :  { %6585 = vperm.xlu0 %12193, %v6582_v38   ;;  %v5535_v62 = vrot.slane %v5503_v36, 2  ;;  %v6451_v49 = vrot.slane %v6419_v63, 3  ;;  %v5792_v15 = vpop.permute.xlu1 %5791  ;;  %v5615_v17 = vpop.permute.xlu0 %5614  ;;  %vm19187_vm5 = vmmov %vm19186_vm0 }
 0x45c   :  { %v5809_v57 = vsel %vm5793_vm2, %v5792_v15, %v14838_v0  ;;  %v5632_v7 = vsel %vm19183_vm6, %v5615_v17, %v14815_v34  ;;  %vm19191_vm6 = vcmp.lt.s32.totalorder %v12698_v26, 32 }
 0x45d   :  { %5567 = vst [vmem:[#allocation2 + $0x2d8] ss:$-308 sps:$4 sm:$0xc1] %v5535_v62   ;;  %6483 = vst [vmem:[#allocation2 + $0x148] sm:$0xe0] %v6451_v49  ;;  %v5889_v1 = vmul.f32 %v11413_v46, %v5809_v57  ;;  %v5696_v43 = vmul.f32 %v11397_v29, %v5632_v7  ;;  %v19185_v29 = vld [vmem:[#allocation43_spill] sm:$0xff] }
 0x45f   :  { %v5921_v21 = vrot.slane %v5889_v1, 4  ;;  %v5728_v33 = vrot.slane %v5696_v43, 7  ;;  %v16127_v2 = vpop.permute.xlu1 %5612  ;;  %v16129_v4 = vpop.permute.xlu0 %5467 }
 0x460   :  { %v5617_v41 = vsel %vm19184_vm3, %v16127_v2, %v5615_v17  ;;  %v5472_v0 = vsel %vm3263_vm10, %v16129_v4, %v5470_v37  ;;  %v6506_v34 = vld [vmem:[#allocation2 + $0x228] sm:$0xff]  ;;  %vm19193_vm3 = vmmov %vm19191_vm6 }
 0x461   :  { %v6507_v14 = vld [vmem:[#allocation2 + $0xa8] sm:$0xff]  ;;  %5953 = vst [vmem:[#allocation2 + $0x2d8] sm:$0x70] %v5921_v21  ;;  %5760 = vst [vmem:[#allocation2 + $0x2d8] sm:$0xe] %v5728_v33  ;;  %v5695_v38 = vmul.f32 %v16081_v47, %v5617_v41  ;;  %v5502_v30 = vmul.f32 %v19175_v52, %v5472_v0 }
 0x462   :  { %6762 = vmatprep.subr.mxu0 %v6507_v14  ;;  %v19189_v21 = vld [vmem:[#allocation72_spill] sm:$0xff]  ;;  %v19190_v14 = vld [vmem:[#allocation87_spill] sm:$0xff] }
 0x463   :  { %6763 = vmatpush1.msra.mxu0 %v6506_v34  ;;  %v5727_v18 = vrot.slane %v5695_v38, 7  ;;  %v5534_v10 = vrot.slane %v5502_v30, 2  ;;  %v16139_v32 = vpop.permute.xlu1 %5982  ;;  %v16141_v36 = vpop.permute.xlu0 %5789  ;;  %v19192_v34 = vld [vmem:[#allocation21_spill] sm:$0xff] }
 0x464   :  { %v5987_v37 = vsel %vm5986_vm11, %v16139_v32, %v15985_v42  ;;  %v5794_v63 = vsel %vm5793_vm2, %v16141_v36, %v5792_v15 }
 0x465   :  { %5759 = vst [vmem:[#allocation2 + $0x160] sm:$0xe] %v5727_v18  ;;  %5566 = vst [vmem:[#allocation2 + $0x160] ss:$156 sps:$4 sm:$0xc1] %v5534_v10   ;;  %v6081_v46 = vrot.slane %v5987_v37, 1  ;;  %v5888_v62 = vmul.f32 %v19185_v29, %v5794_v63 }
 0x466   :  { %v16176_v10 = vsel %vm4601_vm7, 1.0, %v19013_v22  ;;  %vm19199_vm7 = vmmov %vm19188_vm1 }
 0x467   :  { %6113 = vst [vmem:[#allocation2 + $0x148] ss:$28 sps:$4 sm:$0x83] %v6081_v46   ;;  %v5920_v49 = vrot.slane %v5888_v62, 4  ;;  %v4191_v17 = vpop.permute.xlu1 %4190  ;;  %v5341_v57 = vpop.permute.xlu0 %5340  ;;  %19195 = vst [vmem:[#allocation23_spill] sm:$0xff] %v16176_v10 }
 0x468   :  { %v4225_v7 = vsel %vm19186_vm0, %v4191_v17, %v15609_v55  ;;  %v4226_v42 = vsel %vm19187_vm5, %v15247_v19, %v4191_v17  ;;  %v5358_v15 = vsel %vm19188_vm1, %v5341_v57, %v14916_v6  ;;  %v6565_v62 = vld [vmem:[#allocation2 + $0x2d8] sm:$0xff]  ;;  %vm19201_vm0 = vcmp.lt.s32.totalorder %v12698_v26, 30 }
 0x469   :  { %5952 = vst [vmem:[#allocation2 + $0x160] sm:$0x70] %v5920_v49  ;;  %v4235_v1 = vmul.f32 %v19145_v12, %v4226_v42  ;;  %v4236_v43 = vmul.f32 %v19146_v45, %v4225_v7  ;;  %v5374_v33 = vmul.f32 %v19189_v21, %v5358_v15  ;;  %v19194_v45 = vld [vmem:[#allocation62_spill] sm:$0xff]  ;;  %v19197_v7 = vld [vmem:[#allocation65_spill] sm:$0xff]  ;;  %vm19203_vm5 = vcmp.lt.s32.totalorder %v12698_v26, 31 }
 0x46a   :  { %v19196_v49 = vld [vmem:[#allocation18_spill] sm:$0xff]  ;;  %vm19204_vm1 = vmmov %vm19203_vm5 }
 0x46b   :  { %4251 = vst [vmem:[#allocation2 + $0x30] sm:$0x7] %v4235_v1  ;;  %4252 = vst [vmem:[#allocation2 + $0xf0] sm:$0x7] %v4236_v43  ;;  %v5406_v41 = vrot.slane %v5374_v33, 5  ;;  %v4970_v0 = vpop.permute.xlu1 %4969  ;;  %v4272_v55 = vpop.permute.xlu0 %4271  ;;  %v19198_v1 = vld [vmem:[#allocation71_spill] sm:$0xff] }
 0x46c   :  { %v4987_v19 = vsel %vm2596_vm14, %v4970_v0, %v14902_v48  ;;  %v4306_v6 = vsel %vm19191_vm6, %v4272_v55, %v19190_v14  ;;  %v4307_v12 = vsel %vm19193_vm3, %v19192_v34, %v4272_v55  ;;  %vm19206_vm6 = vcmp.lt.s32.totalorder %v12698_v26, 1 }
 0x46d   :  { %5438 = vst [vmem:[#allocation2 + $0x1a0] sm:$0x38] %v5406_v41  ;;  %v5003_v38 = vmul.f32 %v19194_v45, %v4987_v19  ;;  %v4348_v30 = vrot.slane %v4307_v12, 5  ;;  %v4349_v18 = vrot.slane %v4306_v6, 5  ;;  %vm19208_vm3 = vmmov %vm19206_vm6 }
 0x46e   :  { %v6580_v37 = vld [vmem:[#allocation2 + $0x148] sm:$0xff] }
 0x46f   :  { %v5035_v48 = vrot.slane %v5003_v38, 6  ;;  %4380 = vst [vmem:[#allocation2 + $0x30] sm:$0x38] %v4348_v30  ;;  %4381 = vst [vmem:[#allocation2 + $0xf0] sm:$0x38] %v4349_v18  ;;  %v5260_v63 = vpop.permute.xlu1 %5259  ;;  %v5099_v46 = vpop.permute.xlu0 %5098  ;;  %7110 = vmatpush1.msra.mxu1 %v6580_v37 }
 0x470   :  { %v5277_v17 = vsel %vm2829_vm15, %v5260_v63, %v19196_v49  ;;  %v5116_v42 = vsel %vm5100_vm9, %v5099_v46, %v19197_v7  ;;  %7111 = vmatprep.subr.mxu1 %v6565_v62  ;;  %v6564_v15 = vld [vmem:[#allocation2 + $0x160] sm:$0xff] }
 0x471   :  { %5067 = vst [vmem:[#allocation2 + $0x50] sm:$0x1c] %v5035_v48  ;;  %v5293_v43 = vmul.f32 %v19198_v1, %v5277_v17  ;;  %v5164_v21 = vmul.f32 %v16176_v10, %v5116_v42  ;;  %7112 = vmatpush1.msra.mxu1 %v6564_v15  ;;  %v19200_v7 = vld [vmem:[#allocation63_spill] sm:$0xff]  ;;  %v19202_v1 = vld [vmem:[#allocation17_spill] sm:$0xff] }
 0x473   :  { %5309 = vst [vmem:[#allocation2 + $0x1a0] sm:$0x7] %v5293_v43  ;;  %v5196_v33 = vrot.slane %v5164_v21, 3 }
 0x474   :  { %v16186_v41 = vpop.permute.xlu1 %5096  ;;  %v16191_v19 = vpop.permute.xlu0 %4967 }
 0x475   :  { %v5101_v55 = vsel %vm5100_vm9, %v16186_v41, %v5099_v46  ;;  %5228 = vst [vmem:[#allocation2 + $0x50] sm:$0xe0] %v5196_v33  ;;  %v4972_v6 = vsel %vm2596_vm14, %v16191_v19, %v4970_v0 }
 0x476   :  { %v5163_v14 = vmul.f32 %v16081_v47, %v5101_v55  ;;  %v5002_v34 = vmul.f32 %v19175_v52, %v4972_v6  ;;  %v6491_v12 = vld [vmem:[#allocation2 + $0xf0] sm:$0xff] }
 0x477   :  { %v6490_v38 = vld [vmem:[#allocation2 + $0x30] sm:$0xff]  ;;  %6764 = vmatprep.subr.mxu0 %v6491_v12 }
 0x478   :  { %v5195_v30 = vrot.slane %v5163_v14, 3  ;;  %v16198_v18 = vpop.permute.xlu1 %5338  ;;  %v5034_v37 = vrot.slane %v5002_v34, 6  ;;  %v16203_v46 = vpop.permute.xlu0 %5257  ;;  %6765 = vmatpush1.msra.mxu0 %v6490_v38  ;;  %v19205_v38 = vld [vmem:[#allocation47_spill] sm:$0xff] }
 0x479   :  { %v5343_v48 = vsel %vm19199_vm7, %v16198_v18, %v5341_v57  ;;  %v5262_v0 = vsel %vm2829_vm15, %v16203_v46, %v5260_v63  ;;  %11450 = vmatmul.mubr.msk.f32.vlgmr.msra.gmra.mxu0 %vm6588_vm8, %v16110_v59  ;;  %vm19209_vm7 = vmmov %vm19201_vm0 }
 0x47a   :  { %5227 = vst [vmem:[#allocation2 + $0x210] sm:$0xe0] %v5195_v30  ;;  %v5405_v62 = vrot.slane %v5343_v48, 5  ;;  %5066 = vst [vmem:[#allocation2 + $0x210] sm:$0x1c] %v5034_v37  ;;  %v5292_v49 = vmul.f32 %v19185_v29, %v5262_v0  ;;  %v6549_v17 = vld [vmem:[#allocation2 + $0x1a0] sm:$0xff]  ;;  %6940 = vmatprep.mubr.f32.mxu0 %v19013_v22 }
 0x47b   :  { %7113 = vmatprep.subr.mxu1 %v6549_v17  ;;  %v19207_v37 = vld [vmem:[#allocation44_spill] sm:$0xff] }
 0x47c   :  { %5437 = vst [vmem:[#allocation2 + $0x1f8] sm:$0x38] %v5405_v62  ;;  %v4566_v57 = vpop.permute.xlu1 %4565  ;;  %5308 = vst [vmem:[#allocation2 + $0x1f8] sm:$0x7] %v5292_v49  ;;  %v4421_v15 = vpop.permute.xlu0 %4420 }
 0x47d   :  { %v4570_v42 = vsel %vm19201_vm0, %v4566_v57, %v19200_v7  ;;  %v4425_v43 = vsel %vm19203_vm5, %v4421_v15, %v19202_v1  ;;  %vm19211_vm0 = vcmp.lt.s32.totalorder %v12698_v26, 32  ;;  %vm19213_vm5 = vcmp.lt.s32.totalorder %v12698_v26, 33 }
 0x47e   :  { %v4665_v63 = vmul.f32 %v16176_v10, %v4570_v42  ;;  %v4456_v21 = vmul.f32 %v19194_v45, %v4425_v43 }
 0x480   :  { %v4697_v33 = vrot.slane %v4665_v63, 7  ;;  %v16220_v55 = vpop.permute.xlu1 %4418  ;;  %v4488_v14 = vrot.slane %v4456_v21, 2  ;;  %v4759_v34 = vpop.permute.xlu0 %4758 }
 0x481   :  { %v4426_v6 = vsel %vm19204_vm1, %v16220_v55, %v4421_v15  ;;  %v4763_v30 = vsel %vm19206_vm6, %v4759_v34, %v19205_v38  ;;  %v6532_v49 = vld [vmem:[#allocation2 + $0x210] sm:$0xff]  ;;  %v19212_v38 = vld [vmem:[#allocation50_spill] sm:$0xff] }
 0x482   :  { %4729 = vst [vmem:[#allocation2 + $0x1a8] sm:$0xe] %v4697_v33  ;;  %v4455_v12 = vmul.f32 %v19175_v52, %v4426_v6  ;;  %4520 = vst [vmem:[#allocation2 + $0x1a8] ss:$-356 sps:$4 sm:$0xc1] %v4488_v14   ;;  %v4794_v48 = vmul.f32 %v19207_v37, %v4763_v30  ;;  %v6533_v52 = vld [vmem:[#allocation2 + $0x50] sm:$0xff] }
 0x483   :  { %v6548_v0 = vld [vmem:[#allocation2 + $0x1f8] sm:$0xff]  ;;  %v19210_v14 = vld [vmem:[#allocation75_spill] sm:$0xff] }
 0x484   :  { %v4487_v45 = vrot.slane %v4455_v12, 2  ;;  %v16230_v62 = vpop.permute.xlu1 %4756  ;;  %v4826_v17 = vrot.slane %v4794_v48, 4  ;;  %v16235_v42 = vpop.permute.xlu0 %4563  ;;  %7114 = vmatpush1.msra.mxu1 %v6548_v0  ;;  %v19215_v0 = vld [vmem:[#allocation29_spill] sm:$0xff] }
 0x485   :  { %v4764_v7 = vsel %vm19208_vm3, %v16230_v62, %v4759_v34  ;;  %v4571_v63 = vsel %vm19209_vm7, %v16235_v42, %v4566_v57  ;;  %7115 = vmatprep.subr.mxu1 %v6533_v52  ;;  %vm4595_vm6 = vcmp.le.s32.totalorder %v19215_v0, 29  ;;  %vm19216_vm3 = vmmov %vm19211_vm0 }
 0x486   :  { %4519 = vst [vmem:[#allocation2 + $0x2e0] ss:$-356 sps:$4 sm:$0xc1] %v4487_v45   ;;  %v4793_v15 = vmul.f32 %v19185_v29, %v4764_v7  ;;  %4858 = vst [vmem:[#allocation2 + $0x1a8] sm:$0x70] %v4826_v17  ;;  %v4664_v1 = vmul.f32 %v16081_v47, %v4571_v63  ;;  %7116 = vmatpush1.msra.mxu1 %v6532_v49  ;;  %v19214_v45 = vld [vmem:[#allocation28_spill] sm:$0xff] }
 0x487   :  { %vm18889_vm1 = vcmp.le.s32.totalorder %v19214_v45, 29  ;;  %vm19217_vm7 = vmmov %vm19213_vm5  ;;  %v16263_v63 = vsel %vm4595_vm6, 1.0, %v19013_v22  ;;  %vm19223_vm6 = vcmp.lt.s32.totalorder %v12698_v26, 63 }
 0x488   :  { %v4825_v43 = vrot.slane %v4793_v15, 4  ;;  %v4292_v21 = vpop.permute.xlu1 %4291  ;;  %v4696_v33 = vrot.slane %v4664_v1, 7  ;;  %v4211_v34 = vpop.permute.xlu0 %4210  ;;  %v16268_v1 = vsel %vm18889_vm1, 1.0, %v19013_v22 }
 0x489   :  { %v4296_v6 = vsel %vm19211_vm0, %v4292_v21, %v19210_v14  ;;  %v4215_v30 = vsel %vm19213_vm5, %v4211_v34, %v19212_v38  ;;  %vm19219_vm0 = vcmp.lt.s32.totalorder %v12698_v26, 62  ;;  %v19220_v14 = vld [vmem:[#allocation78_spill] sm:$0xff]  ;;  %v19222_v38 = vld [vmem:[#allocation89_spill] sm:$0xff] }
 0x48a   :  { %4857 = vst [vmem:[#allocation2 + $0x2e0] sm:$0x70] %v4825_v43  ;;  %v4359_v12 = vrot.slane %v4296_v6, 5  ;;  %4728 = vst [vmem:[#allocation2 + $0x2e0] sm:$0xe] %v4696_v33  ;;  %v4246_v57 = vmul.f32 %v19207_v37, %v4215_v30 }
 0x48b   :  { %vm19221_vm5 = vmmov %vm19219_vm0 }
 0x48c   :  { %4391 = vst [vmem:[#allocation2 + $0x40] sm:$0x38] %v4359_v12  ;;  %v16249_v48 = vpop.permute.xlu1 %4289  ;;  %4262 = vst [vmem:[#allocation2 + $0x40] sm:$0x7] %v4246_v57  ;;  %v16256_v17 = vpop.permute.xlu0 %4208  ;;  %v19224_v57 = vld [vmem:[#allocation76_spill] sm:$0xff] }
 0x48d   :  { %v4297_v49 = vsel %vm19216_vm3, %v16249_v48, %v4292_v21  ;;  %v4216_v52 = vsel %vm19217_vm7, %v16256_v17, %v4211_v34  ;;  %v6517_v37 = vld [vmem:[#allocation2 + $0x1a8] sm:$0xff]  ;;  %vm19225_vm3 = vmmov %vm19223_vm6  ;;  %vm19229_vm7 = vcmp.lt.s32.totalorder %v12698_v26, 94 }
 0x48e   :  { %v4358_v7 = vrot.slane %v4297_v49, 5  ;;  %v4245_v15 = vmul.f32 %v19185_v29, %v4216_v52  ;;  %7117 = vmatprep.subr.mxu1 %v6517_v37  ;;  %v19218_v21 = vld [vmem:[#allocation88_spill] sm:$0xff]  ;;  %v19226_v52 = vld [vmem:[#allocation66_spill] sm:$0xff] }
 0x490   :  { %4390 = vst [vmem:[#allocation2 + $0x178] sm:$0x38] %v4358_v7  ;;  %v6327_v43 = vpop.permute.xlu1 %6326  ;;  %4261 = vst [vmem:[#allocation2 + $0x178] sm:$0x7] %v4245_v15  ;;  %v6150_v6 = vpop.permute.xlu0 %6149  ;;  %v19227_v15 = vld [vmem:[#allocation56_spill] sm:$0xff] }
 0x491   :  { %v6346_v33 = vsel %vm19219_vm0, %v6327_v43, %v19218_v21  ;;  %v6347_v29 = vsel %vm19221_vm5, %v19220_v14, %v6327_v43  ;;  %v6169_v30 = vsel %vm19223_vm6, %v6150_v6, %v19222_v38  ;;  %v6170_v49 = vsel %vm19225_vm3, %v19224_v57, %v6150_v6  ;;  %v6516_v7 = vld [vmem:[#allocation2 + $0x2e0] sm:$0xff]  ;;  %vm19231_vm0 = vmmov %vm19229_vm7 }
 0x492   :  { %v6413_v34 = vmul.f32 %v16268_v1, %v6347_v29  ;;  %v6414_v12 = vmul.f32 %v16263_v63, %v6346_v33  ;;  %v6236_v37 = vmul.f32 %v19226_v52, %v6170_v49  ;;  %v6237_v21 = vmul.f32 %v19227_v15, %v6169_v30  ;;  %7118 = vmatpush1.msra.mxu1 %v6516_v7  ;;  %v19232_v49 = vld [vmem:[#allocation79_spill] sm:$0xff]  ;;  %vm16339_vm5 = vmand %vm12834_vm12, %vm18889_vm1 }
 0x493   :  { %v6501_v29 = vld [vmem:[#allocation2 + $0x40] sm:$0xff]  ;;  %vm19244_vm6 = vcmp.lt.s32.totalorder %v12698_v26, 96  ;;  %vm19248_vm12 = vcmp.lt.s32.totalorder %v12698_v26, 30 }
 0x494   :  { %v6445_v43 = vrot.slane %v6413_v34, 3  ;;  %v6446_v14 = vrot.slane %v6414_v12, 3  ;;  %v5603_v10 = vpop.permute.xlu1 %5602  ;;  %v6268_v47 = vrot.slane %v6236_v37, 6  ;;  %v6269_v33 = vrot.slane %v6237_v21, 6  ;;  %v5458_v57 = vpop.permute.xlu0 %5457  ;;  %7119 = vmatprep.subr.mxu1 %v6501_v29  ;;  %vm19246_vm3 = vmmov %vm19244_vm6 }
 0x495   :  { %v5622_v38 = vsel %vm19229_vm7, %v5603_v10, %v19228_v61  ;;  %v5623_v6 = vsel %vm19231_vm0, %v19230_v25, %v5603_v10  ;;  %v5477_v12 = vsel %vm3263_vm10, %v5458_v57, %v15687_v53  ;;  %v5478_v61 = vsel %vm3263_vm10, %v19232_v49, %v5458_v57  ;;  %v19236_v49 = vld [vmem:[#allocation73_spill] sm:$0xff]  ;;  %vm19250_vm7 = vmmov %vm19248_vm12 }
 0x496   :  { %6477 = vst [vmem:[#allocation2 + $0x260] sm:$0xe0] %v6445_v43  ;;  %6478 = vst [vmem:[#allocation2 + $0x268] sm:$0xe0] %v6446_v14  ;;  %v5689_v30 = vmul.f32 %v16268_v1, %v5623_v6  ;;  %v5690_v34 = vmul.f32 %v16263_v63, %v5622_v38  ;;  %v5496_v25 = vmul.f32 %v19226_v52, %v5478_v61  ;;  %v19233_v38 = vld [vmem:[#allocation93_spill] sm:$0xff]  ;;  %v19234_v6 = vld [vmem:[#allocation8_spill] sm:$0xff] }
 0x497   :  { %6300 = vst [vmem:[#allocation2 + $0x260] sm:$0x1c] %v6268_v47  ;;  %6301 = vst [vmem:[#allocation2 + $0x268] sm:$0x1c] %v6269_v33  ;;  %v5497_v10 = vmul.f32 %v19227_v15, %v5477_v12  ;;  %v6500_v43 = vld [vmem:[#allocation2 + $0x178] sm:$0xff]  ;;  %vm19251_vm0 = vcmp.lt.s32.totalorder %v12698_v26, 31 }
 0x498   :  { %v5721_v7 = vrot.slane %v5689_v30, 7  ;;  %v5722_v37 = vrot.slane %v5690_v34, 7  ;;  %v5973_v21 = vpop.permute.xlu1 %5972  ;;  %v5528_v14 = vrot.slane %v5496_v25, 2  ;;  %7120 = vmatpush1.msra.mxu1 %v6500_v43  ;;  %v19235_v30 = vld [vmem:[#allocation94_spill] sm:$0xff]  ;;  %v19237_v25 = vld [vmem:[#allocation64_spill] sm:$0xff] }
 0x499   :  { %v5529_v29 = vrot.slane %v5497_v10, 2  ;;  %v5992_v53 = vsel %vm5986_vm11, %v5973_v21, %v19233_v38  ;;  %v5993_v57 = vsel %vm5986_vm11, %v19234_v6, %v5973_v21  ;;  %v5780_v47 = vpop.permute.xlu0 %5779  ;;  %11455 = vmatmul.mubr.msk.f32.vlgmr.msra.gmra.mxu1 %vm6588_vm8, %v16110_v59  ;;  %v19238_v21 = vld [vmem:[#allocation38_spill] sm:$0xff]  ;;  %v19239_v6 = vld [vmem:[#allocation80_spill] sm:$0xff] }
 0x49a   :  { %5753 = vst [vmem:[#allocation2 + $0x1e0] sm:$0xe] %v5721_v7  ;;  %5754 = vst [vmem:[#allocation2 + $0x150] sm:$0xe] %v5722_v37  ;;  %v6075_v33 = vrot.slane %v5993_v57, 1  ;;  %v6076_v12 = vrot.slane %v5992_v53, 1  ;;  %v5799_v34 = vsel %vm5793_vm2, %v5780_v47, %v19235_v30  ;;  %v5800_v61 = vsel %vm5793_vm2, %v19236_v49, %v5780_v47  ;;  %9597 = vmatprep.mubr.f32.mxu1 %v19013_v22 }
 0x49b   :  { %5560 = vst [vmem:[#allocation2 + $0x1e0] ss:$188 sps:$4 sm:$0xc1] %v5528_v14   ;;  %5561 = vst [vmem:[#allocation2 + $0x150] ss:$-220 sps:$4 sm:$0xc1] %v5529_v29   ;;  %v5882_v10 = vmul.f32 %v19237_v25, %v5800_v61  ;;  %v5883_v7 = vmul.f32 %v19238_v21, %v5799_v34 }
 0x49c   :  { %6107 = vst [vmem:[#allocation2 + $0x260] ss:$-124 sps:$4 sm:$0x83] %v6075_v33   ;;  %6108 = vst [vmem:[#allocation2 + $0x268] ss:$-276 sps:$4 sm:$0x83] %v6076_v12   ;;  %v5087_v37 = vpop.permute.xlu1 %5086 }
 0x49d   :  { %v5914_v43 = vrot.slane %v5882_v10, 4  ;;  %v5915_v38 = vrot.slane %v5883_v7, 4  ;;  %v5106_v53 = vsel %vm5100_vm9, %v5087_v37, %v15789_v51  ;;  %v5107_v14 = vsel %vm5100_vm9, %v19239_v6, %v5087_v37  ;;  %v4958_v29 = vpop.permute.xlu0 %4957  ;;  %v19240_v12 = vld [vmem:[#allocation69_spill] sm:$0xff] }
 0x49e   :  { %v5157_v57 = vmul.f32 %v16268_v1, %v5107_v14  ;;  %v5158_v47 = vmul.f32 %v16263_v63, %v5106_v53  ;;  %v4977_v33 = vsel %vm2596_vm14, %v4958_v29, %v15791_v13  ;;  %v4978_v30 = vsel %vm2596_vm14, %v19240_v12, %v4958_v29 }
 0x49f   :  { %5946 = vst [vmem:[#allocation2 + $0x1e0] sm:$0x70] %v5914_v43  ;;  %5947 = vst [vmem:[#allocation2 + $0x150] sm:$0x70] %v5915_v38  ;;  %v4996_v51 = vmul.f32 %v19226_v52, %v4978_v30  ;;  %v4997_v34 = vmul.f32 %v19227_v15, %v4977_v33  ;;  %v19245_v52 = vld [vmem:[#allocation24_spill] sm:$0xff]  ;;  %v11358_v30 = vsel %vm16339_vm5, 1.0, %v19013_v22 }
 0x4a0   :  { %v5189_v49 = vrot.slane %v5157_v57, 3  ;;  %v5190_v61 = vrot.slane %v5158_v47, 3  ;;  %v5329_v10 = vpop.permute.xlu1 %5328  ;;  %v19247_v47 = vld [vmem:[#allocation81_spill] sm:$0xff]  ;;  %vm19253_vm5 = vmmov %vm19251_vm0 }
 0x4a1   :  { %v5028_v13 = vrot.slane %v4996_v51, 6  ;;  %v5029_v53 = vrot.slane %v4997_v34, 6  ;;  %v5348_v43 = vsel %vm19244_vm6, %v5329_v10, %v15805_v35  ;;  %v5349_v38 = vsel %vm19246_vm3, %v19245_v52, %v5329_v10  ;;  %v5248_v6 = vpop.permute.xlu0 %5247 }
 0x4a2   :  { %5221 = vst [vmem:[#allocation2 + $0x1c8] sm:$0xe0] %v5189_v49  ;;  %5222 = vst [vmem:[#allocation2 + $0x280] sm:$0xe0] %v5190_v61  ;;  %v5399_v14 = vrot.slane %v5349_v38, 5  ;;  %v5400_v29 = vrot.slane %v5348_v43, 5  ;;  %v5267_v57 = vsel %vm2829_vm15, %v5248_v6, %v15807_v56  ;;  %v5268_v33 = vsel %vm2829_vm15, %v19247_v47, %v5248_v6 }
 0x4a3   :  { %5060 = vst [vmem:[#allocation2 + $0x1c8] sm:$0x1c] %v5028_v13  ;;  %5061 = vst [vmem:[#allocation2 + $0x280] sm:$0x1c] %v5029_v53  ;;  %v5286_v35 = vmul.f32 %v19237_v25, %v5268_v33  ;;  %v5287_v12 = vmul.f32 %v19238_v21, %v5267_v57  ;;  %v6575_v51 = vld [vmem:[#allocation2 + $0x268] sm:$0xff]  ;;  %v6574_v34 = vld [vmem:[#allocation2 + $0x260] sm:$0xff] }
 0x4a4   :  { %5431 = vst [vmem:[#allocation2 + $0x298] sm:$0x38] %v5399_v14  ;;  %5432 = vst [vmem:[#allocation2 + $0x70] sm:$0x38] %v5400_v29  ;;  %v4554_v49 = vpop.permute.xlu1 %4553  ;;  %6896 = vmatprep.subr.mxu0 %v6575_v51  ;;  %v19249_v61 = vld [vmem:[#allocation82_spill] sm:$0xff]  ;;  %vm19255_vm6 = vcmp.lt.s32.totalorder %v12698_v26, 32 }
 0x4a5   :  { %5302 = vst [vmem:[#allocation2 + $0x298] sm:$0x7] %v5286_v35  ;;  %5303 = vst [vmem:[#allocation2 + $0x70] sm:$0x7] %v5287_v12  ;;  %v4576_v56 = vsel %vm19248_vm12, %v4554_v49, %v15890_v60  ;;  %v4577_v10 = vsel %vm19250_vm7, %v19249_v61, %v4554_v49  ;;  %v4409_v7 = vpop.permute.xlu0 %4408  ;;  %6897 = vmatpush1.msra.mxu0 %v6574_v34  ;;  %v19252_v43 = vld [vmem:[#allocation70_spill] sm:$0xff]  ;;  %v19254_v60 = vld [vmem:[#allocation55_spill] sm:$0xff] }
 0x4a6   :  { %v4658_v37 = vmul.f32 %v11358_v30, %v4577_v10  ;;  %v4659_v13 = vmul.f32 %v16263_v63, %v4576_v56  ;;  %v4431_v53 = vsel %vm19251_vm0, %v4409_v7, %v15892_v31  ;;  %v4432_v52 = vsel %vm19253_vm5, %v19252_v43, %v4409_v7  ;;  %v6559_v38 = vld [vmem:[#allocation2 + $0x150] sm:$0xff]  ;;  %v6558_v6 = vld [vmem:[#allocation2 + $0x1e0] sm:$0xff]  ;;  %vm19257_vm3 = vmmov %vm19255_vm6 }
 0x4a7   :  { %v4449_v14 = vmul.f32 %v19254_v60, %v4432_v52  ;;  %v4450_v29 = vmul.f32 %v19227_v15, %v4431_v53  ;;  %6898 = vmatprep.subr.mxu0 %v6559_v38  ;;  %v19256_v30 = vld [vmem:[#allocation84_spill] sm:$0xff]  ;;  %v19258_v49 = vld [vmem:[#allocation46_spill] sm:$0xff]  ;;  %vm19259_vm12 = vcmp.lt.s32.totalorder %v12698_v26, 1  ;;  %v19260_v10 = vld [vmem:[#allocation83_spill] sm:$0xff] }
 0x4a8   :  { %v4690_v57 = vrot.slane %v4658_v37, 7  ;;  %v4691_v47 = vrot.slane %v4659_v13, 7  ;;  %6899 = vmatpush1.msra.mxu0 %v6558_v6  ;;  %v4280_v33 = vpop.permute.xlu1 %4279  ;;  %vm19261_vm7 = vmmov %vm19259_vm12  ;;  %v19262_v38 = vld [vmem:[#allocation32_spill] sm:$0xff]  ;;  %v19263_v6 = vld [vmem:[#allocation33_spill] sm:$0xff] }
 0x4a9   :  { %v4481_v35 = vrot.slane %v4449_v14, 2  ;;  %v4482_v12 = vrot.slane %v4450_v29, 2  ;;  %v4302_v31 = vsel %vm19255_vm6, %v4280_v33, %v16023_v39  ;;  %v4303_v51 = vsel %vm19257_vm3, %v19256_v30, %v4280_v33  ;;  %v4747_v34 = vpop.permute.xlu0 %4746  ;;  %v19265_v29 = vld [vmem:[#allocation85_spill] sm:$0xff] }
 0x4aa   :  { %4722 = vst [vmem:[#allocation2 + $0x220] sm:$0xe] %v4690_v57  ;;  %4723 = vst [vmem:[#allocation2 + $0x258] sm:$0xe] %v4691_v47  ;;  %v4320_v15 = vmul.f32 %v19258_v49, %v4303_v51  ;;  %v4353_v56 = vrot.slane %v4302_v31, 5  ;;  %v4769_v61 = vsel %vm19259_vm12, %v4747_v34, %v15906_v27  ;;  %v4770_v7 = vsel %vm19261_vm7, %v19260_v10, %v4747_v34  ;;  %v19267_v47 = vld [vmem:[#allocation59_spill] sm:$0xff] }
 0x4ab   :  { %4513 = vst [vmem:[#allocation2 + $0x220] ss:$-244 sps:$4 sm:$0xc1] %v4481_v35   ;;  %4514 = vst [vmem:[#allocation2 + $0x258] ss:$-372 sps:$4 sm:$0xc1] %v4482_v12   ;;  %v4787_v39 = vmul.f32 %v19237_v25, %v4770_v7  ;;  %v4788_v37 = vmul.f32 %v19238_v21, %v4769_v61 }
 0x4ac   :  { %v4352_v13 = vrot.slane %v4320_v15, 5  ;;  %4385 = vst [vmem:[#allocation2 + $0xe0] sm:$0x38] %v4353_v56  ;;  %v6158_v53 = vpop.permute.xlu1 %6157  ;;  %v6543_v43 = vld [vmem:[#allocation2 + $0x70] sm:$0xff]  ;;  %v6542_v52 = vld [vmem:[#allocation2 + $0x298] sm:$0xff]  ;;  %vm4598_vm0 = vcmp.le.s32.totalorder %v19262_v38, 29 }
 0x4ad   :  { %vm4599_vm5 = vcmp.le.s32.totalorder %v19263_v6, 29  ;;  %v4819_v27 = vrot.slane %v4787_v39, 4  ;;  %v4820_v60 = vrot.slane %v4788_v37, 4  ;;  %vm19264_vm6 = vcmp.lt.s32.totalorder %v12698_v26, 63  ;;  %6900 = vmatprep.subr.mxu0 %v6543_v43  ;;  %v4199_v57 = vpop.permute.xlu0 %4198  ;;  %v19268_v35 = vld [vmem:[#allocation60_spill] sm:$0xff]  ;;  %v19270_v30 = vld [vmem:[#allocation25_spill] sm:$0xff] }
 0x4ae   :  { %v6165_v14 = vsel %vm19264_vm6, %v6158_v53, %v16060_v3  ;;  %vm19266_vm3 = vmmov %vm19264_vm6  ;;  %4384 = vst [vmem:[#allocation2 + $0x128] sm:$0x38] %v4352_v13  ;;  %vm19269_vm12 = vcmp.lt.s32.totalorder %v12698_v26, 33  ;;  %6901 = vmatpush1.msra.mxu0 %v6542_v52  ;;  %v6527_v3 = vld [vmem:[#allocation2 + $0x280] sm:$0xff]  ;;  %v19272_v34 = vld [vmem:[#allocation37_spill] sm:$0xff]  ;;  %v16416_v39 = vsel %vm4599_vm5, 1.0, %v19013_v22 }
 0x4af   :  { %v6166_v25 = vsel %vm19266_vm3, %v19265_v29, %v6158_v53  ;;  %v6241_v12 = vmul.f32 %v19268_v35, %v6165_v14  ;;  %v4221_v31 = vsel %vm19269_vm12, %v4199_v57, %v16025_v9  ;;  %vm19271_vm7 = vmmov %vm19269_vm12  ;;  %4851 = vst [vmem:[#allocation2 + $0x220] sm:$0x70] %v4819_v27  ;;  %6902 = vmatprep.subr.mxu0 %v6527_v3  ;;  %v6526_v56 = vld [vmem:[#allocation2 + $0x1c8] sm:$0xff]  ;;  %v16411_v9 = vsel %vm4598_vm0, 1.0, %v19013_v22  ;;  %v19273_v37 = vld [vmem:[#allocation57_spill] sm:$0xff] }
 0x4b0   :  { %v6240_v33 = vmul.f32 %v19267_v47, %v6166_v25  ;;  %v4222_v51 = vsel %vm19271_vm7, %v19270_v30, %v4199_v57  ;;  %4852 = vst [vmem:[#allocation2 + $0x258] sm:$0x70] %v4820_v60  ;;  %v4240_v15 = vmul.f32 %v19238_v21, %v4221_v31  ;;  %6903 = vmatpush1.msra.mxu0 %v6526_v56  ;;  %v5466_v7 = vpop.permute.xlu1 %5465  ;;  %vm19274_vm0 = vcmp.lt.s32.totalorder %v12698_v26, 62  ;;  %v19275_v60 = vld [vmem:[#allocation86_spill] sm:$0xff] }
 0x4b1   :  { %v4239_v49 = vmul.f32 %v19272_v34, %v4222_v51  ;;  %v6273_v10 = vrot.slane %v6241_v12, 6  ;;  %v5473_v21 = vsel %vm3263_vm10, %v5466_v7, %v16129_v4  ;;  %v5474_v13 = vsel %vm3263_vm10, %v19273_v37, %v5466_v7  ;;  %v6335_v53 = vpop.permute.xlu0 %6334  ;;  %vm19276_vm5 = vmmov %vm19274_vm0  ;;  %v19277_v51 = vld [vmem:[#allocation91_spill] sm:$0xff]  ;;  %v19278_v34 = vld [vmem:[#allocation41_spill] sm:$0xff] }
 0x4b2   :  { %v6272_v61 = vrot.slane %v6240_v33, 6  ;;  %4256 = vst [vmem:[#allocation2 + $0xe0] sm:$0x7] %v4240_v15  ;;  %v5500_v43 = vmul.f32 %v19267_v47, %v5474_v13  ;;  %v5501_v52 = vmul.f32 %v19268_v35, %v5473_v21  ;;  %v6342_v27 = vsel %vm19274_vm0, %v6335_v53, %v16091_v40  ;;  %v19279_v15 = vld [vmem:[#allocation42_spill] sm:$0xff] }
 0x4b3   :  { %4255 = vst [vmem:[#allocation2 + $0x128] sm:$0x7] %v4239_v49  ;;  %6305 = vst [vmem:[#allocation2 + $0x198] sm:$0x1c] %v6273_v10  ;;  %v6343_v14 = vsel %vm19276_vm5, %v19275_v60, %v6335_v53  ;;  %v6418_v29 = vmul.f32 %v16416_v39, %v6342_v27  ;;  %vm19280_vm10 = vcmp.lt.s32.totalorder %v12698_v26, 94  ;;  %v19281_v10 = vld [vmem:[#allocation90_spill] sm:$0xff] }
 0x4b4   :  { %6304 = vst [vmem:[#allocation2 + $0x108] sm:$0x1c] %v6272_v61  ;;  %v6417_v4 = vmul.f32 %v16411_v9, %v6343_v14  ;;  %v5532_v25 = vrot.slane %v5500_v43, 2  ;;  %v5533_v57 = vrot.slane %v5501_v52, 2  ;;  %v5788_v33 = vpop.permute.xlu1 %5787  ;;  %vm19282_vm6 = vmmov %vm19280_vm10  ;;  %vm19292_vm12 = vcmp.lt.s32.totalorder %v12698_v26, 1 }
 0x4b5   :  { %v6450_v31 = vrot.slane %v6418_v29, 3  ;;  %v5795_v30 = vsel %vm5793_vm2, %v5788_v33, %v16141_v36  ;;  %v5796_v40 = vsel %vm5793_vm2, %v19277_v51, %v5788_v33  ;;  %v5611_v3 = vpop.permute.xlu0 %5610  ;;  %v19283_v29 = vld [vmem:[#allocation39_spill] sm:$0xff]  ;;  %vm19289_vm2 = vcmp.lt.s32.totalorder %v12698_v26, 96  ;;  %vm19293_vm7 = vmmov %vm19292_vm12 }
 0x4b6   :  { %v6449_v12 = vrot.slane %v6417_v4, 3  ;;  %5564 = vst [vmem:[#allocation2 + $0x140] ss:$260 sps:$4 sm:$0xc1] %v5532_v25   ;;  %v5886_v49 = vmul.f32 %v19278_v34, %v5796_v40  ;;  %v5887_v56 = vmul.f32 %v19279_v15, %v5795_v30  ;;  %v5618_v61 = vsel %vm19280_vm10, %v5611_v3, %v16127_v2  ;;  %v6510_v21 = vld [vmem:[#allocation2 + $0x220] sm:$0xff]  ;;  %v19284_v30 = vld [vmem:[#allocation40_spill] sm:$0xff]  ;;  %vm19291_vm3 = vmmov %vm19289_vm2 }
 0x4b7   :  { %5565 = vst [vmem:[#allocation2 + $0x230] ss:$-172 sps:$4 sm:$0xc1] %v5533_v57   ;;  %v5619_v7 = vsel %vm19282_vm6, %v19281_v10, %v5611_v3  ;;  %v6511_v36 = vld [vmem:[#allocation2 + $0x258] sm:$0xff]  ;;  %6482 = vst [vmem:[#allocation2 + $0x198] sm:$0xe0] %v6450_v31  ;;  %v5694_v13 = vmul.f32 %v16416_v39, %v5618_v61 }
 0x4b8   :  { %6481 = vst [vmem:[#allocation2 + $0x108] sm:$0xe0] %v6449_v12  ;;  %v5693_v37 = vmul.f32 %v16411_v9, %v5619_v7  ;;  %6904 = vmatprep.subr.mxu0 %v6511_v36  ;;  %v5918_v53 = vrot.slane %v5886_v49, 4  ;;  %v5919_v43 = vrot.slane %v5887_v56, 4  ;;  %v4966_v52 = vpop.permute.xlu1 %4965  ;;  %v19285_v61 = vld [vmem:[#allocation52_spill] sm:$0xff]  ;;  %vm19294_vm0 = vcmp.lt.s32.totalorder %v12698_v26, 30 }
 0x4b9   :  { %6905 = vmatpush1.msra.mxu0 %v6510_v21  ;;  %v6495_v27 = vld [vmem:[#allocation2 + $0xe0] sm:$0xff]  ;;  %v5726_v14 = vrot.slane %v5694_v13, 7  ;;  %v4973_v4 = vsel %vm2596_vm14, %v4966_v52, %v16191_v19  ;;  %v4974_v25 = vsel %vm2596_vm14, %v19283_v29, %v4966_v52  ;;  %v5981_v57 = vpop.permute.xlu0 %5980  ;;  %vm19287_vm14 = vcmp.lt.s32.totalorder %v12698_v26, 31  ;;  %vm19295_vm5 = vmmov %vm19294_vm0 }
 0x4ba   :  { %v6494_v60 = vld [vmem:[#allocation2 + $0x128] sm:$0xff]  ;;  %v5725_v2 = vrot.slane %v5693_v37, 7  ;;  %6906 = vmatprep.subr.mxu0 %v6495_v27  ;;  %5950 = vst [vmem:[#allocation2 + $0x140] sm:$0x70] %v5918_v53  ;;  %5951 = vst [vmem:[#allocation2 + $0x230] sm:$0x70] %v5919_v43  ;;  %v5000_v33 = vmul.f32 %v19267_v47, %v4974_v25  ;;  %v5001_v12 = vmul.f32 %v19268_v35, %v4973_v4 }
 0x4bb   :  { %v5988_v31 = vsel %vm5986_vm11, %v5981_v57, %v16139_v32  ;;  %v5989_v19 = vsel %vm5986_vm11, %v19284_v30, %v5981_v57  ;;  %6907 = vmatpush1.msra.mxu0 %v6494_v60  ;;  %5758 = vst [vmem:[#allocation2 + $0x230] sm:$0xe] %v5726_v14  ;;  %v19286_v13 = vld [vmem:[#allocation51_spill] sm:$0xff]  ;;  %vm19296_vm10 = vcmp.lt.s32.totalorder %v12698_v26, 32 }
 0x4bc   :  { %5757 = vst [vmem:[#allocation2 + $0x140] sm:$0xe] %v5725_v2  ;;  %v6079_v51 = vrot.slane %v5989_v19, 1  ;;  %v6080_v40 = vrot.slane %v5988_v31, 1  ;;  %11452 = vmatmul.mubr.msk.f32.vlgmr.msra.gmra.mxu0 %vm6588_vm8, %v16110_v59  ;;  %v5032_v3 = vrot.slane %v5000_v33, 6  ;;  %v5033_v49 = vrot.slane %v5001_v12, 6  ;;  %v5256_v56 = vpop.permute.xlu1 %5255  ;;  %vm19297_vm6 = vmmov %vm19296_vm10 }
 0x4bd   :  { %7082 = vmatprep.mubr.f32.mxu0 %v19013_v22  ;;  %v5263_v32 = vsel %vm2829_vm15, %v5256_v56, %v16203_v46  ;;  %v5264_v10 = vsel %vm2829_vm15, %v19285_v61, %v5256_v56  ;;  %v5095_v7 = vpop.permute.xlu0 %5094  ;;  %vm19288_vm15 = vmmov %vm19287_vm14  ;;  %v19290_v57 = vld [vmem:[#allocation95_spill] sm:$0xff] }
 0x4be   :  { %6111 = vst [vmem:[#allocation2 + $0x108] ss:$60 sps:$4 sm:$0x83] %v6079_v51   ;;  %6112 = vst [vmem:[#allocation2 + $0x198] ss:$156 sps:$4 sm:$0x83] %v6080_v40   ;;  %v5290_v36 = vmul.f32 %v19278_v34, %v5264_v10  ;;  %v5291_v21 = vmul.f32 %v19279_v15, %v5263_v32  ;;  %v5102_v37 = vsel %vm5100_vm9, %v5095_v7, %v16186_v41  ;;  %v6658_v10 = vpop.f32.mrf.mxu1 }
 0x4bf   :  { %5064 = vst [vmem:[#allocation2 + $0x288] sm:$0x1c] %v5032_v3  ;;  %5065 = vst [vmem:[#allocation2 + $0x60] sm:$0x1c] %v5033_v49  ;;  %v5103_v53 = vsel %vm5100_vm9, %v19286_v13, %v5095_v7  ;;  %v5162_v43 = vmul.f32 %v16416_v39, %v5102_v37 }
 0x4c0   :  { %v5161_v46 = vmul.f32 %v16411_v9, %v5103_v53  ;;  %5306 = vst [vmem:[#allocation2 + $0x240] sm:$0x7] %v5290_v36  ;;  %5307 = vst [vmem:[#allocation2 + $0x180] sm:$0x7] %v5291_v21  ;;  %v4417_v52 = vpop.permute.xlu1 %4416 }
 0x4c1   :  { %v5194_v60 = vrot.slane %v5162_v43, 3  ;;  %v4427_v2 = vsel %vm19287_vm14, %v4417_v52, %v16220_v55  ;;  %v4428_v41 = vsel %vm19288_vm15, %v15860_v44, %v4417_v52  ;;  %v5337_v14 = vpop.permute.xlu0 %5336  ;;  %vm19298_vm14 = vcmp.lt.s32.totalorder %v12698_v26, 33 }
 0x4c2   :  { %v5193_v27 = vrot.slane %v5161_v46, 3  ;;  %v4453_v4 = vmul.f32 %v19267_v47, %v4428_v41  ;;  %v4454_v29 = vmul.f32 %v19268_v35, %v4427_v2  ;;  %v5344_v25 = vsel %vm19289_vm2, %v5337_v14, %v16198_v18  ;;  %vm19299_vm15 = vmmov %vm19298_vm14 }
 0x4c3   :  { %v5345_v33 = vsel %vm19291_vm3, %v19290_v57, %v5337_v14  ;;  %5226 = vst [vmem:[#allocation2 + $0x60] sm:$0xe0] %v5194_v60  ;;  %v5404_v12 = vrot.slane %v5344_v25, 5 }
 0x4c4   :  { %5225 = vst [vmem:[#allocation2 + $0x288] sm:$0xe0] %v5193_v27  ;;  %v5403_v55 = vrot.slane %v5345_v33, 5  ;;  %v4485_v31 = vrot.slane %v4453_v4, 2  ;;  %v4486_v30 = vrot.slane %v4454_v29, 2  ;;  %v4755_v44 = vpop.permute.xlu1 %4754 }
 0x4c5   :  { %v6579_v19 = vld [vmem:[#allocation2 + $0x198] sm:$0xff]  ;;  %v6578_v51 = vld [vmem:[#allocation2 + $0x108] sm:$0xff]  ;;  %5436 = vst [vmem:[#allocation2 + $0x180] sm:$0x38] %v5404_v12  ;;  %v4765_v47 = vsel %vm19292_vm12, %v4755_v44, %v16230_v62  ;;  %v4766_v18 = vsel %vm19293_vm7, %v15880_v8, %v4755_v44  ;;  %v4562_v35 = vpop.permute.xlu0 %4561  ;;  %v6563_v56 = vld [vmem:[#allocation2 + $0x230] sm:$0xff] }
 0x4c6   :  { %5435 = vst [vmem:[#allocation2 + $0x240] sm:$0x38] %v5403_v55  ;;  %7038 = vmatprep.subr.mxu0 %v6579_v19  ;;  %4517 = vst [vmem:[#allocation2 + $0x158] ss:$332 sps:$4 sm:$0xc1] %v4485_v31   ;;  %v4791_v40 = vmul.f32 %v19278_v34, %v4766_v18  ;;  %v4792_v3 = vmul.f32 %v19279_v15, %v4765_v47  ;;  %v4572_v49 = vsel %vm19294_vm0, %v4562_v35, %v16235_v42  ;;  %v6562_v61 = vld [vmem:[#allocation2 + $0x140] sm:$0xff] }
 0x4c7   :  { %4518 = vst [vmem:[#allocation2 + $0x98] ss:$212 sps:$4 sm:$0xc1] %v4486_v30   ;;  %v4573_v62 = vsel %vm19295_vm5, %v15870_v50, %v4562_v35  ;;  %7039 = vmatpush1.msra.mxu0 %v6578_v51  ;;  %v4663_v32 = vmul.f32 %v16416_v39, %v4572_v49 }
 0x4c8   :  { %v4662_v8 = vmul.f32 %v16411_v9, %v4573_v62  ;;  %7040 = vmatprep.subr.mxu0 %v6563_v56  ;;  %v4823_v7 = vrot.slane %v4791_v40, 4  ;;  %v4824_v36 = vrot.slane %v4792_v3, 4  ;;  %v4288_v21 = vpop.permute.xlu1 %4287 }
 0x4c9   :  { %7041 = vmatpush1.msra.mxu0 %v6562_v61  ;;  %v4695_v13 = vrot.slane %v4663_v32, 7  ;;  %v4298_v42 = vsel %vm19296_vm10, %v4288_v21, %v16249_v48  ;;  %v4299_v50 = vsel %vm19297_vm6, %v15987_v16, %v4288_v21  ;;  %v4207_v53 = vpop.permute.xlu0 %4206  ;;  %v6660_v16 = vpop.f32.mrf.mxu1 }
 0x4ca   :  { %v4694_v37 = vrot.slane %v4662_v8, 7  ;;  %4855 = vst [vmem:[#allocation2 + $0x158] sm:$0x70] %v4823_v7  ;;  %4856 = vst [vmem:[#allocation2 + $0x98] sm:$0x70] %v4824_v36  ;;  %v4356_v46 = vrot.slane %v4299_v50, 5  ;;  %v4217_v52 = vsel %vm19298_vm14, %v4207_v53, %v16256_v17  ;;  %v4218_v27 = vsel %vm19299_vm15, %v15956_v20, %v4207_v53 }
 0x4cb   :  { %v4357_v43 = vrot.slane %v4298_v42, 5  ;;  %4727 = vst [vmem:[#allocation2 + $0x98] sm:$0xe] %v4695_v13  ;;  %v4243_v48 = vmul.f32 %v19278_v34, %v4218_v27  ;;  %v4244_v60 = vmul.f32 %v19279_v15, %v4217_v52  ;;  %v6531_v17 = vld [vmem:[#allocation2 + $0x60] sm:$0xff]  ;;  %v6530_v14 = vld [vmem:[#allocation2 + $0x288] sm:$0xff]  ;;  %v6729_v4 = vpop.f32.mrf.mxu1 }
 0x4cc   :  { %4726 = vst [vmem:[#allocation2 + $0x158] sm:$0xe] %v4694_v37  ;;  %4388 = vst [vmem:[#allocation2 + $0x2a0] sm:$0x38] %v4356_v46  ;;  %v6547_v2 = vld [vmem:[#allocation2 + $0x180] sm:$0xff] }
 0x4cd   :  { %4389 = vst [vmem:[#allocation2 + $0x168] sm:$0x38] %v4357_v43  ;;  %v6546_v41 = vld [vmem:[#allocation2 + $0x240] sm:$0xff]  ;;  %4259 = vst [vmem:[#allocation2 + $0x2a0] sm:$0x7] %v4243_v48  ;;  %7042 = vmatprep.subr.mxu0 %v6547_v2  ;;  %v6731_v20 = vpop.f32.mrf.mxu1 }
 0x4ce   :  { %4260 = vst [vmem:[#allocation2 + $0x168] sm:$0x7] %v4244_v60  ;;  %7043 = vmatpush1.msra.mxu0 %v6546_v41 }
 0x4cf   :  { %7044 = vmatprep.subr.mxu0 %v6531_v17  ;;  %v6871_v34 = vpop.f32.mrf.mxu1 }
 0x4d0   :  { %7045 = vmatpush1.msra.mxu0 %v6530_v14 }
 0x4d1   :  { %v6873_v44 = vpop.f32.mrf.mxu1 }
 0x4d2   :  { %v6515_v29 = vld [vmem:[#allocation2 + $0x98] sm:$0xff] }
 0x4d3   :  { %v6514_v25 = vld [vmem:[#allocation2 + $0x158] sm:$0xff]  ;;  %7046 = vmatprep.subr.mxu0 %v6515_v29 }
 0x4d4   :  { %7047 = vmatpush1.msra.mxu0 %v6514_v25  ;;  %v6498_v57 = vld [vmem:[#allocation2 + $0x2a0] sm:$0xff] }
 0x4d5   :  { %v6499_v15 = vld [vmem:[#allocation2 + $0x168] sm:$0xff] }
 0x4d6   :  { %7048 = vmatprep.subr.mxu0 %v6499_v15  ;;  %v16527_v33 = vpop.permute.xlu0 %6585 }
 0x4d7   :  { %7049 = vmatpush1.msra.mxu0 %v6498_v57  ;;  %v6730_v55 = vadd.f32 %v6729_v4, %v16527_v33  ;;  %v6732_v12 = vadd.f32 %v6731_v20, %v16527_v33  ;;  %v6661_v31 = vadd.f32 %v6660_v16, %v16527_v33  ;;  %v6872_v30 = vadd.f32 %v6871_v34, %v16527_v33 }
 0x4d8   :  { %11454 = vmatmul.mubr.msk.f32.vlgmr.msra.gmra.mxu0 %vm6588_vm8, %v16110_v59  ;;  %v6874_v19 = vadd.f32 %v6873_v44, %v16527_v33  ;;  %v6659_v51 = vadd.f32 %v6658_v10, %v16527_v33  ;;  %v19300_v44 = vld [vmem:[#allocation10_spill] sm:$0xff] }
 0x4d9   :  { %9526 = vmatprep.mubr.f32.mxu0 %v19013_v22  ;;  %vm7162_vm2 = vcmp.gt.f32.partialorder %v6730_v55, 0.0  ;;  %v7178_v47 = vmul.f32 0.01, %v6730_v55  ;;  %vm7163_vm3 = vcmp.gt.f32.partialorder %v6732_v12, 0.0  ;;  %v7179_v18 = vmul.f32 0.01, %v6732_v12 }
 0x4da   :  { %vm7161_vm12 = vcmp.gt.f32.partialorder %v6661_v31, 0.0  ;;  %v7177_v35 = vmul.f32 0.01, %v6661_v31  ;;  %vm7166_vm7 = vcmp.gt.f32.partialorder %v6872_v30, 0.0  ;;  %v7182_v59 = vmul.f32 0.01, %v6872_v30 }
 0x4db   :  { %v16538_v40 = vsel %vm7162_vm2, %v6730_v55, %v7178_v47  ;;  %v16540_v3 = vsel %vm7163_vm3, %v6732_v12, %v7179_v18  ;;  %vm7167_vm0 = vcmp.gt.f32.partialorder %v6874_v19, 0.0  ;;  %v7183_v49 = vmul.f32 0.01, %v6874_v19 }
 0x4dc   :  { %v8093_v62 = vrot.slane %v16538_v40, 1  ;;  %v8094_v56 = vrot.slane %v16540_v3, 1  ;;  %8159 = vrot.lane.b32.xlu1 %v16538_v40, %s12442_s21  ;;  %8287 = vrot.lane.b32.xlu0 %v16538_v40, %s12451_s3  ;;  %v16548_v8 = vsel %vm7161_vm12, %v6661_v31, %v7177_v35  ;;  %v16550_v32 = vsel %vm7166_vm7, %v6872_v30, %v7182_v59  ;;  %v19302_v35 = vld [vmem:[#allocation45_spill] sm:$0xff] }
 0x4dd   :  { %v8092_v61 = vrot.slane %v16548_v8, 1  ;;  %v8097_v10 = vrot.slane %v16550_v32, 1  ;;  %v16554_v7 = vsel %vm7167_vm0, %v6874_v19, %v7183_v49  ;;  %vm7160_vm5 = vcmp.gt.f32.partialorder %v6659_v51, 0.0  ;;  %v19301_v19 = vld [vmem:[#allocation11_spill] sm:$0xff] }
 0x4de   :  { %8125 = vst [vmem:[#allocation2 + $0x188] ss:$-156 sps:$4 sm:$0x83] %v8093_v62   ;;  %9069 = vst [vmem:[#allocation2 + $0x170] ss:$268 sps:$4 sm:$0x83] %v8093_v62  }
 0x4df   :  { %8126 = vst [vmem:[#allocation2 + $0x208] ss:$-412 sps:$4 sm:$0x83] %v8094_v56   ;;  %9070 = vst [vmem:[#allocation2 + $0x90] ss:$-132 sps:$4 sm:$0x83] %v8094_v56  }
 0x4e0   :  { %v8098_v36 = vrot.slane %v16554_v7, 1  ;;  %v7176_v21 = vmul.f32 0.01, %v6659_v51  ;;  %8124 = vst [vmem:[#allocation2 + $0x80] ss:$460 sps:$4 sm:$0x83] %v8092_v61   ;;  %8161 = vrot.lane.b32.xlu1 %v16540_v3, %s12442_s21  ;;  %8157 = vrot.lane.b32.xlu0 %v16548_v8, %s12442_s21 }
 0x4e1   :  { %9068 = vst [vmem:[#allocation2 + $0xc0] ss:$-28 sps:$4 sm:$0x83] %v8092_v61   ;;  %8129 = vst [vmem:[#allocation2 + $0x218] ss:$-500 sps:$4 sm:$0x83] %v8097_v10  }
 0x4e2   :  { %9073 = vst [vmem:[#allocation2 + $0xd8] ss:$444 sps:$4 sm:$0x83] %v8097_v10   ;;  %8130 = vst [vmem:[#allocation2 + $0x250] ss:$-156 sps:$4 sm:$0x83] %v8098_v36   ;;  %v16561_v37 = vsel %vm7160_vm5, %v6659_v51, %v7176_v21 }
 0x4e3   :  { %9074 = vst [vmem:[#allocation2 + $0x1d8] ss:$212 sps:$4 sm:$0x83] %v8098_v36   ;;  %v8091_v13 = vrot.slane %v16561_v37, 1  ;;  %v9019_v42 = vmul.f32 0.0, %v16561_v37  ;;  %vm7771_vm2 = vcmp.le.s32.totalorder %v19300_v44, 27 }
 0x4e4   :  { %8289 = vrot.lane.b32.xlu1 %v16540_v3, %s12451_s3  ;;  %7531 = vrot.lane.b32.xlu0 %v16548_v8, %s12435_s17  ;;  %vm7772_vm3 = vcmp.le.s32.totalorder %v19301_v19, 27  ;;  %vm8315_vm12 = vcmp.lt.s32.totalorder %v12698_v26, 124  ;;  %v19303_v49 = vld [vmem:[#allocation7_spill] sm:$0xff]  ;;  %v19304_v61 = vld [vmem:[#allocation48_spill] sm:$0xff]  ;;  %v16637_v36 = vsel %vm7771_vm2, 1.0, %v19013_v22  ;;  %vm7946_vm2 = vcmp.lt.s32.totalorder %v12698_v26, 2 }
 0x4e5   :  { %8139 = vst [vmem:[#allocation2 + $0x1b8] ss:$-436 sps:$4 sm:$0x83] %v8091_v13   ;;  %v9051_v50 = vrot.slane %v9019_v42, 1  ;;  %v16640_v21 = vsel %vm7772_vm3, 1.0, %v19013_v22  ;;  %v19305_v13 = vld [vmem:[#allocation9_spill] sm:$0xff] }
 0x4e6   :  { %vm7770_vm7 = vcmp.le.s32.totalorder %v19305_v13, 27 }
 0x4e7   :  { %9099 = vst [vmem:[#allocation2 + $0x118] ss:$452 sps:$4 sm:$0x83] %v9051_v50  }
 0x4e8   :  { %8285 = vrot.lane.b32.xlu1 %v16548_v8, %s12451_s3  ;;  %7723 = vrot.lane.b32.xlu0 %v16548_v8, %s12452_s4 }
 0x4ec   :  { %7533 = vrot.lane.b32.xlu1 %v16538_v40, %s12435_s17  ;;  %7916 = vrot.lane.b32.xlu0 %v16548_v8, %s12453_s18 }
 0x4f0   :  { %7725 = vrot.lane.b32.xlu1 %v16538_v40, %s12452_s4 }
 0x4f4   :  { %7918 = vrot.lane.b32.xlu1 %v16538_v40, %s12453_s18 }
 0x519   :  { %v7013_v53 = vpop.f32.mrf.mxu1 }
 0x51a   :  { %v7014_v46 = vadd.f32 %v7013_v53, %v16527_v33 }
 0x51b   :  { %v7015_v43 = vpop.f32.mrf.mxu1 }
 0x51c   :  { %vm7170_vm10 = vcmp.gt.f32.partialorder %v7014_v46, 0.0  ;;  %v7186_v52 = vmul.f32 0.01, %v7014_v46  ;;  %v7016_v27 = vadd.f32 %v7015_v43, %v16527_v33 }
 0x51e   :  { %v16583_v48 = vsel %vm7170_vm10, %v7014_v46, %v7186_v52  ;;  %vm7171_vm6 = vcmp.gt.f32.partialorder %v7016_v27, 0.0  ;;  %v7187_v60 = vmul.f32 0.01, %v7016_v27  ;;  %vm19306_vm10 = vcmp.lt.s32.totalorder %v12698_v26, 62 }
 0x51f   :  { %v8101_v16 = vrot.slane %v16583_v48, 1 }
 0x520   :  { %v16586_v2 = vsel %vm7171_vm6, %v7016_v27, %v7187_v60  ;;  %vm7753_vm6 = vcmp.lt.s32.totalorder %v12698_v26, 60 }
 0x521   :  { %8133 = vst [vmem:[#allocation2 + $0x100] ss:$316 sps:$4 sm:$0x83] %v8101_v16   ;;  %9077 = vst [vmem:[#allocation2 + $0x268] ss:$-276 sps:$4 sm:$0x83] %v8101_v16  }
 0x522   :  { %v8102_v41 = vrot.slane %v16586_v2, 1 }
 0x524   :  { %8134 = vst [vmem:[#allocation2 + $0xb8] ss:$124 sps:$4 sm:$0x83] %v8102_v41   ;;  %9078 = vst [vmem:[#allocation2 + $0x88] ss:$580 sps:$4 sm:$0x83] %v8102_v41  }
 0x525   :  { %v16659_v41 = vsel %vm7770_vm7, 1.0, %v19013_v22 }
 0x539   :  { %v6800_v17 = vpop.f32.mrf.mxu0 }
 0x53a   :  { %v6801_v14 = vadd.f32 %v6800_v17, %v16527_v33 }
 0x53b   :  { %v6802_v4 = vpop.f32.mrf.mxu0 }
 0x53c   :  { %vm7164_vm14 = vcmp.gt.f32.partialorder %v6801_v14, 0.0  ;;  %v7180_v20 = vmul.f32 0.01, %v6801_v14  ;;  %v6803_v29 = vadd.f32 %v6802_v4, %v16527_v33 }
 0x53e   :  { %v16591_v25 = vsel %vm7164_vm14, %v6801_v14, %v7180_v20  ;;  %vm7165_vm15 = vcmp.gt.f32.partialorder %v6803_v29, 0.0  ;;  %v7181_v34 = vmul.f32 0.01, %v6803_v29  ;;  %vm7274_vm14 = vcmp.ge.s32.totalorder %v19300_v44, 2 }
 0x53f   :  { %v8095_v15 = vrot.slane %v16591_v25, 1  ;;  %8163 = vrot.lane.b32.xlu0 %v16591_v25, %s12442_s21 }
 0x540   :  { %v16596_v57 = vsel %vm7165_vm15, %v6803_v29, %v7181_v34  ;;  %vm7275_vm15 = vcmp.ge.s32.totalorder %v19301_v19, 2 }
 0x541   :  { %8127 = vst [vmem:[#allocation2 + $0x38] ss:$500 sps:$4 sm:$0x83] %v8095_v15   ;;  %9071 = vst [vmem:[#allocation2 + $0xb0] ss:$532 sps:$4 sm:$0x83] %v8095_v15   ;;  %8165 = vrot.lane.b32.xlu1 %v16596_v57, %s12442_s21 }
 0x542   :  { %v8096_v55 = vrot.slane %v16596_v57, 1 }
 0x543   :  { %8291 = vrot.lane.b32.xlu0 %v16591_v25, %s12451_s3 }
 0x544   :  { %8128 = vst [vmem:[#allocation2 + $0x190] ss:$-228 sps:$4 sm:$0x83] %v8096_v55   ;;  %9072 = vst [vmem:[#allocation2 + $0x200] ss:$116 sps:$4 sm:$0x83] %v8096_v55  }
 0x545   :  { %8293 = vrot.lane.b32.xlu1 %v16596_v57, %s12451_s3 }
 0x547   :  { %7529 = vrot.lane.b32.xlu0 %v16561_v37, %s12435_s17 }
 0x549   :  { %7721 = vrot.lane.b32.xlu1 %v16561_v37, %s12452_s4 }
 0x54b   :  { %7914 = vrot.lane.b32.xlu0 %v16561_v37, %s12453_s18 }
 0x54d   :  { %7535 = vrot.lane.b32.xlu1 %v16540_v3, %s12435_s17 }
 0x54e   :  { %v8160_v12 = vpop.permute.xlu1 %8159  ;;  %v8288_v31 = vpop.permute.xlu0 %8287 }
 0x54f   :  { %7537 = vrot.lane.b32.xlu0 %v16591_v25, %s12435_s17 }
 0x551   :  { %7727 = vrot.lane.b32.xlu1 %v16540_v3, %s12452_s4 }
 0x552   :  { %v16615_v30 = vpop.permute.xlu1 %8161  ;;  %v16621_v51 = vpop.permute.xlu0 %8157 }
 0x553   :  { %v8199_v47 = vsel %vm5100_vm9, %v8160_v12, %v16615_v30  ;;  %v8200_v18 = vsel %vm5100_vm9, %v16621_v51, %v8160_v12  ;;  %7729 = vrot.lane.b32.xlu0 %v16591_v25, %s12452_s4 }
 0x554   :  { %v8205_v59 = vmul.f32 %v19302_v35, %v8199_v47  ;;  %v9149_v62 = vmul.f32 %v19303_v49, %v8199_v47  ;;  %v8204_v56 = vmul.f32 %v19303_v49, %v8200_v18  ;;  %v9148_v10 = vmul.f32 %v19304_v61, %v8200_v18 }
 0x555   :  { %7920 = vrot.lane.b32.xlu1 %v16540_v3, %s12453_s18 }
 0x556   :  { %v8237_v42 = vrot.slane %v8205_v59, 6  ;;  %v9181_v50 = vrot.slane %v9149_v62, 6  ;;  %v16643_v53 = vpop.permute.xlu1 %8289  ;;  %v8236_v46 = vrot.slane %v8204_v56, 6  ;;  %v9180_v43 = vrot.slane %v9148_v10, 6  ;;  %v16654_v16 = vpop.permute.xlu0 %7531 }
 0x557   :  { %v8328_v52 = vsel %vm8315_vm12, %v8288_v31, %v16643_v53  ;;  %7922 = vrot.lane.b32.xlu0 %v16591_v25, %s12453_s18 }
 0x558   :  { %8269 = vst [vmem:[#allocation2 + $0x188] sm:$0x1c] %v8237_v42  ;;  %9213 = vst [vmem:[#allocation2 + $0x170] sm:$0x1c] %v9181_v50  ;;  %v8366_v27 = vmul.f32 %v16640_v21, %v8328_v52  ;;  %v9277_v60 = vmul.f32 %v16637_v36, %v8328_v52 }
 0x559   :  { %8268 = vst [vmem:[#allocation2 + $0x80] sm:$0x1c] %v8236_v46  ;;  %9212 = vst [vmem:[#allocation2 + $0xc0] sm:$0x1c] %v9180_v43  ;;  %v7155_v4 = vpop.f32.mrf.mxu1  ;;  %7210 = vrot.lane.b32.xlu1 %v16548_v8, %s12454_s1 }
 0x55a   :  { %v8398_v17 = vrot.slane %v8366_v27, 3  ;;  %v9309_v14 = vrot.slane %v9277_v60, 3  ;;  %v16661_v20 = vpop.permute.xlu1 %8285  ;;  %v7156_v29 = vadd.f32 %v7155_v4, %v16527_v33 }
 0x55b   :  { %v8329_v34 = vsel %vm8315_vm12, %v16661_v20, %v8288_v31  ;;  %v7157_v12 = vpop.f32.mrf.mxu1  ;;  %7212 = vrot.lane.b32.xlu0 %v16538_v40, %s12454_s1  ;;  %v16678_v31 = vpop.permute.xlu0 %7723 }
 0x55c   :  { %8430 = vst [vmem:[#allocation2 + $0x188] sm:$0xe0] %v8398_v17  ;;  %9341 = vst [vmem:[#allocation2 + $0x170] sm:$0xe0] %v9309_v14  ;;  %v8365_v15 = vmul.f32 %v16637_v36, %v8329_v34  ;;  %v9276_v55 = vmul.f32 %v16659_v41, %v8329_v34  ;;  %vm7174_vm0 = vcmp.gt.f32.partialorder %v7156_v29, 0.0  ;;  %v7158_v18 = vadd.f32 %v7157_v12, %v16527_v33 }
 0x55d   :  { %v7190_v47 = vmul.f32 0.01, %v7156_v29  ;;  %7371 = vrot.lane.b32.xlu1 %v16548_v8, %s12440_s19 }
 0x55e   :  { %v8397_v59 = vrot.slane %v8365_v15, 3  ;;  %v9308_v62 = vrot.slane %v9276_v55, 3  ;;  %v16674_v56 = vpop.permute.xlu1 %7533  ;;  %vm7175_vm5 = vcmp.gt.f32.partialorder %v7158_v18, 0.0  ;;  %v7191_v42 = vmul.f32 0.01, %v7158_v18 }
 0x55f   :  { %v16680_v10 = vsel %vm7174_vm0, %v7156_v29, %v7190_v47  ;;  %v7574_v50 = vsel %vm19306_vm10, %v16654_v16, %v16674_v56  ;;  %7373 = vrot.lane.b32.xlu0 %v16538_v40, %s12440_s19  ;;  %v16710_v19 = vpop.permute.xlu0 %7916  ;;  %v16715_v15 = vsel %vm7274_vm14, 1.0, %v19013_v22  ;;  %v16718_v55 = vsel %vm7275_vm15, 1.0, %v19013_v22 }
 0x560   :  { %v8105_v46 = vrot.slane %v16680_v10, 1  ;;  %8429 = vst [vmem:[#allocation2 + $0x80] sm:$0xe0] %v8397_v59  ;;  %9340 = vst [vmem:[#allocation2 + $0xc0] sm:$0xe0] %v9308_v62  ;;  %v7627_v43 = vmul.f32 %v19302_v35, %v7574_v50  ;;  %v8605_v52 = vmul.f32 %v19303_v49, %v7574_v50  ;;  %v16692_v8 = vsel %vm7175_vm5, %v7158_v18, %v7191_v42 }
 0x561   :  { %v8106_v27 = vrot.slane %v16692_v8, 1  ;;  %7208 = vrot.lane.b32.xlu1 %v16561_v37, %s12454_s1 }
 0x562   :  { %8137 = vst [vmem:[#allocation2 + $0x210] ss:$212 sps:$4 sm:$0x83] %v8105_v46   ;;  %9081 = vst [vmem:[#allocation2 + $0x198] ss:$156 sps:$4 sm:$0x83] %v8105_v46   ;;  %v16696_v14 = vpop.permute.xlu1 %7725 }
 0x563   :  { %v7659_v60 = vrot.slane %v7627_v43, 2  ;;  %v8637_v17 = vrot.slane %v8605_v52, 2  ;;  %v7767_v40 = vsel %vm7753_vm6, %v16678_v31, %v16696_v14  ;;  %v9438_v4 = vld [vmem:[#allocation2 + $0x170] sm:$0xff]  ;;  %8138 = vst [vmem:[#allocation2 + $0x50] ss:$348 sps:$4 sm:$0x83] %v8106_v27   ;;  %7369 = vrot.lane.b32.xlu0 %v16561_v37, %s12440_s19 }
 0x564   :  { %9082 = vst [vmem:[#allocation2 + $0x148] ss:$28 sps:$4 sm:$0x83] %v8106_v27   ;;  %v7836_v29 = vmul.f32 %v16640_v21, %v7767_v40  ;;  %v8749_v34 = vmul.f32 %v16637_v36, %v7767_v40  ;;  %9482 = vmatprep.subr.mxu0 %v9438_v4 }
 0x565   :  { %7691 = vst [vmem:[#allocation2 + $0xe8] ss:$-212 sps:$4 sm:$0xc1] %v7659_v60   ;;  %8669 = vst [vmem:[#allocation2 + $0x278] ss:$92 sps:$4 sm:$0xc1] %v8637_v17   ;;  %8155 = vrot.lane.b32.xlu1 %v16561_v37, %s12442_s21 }
 0x566   :  { %v7868_v12 = vrot.slane %v7836_v29, 7  ;;  %v8781_v47 = vrot.slane %v8749_v34, 7  ;;  %v16720_v18 = vpop.permute.xlu1 %7918 }
 0x567   :  { %v7960_v59 = vsel %vm7946_vm2, %v16710_v19, %v16720_v18  ;;  %v9437_v62 = vld [vmem:[#allocation2 + $0xc0] sm:$0xff]  ;;  %8283 = vrot.lane.b32.xlu0 %v16561_v37, %s12451_s3 }
 0x568   :  { %7900 = vst [vmem:[#allocation2 + $0xe8] sm:$0xe] %v7868_v12  ;;  %8813 = vst [vmem:[#allocation2 + $0x278] sm:$0xe] %v8781_v47  ;;  %v7997_v44 = vmul.f32 %v16718_v55, %v7960_v59  ;;  %v8893_v42 = vmul.f32 %v16715_v15, %v7960_v59  ;;  %9483 = vmatpush1.msra.mxu0 %v9437_v62 }
 0x569   :  { %7214 = vrot.lane.b32.xlu1 %v16540_v3, %s12454_s1 }
 0x56a   :  { %v8029_v50 = vrot.slane %v7997_v44, 4  ;;  %v8925_v46 = vrot.slane %v8893_v42, 4 }
 0x56b   :  { %7216 = vrot.lane.b32.xlu0 %v16591_v25, %s12454_s1 }
 0x56c   :  { %8061 = vst [vmem:[#allocation2 + $0xe8] sm:$0x70] %v8029_v50  ;;  %8957 = vst [vmem:[#allocation2 + $0x278] sm:$0x70] %v8925_v46 }
 0x56d   :  { %7375 = vrot.lane.b32.xlu1 %v16540_v3, %s12440_s19 }
 0x56f   :  { %7377 = vrot.lane.b32.xlu0 %v16591_v25, %s12440_s19 }
 0x571   :  { %7559 = vrot.lane.b32.xlu1 %v16692_v8, %s12435_s17 }
 0x573   :  { %v9422_v37 = vld [vmem:[#allocation2 + $0x278] sm:$0xff]  ;;  %7751 = vrot.lane.b32.xlu0 %v16692_v8, %s12452_s4 }
 0x574   :  { %9484 = vmatprep.subr.mxu0 %v9422_v37 }
 0x575   :  { %7944 = vrot.lane.b32.xlu1 %v16692_v8, %s12453_s18 }
 0x577   :  { %7399 = vrot.lane.b32.xlu0 %v16692_v8, %s12440_s19 }
 0x579   :  { %7238 = vrot.lane.b32.xlu1 %v16692_v8, %s12454_s1 }
 0x57b   :  { %8167 = vrot.lane.b32.xlu0 %v16550_v32, %s12442_s21 }
 0x57c   :  { %v6942_v3 = vpop.f32.mrf.mxu0 }
 0x57d   :  { %v6943_v25 = vadd.f32 %v6942_v3, %v16527_v33  ;;  %8169 = vrot.lane.b32.xlu1 %v16554_v7, %s12442_s21 }
 0x57e   :  { %v6944_v43 = vpop.f32.mrf.mxu0 }
 0x57f   :  { %vm7168_vm3 = vcmp.gt.f32.partialorder %v6943_v25, 0.0  ;;  %v7184_v52 = vmul.f32 0.01, %v6943_v25  ;;  %v6945_v27 = vadd.f32 %v6944_v43, %v16527_v33  ;;  %8295 = vrot.lane.b32.xlu0 %v16550_v32, %s12451_s3  ;;  %v19307_v43 = vld [vmem:[#allocation12_spill] sm:$0xff] }
 0x580   :  { %vm7773_vm14 = vcmp.le.s32.totalorder %v19307_v43, 27 }
 0x581   :  { %v7200_v60 = vsel %vm7168_vm3, %v6943_v25, %v7184_v52  ;;  %vm7169_vm0 = vcmp.gt.f32.partialorder %v6945_v27, 0.0  ;;  %v7185_v17 = vmul.f32 0.01, %v6945_v27  ;;  %8297 = vrot.lane.b32.xlu1 %v16554_v7, %s12451_s3  ;;  %v19308_v52 = vld [vmem:[#allocation49_spill] sm:$0xff]  ;;  %vm7273_vm3 = vcmp.ge.s32.totalorder %v19305_v13, 2 }
 0x582   :  { %v8099_v40 = vrot.slane %v7200_v60, 1  ;;  %v9011_v4 = vmul.f32 0.0, %v7200_v60 }
 0x583   :  { %v16758_v29 = vsel %vm7169_vm0, %v6945_v27, %v7185_v17  ;;  %7539 = vrot.lane.b32.xlu0 %v16596_v57, %s12435_s17  ;;  %vm19310_vm0 = vcmp.lt.s32.totalorder %v12698_v26, 62 }
 0x584   :  { %8131 = vst [vmem:[#allocation2 + $0x1c8] ss:$92 sps:$4 sm:$0x83] %v8099_v40   ;;  %v9043_v34 = vrot.slane %v9011_v4, 1  ;;  %v8100_v12 = vrot.slane %v16758_v29, 1  ;;  %v19309_v40 = vld [vmem:[#allocation13_spill] sm:$0xff] }
 0x585   :  { %7541 = vrot.lane.b32.xlu1 %v16550_v32, %s12435_s17  ;;  %vm7774_vm15 = vcmp.le.s32.totalorder %v19309_v40, 27 }
 0x586   :  { %9075 = vst [vmem:[#allocation2 + $0x2e8] ss:$12 sps:$4 sm:$0x83] %v9043_v34   ;;  %8132 = vst [vmem:[#allocation2 + $0x280] ss:$-36 sps:$4 sm:$0x83] %v8100_v12  }
 0x587   :  { %9076 = vst [vmem:[#allocation2 + $0x260] ss:$-124 sps:$4 sm:$0x83] %v8100_v12   ;;  %7731 = vrot.lane.b32.xlu0 %v16596_v57, %s12452_s4 }
 0x589   :  { %7733 = vrot.lane.b32.xlu1 %v16550_v32, %s12452_s4 }
 0x58b   :  { %7924 = vrot.lane.b32.xlu0 %v16596_v57, %s12453_s18 }
 0x58d   :  { %7926 = vrot.lane.b32.xlu1 %v16550_v32, %s12453_s18 }
 0x58f   :  { %8171 = vrot.lane.b32.xlu0 %v7200_v60, %s12442_s21 }
 0x591   :  { %8173 = vrot.lane.b32.xlu1 %v16758_v29, %s12442_s21 }
 0x593   :  { %8299 = vrot.lane.b32.xlu0 %v7200_v60, %s12451_s3 }
 0x595   :  { %8301 = vrot.lane.b32.xlu1 %v16758_v29, %s12451_s3 }
 0x597   :  { %7543 = vrot.lane.b32.xlu0 %v16554_v7, %s12435_s17 }
 0x598   :  { %v7084_v47 = vpop.f32.mrf.mxu0 }
 0x599   :  { %v7085_v59 = vadd.f32 %v7084_v47, %v16527_v33  ;;  %7545 = vrot.lane.b32.xlu1 %v7200_v60, %s12435_s17 }
 0x59a   :  { %v7086_v62 = vpop.f32.mrf.mxu0 }
 0x59b   :  { %vm7172_vm5 = vcmp.gt.f32.partialorder %v7085_v59, 0.0  ;;  %v7188_v44 = vmul.f32 0.01, %v7085_v59  ;;  %v7087_v42 = vadd.f32 %v7086_v62, %v16527_v33  ;;  %7735 = vrot.lane.b32.xlu0 %v16554_v7, %s12452_s4  ;;  %v16837_v62 = vsel %vm7774_vm15, 1.0, %v19013_v22 }
 0x59c   :  { %vm7277_vm15 = vcmp.ge.s32.totalorder %v19309_v40, 2 }
 0x59d   :  { %v16786_v50 = vsel %vm7172_vm5, %v7085_v59, %v7188_v44  ;;  %vm7173_vm10 = vcmp.gt.f32.partialorder %v7087_v42, 0.0  ;;  %v7189_v46 = vmul.f32 0.01, %v7087_v42  ;;  %7737 = vrot.lane.b32.xlu1 %v7200_v60, %s12452_s4  ;;  %vm19311_vm5 = vmmov %vm19310_vm0 }
 0x59e   :  { %v8103_v37 = vrot.slane %v16786_v50, 1 }
 0x59f   :  { %v16791_v3 = vsel %vm7173_vm10, %v7087_v42, %v7189_v46  ;;  %7928 = vrot.lane.b32.xlu0 %v16554_v7, %s12453_s18  ;;  %vm19312_vm10 = vmmov %vm19310_vm0 }
 0x5a0   :  { %8135 = vst [vmem:[#allocation2 + $0x288] ss:$-300 sps:$4 sm:$0x83] %v8103_v37   ;;  %9079 = vst [vmem:[#allocation2 + $0x110] ss:$196 sps:$4 sm:$0x83] %v8103_v37  }
 0x5a1   :  { %v8104_v25 = vrot.slane %v16791_v3, 1  ;;  %7930 = vrot.lane.b32.xlu1 %v7200_v60, %s12453_s18 }
 0x5a3   :  { %8136 = vst [vmem:[#allocation2 + $0x60] ss:$60 sps:$4 sm:$0x83] %v8104_v25   ;;  %9080 = vst [vmem:[#allocation2 + $0x108] ss:$60 sps:$4 sm:$0x83] %v8104_v25   ;;  %7218 = vrot.lane.b32.xlu0 %v16596_v57, %s12454_s1 }
 0x5a5   :  { %7220 = vrot.lane.b32.xlu1 %v16550_v32, %s12454_s1 }
 0x5a7   :  { %7379 = vrot.lane.b32.xlu0 %v16596_v57, %s12440_s19 }
 0x5a9   :  { %7381 = vrot.lane.b32.xlu1 %v16550_v32, %s12440_s19 }
 0x5ab   :  { %7383 = vrot.lane.b32.xlu0 %v16554_v7, %s12440_s19 }
 0x5ad   :  { %7385 = vrot.lane.b32.xlu1 %v7200_v60, %s12440_s19 }
 0x5af   :  { %7222 = vrot.lane.b32.xlu0 %v16554_v7, %s12454_s1 }
 0x5b1   :  { %v8164_v33 = vpop.permute.xlu0 %8163  ;;  %7224 = vrot.lane.b32.xlu1 %v7200_v60, %s12454_s1  ;;  %v16827_v60 = vsel %vm7773_vm14, 1.0, %v19013_v22  ;;  %vm7276_vm14 = vcmp.ge.s32.totalorder %v19307_v43, 2  ;;  %v16933_v43 = vsel %vm7277_vm15, 1.0, %v19013_v22 }
 0x5b2   :  { %v8198_v57 = vsel %vm5100_vm9, %v16615_v30, %v8164_v33 }
 0x5b3   :  { %v8206_v27 = vmul.f32 %v19308_v52, %v8198_v57  ;;  %v9150_v32 = vmul.f32 %v19302_v35, %v8198_v57  ;;  %v16818_v17 = vpop.permute.xlu1 %8165  ;;  %8175 = vrot.lane.b32.xlu0 %v16583_v48, %s12442_s21 }
 0x5b4   :  { %v8197_v7 = vsel %vm5100_vm9, %v8164_v33, %v16818_v17 }
 0x5b5   :  { %v8238_v4 = vrot.slane %v8206_v27, 6  ;;  %v9182_v30 = vrot.slane %v9150_v32, 6  ;;  %v8207_v34 = vmul.f32 %v15719_v54, %v8197_v7  ;;  %v9151_v12 = vmul.f32 %v19308_v52, %v8197_v7  ;;  %v8292_v47 = vpop.permute.xlu0 %8291  ;;  %8177 = vrot.lane.b32.xlu1 %v16586_v2, %s12442_s21 }
 0x5b6   :  { %v8327_v59 = vsel %vm8315_vm12, %v16643_v53, %v8292_v47 }
 0x5b7   :  { %8270 = vst [vmem:[#allocation2 + $0x208] sm:$0x1c] %v8238_v4  ;;  %9214 = vst [vmem:[#allocation2 + $0x90] sm:$0x1c] %v9182_v30  ;;  %v8239_v44 = vrot.slane %v8207_v34, 6  ;;  %v9183_v42 = vrot.slane %v9151_v12, 6  ;;  %v8367_v46 = vmul.f32 %v16827_v60, %v8327_v59  ;;  %v9278_v37 = vmul.f32 %v16640_v21, %v8327_v59  ;;  %v16841_v25 = vpop.permute.xlu1 %8293  ;;  %8303 = vrot.lane.b32.xlu0 %v16583_v48, %s12451_s3 }
 0x5b8   :  { %v8326_v53 = vsel %vm8315_vm12, %v8292_v47, %v16841_v25 }
 0x5b9   :  { %8271 = vst [vmem:[#allocation2 + $0x38] sm:$0x1c] %v8239_v44  ;;  %9215 = vst [vmem:[#allocation2 + $0xb0] sm:$0x1c] %v9183_v42  ;;  %v8399_v33 = vrot.slane %v8367_v46, 3  ;;  %v9310_v57 = vrot.slane %v9278_v37, 3  ;;  %v8368_v27 = vmul.f32 %v16837_v62, %v8326_v53  ;;  %v9279_v32 = vmul.f32 %v16827_v60, %v8326_v53  ;;  %8305 = vrot.lane.b32.xlu1 %v16586_v2, %s12451_s3  ;;  %v16853_v7 = vpop.permute.xlu0 %7529 }
 0x5ba   :  { %v7575_v4 = vsel %vm19310_vm0, %v16853_v7, %v16654_v16  ;;  %v16872_v16 = vsel %vm7273_vm3, 1.0, %v19013_v22  ;;  %vm7240_vm0 = vcmp.lt.s32.totalorder %v12698_v26, 66 }
 0x5bb   :  { %8431 = vst [vmem:[#allocation2 + $0x208] sm:$0xe0] %v8399_v33  ;;  %9342 = vst [vmem:[#allocation2 + $0x90] sm:$0xe0] %v9310_v57  ;;  %v8400_v30 = vrot.slane %v8368_v27, 3  ;;  %v9311_v34 = vrot.slane %v9279_v32, 3  ;;  %v7626_v12 = vmul.f32 %v19303_v49, %v7575_v4  ;;  %v8604_v47 = vmul.f32 %v19304_v61, %v7575_v4  ;;  %v16861_v59 = vpop.permute.xlu1 %7721  ;;  %7547 = vrot.lane.b32.xlu0 %v16758_v29, %s12435_s17 }
 0x5bc   :  { %v7768_v44 = vsel %vm7753_vm6, %v16861_v59, %v16678_v31 }
 0x5bd   :  { %8432 = vst [vmem:[#allocation2 + $0x38] sm:$0xe0] %v8400_v30  ;;  %9343 = vst [vmem:[#allocation2 + $0xb0] sm:$0xe0] %v9311_v34  ;;  %v7658_v49 = vrot.slane %v7626_v12, 2  ;;  %v8636_v42 = vrot.slane %v8604_v47, 2  ;;  %v7835_v46 = vmul.f32 %v16637_v36, %v7768_v44  ;;  %v8748_v37 = vmul.f32 %v16659_v41, %v7768_v44  ;;  %7549 = vrot.lane.b32.xlu1 %v16583_v48, %s12435_s17  ;;  %v16878_v53 = vpop.permute.xlu0 %7914 }
 0x5be   :  { %v7961_v31 = vsel %vm7946_vm2, %v16878_v53, %v16710_v19 }
 0x5bf   :  { %7690 = vst [vmem:[#allocation2 + $0x248] ss:$-372 sps:$4 sm:$0xc1] %v7658_v49   ;;  %8668 = vst [vmem:[#allocation2 + $0xa0] ss:$332 sps:$4 sm:$0xc1] %v8636_v42   ;;  %v7996_v27 = vmul.f32 %v16715_v15, %v7961_v31  ;;  %v8892_v36 = vmul.f32 %v16872_v16, %v7961_v31  ;;  %v7536_v32 = vpop.permute.xlu1 %7535  ;;  %7739 = vrot.lane.b32.xlu0 %v16758_v29, %s12452_s4 }
 0x5c0   :  { %v7867_v33 = vrot.slane %v7835_v46, 7  ;;  %v8780_v57 = vrot.slane %v8748_v37, 7  ;;  %v7573_v4 = vsel %vm19311_vm5, %v16674_v56, %v7536_v32 }
 0x5c1   :  { %v8028_v30 = vrot.slane %v7996_v27, 4  ;;  %v8924_v19 = vrot.slane %v8892_v36, 4  ;;  %v7628_v34 = vmul.f32 %v19308_v52, %v7573_v4  ;;  %v8606_v12 = vmul.f32 %v19302_v35, %v7573_v4  ;;  %7741 = vrot.lane.b32.xlu1 %v16583_v48, %s12452_s4  ;;  %v16895_v47 = vpop.permute.xlu0 %7537 }
 0x5c2   :  { %7899 = vst [vmem:[#allocation2 + $0x248] sm:$0xe] %v7867_v33  ;;  %8812 = vst [vmem:[#allocation2 + $0xa0] sm:$0xe] %v8780_v57  ;;  %v7572_v44 = vsel %vm19312_vm10, %v7536_v32, %v16895_v47  ;;  %v9439_v32 = vld [vmem:[#allocation2 + $0x90] sm:$0xff]  ;;  %v16921_v4 = vsel %vm7276_vm14, 1.0, %v19013_v22 }
 0x5c3   :  { %8060 = vst [vmem:[#allocation2 + $0x248] sm:$0x70] %v8028_v30  ;;  %8956 = vst [vmem:[#allocation2 + $0xa0] sm:$0x70] %v8924_v19  ;;  %v7660_v56 = vrot.slane %v7628_v34, 2  ;;  %v8638_v49 = vrot.slane %v8606_v12, 2  ;;  %v7629_v42 = vmul.f32 %v15719_v54, %v7572_v44  ;;  %v8607_v46 = vmul.f32 %v19308_v52, %v7572_v44  ;;  %v7728_v35 = vpop.permute.xlu1 %7727  ;;  %7932 = vrot.lane.b32.xlu0 %v16758_v29, %s12453_s18 }
 0x5c4   :  { %v7766_v37 = vsel %vm7753_vm6, %v16696_v14, %v7728_v35  ;;  %v9440_v31 = vld [vmem:[#allocation2 + $0xb0] sm:$0xff]  ;;  %vm7785_vm10 = vcmp.le.s32.totalorder %v19159_v23, 27  ;;  %vm19316_vm14 = vcmp.le.s32.totalorder %v19305_v13, 29 }
 0x5c5   :  { %7692 = vst [vmem:[#allocation2 + $0x68] ss:$-28 sps:$4 sm:$0xc1] %v7660_v56   ;;  %8670 = vst [vmem:[#allocation2 + $0x8] ss:$492 sps:$4 sm:$0xc1] %v8638_v49   ;;  %v7837_v27 = vmul.f32 %v16827_v60, %v7766_v37  ;;  %v8750_v36 = vmul.f32 %v16640_v21, %v7766_v37  ;;  %9553 = vmatprep.subr.mxu1 %v9440_v31  ;;  %7934 = vrot.lane.b32.xlu1 %v16583_v48, %s12453_s18  ;;  %v16913_v52 = vpop.permute.xlu0 %7729 }
 0x5c6   :  { %v7661_v33 = vrot.slane %v7629_v42, 2  ;;  %v8639_v57 = vrot.slane %v8607_v46, 2  ;;  %v7765_v14 = vsel %vm7753_vm6, %v7728_v35, %v16913_v52  ;;  %9554 = vmatpush1.msra.mxu1 %v9439_v32 }
 0x5c7   :  { %v7869_v21 = vrot.slane %v7837_v27, 7  ;;  %v8782_v30 = vrot.slane %v8750_v36, 7  ;;  %v7838_v19 = vmul.f32 %v16837_v62, %v7765_v14  ;;  %v8751_v34 = vmul.f32 %v16827_v60, %v7765_v14  ;;  %v7921_v12 = vpop.permute.xlu1 %7920  ;;  %8179 = vrot.lane.b32.xlu0 %v16786_v50, %s12442_s21 }
 0x5c8   :  { %7693 = vst [vmem:[#allocation2 + $0x228] ss:$-500 sps:$4 sm:$0xc1] %v7661_v33   ;;  %8671 = vst [vmem:[#allocation2 + $0x2c0] ss:$-660 sps:$4 sm:$0xc1] %v8639_v57   ;;  %v7959_v44 = vsel %vm7946_vm2, %v16720_v18, %v7921_v12 }
 0x5c9   :  { %7901 = vst [vmem:[#allocation2 + $0x68] sm:$0xe] %v7869_v21  ;;  %8814 = vst [vmem:[#allocation2 + $0x8] sm:$0xe] %v8782_v30  ;;  %v7870_v56 = vrot.slane %v7838_v19, 7  ;;  %v8783_v49 = vrot.slane %v8751_v34, 7  ;;  %v7998_v42 = vmul.f32 %v16921_v4, %v7959_v44  ;;  %v8894_v60 = vmul.f32 %v16718_v55, %v7959_v44  ;;  %8181 = vrot.lane.b32.xlu1 %v16791_v3, %s12442_s21  ;;  %v16939_v46 = vpop.permute.xlu0 %7922 }
 0x5ca   :  { %v7958_v18 = vsel %vm7946_vm2, %v7921_v12, %v16939_v46  ;;  %v9421_v40 = vld [vmem:[#allocation2 + $0xa0] sm:$0xff] }
 0x5cb   :  { %7902 = vst [vmem:[#allocation2 + $0x228] sm:$0xe] %v7870_v56  ;;  %8815 = vst [vmem:[#allocation2 + $0x2c0] sm:$0xe] %v8783_v49  ;;  %v8030_v35 = vrot.slane %v7998_v42, 4  ;;  %v8926_v37 = vrot.slane %v8894_v60, 4  ;;  %v7999_v31 = vmul.f32 %v16933_v43, %v7958_v18  ;;  %v8895_v33 = vmul.f32 %v16921_v4, %v7958_v18  ;;  %v7211_v57 = vpop.permute.xlu1 %7210  ;;  %8307 = vrot.lane.b32.xlu0 %v16786_v50, %s12451_s3 }
 0x5cc   :  { %9485 = vmatpush1.msra.mxu0 %v9421_v40 }
 0x5cd   :  { %8062 = vst [vmem:[#allocation2 + $0x68] sm:$0x70] %v8030_v35  ;;  %8958 = vst [vmem:[#allocation2 + $0x8] sm:$0x70] %v8926_v37  ;;  %v8031_v27 = vrot.slane %v7999_v31, 4  ;;  %v8927_v36 = vrot.slane %v8895_v33, 4  ;;  %8309 = vrot.lane.b32.xlu1 %v16791_v3, %s12451_s3  ;;  %v7213_v32 = vpop.permute.xlu0 %7212 }
 0x5ce   :  { %v7254_v14 = vsel %vm7240_vm0, %v7211_v57, %v7213_v32 }
 0x5cf   :  { %8063 = vst [vmem:[#allocation2 + $0x228] sm:$0x70] %v8031_v27  ;;  %8959 = vst [vmem:[#allocation2 + $0x2c0] sm:$0x70] %v8927_v36  ;;  %v7339_v21 = vmul.f32 %v16718_v55, %v7254_v14  ;;  %v8493_v30 = vmul.f32 %v16715_v15, %v7254_v14  ;;  %v7372_v19 = vpop.permute.xlu1 %7371  ;;  %7551 = vrot.lane.b32.xlu0 %v16586_v2, %s12435_s17 }
 0x5d1   :  { %7355 = vst [vmem:[#allocation2 + $0x10] sm:$0x7] %v7339_v21  ;;  %8509 = vst [vmem:[#allocation2 + $0x2d0] sm:$0x7] %v8493_v30  ;;  %7553 = vrot.lane.b32.xlu1 %v16786_v50, %s12435_s17  ;;  %v7374_v34 = vpop.permute.xlu0 %7373 }
 0x5d2   :  { %v7414_v12 = vsel %vm5986_vm11, %v7372_v19, %v7374_v34 }
 0x5d3   :  { %v7483_v44 = vrot.slane %v7414_v12, 5  ;;  %v16961_v56 = vpop.permute.xlu1 %7208  ;;  %7743 = vrot.lane.b32.xlu0 %v16586_v2, %s12452_s4 }
 0x5d4   :  { %v7255_v49 = vsel %vm7240_vm0, %v16961_v56, %v7211_v57 }
 0x5d5   :  { %7515 = vst [vmem:[#allocation2 + $0x10] sm:$0x38] %v7483_v44  ;;  %8589 = vst [vmem:[#allocation2 + $0x2d0] sm:$0x38] %v7483_v44  ;;  %v7338_v42 = vmul.f32 %v16715_v15, %v7255_v49  ;;  %v8492_v60 = vmul.f32 %v16872_v16, %v7255_v49  ;;  %7745 = vrot.lane.b32.xlu1 %v16786_v50, %s12452_s4  ;;  %v16972_v18 = vpop.permute.xlu0 %7369  ;;  %v9423_v15 = vld [vmem:[#allocation2 + $0x8] sm:$0xff]  ;;  %v19313_v49 = vand.u32 1023, %v12698_v26 }
 0x5d6   :  { %v7415_v40 = vsel %vm5986_vm11, %v16972_v18, %v7372_v19  ;;  %v9424_v35 = vld [vmem:[#allocation2 + $0x2c0] sm:$0xff] }
 0x5d7   :  { %7354 = vst [vmem:[#allocation2 + $0xd0] sm:$0x7] %v7338_v42  ;;  %8508 = vst [vmem:[#allocation2 + $0x1e8] sm:$0x7] %v8492_v60  ;;  %v7482_v37 = vrot.slane %v7415_v40, 5  ;;  %v16977_v31 = vpop.permute.xlu1 %8155  ;;  %7936 = vrot.lane.b32.xlu0 %v16586_v2, %s12453_s18  ;;  %9555 = vmatprep.subr.mxu1 %v9424_v35  ;;  %vm17001_vm5 = vcmp.ge.s32.totalorder %v19313_v49, 64 }
 0x5d8   :  { %v8201_v33 = vsel %vm5100_vm9, %v16977_v31, %v16621_v51  ;;  %9556 = vmatpush1.msra.mxu1 %v9423_v15  ;;  %vm7577_vm15 = vmand %vm17001_vm5, %vm19316_vm14 }
 0x5d9   :  { %7514 = vst [vmem:[#allocation2 + $0xd0] sm:$0x38] %v7482_v37  ;;  %8588 = vst [vmem:[#allocation2 + $0x1e8] sm:$0x38] %v7482_v37  ;;  %v8203_v57 = vmul.f32 %v19304_v61, %v8201_v33  ;;  %v9163_v27 = vmul.f32 0.0, %v8201_v33  ;;  %7938 = vrot.lane.b32.xlu1 %v16786_v50, %s12453_s18  ;;  %v16988_v36 = vpop.permute.xlu0 %8283 }
 0x5da   :  { %v8330_v14 = vsel %vm8315_vm12, %v16988_v36, %v16661_v20  ;;  %vm17029_vm1 = vmand %vm17001_vm5, %vm7770_vm7  ;;  %vm19319_vm7 = vcmp.lt.s32.totalorder %v12698_v26, 62 }
 0x5db   :  { %v8235_v21 = vrot.slane %v8203_v57, 6  ;;  %v9195_v30 = vrot.slane %v9163_v27, 6  ;;  %v8364_v51 = vmul.f32 %v16659_v41, %v8330_v14  ;;  %v9291_v19 = vmul.f32 0.0, %v8330_v14  ;;  %v7215_v12 = vpop.permute.xlu1 %7214  ;;  %7226 = vrot.lane.b32.xlu0 %v16758_v29, %s12454_s1  ;;  %v9390_v14 = vld [vmem:[#allocation2 + $0x80] sm:$0xff]  ;;  %vm8715_vm14 = vmand %vm15960_vm13, %vm7785_vm10 }
 0x5dc   :  { %v7253_v61 = vsel %vm7240_vm0, %v7213_v32, %v7215_v12  ;;  %v9406_v44 = vld [vmem:[#allocation2 + $0x2d0] sm:$0xff] }
 0x5dd   :  { %8267 = vst [vmem:[#allocation2 + $0x1b8] sm:$0x1c] %v8235_v21  ;;  %9227 = vst [vmem:[#allocation2 + $0x118] sm:$0x1c] %v9195_v30  ;;  %v8396_v20 = vrot.slane %v8364_v51, 3  ;;  %v9323_v60 = vrot.slane %v9291_v19, 3  ;;  %v7340_v41 = vmul.f32 %v16921_v4, %v7253_v61  ;;  %v8494_v40 = vmul.f32 %v16718_v55, %v7253_v61  ;;  %7228 = vrot.lane.b32.xlu1 %v16583_v48, %s12454_s1  ;;  %v17009_v32 = vpop.permute.xlu0 %7216 }
 0x5de   :  { %9486 = vmatprep.subr.mxu0 %v9406_v44  ;;  %v7252_v35 = vsel %vm7240_vm0, %v7215_v12, %v17009_v32  ;;  %v11474_v21 = vsel %vm7577_vm15, 1.0, %v19013_v22  ;;  %v11490_v19 = vsel %vm17029_vm1, 1.0, %v19013_v22  ;;  %v11569_v12 = vsel %vm8715_vm14, 1.0, %v19013_v22  ;;  %vm17071_vm1 = vmand %vm17001_vm5, %vm7273_vm3 }
 0x5df   :  { %8428 = vst [vmem:[#allocation2 + $0x1b8] sm:$0xe0] %v8396_v20  ;;  %9355 = vst [vmem:[#allocation2 + $0x118] sm:$0xe0] %v9323_v60  ;;  %v7341_v37 = vmul.f32 %v16933_v43, %v7252_v35  ;;  %v8495_v55 = vmul.f32 %v16921_v4, %v7252_v35  ;;  %v7376_v15 = vpop.permute.xlu1 %7375  ;;  %7387 = vrot.lane.b32.xlu0 %v16758_v29, %s12440_s19  ;;  %vm7288_vm15 = vcmp.ge.s32.totalorder %v19159_v23, 2  ;;  %v11456_v42 = vsel %vm17071_vm1, 1.0, %v19013_v22 }
 0x5e0   :  { %7356 = vst [vmem:[#allocation2 + $0x48] sm:$0x7] %v7340_v41  ;;  %8510 = vst [vmem:[#allocation2 + $0x1f0] sm:$0x7] %v8494_v40  ;;  %v7413_v33 = vsel %vm5986_vm11, %v7374_v34, %v7376_v15  ;;  %v9405_v57 = vld [vmem:[#allocation2 + $0x1e8] sm:$0xff] }
 0x5e1   :  { %7357 = vst [vmem:[#allocation2 + $0x30] sm:$0x7] %v7341_v37  ;;  %8511 = vst [vmem:[#allocation2 + $0x28] sm:$0x7] %v8495_v55  ;;  %v7484_v29 = vrot.slane %v7413_v33, 5  ;;  %7389 = vrot.lane.b32.xlu1 %v16583_v48, %s12440_s19  ;;  %9487 = vmatpush1.msra.mxu0 %v9405_v57  ;;  %v17035_v4 = vpop.permute.xlu0 %7377  ;;  %v11472_v55 = vsel %vm17001_vm5, 1.0, %v19013_v22 }
 0x5e2   :  { %v7412_v34 = vsel %vm5986_vm11, %v7376_v15, %v17035_v4  ;;  %9488 = vmatprep.subr.mxu0 %v9390_v14  ;;  %vm8459_vm14 = vmand %vm15960_vm13, %vm7288_vm15 }
 0x5e3   :  { %7516 = vst [vmem:[#allocation2 + $0x48] sm:$0x38] %v7484_v29  ;;  %8590 = vst [vmem:[#allocation2 + $0x1f0] sm:$0x38] %v7484_v29  ;;  %v7485_v30 = vrot.slane %v7412_v34, 5  ;;  %v17045_v48 = vpop.permute.xlu1 %7559  ;;  %7230 = vrot.lane.b32.xlu0 %v16586_v2, %s12454_s1  ;;  %v11553_v27 = vsel %vm8459_vm14, 1.0, %v19013_v22 }
 0x5e4   :  { %v7576_v51 = vsel %vm19319_vm7, %v17045_v48, %v16853_v7  ;;  %vm19325_vm5 = vmmov %vm19319_vm7 }
 0x5e5   :  { %7517 = vst [vmem:[#allocation2 + $0x30] sm:$0x38] %v7485_v30  ;;  %8591 = vst [vmem:[#allocation2 + $0x28] sm:$0x38] %v7485_v30  ;;  %v7625_v61 = vmul.f32 %v11474_v21, %v7576_v51  ;;  %v8619_v44 = vmul.f32 %v16006_v28, %v7576_v51  ;;  %7232 = vrot.lane.b32.xlu1 %v16786_v50, %s12454_s1  ;;  %v17061_v49 = vpop.permute.xlu0 %7751  ;;  %v19322_v30 = vld [vmem:[#allocation14_spill] sm:$0xff] }
 0x5e6   :  { %v7769_v7 = vsel %vm7753_vm6, %v17061_v49, %v16861_v59  ;;  %v9389_v20 = vld [vmem:[#allocation2 + $0x1b8] sm:$0xff]  ;;  %v9374_v59 = vld [vmem:[#allocation2 + $0x248] sm:$0xff]  ;;  %vm7775_vm13 = vcmp.le.s32.totalorder %v19322_v30, 27  ;;  %vm19326_vm7 = vmmov %vm19325_vm5  ;;  %vm7278_vm1 = vcmp.ge.s32.totalorder %v19322_v30, 2 }
 0x5e7   :  { %v7657_v28 = vrot.slane %v7625_v61, 2  ;;  %v8651_v41 = vrot.slane %v8619_v44, 2  ;;  %v7834_v40 = vmul.f32 %v11490_v19, %v7769_v7  ;;  %v8763_v35 = vmul.f32 %v11569_v12, %v7769_v7  ;;  %v17075_v37 = vpop.permute.xlu1 %7944  ;;  %7391 = vrot.lane.b32.xlu0 %v16586_v2, %s12440_s19  ;;  %9489 = vmatpush1.msra.mxu0 %v9389_v20 }
 0x5e8   :  { %v7962_v13 = vsel %vm7946_vm2, %v17075_v37, %v16878_v53  ;;  %9490 = vmatprep.subr.mxu0 %v9374_v59  ;;  %v17131_v59 = vsel %vm7775_vm13, 1.0, %v19013_v22 }
 0x5e9   :  { %7689 = vst [vmem:[#allocation2] ss:$692 sps:$4 sm:$0xc1] %v7657_v28   ;;  %8683 = vst [vmem:[#allocation2 + $0x2d8] ss:$-308 sps:$4 sm:$0xc1] %v8651_v41   ;;  %v7995_v33 = vmul.f32 %v16872_v16, %v7962_v13  ;;  %7393 = vrot.lane.b32.xlu1 %v16786_v50, %s12440_s19  ;;  %v17093_v11 = vpop.permute.xlu0 %7399 }
 0x5ea   :  { %v7866_v2 = vrot.slane %v7834_v40, 7  ;;  %v8795_v15 = vrot.slane %v8763_v35, 7  ;;  %v8907_v57 = vmul.f32 0.0, %v7962_v13  ;;  %v7416_v53 = vsel %vm5986_vm11, %v17093_v11, %v16972_v18  ;;  %v9407_v44 = vld [vmem:[#allocation2 + $0x1f0] sm:$0xff]  ;;  %v9391_v41 = vld [vmem:[#allocation2 + $0x188] sm:$0xff] }
 0x5eb   :  { %v8027_v16 = vrot.slane %v7995_v33, 4  ;;  %v7449_v14 = vmul.f32 %v11472_v55, %v7416_v53  ;;  %v8539_v50 = vmul.f32 %v15979_v58, %v7416_v53  ;;  %v17104_v34 = vpop.permute.xlu1 %7238  ;;  %8183 = vrot.lane.b32.xlu0 %v16680_v10, %s12442_s21  ;;  %v19323_v40 = vld [vmem:[#allocation15_spill] sm:$0xff] }
 0x5ec   :  { %7898 = vst [vmem:[#allocation2] sm:$0xe] %v7866_v2  ;;  %8827 = vst [vmem:[#allocation2 + $0x2d8] sm:$0xe] %v8795_v15  ;;  %v8939_v29 = vrot.slane %v8907_v57, 4  ;;  %v7256_v18 = vsel %vm7240_vm0, %v17104_v34, %v16961_v56  ;;  %v9408_v21 = vld [vmem:[#allocation2 + $0x28] sm:$0xff] }
 0x5ed   :  { %8059 = vst [vmem:[#allocation2] sm:$0x70] %v8027_v16  ;;  %v7481_v51 = vrot.slane %v7449_v14, 5  ;;  %v8571_v19 = vrot.slane %v8539_v50, 5  ;;  %v7337_v12 = vmul.f32 %v11456_v42, %v7256_v18  ;;  %v8507_v61 = vmul.f32 %v11553_v27, %v7256_v18  ;;  %8185 = vrot.lane.b32.xlu1 %v16692_v8, %s12442_s21  ;;  %9557 = vmatprep.subr.mxu1 %v9408_v21  ;;  %v8168_v58 = vpop.permute.xlu0 %8167  ;;  %v9392_v56 = vld [vmem:[#allocation2 + $0x208] sm:$0xff]  ;;  %v19324_v2 = vld [vmem:[#allocation53_spill] sm:$0xff] }
 0x5ee   :  { %8971 = vst [vmem:[#allocation2 + $0x2d8] sm:$0x70] %v8939_v29  ;;  %v8196_v7 = vsel %vm5100_vm9, %v16818_v17, %v8168_v58  ;;  %9558 = vmatpush1.msra.mxu1 %v9407_v44  ;;  %vm7776_vm3 = vcmp.le.s32.totalorder %v19323_v40, 27  ;;  %v9376_v35 = vld [vmem:[#allocation2 + $0x68] sm:$0xff]  ;;  %v17146_v29 = vld [vmem:[%s18676_s5] sm:$0x7] }
 0x5ef   :  { %7513 = vst [vmem:[#allocation2 + $0x2b0] sm:$0x38] %v7481_v51  ;;  %8603 = vst [vmem:[#allocation2 + $0x1a0] sm:$0x38] %v8571_v19  ;;  %v8208_v20 = vmul.f32 %v15722_v5, %v8196_v7  ;;  %v9152_v60 = vmul.f32 %v15719_v54, %v8196_v7  ;;  %v17120_v28 = vpop.permute.xlu1 %8169  ;;  %8311 = vrot.lane.b32.xlu0 %v16680_v10, %s12451_s3  ;;  %9559 = vmatprep.subr.mxu1 %v9392_v56  ;;  %v9375_v53 = vld [vmem:[#allocation2 + $0xe8] sm:$0xff]  ;;  %v17141_v27 = vsel %vm7776_vm3, 1.0, %v19013_v22 }
 0x5f0   :  { %7353 = vst [vmem:[#allocation2 + $0x2b0] sm:$0x7] %v7337_v12  ;;  %8523 = vst [vmem:[#allocation2 + $0x1a0] sm:$0x7] %v8507_v61  ;;  %v8195_v17 = vsel %vm5100_vm9, %v8168_v58, %v17120_v28  ;;  %9560 = vmatpush1.msra.mxu1 %v9391_v41  ;;  %v9360_v16 = vld [vmem:[#allocation2 + $0x48] sm:$0xff]  ;;  %vm7279_vm14 = vcmp.ge.s32.totalorder %v19323_v40, 2 }
 0x5f1   :  { %v8240_v13 = vrot.slane %v8208_v20, 6  ;;  %v9184_v55 = vrot.slane %v9152_v60, 6  ;;  %v8209_v15 = vmul.f32 %v19324_v2, %v8195_v17  ;;  %v9153_v33 = vmul.f32 %v15722_v5, %v8195_v17  ;;  %8313 = vrot.lane.b32.xlu1 %v16692_v8, %s12451_s3  ;;  %9561 = vmatprep.subr.mxu1 %v9376_v35  ;;  %v8296_v57 = vpop.permute.xlu0 %8295  ;;  %v9358_v20 = vld [vmem:[#allocation2 + $0xd0] sm:$0xff] }
 0x5f2   :  { %v8325_v42 = vsel %vm8315_vm12, %v16841_v25, %v8296_v57  ;;  %9562 = vmatpush1.msra.mxu1 %v9375_v53  ;;  %v9359_v25 = vld [vmem:[#allocation2 + $0x10] sm:$0xff]  ;;  %v17212_v30 = vsel %vm7279_vm14, 1.0, %v19013_v22  ;;  %vm7778_vm3 = vcmp.le.s32.totalorder %v19214_v45, 27  ;;  %vm19334_vm14 = vcmp.lt.s32.totalorder %v12698_v26, 62 }
 0x5f3   :  { %8272 = vst [vmem:[#allocation2 + $0x190] sm:$0x1c] %v8240_v13  ;;  %9216 = vst [vmem:[#allocation2 + $0x200] sm:$0x1c] %v9184_v55  ;;  %v8241_v8 = vrot.slane %v8209_v15, 6  ;;  %v9185_v14 = vrot.slane %v9153_v33, 6  ;;  %v8369_v50 = vmul.f32 %v17131_v59, %v8325_v42  ;;  %v9280_v18 = vmul.f32 %v16837_v62, %v8325_v42  ;;  %v17150_v21 = vpop.permute.xlu1 %8297  ;;  %7555 = vrot.lane.b32.xlu0 %v16791_v3, %s12435_s17 }
 0x5f4   :  { %9563 = vmatprep.subr.mxu1 %v9360_v16  ;;  %v8324_v51 = vsel %vm8315_vm12, %v8296_v57, %v17150_v21  ;;  %v9373_v19 = vld [vmem:[#allocation2] sm:$0xff] }
 0x5f5   :  { %9564 = vmatpush1.msra.mxu1 %v9359_v25  ;;  %8273 = vst [vmem:[#allocation2 + $0x218] sm:$0x1c] %v8241_v8  ;;  %9217 = vst [vmem:[#allocation2 + $0xd8] sm:$0x1c] %v9185_v14  ;;  %v8401_v12 = vrot.slane %v8369_v50, 3  ;;  %v9312_v61 = vrot.slane %v9280_v18, 3  ;;  %v8370_v58 = vmul.f32 %v17141_v27, %v8324_v51  ;;  %v9281_v44 = vmul.f32 %v17131_v59, %v8324_v51  ;;  %v7540_v7 = vpop.permute.xlu0 %7539 }
 0x5f6   :  { %7557 = vrot.lane.b32.xlu1 %v16680_v10, %s12435_s17  ;;  %11613 = vmatmul.mubr.msk.f32.vlgmr.msra.gmra.mxu1 %vm6588_vm8, %v17146_v29  ;;  %v7571_v56 = vsel %vm19325_vm5, %v16895_v47, %v7540_v7  ;;  %v17200_v18 = vsel %vm7278_vm1, 1.0, %v19013_v22 }
 0x5f7   :  { %9491 = vmatpush1.msra.mxu0 %v9373_v19  ;;  %v9357_v60 = vld [vmem:[#allocation2 + $0x2b0] sm:$0xff]  ;;  %9739 = vmatprep.mubr.f32.mxu1 %v19013_v22  ;;  %8433 = vst [vmem:[#allocation2 + $0x190] sm:$0xe0] %v8401_v12  ;;  %9344 = vst [vmem:[#allocation2 + $0x200] sm:$0xe0] %v9312_v61  ;;  %v8402_v41 = vrot.slane %v8370_v58, 3  ;;  %v7630_v35 = vmul.f32 %v15722_v5, %v7571_v56  ;;  %v8608_v13 = vmul.f32 %v15719_v54, %v7571_v56  ;;  %v17169_v55 = vpop.permute.xlu1 %7541 }
 0x5f8   :  { %v9313_v17 = vrot.slane %v9281_v44, 3  ;;  %9492 = vmatprep.subr.mxu0 %v9358_v20  ;;  %7747 = vrot.lane.b32.xlu0 %v16791_v3, %s12452_s4  ;;  %v7570_v47 = vsel %vm19326_vm7, %v7540_v7, %v17169_v55  ;;  %v19327_v20 = vld [vmem:[#allocation16_spill] sm:$0xff]  ;;  %vm19333_vm7 = vcmp.le.s32.totalorder %v19214_v45, 29 }
 0x5f9   :  { %9493 = vmatpush1.msra.mxu0 %v9357_v60  ;;  %8434 = vst [vmem:[#allocation2 + $0x218] sm:$0xe0] %v8402_v41  ;;  %v7662_v15 = vrot.slane %v7630_v35, 2  ;;  %v8640_v33 = vrot.slane %v8608_v13, 2  ;;  %v7631_v57 = vmul.f32 %v19324_v2, %v7570_v47  ;;  %v8609_v54 = vmul.f32 %v15722_v5, %v7570_v47  ;;  %v7732_v53 = vpop.permute.xlu0 %7731 }
 0x5fa   :  { %9345 = vst [vmem:[#allocation2 + $0xd8] sm:$0xe0] %v9313_v17  ;;  %11612 = vmatmul.mubr.msk.f32.vlgmr.msra.gmra.mxu0 %vm6588_vm8, %v17146_v29  ;;  %7749 = vrot.lane.b32.xlu1 %v16680_v10, %s12452_s4  ;;  %v7764_v42 = vsel %vm7753_vm6, %v16913_v52, %v7732_v53  ;;  %vm7777_vm13 = vcmp.le.s32.totalorder %v19327_v20, 27 }
 0x5fb   :  { %9668 = vmatprep.mubr.f32.mxu0 %v19013_v22  ;;  %7694 = vst [vmem:[#allocation2 + $0xa8] ss:$76 sps:$4 sm:$0xc1] %v7662_v15   ;;  %8672 = vst [vmem:[#allocation2 + $0x270] ss:$-308 sps:$4 sm:$0xc1] %v8640_v33   ;;  %v7839_v5 = vmul.f32 %v17131_v59, %v7764_v42  ;;  %v8752_v14 = vmul.f32 %v16837_v62, %v7764_v42  ;;  %v17190_v50 = vpop.permute.xlu1 %7733 }
 0x5fc   :  { %v7663_v16 = vrot.slane %v7631_v57, 2  ;;  %v8641_v8 = vrot.slane %v8609_v54, 2  ;;  %7940 = vrot.lane.b32.xlu0 %v16791_v3, %s12453_s18  ;;  %v7763_v52 = vsel %vm7753_vm6, %v7732_v53, %v17190_v50  ;;  %v19328_v54 = vld [vmem:[#allocation54_spill] sm:$0xff] }
 0x5fd   :  { %v7871_v25 = vrot.slane %v7839_v5, 7  ;;  %v8784_v51 = vrot.slane %v8752_v14, 7  ;;  %v7840_v62 = vmul.f32 %v17141_v27, %v7763_v52  ;;  %v8753_v19 = vmul.f32 %v17131_v59, %v7763_v52  ;;  %v7925_v12 = vpop.permute.xlu0 %7924  ;;  %v9453_v5 = vld [vmem:[%s18677_s6] sm:$0x7] }
 0x5fe   :  { %7695 = vst [vmem:[#allocation2 + $0x20] ss:$220 sps:$4 sm:$0xc1] %v7663_v16   ;;  %8673 = vst [vmem:[#allocation2 + $0x290] ss:$-452 sps:$4 sm:$0xc1] %v8641_v8   ;;  %7942 = vrot.lane.b32.xlu1 %v16680_v10, %s12453_s18  ;;  %v7957_v61 = vsel %vm7946_vm2, %v16939_v46, %v7925_v12 }
 0x5ff   :  { %7903 = vst [vmem:[#allocation2 + $0xa8] sm:$0xe] %v7871_v25  ;;  %8816 = vst [vmem:[#allocation2 + $0x270] sm:$0xe] %v8784_v51  ;;  %v7872_v58 = vrot.slane %v7840_v62, 7  ;;  %v8785_v44 = vrot.slane %v8753_v19, 7  ;;  %v8000_v7 = vmul.f32 %v17200_v18, %v7957_v61  ;;  %v8896_v59 = vmul.f32 %v16933_v43, %v7957_v61  ;;  %v17216_v56 = vpop.permute.xlu1 %7926 }
 0x600   :  { %7234 = vrot.lane.b32.xlu0 %v16791_v3, %s12454_s1  ;;  %v7956_v46 = vsel %vm7946_vm2, %v7925_v12, %v17216_v56  ;;  %v9441_v47 = vld [vmem:[#allocation2 + $0x200] sm:$0xff]  ;;  %v11497_v8 = vsel %vm7777_vm13, 1.0, %v19013_v22 }
 0x601   :  { %v9442_v40 = vld [vmem:[#allocation2 + $0xd8] sm:$0xff]  ;;  %7904 = vst [vmem:[#allocation2 + $0x20] sm:$0xe] %v7872_v58  ;;  %8817 = vst [vmem:[#allocation2 + $0x290] sm:$0xe] %v8785_v44  ;;  %v8032_v60 = vrot.slane %v8000_v7, 4  ;;  %v8001_v17 = vmul.f32 %v17212_v30, %v7956_v46  ;;  %v8897_v35 = vmul.f32 %v17200_v18, %v7956_v46  ;;  %v8172_v13 = vpop.permute.xlu0 %8171 }
 0x602   :  { %v8928_v41 = vrot.slane %v8896_v59, 4  ;;  %7236 = vrot.lane.b32.xlu1 %v16680_v10, %s12454_s1  ;;  %9624 = vmatprep.subr.mxu0 %v9442_v40  ;;  %v8194_v15 = vsel %vm5100_vm9, %v17120_v28, %v8172_v13  ;;  %v19329_v14 = vld [vmem:[#allocation26_spill] sm:$0xff]  ;;  %v17262_v58 = vsel %vm7778_vm3, 1.0, %v19013_v22 }
 0x603   :  { %9625 = vmatpush1.msra.mxu0 %v9441_v47  ;;  %8064 = vst [vmem:[#allocation2 + $0xa8] sm:$0x70] %v8032_v60  ;;  %v8033_v33 = vrot.slane %v8001_v17, 4  ;;  %v8929_v57 = vrot.slane %v8897_v35, 4  ;;  %v8210_v53 = vmul.f32 %v19328_v54, %v8194_v15  ;;  %v9154_v42 = vmul.f32 %v19324_v2, %v8194_v15  ;;  %v17234_v16 = vpop.permute.xlu1 %8173 }
 0x604   :  { %8960 = vst [vmem:[#allocation2 + $0x270] sm:$0x70] %v8928_v41  ;;  %7395 = vrot.lane.b32.xlu0 %v16791_v3, %s12440_s19  ;;  %v8193_v28 = vsel %vm5100_vm9, %v8172_v13, %v17234_v16  ;;  %v19330_v52 = vand.u32 1023, %v19329_v14 }
 0x605   :  { %8065 = vst [vmem:[#allocation2 + $0x20] sm:$0x70] %v8033_v33  ;;  %8961 = vst [vmem:[#allocation2 + $0x290] sm:$0x70] %v8929_v57  ;;  %v8242_v3 = vrot.slane %v8210_v53, 6  ;;  %v9186_v51 = vrot.slane %v9154_v42, 6  ;;  %v8211_v62 = vmul.f32 %v16268_v1, %v8193_v28  ;;  %v8300_v12 = vpop.permute.xlu0 %8299 }
 0x606   :  { %vm17249_vm5 = vcmp.ge.s32.totalorder %v19330_v52, 64  ;;  %v9155_v19 = vmul.f32 0.0, %v8193_v28  ;;  %7397 = vrot.lane.b32.xlu1 %v16680_v10, %s12440_s19  ;;  %v8323_v61 = vsel %vm8315_vm12, %v17150_v21, %v8300_v12 }
 0x607   :  { %8274 = vst [vmem:[#allocation2 + $0x250] sm:$0x1c] %v8242_v3  ;;  %9218 = vst [vmem:[#allocation2 + $0x1d8] sm:$0x1c] %v9186_v51  ;;  %v8243_v44 = vrot.slane %v8211_v62, 6  ;;  %v8371_v59 = vmul.f32 %v11497_v8, %v8323_v61  ;;  %v9282_v46 = vmul.f32 %v17141_v27, %v8323_v61  ;;  %v17265_v40 = vpop.permute.xlu1 %8301  ;;  %v19341_v51 = vld [vmem:[#allocation77_spill] sm:$0xff] }
 0x608   :  { %v9187_v7 = vrot.slane %v9155_v19, 6  ;;  %9456 = vperm.xlu0 %12193, %v9453_v5   ;;  %vm7585_vm1 = vmand %vm17249_vm5, %vm19333_vm7  ;;  %v8322_v10 = vsel %vm8315_vm12, %v8300_v12, %v17265_v40 }
 0x609   :  { %8275 = vst [vmem:[#allocation2 + $0x1c8] sm:$0x1c] %v8243_v44  ;;  %v8403_v21 = vrot.slane %v8371_v59, 3  ;;  %v9314_v60 = vrot.slane %v9282_v46, 3  ;;  %v8372_v41 = vmul.f32 %v17262_v58, %v8322_v10  ;;  %v9283_v17 = vmul.f32 0.0, %v8322_v10  ;;  %v7544_v35 = vpop.permute.xlu0 %7543  ;;  %vm17283_vm7 = vmand %vm17249_vm5, %vm7778_vm3 }
 0x60a   :  { %9219 = vst [vmem:[#allocation2 + $0x2e8] sm:$0x1c] %v9187_v7  ;;  %v7569_v13 = vsel %vm19334_vm14, %v17169_v55, %v7544_v35  ;;  %v11482_v47 = vsel %vm7585_vm1, 1.0, %v19013_v22  ;;  %vm17295_vm1 = vmand %vm15266_vm4, %vm7777_vm13  ;;  %v11498_v44 = vsel %vm17283_vm7, 1.0, %v19013_v22  ;;  %vm7281_vm13 = vcmp.ge.s32.totalorder %v19214_v45, 2 }
 0x60b   :  { %8435 = vst [vmem:[#allocation2 + $0x250] sm:$0xe0] %v8403_v21  ;;  %9346 = vst [vmem:[#allocation2 + $0x1d8] sm:$0xe0] %v9314_v60  ;;  %v8404_v33 = vrot.slane %v8372_v41, 3  ;;  %v9315_v57 = vrot.slane %v9283_v17, 3  ;;  %v7632_v53 = vmul.f32 %v19328_v54, %v7569_v13  ;;  %v8610_v42 = vmul.f32 %v19324_v2, %v7569_v13  ;;  %v17289_v28 = vpop.permute.xlu1 %7545 }
 0x60c   :  { %vm19340_vm3 = vmmov %vm19334_vm14  ;;  %v9426_v52 = vld [vmem:[#allocation2 + $0x290] sm:$0xff]  ;;  %vm7280_vm14 = vcmp.ge.s32.totalorder %v19327_v20, 2  ;;  %v11561_v7 = vsel %vm17295_vm1, 1.0, %v19013_v22  ;;  %v17331_v15 = vsel %vm7281_vm13, 1.0, %v19013_v22 }
 0x60d   :  { %v7568_v14 = vsel %vm19340_vm3, %v7544_v35, %v17289_v28  ;;  %8436 = vst [vmem:[#allocation2 + $0x1c8] sm:$0xe0] %v8404_v33  ;;  %9347 = vst [vmem:[#allocation2 + $0x2e8] sm:$0xe0] %v9315_v57  ;;  %v7664_v2 = vrot.slane %v7632_v53, 2  ;;  %v8642_v54 = vrot.slane %v8610_v42, 2  ;;  %v7736_v19 = vpop.permute.xlu0 %7735  ;;  %9626 = vmatprep.subr.mxu0 %v9426_v52 }
 0x60e   :  { %v7633_v3 = vmul.f32 %v11482_v47, %v7568_v14  ;;  %v8611_v62 = vmul.f32 %v19341_v51, %v7568_v14  ;;  %v9425_v12 = vld [vmem:[#allocation2 + $0x270] sm:$0xff]  ;;  %v7762_v61 = vsel %vm7753_vm6, %v17190_v50, %v7736_v19  ;;  %v17323_v41 = vsel %vm7280_vm14, 1.0, %v19013_v22  ;;  %vm17364_vm7 = vmand %vm17249_vm5, %vm7281_vm13 }
 0x60f   :  { %9627 = vmatpush1.msra.mxu0 %v9425_v12  ;;  %7696 = vst [vmem:[#allocation2 + $0x1b0] ss:$-308 sps:$4 sm:$0xc1] %v7664_v2   ;;  %8674 = vst [vmem:[#allocation2 + $0x2a8] ss:$-588 sps:$4 sm:$0xc1] %v8642_v54   ;;  %v7841_v10 = vmul.f32 %v11497_v8, %v7762_v61  ;;  %v8754_v21 = vmul.f32 %v17141_v27, %v7762_v61  ;;  %v17315_v60 = vpop.permute.xlu1 %7737 }
 0x610   :  { %v7665_v59 = vrot.slane %v7633_v3, 2  ;;  %v8643_v46 = vrot.slane %v8611_v62, 2  ;;  %v7761_v50 = vsel %vm7753_vm6, %v7736_v19, %v17315_v60  ;;  %vm8451_vm1 = vmand %vm15266_vm4, %vm7280_vm14  ;;  %v11464_v20 = vsel %vm17364_vm7, 1.0, %v19013_v22 }
 0x611   :  { %v7873_v17 = vrot.slane %v7841_v10, 7  ;;  %v8786_v35 = vrot.slane %v8754_v21, 7  ;;  %v7842_v13 = vmul.f32 %v11498_v44, %v7761_v50  ;;  %v8755_v47 = vmul.f32 %v11561_v7, %v7761_v50  ;;  %v7929_v8 = vpop.permute.xlu0 %7928  ;;  %vm19346_vm14 = vmmov %vm19340_vm3 }
 0x612   :  { %7697 = vst [vmem:[#allocation2 + $0x220] ss:$-244 sps:$4 sm:$0xc1] %v7665_v59   ;;  %8675 = vst [vmem:[#allocation2 + $0x2f0] ss:$-300 sps:$4 sm:$0xc1] %v8643_v46   ;;  %v7955_v27 = vsel %vm7946_vm2, %v17216_v56, %v7929_v8 }
 0x613   :  { %7905 = vst [vmem:[#allocation2 + $0x1b0] sm:$0xe] %v7873_v17  ;;  %8818 = vst [vmem:[#allocation2 + $0x2a8] sm:$0xe] %v8786_v35  ;;  %v7874_v33 = vrot.slane %v7842_v13, 7  ;;  %v8787_v57 = vrot.slane %v8755_v47, 7  ;;  %v8002_v53 = vmul.f32 %v17323_v41, %v7955_v27  ;;  %v8898_v42 = vmul.f32 %v17212_v30, %v7955_v27  ;;  %v17335_v5 = vpop.permute.xlu1 %7930 }
 0x614   :  { %v7954_v14 = vsel %vm7946_vm2, %v7929_v8, %v17335_v5  ;;  %v9444_v56 = vld [vmem:[#allocation2 + $0x2e8] sm:$0xff]  ;;  %v9443_v62 = vld [vmem:[#allocation2 + $0x1d8] sm:$0xff]  ;;  %v11545_v55 = vsel %vm8451_vm1, 1.0, %v19013_v22  ;;  %vm7779_vm4 = vcmp.le.s32.totalorder %v19215_v0, 27  ;;  %vm7282_vm13 = vcmp.ge.s32.totalorder %v19215_v0, 2 }
 0x615   :  { %7906 = vst [vmem:[#allocation2 + $0x220] sm:$0xe] %v7874_v33  ;;  %8819 = vst [vmem:[#allocation2 + $0x2f0] sm:$0xe] %v8787_v57  ;;  %v8034_v52 = vrot.slane %v8002_v53, 4  ;;  %v8930_v2 = vrot.slane %v8898_v42, 4  ;;  %v8003_v54 = vmul.f32 %v17331_v15, %v7954_v14  ;;  %9695 = vmatprep.subr.mxu1 %v9444_v56  ;;  %v7219_v51 = vpop.permute.xlu0 %7218 }
 0x616   :  { %v8899_v3 = vmul.f32 0.0, %v7954_v14  ;;  %v7251_v19 = vsel %vm7240_vm0, %v17009_v32, %v7219_v51  ;;  %9696 = vmatpush1.msra.mxu1 %v9443_v62  ;;  %v19344_v53 = vld [vmem:[#allocation20_spill] sm:$0xff] }
 0x617   :  { %8066 = vst [vmem:[#allocation2 + $0x1b0] sm:$0x70] %v8034_v52  ;;  %8962 = vst [vmem:[#allocation2 + $0x2a8] sm:$0x70] %v8930_v2  ;;  %v8035_v12 = vrot.slane %v8003_v54, 4  ;;  %v7342_v44 = vmul.f32 %v17200_v18, %v7251_v19  ;;  %v8496_v7 = vmul.f32 %v16933_v43, %v7251_v19  ;;  %v7221_v59 = vpop.permute.xlu1 %7220 }
 0x618   :  { %v8931_v61 = vrot.slane %v8899_v3, 4  ;;  %v7250_v46 = vsel %vm7240_vm0, %v7219_v51, %v7221_v59 }
 0x619   :  { %8067 = vst [vmem:[#allocation2 + $0x220] sm:$0x70] %v8035_v12  ;;  %7358 = vst [vmem:[#allocation2 + $0xf0] sm:$0x7] %v7342_v44  ;;  %v7343_v10 = vmul.f32 %v17212_v30, %v7250_v46  ;;  %v8497_v32 = vmul.f32 %v17200_v18, %v7250_v46  ;;  %v7380_v21 = vpop.permute.xlu0 %7379  ;;  %v11473_v18 = vsel %vm17249_vm5, 1.0, %v19013_v22 }
 0x61a   :  { %8963 = vst [vmem:[#allocation2 + $0x2f0] sm:$0x70] %v8931_v61  ;;  %8512 = vst [vmem:[#allocation2 + $0x138] sm:$0x7] %v8496_v7  ;;  %v7411_v50 = vsel %vm5986_vm11, %v17035_v4, %v7380_v21 }
 0x61b   :  { %7359 = vst [vmem:[#allocation2 + $0xf8] sm:$0x7] %v7343_v10  ;;  %8513 = vst [vmem:[#allocation2 + $0xc8] sm:$0x7] %v8497_v32  ;;  %v7486_v43 = vrot.slane %v7411_v50, 5  ;;  %v7382_v17 = vpop.permute.xlu1 %7381  ;;  %v19345_v32 = vld [vmem:[#allocation30_spill] sm:$0xff] }
 0x61c   :  { %v7410_v35 = vsel %vm5986_vm11, %v7380_v21, %v7382_v17  ;;  %vm7780_vm5 = vcmp.le.s32.totalorder %v19345_v32, 27  ;;  %v9394_v50 = vld [vmem:[#allocation2 + $0x190] sm:$0xff]  ;;  %vm7283_vm7 = vcmp.ge.s32.totalorder %v19345_v32, 2 }
 0x61d   :  { %7518 = vst [vmem:[#allocation2 + $0xf0] sm:$0x38] %v7486_v43  ;;  %8592 = vst [vmem:[#allocation2 + $0x138] sm:$0x38] %v7486_v43  ;;  %v7487_v13 = vrot.slane %v7410_v35, 5  ;;  %v7384_v47 = vpop.permute.xlu0 %7383  ;;  %v17412_v4 = vsel %vm7780_vm5, 1.0, %v19013_v22 }
 0x61e   :  { %v7409_v8 = vsel %vm5986_vm11, %v7382_v17, %v7384_v47  ;;  %v9427_v56 = vld [vmem:[#allocation2 + $0x2a8] sm:$0xff]  ;;  %v17463_v0 = vsel %vm7283_vm7, 1.0, %v19013_v22  ;;  %vm19349_vm5 = vmmov %vm19340_vm3  ;;  %vm7783_vm7 = vcmp.le.s32.totalorder %v19263_v6, 27 }
 0x61f   :  { %7519 = vst [vmem:[#allocation2 + $0xf8] sm:$0x38] %v7487_v13  ;;  %8593 = vst [vmem:[#allocation2 + $0xc8] sm:$0x38] %v7487_v13  ;;  %v7488_v27 = vrot.slane %v7409_v8, 5  ;;  %v17368_v33 = vpop.permute.xlu1 %7385  ;;  %v9393_v8 = vld [vmem:[#allocation2 + $0x38] sm:$0xff] }
 0x620   :  { %v7408_v45 = vsel %vm5986_vm11, %v7384_v47, %v17368_v33 }
 0x621   :  { %v9428_v57 = vld [vmem:[#allocation2 + $0x2f0] sm:$0xff]  ;;  %7520 = vst [vmem:[#allocation2 + $0x78] sm:$0x38] %v7488_v27  ;;  %8594 = vst [vmem:[#allocation2 + $0x58] sm:$0x38] %v7488_v27  ;;  %v7457_v25 = vmul.f32 %v11473_v18, %v7408_v45  ;;  %v8531_v42 = vmul.f32 %v19344_v53, %v7408_v45  ;;  %v7223_v14 = vpop.permute.xlu0 %7222  ;;  %v9378_v27 = vld [vmem:[#allocation2 + $0xa8] sm:$0xff] }
 0x622   :  { %9697 = vmatprep.subr.mxu1 %v9428_v57  ;;  %v7249_v52 = vsel %vm7240_vm0, %v7221_v59, %v7223_v14 }
 0x623   :  { %9698 = vmatpush1.msra.mxu1 %v9427_v56  ;;  %v7489_v2 = vrot.slane %v7457_v25, 5  ;;  %v8563_v54 = vrot.slane %v8531_v42, 5  ;;  %v7344_v3 = vmul.f32 %v17323_v41, %v7249_v52  ;;  %v8498_v51 = vmul.f32 %v17212_v30, %v7249_v52  ;;  %v17386_v62 = vpop.permute.xlu1 %7224 }
 0x624   :  { %v7248_v19 = vsel %vm7240_vm0, %v7223_v14, %v17386_v62  ;;  %v9409_v10 = vld [vmem:[#allocation2 + $0x138] sm:$0xff]  ;;  %v9377_v14 = vld [vmem:[#allocation2 + $0x228] sm:$0xff]  ;;  %v9362_v56 = vld [vmem:[#allocation2 + $0xf0] sm:$0xff] }
 0x625   :  { %7521 = vst [vmem:[#allocation2 + $0x128] sm:$0x38] %v7489_v2  ;;  %8595 = vst [vmem:[#allocation2 + $0x1c0] sm:$0x38] %v8563_v54  ;;  %v7345_v12 = vmul.f32 %v11464_v20, %v7248_v19  ;;  %v8499_v61 = vmul.f32 %v11545_v55, %v7248_v19  ;;  %v8176_v44 = vpop.permute.xlu0 %8175 }
 0x626   :  { %7360 = vst [vmem:[#allocation2 + $0x78] sm:$0x7] %v7344_v3  ;;  %8514 = vst [vmem:[#allocation2 + $0x58] sm:$0x7] %v8498_v51  ;;  %v8192_v41 = vsel %vm5100_vm9, %v17234_v16, %v8176_v44  ;;  %v9410_v30 = vld [vmem:[#allocation2 + $0xc8] sm:$0xff]  ;;  %v17404_v16 = vsel %vm7779_vm4, 1.0, %v19013_v22 }
 0x627   :  { %7361 = vst [vmem:[#allocation2 + $0x128] sm:$0x7] %v7345_v12  ;;  %8515 = vst [vmem:[#allocation2 + $0x1c0] sm:$0x7] %v8499_v61  ;;  %v8212_v7 = vmul.f32 %v16263_v63, %v8192_v41  ;;  %v9156_v59 = vmul.f32 %v16268_v1, %v8192_v41  ;;  %v17397_v46 = vpop.permute.xlu1 %8177  ;;  %9628 = vmatprep.subr.mxu0 %v9410_v30  ;;  %v9361_v3 = vld [vmem:[#allocation2 + $0x30] sm:$0xff]  ;;  %vm7782_vm4 = vcmp.le.s32.totalorder %v19262_v38, 27 }
 0x628   :  { %v8191_v21 = vsel %vm5100_vm9, %v8176_v44, %v17397_v46  ;;  %9629 = vmatpush1.msra.mxu0 %v9409_v10 }
 0x629   :  { %v8244_v43 = vrot.slane %v8212_v7, 6  ;;  %v9188_v17 = vrot.slane %v9156_v59, 6  ;;  %v8213_v35 = vmul.f32 %v15624_v24, %v8191_v21  ;;  %v9157_v13 = vmul.f32 %v16263_v63, %v8191_v21  ;;  %v8304_v47 = vpop.permute.xlu0 %8303  ;;  %9630 = vmatprep.subr.mxu0 %v9394_v50  ;;  %v9396_v59 = vld [vmem:[#allocation2 + $0x250] sm:$0xff] }
 0x62a   :  { %v8321_v18 = vsel %vm8315_vm12, %v17265_v40, %v8304_v47  ;;  %9631 = vmatpush1.msra.mxu0 %v9393_v8 }
 0x62b   :  { %8276 = vst [vmem:[#allocation2 + $0x280] sm:$0x1c] %v8244_v43  ;;  %9220 = vst [vmem:[#allocation2 + $0x260] sm:$0x1c] %v9188_v17  ;;  %v8245_v45 = vrot.slane %v8213_v35, 6  ;;  %v9189_v57 = vrot.slane %v9157_v13, 6  ;;  %v8373_v25 = vmul.f32 %v17404_v16, %v8321_v18  ;;  %v9284_v53 = vmul.f32 %v17262_v58, %v8321_v18  ;;  %v17416_v42 = vpop.permute.xlu1 %8305  ;;  %9632 = vmatprep.subr.mxu0 %v9378_v27 }
 0x62c   :  { %v8320_v40 = vsel %vm8315_vm12, %v8304_v47, %v17416_v42  ;;  %9633 = vmatpush1.msra.mxu0 %v9377_v14  ;;  %v9395_v17 = vld [vmem:[#allocation2 + $0x218] sm:$0xff]  ;;  %v9380_v13 = vld [vmem:[#allocation2 + $0x1b0] sm:$0xff] }
 0x62d   :  { %8277 = vst [vmem:[#allocation2 + $0x100] sm:$0x1c] %v8245_v45  ;;  %9221 = vst [vmem:[#allocation2 + $0x268] sm:$0x1c] %v9189_v57  ;;  %v8405_v52 = vrot.slane %v8373_v25, 3  ;;  %v9316_v20 = vrot.slane %v9284_v53, 3  ;;  %v8374_v55 = vmul.f32 %v17412_v4, %v8320_v40  ;;  %v9285_v2 = vmul.f32 %v17404_v16, %v8320_v40  ;;  %v7548_v54 = vpop.permute.xlu0 %7547  ;;  %9634 = vmatprep.subr.mxu0 %v9362_v56 }
 0x62e   :  { %v7567_v51 = vsel %vm19340_vm3, %v17289_v28, %v7548_v54  ;;  %9635 = vmatpush1.msra.mxu0 %v9361_v3  ;;  %v9412_v19 = vld [vmem:[#allocation2 + $0x1c0] sm:$0xff]  ;;  %v9411_v7 = vld [vmem:[#allocation2 + $0x58] sm:$0xff]  ;;  %v17453_v25 = vsel %vm7282_vm13, 1.0, %v19013_v22  ;;  %vm7285_vm13 = vcmp.ge.s32.totalorder %v19262_v38, 2 }
 0x62f   :  { %8437 = vst [vmem:[#allocation2 + $0x280] sm:$0xe0] %v8405_v52  ;;  %9348 = vst [vmem:[#allocation2 + $0x260] sm:$0xe0] %v9316_v20  ;;  %v8406_v12 = vrot.slane %v8374_v55, 3  ;;  %v9317_v61 = vrot.slane %v9285_v2, 3  ;;  %v7634_v44 = vmul.f32 %v16263_v63, %v7567_v51  ;;  %v8612_v41 = vmul.f32 %v16268_v1, %v7567_v51  ;;  %v17428_v30 = vpop.permute.xlu1 %7549  ;;  %11614 = vmatmul.mubr.msk.f32.vlgmr.msra.gmra.mxu0 %vm6588_vm8, %v17146_v29 }
 0x630   :  { %9699 = vmatprep.subr.mxu1 %v9412_v19  ;;  %v7566_v28 = vsel %vm19346_vm14, %v7548_v54, %v17428_v30  ;;  %9810 = vmatprep.mubr.f32.mxu0 %v19013_v22  ;;  %v9379_v45 = vld [vmem:[#allocation2 + $0x20] sm:$0xff]  ;;  %v9364_v57 = vld [vmem:[#allocation2 + $0x78] sm:$0xff] }
 0x631   :  { %9700 = vmatpush1.msra.mxu1 %v9411_v7  ;;  %8438 = vst [vmem:[#allocation2 + $0x100] sm:$0xe0] %v8406_v12  ;;  %9349 = vst [vmem:[#allocation2 + $0x268] sm:$0xe0] %v9317_v61  ;;  %v7666_v1 = vrot.slane %v7634_v44, 2  ;;  %v8644_v10 = vrot.slane %v8612_v41, 2  ;;  %v7635_v21 = vmul.f32 %v15624_v24, %v7566_v28  ;;  %v8613_v50 = vmul.f32 %v16263_v63, %v7566_v28  ;;  %v7740_v43 = vpop.permute.xlu0 %7739 }
 0x632   :  { %9701 = vmatprep.subr.mxu1 %v9396_v59  ;;  %v7760_v35 = vsel %vm7753_vm6, %v17315_v60, %v7740_v43  ;;  %v9363_v52 = vld [vmem:[#allocation2 + $0xf8] sm:$0xff]  ;;  %v19347_v51 = vld [vmem:[#allocation31_spill] sm:$0xff] }
 0x633   :  { %9702 = vmatpush1.msra.mxu1 %v9395_v17  ;;  %7698 = vst [vmem:[#allocation2 + $0x258] ss:$-372 sps:$4 sm:$0xc1] %v7666_v1   ;;  %8676 = vst [vmem:[#allocation2 + $0x1e0] ss:$188 sps:$4 sm:$0xc1] %v8644_v10   ;;  %v7843_v18 = vmul.f32 %v17404_v16, %v7760_v35  ;;  %v8756_v27 = vmul.f32 %v17262_v58, %v7760_v35  ;;  %v17445_v63 = vpop.permute.xlu1 %7741 }
 0x634   :  { %v7667_v47 = vrot.slane %v7635_v21, 2  ;;  %v8645_v8 = vrot.slane %v8613_v50, 2  ;;  %9703 = vmatprep.subr.mxu1 %v9380_v13  ;;  %v7759_v60 = vsel %vm7753_vm6, %v7740_v43, %v17445_v63  ;;  %vm7781_vm1 = vcmp.le.s32.totalorder %v19347_v51, 27  ;;  %v19348_v1 = vld [vmem:[#allocation58_spill] sm:$0xff] }
 0x635   :  { %9704 = vmatpush1.msra.mxu1 %v9379_v45  ;;  %v7875_v53 = vrot.slane %v7843_v18, 7  ;;  %v8788_v14 = vrot.slane %v8756_v27, 7  ;;  %v7844_v58 = vmul.f32 %v17412_v4, %v7759_v60  ;;  %v8757_v40 = vmul.f32 %v17404_v16, %v7759_v60  ;;  %v7933_v56 = vpop.permute.xlu0 %7932 }
 0x636   :  { %7699 = vst [vmem:[#allocation2 + $0x238] ss:$196 sps:$4 sm:$0xc1] %v7667_v47   ;;  %8677 = vst [vmem:[#allocation2 + $0x150] ss:$-220 sps:$4 sm:$0xc1] %v8645_v8   ;;  %9705 = vmatprep.subr.mxu1 %v9364_v57  ;;  %v7953_v20 = vsel %vm7946_vm2, %v17335_v5, %v7933_v56 }
 0x637   :  { %9706 = vmatpush1.msra.mxu1 %v9363_v52  ;;  %7907 = vst [vmem:[#allocation2 + $0x258] sm:$0xe] %v7875_v53  ;;  %8820 = vst [vmem:[#allocation2 + $0x1e0] sm:$0xe] %v8788_v14  ;;  %v7876_v55 = vrot.slane %v7844_v58, 7  ;;  %v8789_v2 = vrot.slane %v8757_v40, 7  ;;  %v8004_v54 = vmul.f32 %v17453_v25, %v7953_v20  ;;  %v8900_v16 = vmul.f32 %v17331_v15, %v7953_v20  ;;  %v17467_v3 = vpop.permute.xlu1 %7934 }
 0x638   :  { %11615 = vmatmul.mubr.msk.f32.vlgmr.msra.gmra.mxu1 %vm6588_vm8, %v17146_v29  ;;  %v7952_v5 = vsel %vm7946_vm2, %v7933_v56, %v17467_v3  ;;  %v9446_v32 = vld [vmem:[#allocation2 + $0x268] sm:$0xff]  ;;  %v9445_v29 = vld [vmem:[#allocation2 + $0x260] sm:$0xff]  ;;  %v17500_v27 = vsel %vm7782_vm4, 1.0, %v19013_v22  ;;  %vm7284_vm14 = vcmp.ge.s32.totalorder %v19347_v51, 2  ;;  %vm7286_vm4 = vcmp.ge.s32.totalorder %v19263_v6, 2 }
 0x639   :  { %9881 = vmatprep.mubr.f32.mxu1 %v19013_v22  ;;  %7908 = vst [vmem:[#allocation2 + $0x238] sm:$0xe] %v7876_v55  ;;  %8821 = vst [vmem:[#allocation2 + $0x150] sm:$0xe] %v8789_v2  ;;  %v8036_v19 = vrot.slane %v8004_v54, 4  ;;  %v8932_v12 = vrot.slane %v8900_v16, 4  ;;  %v8005_v61 = vmul.f32 %v17463_v0, %v7952_v5  ;;  %v8901_v44 = vmul.f32 %v17453_v25, %v7952_v5  ;;  %v8180_v41 = vpop.permute.xlu0 %8179 }
 0x63a   :  { %9766 = vmatprep.subr.mxu0 %v9446_v32  ;;  %v8190_v7 = vsel %vm5100_vm9, %v17397_v46, %v8180_v41  ;;  %v11501_v46 = vsel %vm7781_vm1, 1.0, %v19013_v22 }
 0x63b   :  { %9767 = vmatpush1.msra.mxu0 %v9445_v29  ;;  %8068 = vst [vmem:[#allocation2 + $0x258] sm:$0x70] %v8036_v19  ;;  %8964 = vst [vmem:[#allocation2 + $0x1e0] sm:$0x70] %v8932_v12  ;;  %v8037_v28 = vrot.slane %v8005_v61, 4  ;;  %v8933_v59 = vrot.slane %v8901_v44, 4  ;;  %v8214_v10 = vmul.f32 %v19348_v1, %v8190_v7  ;;  %v9158_v21 = vmul.f32 %v15624_v24, %v8190_v7  ;;  %v17484_v50 = vpop.permute.xlu1 %8181 }
 0x63c   :  { %v8189_v43 = vsel %vm5100_vm9, %v8180_v41, %v17484_v50 }
 0x63d   :  { %8069 = vst [vmem:[#allocation2 + $0x238] sm:$0x70] %v8037_v28  ;;  %8965 = vst [vmem:[#allocation2 + $0x150] sm:$0x70] %v8933_v59  ;;  %v8246_v17 = vrot.slane %v8214_v10, 6  ;;  %v9190_v35 = vrot.slane %v9158_v21, 6  ;;  %v8215_v13 = vmul.f32 %v16411_v9, %v8189_v43  ;;  %v9159_v47 = vmul.f32 %v19348_v1, %v8189_v43  ;;  %v8308_v8 = vpop.permute.xlu0 %8307 }
 0x63e   :  { %v8319_v18 = vsel %vm8315_vm12, %v17416_v42, %v8308_v8 }
 0x63f   :  { %8278 = vst [vmem:[#allocation2 + $0xb8] sm:$0x1c] %v8246_v17  ;;  %9222 = vst [vmem:[#allocation2 + $0x88] sm:$0x1c] %v9190_v35  ;;  %v8247_v45 = vrot.slane %v8215_v13, 6  ;;  %v9191_v60 = vrot.slane %v9159_v47, 6  ;;  %v8375_v57 = vmul.f32 %v11501_v46, %v8319_v18  ;;  %v9286_v53 = vmul.f32 %v17412_v4, %v8319_v18  ;;  %v17503_v14 = vpop.permute.xlu1 %8309 }
 0x640   :  { %v8318_v58 = vsel %vm8315_vm12, %v8308_v8, %v17503_v14  ;;  %v17544_v18 = vsel %vm7285_vm13, 1.0, %v19013_v22 }
 0x641   :  { %8279 = vst [vmem:[#allocation2 + $0x288] sm:$0x1c] %v8247_v45  ;;  %9223 = vst [vmem:[#allocation2 + $0x110] sm:$0x1c] %v9191_v60  ;;  %v8407_v42 = vrot.slane %v8375_v57, 3  ;;  %v9318_v40 = vrot.slane %v9286_v53, 3  ;;  %v8376_v56 = vmul.f32 %v17500_v27, %v8318_v58  ;;  %v9287_v52 = vmul.f32 %v11501_v46, %v8318_v58  ;;  %v7552_v20 = vpop.permute.xlu0 %7551 }
 0x642   :  { %v7565_v55 = vsel %vm19349_vm5, %v17428_v30, %v7552_v20  ;;  %vm19355_vm5 = vmmov %vm19340_vm3 }
 0x643   :  { %8439 = vst [vmem:[#allocation2 + $0xb8] sm:$0xe0] %v8407_v42  ;;  %9350 = vst [vmem:[#allocation2 + $0x88] sm:$0xe0] %v9318_v40  ;;  %v8408_v2 = vrot.slane %v8376_v56, 3  ;;  %v9319_v54 = vrot.slane %v9287_v52, 3  ;;  %v7636_v16 = vmul.f32 %v19348_v1, %v7565_v55  ;;  %v8614_v5 = vmul.f32 %v15624_v24, %v7565_v55  ;;  %v17514_v32 = vpop.permute.xlu1 %7553 }
 0x644   :  { %v7564_v19 = vsel %vm19340_vm3, %v7552_v20, %v17514_v32  ;;  %v9430_v12 = vld [vmem:[#allocation2 + $0x150] sm:$0xff]  ;;  %v9429_v24 = vld [vmem:[#allocation2 + $0x1e0] sm:$0xff] }
 0x645   :  { %8440 = vst [vmem:[#allocation2 + $0x288] sm:$0xe0] %v8408_v2  ;;  %9351 = vst [vmem:[#allocation2 + $0x110] sm:$0xe0] %v9319_v54  ;;  %v7668_v30 = vrot.slane %v7636_v16, 2  ;;  %v8646_v61 = vrot.slane %v8614_v5, 2  ;;  %v7637_v44 = vmul.f32 %v16411_v9, %v7564_v19  ;;  %v8615_v41 = vmul.f32 %v19348_v1, %v7564_v19  ;;  %v7744_v29 = vpop.permute.xlu0 %7743  ;;  %9768 = vmatprep.subr.mxu0 %v9430_v12 }
 0x646   :  { %v7758_v7 = vsel %vm7753_vm6, %v17445_v63, %v7744_v29  ;;  %9769 = vmatpush1.msra.mxu0 %v9429_v24  ;;  %v17535_v63 = vsel %vm7284_vm14, 1.0, %v19013_v22 }
 0x647   :  { %7700 = vst [vmem:[#allocation2 + $0x130] ss:$396 sps:$4 sm:$0xc1] %v7668_v30   ;;  %8678 = vst [vmem:[#allocation2 + $0x2c8] ss:$-684 sps:$4 sm:$0xc1] %v8646_v61   ;;  %v7845_v10 = vmul.f32 %v11501_v46, %v7758_v7  ;;  %v8758_v21 = vmul.f32 %v17412_v4, %v7758_v7  ;;  %v17527_v43 = vpop.permute.xlu1 %7745 }
 0x648   :  { %v7669_v28 = vrot.slane %v7637_v44, 2  ;;  %v8647_v59 = vrot.slane %v8615_v41, 2  ;;  %v7757_v1 = vsel %vm7753_vm6, %v7744_v29, %v17527_v43 }
 0x649   :  { %v7877_v17 = vrot.slane %v7845_v10, 7  ;;  %v8790_v35 = vrot.slane %v8758_v21, 7  ;;  %v7846_v13 = vmul.f32 %v17500_v27, %v7757_v1  ;;  %v8759_v47 = vmul.f32 %v11501_v46, %v7757_v1  ;;  %v7937_v8 = vpop.permute.xlu0 %7936 }
 0x64a   :  { %7701 = vst [vmem:[#allocation2 + $0x158] ss:$332 sps:$4 sm:$0xc1] %v7669_v28   ;;  %8679 = vst [vmem:[#allocation2 + $0x1d0] ss:$-172 sps:$4 sm:$0xc1] %v8647_v59   ;;  %v7951_v4 = vsel %vm7946_vm2, %v17467_v3, %v7937_v8 }
 0x64b   :  { %7909 = vst [vmem:[#allocation2 + $0x130] sm:$0xe] %v7877_v17  ;;  %8822 = vst [vmem:[#allocation2 + $0x2c8] sm:$0xe] %v8790_v35  ;;  %v7878_v51 = vrot.slane %v7846_v13, 7  ;;  %v8791_v45 = vrot.slane %v8759_v47, 7  ;;  %v8006_v60 = vmul.f32 %v17535_v63, %v7951_v4  ;;  %v8902_v57 = vmul.f32 %v17463_v0, %v7951_v4  ;;  %v17548_v53 = vpop.permute.xlu1 %7938 }
 0x64c   :  { %v7950_v46 = vsel %vm7946_vm2, %v7937_v8, %v17548_v53  ;;  %v9448_v3 = vld [vmem:[#allocation2 + $0x110] sm:$0xff]  ;;  %v9447_v52 = vld [vmem:[#allocation2 + $0x88] sm:$0xff] }
 0x64d   :  { %7910 = vst [vmem:[#allocation2 + $0x158] sm:$0xe] %v7878_v51  ;;  %8823 = vst [vmem:[#allocation2 + $0x1d0] sm:$0xe] %v8791_v45  ;;  %v8038_v38 = vrot.slane %v8006_v60, 4  ;;  %v8934_v58 = vrot.slane %v8902_v57, 4  ;;  %v8007_v42 = vmul.f32 %v17544_v18, %v7950_v46  ;;  %v8903_v40 = vmul.f32 %v17535_v63, %v7950_v46  ;;  %9837 = vmatprep.subr.mxu1 %v9448_v3  ;;  %v7227_v56 = vpop.permute.xlu0 %7226 }
 0x64e   :  { %v7247_v20 = vsel %vm7240_vm0, %v17386_v62, %v7227_v56  ;;  %9838 = vmatpush1.msra.mxu1 %v9447_v52  ;;  %v19350_v51 = vld [vmem:[#allocation34_spill] sm:$0xff]  ;;  %v17611_v52 = vsel %vm7785_vm10, 1.0, %v19013_v22  ;;  %vm19354_vm10 = vmmov %vm19340_vm3 }
 0x64f   :  { %8070 = vst [vmem:[#allocation2 + $0x130] sm:$0x70] %v8038_v38  ;;  %8966 = vst [vmem:[#allocation2 + $0x2c8] sm:$0x70] %v8934_v58  ;;  %v8039_v55 = vrot.slane %v8007_v42, 4  ;;  %v8935_v2 = vrot.slane %v8903_v40, 4  ;;  %v7346_v54 = vmul.f32 %v17453_v25, %v7247_v20  ;;  %v8500_v16 = vmul.f32 %v17331_v15, %v7247_v20  ;;  %v7229_v5 = vpop.permute.xlu1 %7228 }
 0x650   :  { %v7246_v19 = vsel %vm7240_vm0, %v7227_v56, %v7229_v5  ;;  %vm7784_vm1 = vcmp.le.s32.totalorder %v19350_v51, 27  ;;  %v17595_v58 = vsel %vm7783_vm7, 1.0, %v19013_v22  ;;  %v9398_v40 = vld [vmem:[#allocation2 + $0x280] sm:$0xff] }
 0x651   :  { %8071 = vst [vmem:[#allocation2 + $0x158] sm:$0x70] %v8039_v55  ;;  %8967 = vst [vmem:[#allocation2 + $0x1d0] sm:$0x70] %v8935_v2  ;;  %v7347_v12 = vmul.f32 %v17463_v0, %v7246_v19  ;;  %v8501_v62 = vmul.f32 %v17453_v25, %v7246_v19  ;;  %v7388_v30 = vpop.permute.xlu0 %7387  ;;  %v17606_v56 = vsel %vm7784_vm1, 1.0, %v19013_v22  ;;  %v19351_v2 = vld [vmem:[#allocation22_spill] sm:$0xff] }
 0x652   :  { %7362 = vst [vmem:[#allocation2 + $0xe0] sm:$0x7] %v7346_v54  ;;  %8516 = vst [vmem:[#allocation2 + $0x298] sm:$0x7] %v8500_v16  ;;  %v7407_v61 = vsel %vm5986_vm11, %v17368_v33, %v7388_v30  ;;  %v19352_v16 = vld [vmem:[#allocation23_spill] sm:$0xff] }
 0x653   :  { %7363 = vst [vmem:[#allocation2 + $0x2f8] sm:$0x7] %v7347_v12  ;;  %8517 = vst [vmem:[#allocation2 + $0x70] sm:$0x7] %v8501_v62  ;;  %v7490_v15 = vrot.slane %v7407_v61, 5  ;;  %v7390_v44 = vpop.permute.xlu1 %7389  ;;  %v9382_v61 = vld [vmem:[#allocation2 + $0x258] sm:$0xff] }
 0x654   :  { %v7406_v41 = vsel %vm5986_vm11, %v7388_v30, %v7390_v44 }
 0x655   :  { %7522 = vst [vmem:[#allocation2 + $0xe0] sm:$0x38] %v7490_v15  ;;  %8596 = vst [vmem:[#allocation2 + $0x298] sm:$0x38] %v7490_v15  ;;  %v7491_v29 = vrot.slane %v7406_v41, 5  ;;  %v7231_v24 = vpop.permute.xlu0 %7230  ;;  %v17623_v15 = vsel %vm7286_vm4, 1.0, %v19013_v22 }
 0x656   :  { %v7245_v7 = vsel %vm7240_vm0, %v7229_v5, %v7231_v24  ;;  %v9431_v35 = vld [vmem:[#allocation2 + $0x2c8] sm:$0xff] }
 0x657   :  { %7523 = vst [vmem:[#allocation2 + $0x2f8] sm:$0x38] %v7491_v29  ;;  %8597 = vst [vmem:[#allocation2 + $0x70] sm:$0x38] %v7491_v29  ;;  %v7348_v25 = vmul.f32 %v17535_v63, %v7245_v7  ;;  %v8502_v33 = vmul.f32 %v17463_v0, %v7245_v7  ;;  %v17573_v28 = vpop.permute.xlu1 %7232 }
 0x658   :  { %v7244_v59 = vsel %vm7240_vm0, %v7231_v24, %v17573_v28  ;;  %v9432_v10 = vld [vmem:[#allocation2 + $0x1d0] sm:$0xff] }
 0x659   :  { %7364 = vst [vmem:[#allocation2 + $0x2b8] sm:$0x7] %v7348_v25  ;;  %8518 = vst [vmem:[#allocation2 + $0x18] sm:$0x7] %v8502_v33  ;;  %v7349_v21 = vmul.f32 %v17544_v18, %v7244_v59  ;;  %v8503_v1 = vmul.f32 %v17535_v63, %v7244_v59  ;;  %9839 = vmatprep.subr.mxu1 %v9432_v10  ;;  %v7392_v17 = vpop.permute.xlu0 %7391  ;;  %v9381_v25 = vld [vmem:[#allocation2 + $0x220] sm:$0xff] }
 0x65a   :  { %v7405_v13 = vsel %vm5986_vm11, %v7390_v44, %v7392_v17  ;;  %9840 = vmatpush1.msra.mxu1 %v9431_v35 }
 0x65b   :  { %7365 = vst [vmem:[#allocation2 + $0x2a0] sm:$0x7] %v7349_v21  ;;  %8519 = vst [vmem:[#allocation2 + $0x120] sm:$0x7] %v8503_v1  ;;  %v7492_v0 = vrot.slane %v7405_v13, 5  ;;  %v17582_v47 = vpop.permute.xlu1 %7393 }
 0x65c   :  { %v7404_v8 = vsel %vm5986_vm11, %v7392_v17, %v17582_v47  ;;  %v9413_v38 = vld [vmem:[#allocation2 + $0x298] sm:$0xff]  ;;  %v9366_v10 = vld [vmem:[#allocation2 + $0xe0] sm:$0xff] }
 0x65d   :  { %7524 = vst [vmem:[#allocation2 + $0x2b8] sm:$0x38] %v7492_v0  ;;  %8598 = vst [vmem:[#allocation2 + $0x18] sm:$0x38] %v7492_v0  ;;  %v7493_v63 = vrot.slane %v7404_v8, 5  ;;  %v8184_v4 = vpop.permute.xlu0 %8183  ;;  %v9365_v0 = vld [vmem:[#allocation2 + $0x128] sm:$0xff] }
 0x65e   :  { %v8188_v45 = vsel %vm5100_vm9, %v17484_v50, %v8184_v4  ;;  %v9414_v60 = vld [vmem:[#allocation2 + $0x70] sm:$0xff] }
 0x65f   :  { %7525 = vst [vmem:[#allocation2 + $0x2a0] sm:$0x38] %v7493_v63  ;;  %8599 = vst [vmem:[#allocation2 + $0x120] sm:$0x38] %v7493_v63  ;;  %v8216_v57 = vmul.f32 %v16416_v39, %v8188_v45  ;;  %v9160_v46 = vmul.f32 %v16411_v9, %v8188_v45  ;;  %v8186_v3 = vpop.permute.xlu1 %8185  ;;  %9770 = vmatprep.subr.mxu0 %v9414_v60 }
 0x660   :  { %v8187_v42 = vsel %vm5100_vm9, %v8184_v4, %v8186_v3  ;;  %v8202_v50 = vsel %vm5100_vm9, %v8186_v3, %v16977_v31  ;;  %9771 = vmatpush1.msra.mxu0 %v9413_v38  ;;  %v9397_v31 = vld [vmem:[#allocation2 + $0x1c8] sm:$0xff]  ;;  %vm19353_vm9 = vmmov %vm19340_vm3  ;;  %v17645_v38 = vld [vmem:[%s18676_s5] sm:$0x7] }
 0x661   :  { %v8248_v20 = vrot.slane %v8216_v57, 6  ;;  %v9192_v55 = vrot.slane %v9160_v46, 6  ;;  %v8217_v54 = vmul.f32 %v19351_v2, %v8187_v42  ;;  %v8218_v5 = vmul.f32 %v19352_v16, %v8202_v50  ;;  %v8312_v19 = vpop.permute.xlu0 %8311  ;;  %9772 = vmatprep.subr.mxu0 %v9398_v40 }
 0x662   :  { %v9161_v12 = vmul.f32 %v16416_v39, %v8187_v42  ;;  %v9162_v62 = vmul.f32 %v19351_v2, %v8202_v50  ;;  %v8317_v30 = vsel %vm8315_vm12, %v17503_v14, %v8312_v19  ;;  %9773 = vmatpush1.msra.mxu0 %v9397_v31 }
 0x663   :  { %8280 = vst [vmem:[#allocation2 + $0x60] sm:$0x1c] %v8248_v20  ;;  %9224 = vst [vmem:[#allocation2 + $0x108] sm:$0x1c] %v9192_v55  ;;  %v8249_v44 = vrot.slane %v8217_v54, 6  ;;  %v8250_v41 = vrot.slane %v8218_v5, 6  ;;  %v8377_v29 = vmul.f32 %v17595_v58, %v8317_v30  ;;  %v9288_v24 = vmul.f32 %v17500_v27, %v8317_v30  ;;  %v8314_v7 = vpop.permute.xlu1 %8313  ;;  %9774 = vmatprep.subr.mxu0 %v9382_v61 }
 0x664   :  { %v9193_v33 = vrot.slane %v9161_v12, 6  ;;  %v9194_v14 = vrot.slane %v9162_v62, 6  ;;  %v8316_v59 = vsel %vm8315_vm12, %v8312_v19, %v8314_v7  ;;  %v8331_v6 = vsel %vm8315_vm12, %v8314_v7, %v16988_v36  ;;  %9775 = vmatpush1.msra.mxu0 %v9381_v25  ;;  %v9400_v20 = vld [vmem:[#allocation2 + $0xb8] sm:$0xff]  ;;  %v9399_v12 = vld [vmem:[#allocation2 + $0x100] sm:$0xff]  ;;  %v9384_v61 = vld [vmem:[#allocation2 + $0x130] sm:$0xff] }
 0x665   :  { %8281 = vst [vmem:[#allocation2 + $0x210] sm:$0x1c] %v8249_v44  ;;  %8282 = vst [vmem:[#allocation2 + $0x50] sm:$0x1c] %v8250_v41  ;;  %v8409_v21 = vrot.slane %v8377_v29, 3  ;;  %v9320_v1 = vrot.slane %v9288_v24, 3  ;;  %v8378_v17 = vmul.f32 %v17606_v56, %v8316_v59  ;;  %v8379_v35 = vmul.f32 %v17611_v52, %v8331_v6  ;;  %v7556_v13 = vpop.permute.xlu0 %7555  ;;  %9776 = vmatprep.subr.mxu0 %v9366_v10 }
 0x666   :  { %9225 = vst [vmem:[#allocation2 + $0x198] sm:$0x1c] %v9193_v33  ;;  %9226 = vst [vmem:[#allocation2 + $0x148] sm:$0x1c] %v9194_v14  ;;  %v9289_v8 = vmul.f32 %v17595_v58, %v8316_v59  ;;  %v9290_v63 = vmul.f32 %v17606_v56, %v8331_v6  ;;  %v7563_v36 = vsel %vm19353_vm9, %v17514_v32, %v7556_v13  ;;  %9777 = vmatpush1.msra.mxu0 %v9365_v0  ;;  %v9416_v4 = vld [vmem:[#allocation2 + $0x120] sm:$0xff]  ;;  %v9415_v32 = vld [vmem:[#allocation2 + $0x18] sm:$0xff] }
 0x667   :  { %vm7287_vm12 = vcmp.ge.s32.totalorder %v19350_v51, 2  ;;  %8441 = vst [vmem:[#allocation2 + $0x60] sm:$0xe0] %v8409_v21  ;;  %9352 = vst [vmem:[#allocation2 + $0x108] sm:$0xe0] %v9320_v1  ;;  %v8410_v45 = vrot.slane %v8378_v17, 3  ;;  %v7638_v57 = vmul.f32 %v16416_v39, %v7563_v36  ;;  %v8616_v46 = vmul.f32 %v16411_v9, %v7563_v36  ;;  %11616 = vmatmul.mubr.msk.f32.vlgmr.msra.gmra.mxu0 %vm6588_vm8, %v17645_v38 }
 0x668   :  { %v8411_v60 = vrot.slane %v8379_v35, 3  ;;  %v7558_v3 = vpop.permute.xlu1 %7557  ;;  %9841 = vmatprep.subr.mxu1 %v9416_v4  ;;  %v9321_v42 = vrot.slane %v9289_v8, 3  ;;  %v9322_v50 = vrot.slane %v9290_v63, 3  ;;  %9952 = vmatprep.mubr.f32.mxu0 %v19013_v22  ;;  %v17665_v44 = vsel %vm7288_vm15, 1.0, %v19013_v22  ;;  %v9383_v24 = vld [vmem:[#allocation2 + $0x238] sm:$0xff] }
 0x669   :  { %v7561_v40 = vsel %vm19354_vm10, %v7558_v3, %v17045_v48  ;;  %v7562_v9 = vsel %vm19355_vm5, %v7556_v13, %v7558_v3  ;;  %9842 = vmatpush1.msra.mxu1 %v9415_v32  ;;  %8442 = vst [vmem:[#allocation2 + $0x210] sm:$0xe0] %v8410_v45  ;;  %v7670_v55 = vrot.slane %v7638_v57, 2  ;;  %v8648_v54 = vrot.slane %v8616_v46, 2  ;;  %v9368_v33 = vld [vmem:[#allocation2 + $0x2b8] sm:$0xff] }
 0x66a   :  { %8443 = vst [vmem:[#allocation2 + $0x50] sm:$0xe0] %v8411_v60  ;;  %v7639_v5 = vmul.f32 %v19351_v2, %v7562_v9  ;;  %v7640_v19 = vmul.f32 %v19352_v16, %v7561_v40  ;;  %9843 = vmatprep.subr.mxu1 %v9400_v20  ;;  %v7748_v31 = vpop.permute.xlu0 %7747  ;;  %9353 = vst [vmem:[#allocation2 + $0x198] sm:$0xe0] %v9321_v42  ;;  %v8617_v48 = vmul.f32 %v16416_v39, %v7562_v9  ;;  %v9367_v21 = vld [vmem:[#allocation2 + $0x2f8] sm:$0xff] }
 0x66b   :  { %9354 = vst [vmem:[#allocation2 + $0x148] sm:$0xe0] %v9322_v50  ;;  %v8618_v62 = vmul.f32 %v19351_v2, %v7561_v40  ;;  %v7756_v30 = vsel %vm7753_vm6, %v17527_v43, %v7748_v31  ;;  %9844 = vmatpush1.msra.mxu1 %v9399_v12  ;;  %7702 = vst [vmem:[#allocation2 + $0x98] ss:$212 sps:$4 sm:$0xc1] %v7670_v55   ;;  %v11470_v35 = vsel %vm7287_vm12, 1.0, %v19013_v22 }
 0x66c   :  { %8680 = vst [vmem:[#allocation2 + $0x140] ss:$260 sps:$4 sm:$0xc1] %v8648_v54   ;;  %v7671_v16 = vrot.slane %v7639_v5, 2  ;;  %v7672_v41 = vrot.slane %v7640_v19, 2  ;;  %v7847_v29 = vmul.f32 %v17595_v58, %v7756_v30  ;;  %v8760_v39 = vmul.f32 %v17500_v27, %v7756_v30  ;;  %v7750_v2 = vpop.permute.xlu1 %7749  ;;  %9845 = vmatprep.subr.mxu1 %v9384_v61  ;;  %v9452_v13 = vld [vmem:[#allocation2 + $0x118] sm:$0xff] }
 0x66d   :  { %v8649_v7 = vrot.slane %v8617_v48, 2  ;;  %v8650_v43 = vrot.slane %v8618_v62, 2  ;;  %v7754_v25 = vsel %vm7753_vm6, %v7750_v2, %v17061_v49  ;;  %v7755_v23 = vsel %vm7753_vm6, %v7748_v31, %v7750_v2  ;;  %9846 = vmatpush1.msra.mxu1 %v9383_v24  ;;  %v9436_v9 = vld [vmem:[#allocation2 + $0x2d8] sm:$0xff] }
 0x66e   :  { %7703 = vst [vmem:[#allocation2 + $0x2e0] ss:$-356 sps:$4 sm:$0xc1] %v7671_v16   ;;  %7704 = vst [vmem:[#allocation2 + $0x1a8] ss:$-356 sps:$4 sm:$0xc1] %v7672_v41   ;;  %v7848_v27 = vmul.f32 %v17606_v56, %v7755_v23  ;;  %v7849_v6 = vmul.f32 %v17611_v52, %v7754_v25  ;;  %9847 = vmatprep.subr.mxu1 %v9368_v33  ;;  %v7941_v10 = vpop.permute.xlu0 %7940  ;;  %v8761_v49 = vmul.f32 %v17595_v58, %v7755_v23 }
 0x66f   :  { %v7879_v14 = vrot.slane %v7847_v29, 7  ;;  %v8792_v59 = vrot.slane %v8760_v39, 7  ;;  %8681 = vst [vmem:[#allocation2 + $0x230] ss:$-172 sps:$4 sm:$0xc1] %v8649_v7   ;;  %v8762_v1 = vmul.f32 %v17606_v56, %v7754_v25  ;;  %v7949_v17 = vsel %vm7946_vm2, %v17548_v53, %v7941_v10  ;;  %9848 = vmatpush1.msra.mxu1 %v9367_v21  ;;  %v9449_v40 = vld [vmem:[#allocation2 + $0x108] sm:$0xff] }
 0x670   :  { %8682 = vst [vmem:[#allocation2 + $0x160] ss:$156 sps:$4 sm:$0xc1] %v8650_v43   ;;  %v7880_v52 = vrot.slane %v7848_v27, 7  ;;  %v7881_v0 = vrot.slane %v7849_v6, 7  ;;  %v8008_v8 = vmul.f32 %v17623_v15, %v7949_v17  ;;  %v8904_v58 = vmul.f32 %v17544_v18, %v7949_v17  ;;  %v7943_v63 = vpop.permute.xlu1 %7942  ;;  %11617 = vmatmul.mubr.msk.f32.vlgmr.msra.gmra.mxu1 %vm6588_vm8, %v17645_v38  ;;  %9979 = vmatprep.subr.mxu1 %v9452_v13  ;;  %v9420_v43 = vld [vmem:[#allocation2 + $0x1a0] sm:$0xff] }
 0x671   :  { %7911 = vst [vmem:[#allocation2 + $0x98] sm:$0xe] %v7879_v14  ;;  %8824 = vst [vmem:[#allocation2 + $0x140] sm:$0xe] %v8792_v59  ;;  %v8793_v53 = vrot.slane %v8761_v49, 7  ;;  %v8794_v56 = vrot.slane %v8762_v1, 7  ;;  %v7947_v51 = vsel %vm7946_vm2, %v7943_v63, %v17075_v37  ;;  %v7948_v36 = vsel %vm7946_vm2, %v7941_v10, %v7943_v63  ;;  %10023 = vmatprep.mubr.f32.mxu1 %v19013_v22 }
 0x672   :  { %7912 = vst [vmem:[#allocation2 + $0x2e0] sm:$0xe] %v7880_v52  ;;  %7913 = vst [vmem:[#allocation2 + $0x1a8] sm:$0xe] %v7881_v0  ;;  %v8040_v4 = vrot.slane %v8008_v8, 4  ;;  %v8936_v45 = vrot.slane %v8904_v58, 4  ;;  %v8009_v60 = vmul.f32 %v11470_v35, %v7948_v36  ;;  %v8010_v57 = vmul.f32 %v17665_v44, %v7947_v51  ;;  %v7235_v46 = vpop.permute.xlu0 %7234 }
 0x673   :  { %v9450_v3 = vld [vmem:[#allocation2 + $0x198] sm:$0xff]  ;;  %v9451_v32 = vld [vmem:[#allocation2 + $0x148] sm:$0xff]  ;;  %8825 = vst [vmem:[#allocation2 + $0x230] sm:$0xe] %v8793_v53  ;;  %8826 = vst [vmem:[#allocation2 + $0x160] sm:$0xe] %v8794_v56  ;;  %v8905_v42 = vmul.f32 %v17623_v15, %v7948_v36  ;;  %v8906_v37 = vmul.f32 %v11470_v35, %v7947_v51  ;;  %v7243_v50 = vsel %vm7240_vm0, %v17573_v28, %v7235_v46 }
 0x674   :  { %9908 = vmatprep.subr.mxu0 %v9450_v3  ;;  %9980 = vmatpush1.msra.mxu1 %v9451_v32  ;;  %8072 = vst [vmem:[#allocation2 + $0x98] sm:$0x70] %v8040_v4  ;;  %8968 = vst [vmem:[#allocation2 + $0x140] sm:$0x70] %v8936_v45  ;;  %v8041_v20 = vrot.slane %v8009_v60, 4  ;;  %v8042_v55 = vrot.slane %v8010_v57, 4  ;;  %v7350_v54 = vmul.f32 %v17623_v15, %v7243_v50  ;;  %v7237_v19 = vpop.permute.xlu1 %7236 }
 0x675   :  { %v8504_v5 = vmul.f32 %v17544_v18, %v7243_v50  ;;  %9909 = vmatpush1.msra.mxu0 %v9449_v40  ;;  %9981 = vmatprep.subr.mxu1 %v9436_v9  ;;  %v8937_v31 = vrot.slane %v8905_v42, 4  ;;  %v8938_v12 = vrot.slane %v8906_v37, 4  ;;  %v7241_v28 = vsel %vm7240_vm0, %v7237_v19, %v17104_v34  ;;  %v9404_v23 = vld [vmem:[#allocation2 + $0x50] sm:$0xff]  ;;  %v9402_v33 = vld [vmem:[#allocation2 + $0x60] sm:$0xff]  ;;  %v9401_v59 = vld [vmem:[#allocation2 + $0x288] sm:$0xff] }
 0x676   :  { %v7242_v48 = vsel %vm7240_vm0, %v7235_v46, %v7237_v19  ;;  %8073 = vst [vmem:[#allocation2 + $0x2e0] sm:$0x70] %v8041_v20  ;;  %8074 = vst [vmem:[#allocation2 + $0x1a8] sm:$0x70] %v8042_v55  ;;  %v7352_v30 = vmul.f32 %v17665_v44, %v7241_v28  ;;  %v8506_v61 = vmul.f32 %v11470_v35, %v7241_v28  ;;  %v7396_v16 = vpop.permute.xlu0 %7395  ;;  %v9403_v14 = vld [vmem:[#allocation2 + $0x210] sm:$0xff]  ;;  %v9385_v21 = vld [vmem:[#allocation2 + $0x158] sm:$0xff] }
 0x677   :  { %7366 = vst [vmem:[#allocation2 + $0x168] sm:$0x7] %v7350_v54  ;;  %8520 = vst [vmem:[#allocation2 + $0x240] sm:$0x7] %v8504_v5  ;;  %v7351_v62 = vmul.f32 %v11470_v35, %v7242_v48  ;;  %v8505_v18 = vmul.f32 %v17623_v15, %v7242_v48  ;;  %v7403_v34 = vsel %vm5986_vm11, %v17582_v47, %v7396_v16  ;;  %v10141_v35 = vld [vmem:[%s18678_s7 + $0x1f8] sm:$0xff]  ;;  %v9369_v13 = vld [vmem:[#allocation2 + $0x2a0] sm:$0xff] }
 0x678   :  { %8969 = vst [vmem:[#allocation2 + $0x230] sm:$0x70] %v8937_v31  ;;  %8970 = vst [vmem:[#allocation2 + $0x160] sm:$0x70] %v8938_v12  ;;  %v7494_v41 = vrot.slane %v7403_v34, 5  ;;  %v7398_v29 = vpop.permute.xlu1 %7397  ;;  %v10125_v52 = vld [vmem:[%s18678_s7 + $0x178] sm:$0xff] }
 0x679   :  { %7367 = vst [vmem:[#allocation2 + $0x178] sm:$0x7] %v7351_v62  ;;  %7368 = vst [vmem:[#allocation2 + $0x40] sm:$0x7] %v7352_v30  ;;  %v7401_v44 = vsel %vm5986_vm11, %v7398_v29, %v17093_v11  ;;  %v7402_v15 = vsel %vm5986_vm11, %v7396_v16, %v7398_v29  ;;  %v10109_v0 = vld [vmem:[%s18678_s7 + $0xf8] sm:$0xff]  ;;  %v10140_v8 = vld [vmem:[%s18678_s7 + $0x1f0] sm:$0xff] }
 0x67a   :  { %8521 = vst [vmem:[#allocation2 + $0x180] sm:$0x7] %v8505_v18  ;;  %8522 = vst [vmem:[#allocation2 + $0x1f8] sm:$0x7] %v8506_v61  ;;  %v7495_v39 = vrot.slane %v7402_v15, 5  ;;  %v7496_v2 = vrot.slane %v7401_v44, 5 }
 0x67b   :  { %7526 = vst [vmem:[#allocation2 + $0x168] sm:$0x38] %v7494_v41  ;;  %8600 = vst [vmem:[#allocation2 + $0x240] sm:$0x38] %v7494_v41  ;;  %v9433_v7 = vld [vmem:[#allocation2 + $0x140] sm:$0xff]  ;;  %v9386_v6 = vld [vmem:[#allocation2 + $0x98] sm:$0xff] }
 0x67c   :  { %7527 = vst [vmem:[#allocation2 + $0x178] sm:$0x38] %v7495_v39  ;;  %7528 = vst [vmem:[#allocation2 + $0x40] sm:$0x38] %v7496_v2  ;;  %v10093_v58 = vld [vmem:[%s18678_s7 + $0x78] sm:$0xff]  ;;  %v10124_v63 = vld [vmem:[%s18678_s7 + $0x170] sm:$0xff] }
 0x67d   :  { %8601 = vst [vmem:[#allocation2 + $0x180] sm:$0x38] %v7495_v39  ;;  %8602 = vst [vmem:[#allocation2 + $0x1f8] sm:$0x38] %v7496_v2  ;;  %v9388_v27 = vld [vmem:[#allocation2 + $0x1a8] sm:$0xff]  ;;  %v9387_v10 = vld [vmem:[#allocation2 + $0x2e0] sm:$0xff] }
 0x67e   :  { %v10108_v53 = vld [vmem:[%s18678_s7 + $0xf0] sm:$0xff]  ;;  %v10139_v56 = vld [vmem:[%s18678_s7 + $0x1e8] sm:$0xff]  ;;  %v10138_v4 = vld [vmem:[%s18678_s7 + $0x1e0] sm:$0xff] }
 0x67f   :  { %v9434_v47 = vld [vmem:[#allocation2 + $0x230] sm:$0xff]  ;;  %v9435_v24 = vld [vmem:[#allocation2 + $0x160] sm:$0xff]  ;;  %v10107_v36 = vld [vmem:[%s18678_s7 + $0xe8] sm:$0xff] }
 0x680   :  { %9910 = vmatprep.subr.mxu0 %v9434_v47  ;;  %9982 = vmatpush1.msra.mxu1 %v9435_v24  ;;  %v10092_v51 = vld [vmem:[%s18678_s7 + $0x70] sm:$0xff]  ;;  %v10091_v45 = vld [vmem:[%s18678_s7 + $0x68] sm:$0xff]  ;;  %v10122_v60 = vld [vmem:[%s18678_s7 + $0x160] sm:$0xff] }
 0x681   :  { %9911 = vmatpush1.msra.mxu0 %v9433_v7  ;;  %9983 = vmatprep.subr.mxu1 %v9420_v43  ;;  %v10106_v57 = vld [vmem:[%s18678_s7 + $0xe0] sm:$0xff]  ;;  %v10137_v46 = vld [vmem:[%s18678_s7 + $0x1d8] sm:$0xff]  ;;  %v10136_v37 = vld [vmem:[%s18678_s7 + $0x1d0] sm:$0xff] }
 0x682   :  { %v9417_v26 = vld [vmem:[#allocation2 + $0x240] sm:$0xff]  ;;  %v9370_v1 = vld [vmem:[#allocation2 + $0x168] sm:$0xff]  ;;  %v10121_v32 = vld [vmem:[%s18678_s7 + $0x158] sm:$0xff] }
 0x683   :  { %v9372_v49 = vld [vmem:[#allocation2 + $0x40] sm:$0xff]  ;;  %v9371_v17 = vld [vmem:[#allocation2 + $0x178] sm:$0xff]  ;;  %v10120_v40 = vld [vmem:[%s18678_s7 + $0x150] sm:$0xff] }
 0x684   :  { %v9418_v11 = vld [vmem:[#allocation2 + $0x180] sm:$0xff]  ;;  %v9419_v25 = vld [vmem:[#allocation2 + $0x1f8] sm:$0xff]  ;;  %v10104_v9 = vld [vmem:[%s18678_s7 + $0xd0] sm:$0xff] }
 0x685   :  { %9912 = vmatprep.subr.mxu0 %v9418_v11  ;;  %9984 = vmatpush1.msra.mxu1 %v9419_v25  ;;  %v10090_v3 = vld [vmem:[%s18678_s7 + $0x60] sm:$0xff]  ;;  %v10105_v42 = vld [vmem:[%s18678_s7 + $0xd8] sm:$0xff]  ;;  %v10135_v20 = vld [vmem:[%s18678_s7 + $0x1c8] sm:$0xff] }
 0x686   :  { %9913 = vmatpush1.msra.mxu0 %v9417_v26  ;;  %9985 = vmatprep.subr.mxu1 %v9404_v23  ;;  %v10089_v50 = vld [vmem:[%s18678_s7 + $0x58] sm:$0xff]  ;;  %v10088_v55 = vld [vmem:[%s18678_s7 + $0x50] sm:$0xff]  ;;  %v10119_v54 = vld [vmem:[%s18678_s7 + $0x148] sm:$0xff] }
 0x687   :  { %9914 = vmatprep.subr.mxu0 %v9402_v33  ;;  %9986 = vmatpush1.msra.mxu1 %v9403_v14  ;;  %v10103_v5 = vld [vmem:[%s18678_s7 + $0xc8] sm:$0xff]  ;;  %v10134_v19 = vld [vmem:[%s18678_s7 + $0x1c0] sm:$0xff]  ;;  %v10133_v48 = vld [vmem:[%s18678_s7 + $0x1b8] sm:$0xff] }
 0x688   :  { %9915 = vmatpush1.msra.mxu0 %v9401_v59  ;;  %9987 = vmatprep.subr.mxu1 %v9388_v27  ;;  %v10087_v31 = vld [vmem:[%s18678_s7 + $0x48] sm:$0xff]  ;;  %v10118_v12 = vld [vmem:[%s18678_s7 + $0x140] sm:$0xff]  ;;  %v10117_v30 = vld [vmem:[%s18678_s7 + $0x138] sm:$0xff] }
 0x689   :  { %9916 = vmatprep.subr.mxu0 %v9386_v6  ;;  %9988 = vmatpush1.msra.mxu1 %v9387_v10  ;;  %v10102_v28 = vld [vmem:[%s18678_s7 + $0xc0] sm:$0xff]  ;;  %v10101_v18 = vld [vmem:[%s18678_s7 + $0xb8] sm:$0xff]  ;;  %v10132_v61 = vld [vmem:[%s18678_s7 + $0x1b0] sm:$0xff] }
 0x68a   :  { %9917 = vmatpush1.msra.mxu0 %v9385_v21  ;;  %9989 = vmatprep.subr.mxu1 %v9372_v49  ;;  %v10086_v62 = vld [vmem:[%s18678_s7 + $0x40] sm:$0xff]  ;;  %v10085_v16 = vld [vmem:[%s18678_s7 + $0x38] sm:$0xff]  ;;  %v10116_v34 = vld [vmem:[%s18678_s7 + $0x130] sm:$0xff] }
 0x68b   :  { %9918 = vmatprep.subr.mxu0 %v9370_v1  ;;  %9990 = vmatpush1.msra.mxu1 %v9371_v17  ;;  %v10100_v41 = vld [vmem:[%s18678_s7 + $0xb0] sm:$0xff]  ;;  %v10131_v29 = vld [vmem:[%s18678_s7 + $0x1a8] sm:$0xff]  ;;  %v10130_v2 = vld [vmem:[%s18678_s7 + $0x1a0] sm:$0xff] }
 0x68c   :  { %9919 = vmatpush1.msra.mxu0 %v9369_v13  ;;  %11619 = vmatmul.mubr.msk.f32.vlgmr.msra.gmra.mxu1 %vm6588_vm8, %v17645_v38  ;;  %v10084_v44 = vld [vmem:[%s18678_s7 + $0x30] sm:$0xff]  ;;  %v10115_v15 = vld [vmem:[%s18678_s7 + $0x128] sm:$0xff]  ;;  %v10114_v24 = vld [vmem:[%s18678_s7 + $0x120] sm:$0xff] }
 0x68d   :  { %11618 = vmatmul.mubr.msk.f32.vlgmr.msra.gmra.mxu0 %vm6588_vm8, %v17645_v38  ;;  %11660 = vmatprep.subr.mxu1 %v10141_v35  ;;  %v10123_v38 = vld [vmem:[%s18678_s7 + $0x168] sm:$0xff]  ;;  %v10098_v7 = vld [vmem:[%s18678_s7 + $0xa0] sm:$0xff]  ;;  %v10129_v43 = vld [vmem:[%s18678_s7 + $0x198] sm:$0xff] }
 0x68e   :  { %11661 = vmatpush3.msra.mxu1 %v10125_v52  ;;  %11625 = vmatprep.subr.mxu0 %v10109_v0  ;;  %v10099_v39 = vld [vmem:[%s18678_s7 + $0xa8] sm:$0xff]  ;;  %v10082_v11 = vld [vmem:[%s18678_s7 + $0x20] sm:$0xff]  ;;  %v10113_v25 = vld [vmem:[%s18678_s7 + $0x118] sm:$0xff] }
 0x68f   :  { %11662 = vmatprep.subr.mxu1 %v10140_v8  ;;  %11626 = vmatpush3.msra.mxu0 %v10093_v58  ;;  %v10083_v47 = vld [vmem:[%s18678_s7 + $0x28] sm:$0xff]  ;;  %v10097_v26 = vld [vmem:[%s18678_s7 + $0x98] sm:$0xff]  ;;  %v10128_v23 = vld [vmem:[%s18678_s7 + $0x190] sm:$0xff]  ;;  %v17918_v8 = vpop.permute.xlu0 %9456 }
 0x690   :  { %11663 = vmatpush3.msra.mxu1 %v10124_v63  ;;  %11627 = vmatprep.subr.mxu0 %v10108_v53  ;;  %v10081_v33 = vld [vmem:[%s18678_s7 + $0x18] sm:$0xff]  ;;  %v10112_v14 = vld [vmem:[%s18678_s7 + $0x110] sm:$0xff]  ;;  %v10127_v27 = vld [vmem:[%s18678_s7 + $0x188] sm:$0xff] }
 0x691   :  { %11664 = vmatprep.subr.mxu1 %v10139_v56  ;;  %11628 = vmatpush3.msra.mxu0 %v10092_v51  ;;  %v10096_v59 = vld [vmem:[%s18678_s7 + $0x90] sm:$0xff]  ;;  %v10111_v10 = vld [vmem:[%s18678_s7 + $0x108] sm:$0xff]  ;;  %v10126_v49 = vld [vmem:[%s18678_s7 + $0x180] sm:$0xff] }
 0x692   :  { %11665 = vmatpush3.msra.mxu1 %v10123_v38  ;;  %11629 = vmatprep.subr.mxu0 %v10107_v36  ;;  %v10080_v6 = vld [vmem:[%s18678_s7 + $0x10] sm:$0xff]  ;;  %v10095_v21 = vld [vmem:[%s18678_s7 + $0x88] sm:$0xff]  ;;  %v10110_v17 = vld [vmem:[%s18678_s7 + $0x100] sm:$0xff] }
 0x693   :  { %11666 = vmatprep.subr.mxu1 %v10138_v4  ;;  %11630 = vmatpush3.msra.mxu0 %v10091_v45  ;;  %v10079_v1 = vld [vmem:[%s18678_s7 + $0x8] sm:$0xff]  ;;  %v10094_v35 = vld [vmem:[%s18678_s7 + $0x80] sm:$0xff]  ;;  %v10205_v52 = vld [vmem:[%s18678_s7 + $0x3f8] sm:$0xff] }
 0x694   :  { %11667 = vmatpush3.msra.mxu1 %v10122_v60  ;;  %11631 = vmatprep.subr.mxu0 %v10106_v57  ;;  %v10078_v13 = vld [vmem:[%s18678_s7] sm:$0xff]  ;;  %v10173_v0 = vld [vmem:[%s18678_s7 + $0x2f8] sm:$0xff] }
 0x695   :  { %11668 = vmatprep.subr.mxu1 %v10137_v46  ;;  %11632 = vmatpush3.msra.mxu0 %v10090_v3  ;;  %v10189_v46 = vld [vmem:[%s18678_s7 + $0x378] sm:$0xff] }
 0x696   :  { %11669 = vmatpush3.msra.mxu1 %v10121_v32  ;;  %11633 = vmatprep.subr.mxu0 %v10105_v42  ;;  %v10204_v42 = vld [vmem:[%s18678_s7 + $0x3f0] sm:$0xff] }
 0x697   :  { %11670 = vmatprep.subr.mxu1 %v10136_v37  ;;  %11634 = vmatpush3.msra.mxu0 %v10089_v50  ;;  %v10188_v50 = vld [vmem:[%s18678_s7 + $0x370] sm:$0xff] }
 0x698   :  { %11671 = vmatpush3.msra.mxu1 %v10120_v40  ;;  %11635 = vmatprep.subr.mxu0 %v10104_v9  ;;  %v10203_v40 = vld [vmem:[%s18678_s7 + $0x3e8] sm:$0xff] }
 0x699   :  { %11672 = vmatprep.subr.mxu1 %v10135_v20  ;;  %11636 = vmatpush3.msra.mxu0 %v10088_v55  ;;  %v10157_v20 = vld [vmem:[%s18678_s7 + $0x278] sm:$0xff]  ;;  %v10187_v55 = vld [vmem:[%s18678_s7 + $0x368] sm:$0xff] }
 0x69a   :  { %11673 = vmatpush3.msra.mxu1 %v10119_v54  ;;  %11637 = vmatprep.subr.mxu0 %v10103_v5  ;;  %v10172_v5 = vld [vmem:[%s18678_s7 + $0x2f0] sm:$0xff] }
 0x69b   :  { %11674 = vmatprep.subr.mxu1 %v10134_v19  ;;  %11638 = vmatpush3.msra.mxu0 %v10087_v31  ;;  %v10202_v19 = vld [vmem:[%s18678_s7 + $0x3e0] sm:$0xff]  ;;  %v10156_v31 = vld [vmem:[%s18678_s7 + $0x270] sm:$0xff] }
 0x69c   :  { %11675 = vmatpush3.msra.mxu1 %v10118_v12  ;;  %11639 = vmatprep.subr.mxu0 %v10102_v28  ;;  %v10186_v12 = vld [vmem:[%s18678_s7 + $0x360] sm:$0xff]  ;;  %v10171_v28 = vld [vmem:[%s18678_s7 + $0x2e8] sm:$0xff] }
 0x69d   :  { %11676 = vmatprep.subr.mxu1 %v10133_v48  ;;  %11640 = vmatpush3.msra.mxu0 %v10086_v62  ;;  %v10201_v48 = vld [vmem:[%s18678_s7 + $0x3d8] sm:$0xff]  ;;  %v10155_v62 = vld [vmem:[%s18678_s7 + $0x268] sm:$0xff] }
 0x69e   :  { %11677 = vmatpush3.msra.mxu1 %v10117_v30  ;;  %11641 = vmatprep.subr.mxu0 %v10101_v18  ;;  %v10185_v30 = vld [vmem:[%s18678_s7 + $0x358] sm:$0xff]  ;;  %v10170_v18 = vld [vmem:[%s18678_s7 + $0x2e0] sm:$0xff] }
 0x69f   :  { %11678 = vmatprep.subr.mxu1 %v10132_v61  ;;  %11642 = vmatpush3.msra.mxu0 %v10085_v16  ;;  %v10200_v61 = vld [vmem:[%s18678_s7 + $0x3d0] sm:$0xff]  ;;  %v10154_v16 = vld [vmem:[%s18678_s7 + $0x260] sm:$0xff] }
 0x6a0   :  { %11679 = vmatpush3.msra.mxu1 %v10116_v34  ;;  %11643 = vmatprep.subr.mxu0 %v10100_v41  ;;  %v10184_v34 = vld [vmem:[%s18678_s7 + $0x350] sm:$0xff]  ;;  %v10169_v41 = vld [vmem:[%s18678_s7 + $0x2d8] sm:$0xff] }
 0x6a1   :  { %11680 = vmatprep.subr.mxu1 %v10131_v29  ;;  %11644 = vmatpush3.msra.mxu0 %v10084_v44  ;;  %v10199_v29 = vld [vmem:[%s18678_s7 + $0x3c8] sm:$0xff]  ;;  %v10153_v44 = vld [vmem:[%s18678_s7 + $0x258] sm:$0xff] }
 0x6a2   :  { %11681 = vmatpush3.msra.mxu1 %v10115_v15  ;;  %11645 = vmatprep.subr.mxu0 %v10099_v39  ;;  %v10183_v15 = vld [vmem:[%s18678_s7 + $0x348] sm:$0xff]  ;;  %v10168_v39 = vld [vmem:[%s18678_s7 + $0x2d0] sm:$0xff] }
 0x6a3   :  { %11682 = vmatprep.subr.mxu1 %v10130_v2  ;;  %11646 = vmatpush3.msra.mxu0 %v10083_v47  ;;  %v10198_v2 = vld [vmem:[%s18678_s7 + $0x3c0] sm:$0xff]  ;;  %v10152_v47 = vld [vmem:[%s18678_s7 + $0x250] sm:$0xff] }
 0x6a4   :  { %11683 = vmatpush3.msra.mxu1 %v10114_v24  ;;  %11647 = vmatprep.subr.mxu0 %v10098_v7  ;;  %v10182_v24 = vld [vmem:[%s18678_s7 + $0x340] sm:$0xff]  ;;  %v10167_v7 = vld [vmem:[%s18678_s7 + $0x2c8] sm:$0xff] }
 0x6a5   :  { %11684 = vmatprep.subr.mxu1 %v10129_v43  ;;  %11648 = vmatpush3.msra.mxu0 %v10082_v11  ;;  %v10197_v43 = vld [vmem:[%s18678_s7 + $0x3b8] sm:$0xff]  ;;  %v10151_v11 = vld [vmem:[%s18678_s7 + $0x248] sm:$0xff] }
 0x6a6   :  { %11685 = vmatpush3.msra.mxu1 %v10113_v25  ;;  %11649 = vmatprep.subr.mxu0 %v10097_v26  ;;  %v10181_v25 = vld [vmem:[%s18678_s7 + $0x338] sm:$0xff]  ;;  %v10166_v26 = vld [vmem:[%s18678_s7 + $0x2c0] sm:$0xff] }
 0x6a7   :  { %11686 = vmatprep.subr.mxu1 %v10128_v23  ;;  %11650 = vmatpush3.msra.mxu0 %v10081_v33  ;;  %v10196_v23 = vld [vmem:[%s18678_s7 + $0x3b0] sm:$0xff]  ;;  %v10150_v33 = vld [vmem:[%s18678_s7 + $0x240] sm:$0xff] }
 0x6a8   :  { %11687 = vmatpush3.msra.mxu1 %v10112_v14  ;;  %11651 = vmatprep.subr.mxu0 %v10096_v59  ;;  %v10180_v14 = vld [vmem:[%s18678_s7 + $0x330] sm:$0xff]  ;;  %v10165_v59 = vld [vmem:[%s18678_s7 + $0x2b8] sm:$0xff] }
 0x6a9   :  { %11688 = vmatprep.subr.mxu1 %v10127_v27  ;;  %11652 = vmatpush3.msra.mxu0 %v10080_v6  ;;  %v10195_v27 = vld [vmem:[%s18678_s7 + $0x3a8] sm:$0xff]  ;;  %v10149_v6 = vld [vmem:[%s18678_s7 + $0x238] sm:$0xff] }
 0x6aa   :  { %11689 = vmatpush3.msra.mxu1 %v10111_v10  ;;  %11653 = vmatprep.subr.mxu0 %v10095_v21  ;;  %v10179_v10 = vld [vmem:[%s18678_s7 + $0x328] sm:$0xff]  ;;  %v10164_v21 = vld [vmem:[%s18678_s7 + $0x2b0] sm:$0xff] }
 0x6ab   :  { %11690 = vmatprep.subr.mxu1 %v10126_v49  ;;  %11654 = vmatpush3.msra.mxu0 %v10079_v1  ;;  %v10194_v49 = vld [vmem:[%s18678_s7 + $0x3a0] sm:$0xff]  ;;  %v10148_v1 = vld [vmem:[%s18678_s7 + $0x230] sm:$0xff] }
 0x6ac   :  { %11691 = vmatpush3.msra.mxu1 %v10110_v17  ;;  %11655 = vmatprep.subr.mxu0 %v10094_v35  ;;  %v10178_v17 = vld [vmem:[%s18678_s7 + $0x320] sm:$0xff]  ;;  %v10163_v35 = vld [vmem:[%s18678_s7 + $0x2a8] sm:$0xff] }
 0x6ad   :  { %11656 = vmatpush3.msra.mxu0 %v10078_v13  ;;  %11730 = vmatprep.subr.mxu1 %v10205_v52  ;;  %v10193_v13 = vld [vmem:[%s18678_s7 + $0x398] sm:$0xff]  ;;  %v10147_v52 = vld [vmem:[%s18678_s7 + $0x228] sm:$0xff] }
 0x6ae   :  { %11695 = vmatprep.subr.mxu0 %v10173_v0  ;;  %v10177_v0 = vld [vmem:[%s18678_s7 + $0x318] sm:$0xff] }
 0x6b6   :  { %v9599_v58 = vpop.f32.mrf.mxu1 }
 0x6b7   :  { %v9600_v63 = vadd.f32 %v9599_v58, %v17918_v8  ;;  %v10162_v58 = vld [vmem:[%s18678_s7 + $0x2a0] sm:$0xff] }
 0x6b8   :  { %v9601_v53 = vpop.f32.mrf.mxu1 }
 0x6b9   :  { %v9602_v56 = vadd.f32 %v9601_v53, %v17918_v8  ;;  %v10048_v51 = vmul.f32 0.01, %v9600_v63  ;;  %vm10032_vm11 = vcmp.gt.f32.partialorder %v9600_v63, 0.0  ;;  %v10146_v53 = vld [vmem:[%s18678_s7 + $0x220] sm:$0xff] }
 0x6ba   :  { %v9528_v38 = vpop.f32.mrf.mxu0 }
 0x6bb   :  { %v10049_v36 = vmul.f32 0.01, %v9602_v56  ;;  %v9529_v4 = vadd.f32 %v9528_v38, %v17918_v8  ;;  %vm10033_vm8 = vcmp.gt.f32.partialorder %v9602_v56, 0.0  ;;  %v10064_v32 = vsel %vm10032_vm11, %v9600_v63, %v10048_v51  ;;  %v10192_v63 = vld [vmem:[%s18678_s7 + $0x390] sm:$0xff]  ;;  %v10161_v51 = vld [vmem:[%s18678_s7 + $0x298] sm:$0xff]  ;;  %v10191_v38 = vld [vmem:[%s18678_s7 + $0x388] sm:$0xff] }
 0x6bc   :  { %v9530_v45 = vpop.f32.mrf.mxu0  ;;  %vm11049_vm11 = vcmask 1043456  }
 0x6bd   :  { %v9531_v60 = vadd.f32 %v9530_v45, %v17918_v8  ;;  %v10065_v57 = vsel %vm10033_vm8, %v9602_v56, %v10049_v36  ;;  %v10046_v3 = vmul.f32 0.01, %v9529_v4  ;;  %vm10030_vm6 = vcmp.gt.f32.partialorder %v9529_v4, 0.0  ;;  %v10176_v56 = vld [vmem:[%s18678_s7 + $0x310] sm:$0xff]  ;;  %v10145_v36 = vld [vmem:[%s18678_s7 + $0x218] sm:$0xff] }
 0x6be   :  { %10468 = vmatprep.mubr.f32.mxu1 %v10065_v57  ;;  %v10160_v45 = vld [vmem:[%s18678_s7 + $0x290] sm:$0xff]  ;;  %vm10901_vm8 = vcmask 523264  }
 0x6bf   :  { %v10047_v37 = vmul.f32 0.01, %v9531_v60  ;;  %10469 = vmatmul.mubr.f32.vlgmr.msra.gmra.mxu1 %v10064_v32  ;;  %vm10031_vm2 = vcmp.gt.f32.partialorder %v9531_v60, 0.0  ;;  %v10062_v54 = vsel %vm10030_vm6, %v9529_v4, %v10046_v3  ;;  %v10175_v4 = vld [vmem:[%s18678_s7 + $0x308] sm:$0xff]  ;;  %v10144_v57 = vld [vmem:[%s18678_s7 + $0x210] sm:$0xff]  ;;  %v10269_v32 = vld [vmem:[%s18678_s7 + $0x5f8] sm:$0xff] }
 0x6c0   :  { %11731 = vmatpush3.msra.mxu1 %v10189_v46  ;;  %v10174_v46 = vld [vmem:[%s18678_s7 + $0x300] sm:$0xff]  ;;  %v10159_v3 = vld [vmem:[%s18678_s7 + $0x288] sm:$0xff]  ;;  %vm10915_vm6 = vcmask 1040384  }
 0x6c1   :  { %v10063_v9 = vsel %vm10031_vm2, %v9531_v60, %v10047_v37  ;;  %11732 = vmatprep.subr.mxu1 %v10204_v42  ;;  %v10190_v60 = vld [vmem:[%s18678_s7 + $0x380] sm:$0xff]  ;;  %v10143_v42 = vld [vmem:[%s18678_s7 + $0x208] sm:$0xff]  ;;  %vm12455_vm2 = vmmov 0  }
 0x6c2   :  { %10398 = vmatprep.mubr.f32.mxu0 %v10063_v9  ;;  %11733 = vmatpush3.msra.mxu1 %v10188_v50  ;;  %v10158_v37 = vld [vmem:[%s18678_s7 + $0x280] sm:$0xff] }
 0x6c3   :  { %10399 = vmatmul.mubr.f32.vlgmr.msra.gmra.mxu0 %v10062_v54  ;;  %11734 = vmatprep.subr.mxu1 %v10203_v40  ;;  %v10142_v50 = vld [vmem:[%s18678_s7 + $0x200] sm:$0xff]  ;;  %v10237_v40 = vld [vmem:[%s18678_s7 + $0x4f8] sm:$0xff] }
 0x6c4   :  { %11696 = vmatpush3.msra.mxu0 %v10157_v20  ;;  %11735 = vmatpush3.msra.mxu1 %v10187_v55 }
 0x6c5   :  { %11697 = vmatprep.subr.mxu0 %v10172_v5  ;;  %11736 = vmatprep.subr.mxu1 %v10202_v19 }
 0x6c6   :  { %11698 = vmatpush3.msra.mxu0 %v10156_v31  ;;  %11737 = vmatpush3.msra.mxu1 %v10186_v12  ;;  %v10221_v12 = vld [vmem:[%s18678_s7 + $0x478] sm:$0xff] }
 0x6c7   :  { %11699 = vmatprep.subr.mxu0 %v10171_v28  ;;  %11738 = vmatprep.subr.mxu1 %v10201_v48 }
 0x6c8   :  { %11700 = vmatpush3.msra.mxu0 %v10155_v62  ;;  %11739 = vmatpush3.msra.mxu1 %v10185_v30  ;;  %v10236_v62 = vld [vmem:[%s18678_s7 + $0x4f0] sm:$0xff] }
 0x6c9   :  { %11701 = vmatprep.subr.mxu0 %v10170_v18  ;;  %11740 = vmatprep.subr.mxu1 %v10200_v61  ;;  %v10220_v18 = vld [vmem:[%s18678_s7 + $0x470] sm:$0xff] }
 0x6ca   :  { %11702 = vmatpush3.msra.mxu0 %v10154_v16  ;;  %11741 = vmatpush3.msra.mxu1 %v10184_v34  ;;  %v10235_v16 = vld [vmem:[%s18678_s7 + $0x4e8] sm:$0xff] }
 0x6cb   :  { %11703 = vmatprep.subr.mxu0 %v10169_v41  ;;  %11742 = vmatprep.subr.mxu1 %v10199_v29  ;;  %v10219_v41 = vld [vmem:[%s18678_s7 + $0x468] sm:$0xff] }
 0x6cc   :  { %11704 = vmatpush3.msra.mxu0 %v10153_v44  ;;  %11743 = vmatpush3.msra.mxu1 %v10183_v15  ;;  %v10234_v44 = vld [vmem:[%s18678_s7 + $0x4e0] sm:$0xff] }
 0x6cd   :  { %11705 = vmatprep.subr.mxu0 %v10168_v39  ;;  %11744 = vmatprep.subr.mxu1 %v10198_v2  ;;  %v10218_v39 = vld [vmem:[%s18678_s7 + $0x460] sm:$0xff]  ;;  %v10233_v2 = vld [vmem:[%s18678_s7 + $0x4d8] sm:$0xff] }
 0x6ce   :  { %11706 = vmatpush3.msra.mxu0 %v10152_v47  ;;  %11745 = vmatpush3.msra.mxu1 %v10182_v24  ;;  %v10253_v24 = vld [vmem:[%s18678_s7 + $0x578] sm:$0xff] }
 0x6cf   :  { %11707 = vmatprep.subr.mxu0 %v10167_v7  ;;  %11746 = vmatprep.subr.mxu1 %v10197_v43  ;;  %v10217_v7 = vld [vmem:[%s18678_s7 + $0x458] sm:$0xff] }
 0x6d0   :  { %11708 = vmatpush3.msra.mxu0 %v10151_v11  ;;  %11747 = vmatpush3.msra.mxu1 %v10181_v25  ;;  %v10268_v11 = vld [vmem:[%s18678_s7 + $0x5f0] sm:$0xff] }
 0x6d1   :  { %11709 = vmatprep.subr.mxu0 %v10166_v26  ;;  %11748 = vmatprep.subr.mxu1 %v10196_v23  ;;  %v10232_v25 = vld [vmem:[%s18678_s7 + $0x4d0] sm:$0xff] }
 0x6d2   :  { %11710 = vmatpush3.msra.mxu0 %v10150_v33  ;;  %11749 = vmatpush3.msra.mxu1 %v10180_v14  ;;  %v10252_v26 = vld [vmem:[%s18678_s7 + $0x570] sm:$0xff]  ;;  %v10267_v33 = vld [vmem:[%s18678_s7 + $0x5e8] sm:$0xff] }
 0x6d3   :  { %11711 = vmatprep.subr.mxu0 %v10165_v59  ;;  %11750 = vmatprep.subr.mxu1 %v10195_v27  ;;  %v10216_v23 = vld [vmem:[%s18678_s7 + $0x450] sm:$0xff]  ;;  %v10231_v14 = vld [vmem:[%s18678_s7 + $0x4c8] sm:$0xff] }
 0x6d4   :  { %11712 = vmatpush3.msra.mxu0 %v10149_v6  ;;  %11751 = vmatpush3.msra.mxu1 %v10179_v10  ;;  %v10251_v59 = vld [vmem:[%s18678_s7 + $0x568] sm:$0xff]  ;;  %v10266_v6 = vld [vmem:[%s18678_s7 + $0x5e0] sm:$0xff] }
 0x6d5   :  { %11713 = vmatprep.subr.mxu0 %v10164_v21  ;;  %11752 = vmatprep.subr.mxu1 %v10194_v49  ;;  %v10215_v27 = vld [vmem:[%s18678_s7 + $0x448] sm:$0xff]  ;;  %v10230_v10 = vld [vmem:[%s18678_s7 + $0x4c0] sm:$0xff] }
 0x6d6   :  { %11714 = vmatpush3.msra.mxu0 %v10148_v1  ;;  %11753 = vmatpush3.msra.mxu1 %v10178_v17  ;;  %v10250_v21 = vld [vmem:[%s18678_s7 + $0x560] sm:$0xff]  ;;  %v10265_v1 = vld [vmem:[%s18678_s7 + $0x5d8] sm:$0xff] }
 0x6d7   :  { %11715 = vmatprep.subr.mxu0 %v10163_v35  ;;  %11754 = vmatprep.subr.mxu1 %v10193_v13  ;;  %v10214_v49 = vld [vmem:[%s18678_s7 + $0x440] sm:$0xff]  ;;  %v10229_v17 = vld [vmem:[%s18678_s7 + $0x4b8] sm:$0xff] }
 0x6d8   :  { %11716 = vmatpush3.msra.mxu0 %v10147_v52  ;;  %11755 = vmatpush3.msra.mxu1 %v10177_v0  ;;  %v10249_v35 = vld [vmem:[%s18678_s7 + $0x558] sm:$0xff]  ;;  %v10264_v52 = vld [vmem:[%s18678_s7 + $0x5d0] sm:$0xff] }
 0x6d9   :  { %11717 = vmatprep.subr.mxu0 %v10162_v58  ;;  %11756 = vmatprep.subr.mxu1 %v10192_v63  ;;  %v10213_v13 = vld [vmem:[%s18678_s7 + $0x438] sm:$0xff]  ;;  %v10228_v0 = vld [vmem:[%s18678_s7 + $0x4b0] sm:$0xff] }
 0x6da   :  { %11718 = vmatpush3.msra.mxu0 %v10146_v53  ;;  %11757 = vmatpush3.msra.mxu1 %v10176_v56  ;;  %v10248_v58 = vld [vmem:[%s18678_s7 + $0x550] sm:$0xff]  ;;  %v10263_v53 = vld [vmem:[%s18678_s7 + $0x5c8] sm:$0xff] }
 0x6db   :  { %11719 = vmatprep.subr.mxu0 %v10161_v51  ;;  %11758 = vmatprep.subr.mxu1 %v10191_v38  ;;  %v10212_v63 = vld [vmem:[%s18678_s7 + $0x430] sm:$0xff]  ;;  %v10227_v56 = vld [vmem:[%s18678_s7 + $0x4a8] sm:$0xff] }
 0x6dc   :  { %11720 = vmatpush3.msra.mxu0 %v10145_v36  ;;  %11759 = vmatpush3.msra.mxu1 %v10175_v4  ;;  %v10247_v51 = vld [vmem:[%s18678_s7 + $0x548] sm:$0xff]  ;;  %v10262_v36 = vld [vmem:[%s18678_s7 + $0x5c0] sm:$0xff] }
 0x6dd   :  { %11721 = vmatprep.subr.mxu0 %v10160_v45  ;;  %11760 = vmatprep.subr.mxu1 %v10190_v60  ;;  %v10211_v38 = vld [vmem:[%s18678_s7 + $0x428] sm:$0xff]  ;;  %v10226_v4 = vld [vmem:[%s18678_s7 + $0x4a0] sm:$0xff] }
 0x6de   :  { %11722 = vmatpush3.msra.mxu0 %v10144_v57  ;;  %11761 = vmatpush3.msra.mxu1 %v10174_v46  ;;  %v10246_v45 = vld [vmem:[%s18678_s7 + $0x540] sm:$0xff]  ;;  %v10261_v57 = vld [vmem:[%s18678_s7 + $0x5b8] sm:$0xff] }
 0x6df   :  { %11723 = vmatprep.subr.mxu0 %v10159_v3  ;;  %11800 = vmatprep.subr.mxu1 %v10269_v32  ;;  %v10210_v60 = vld [vmem:[%s18678_s7 + $0x420] sm:$0xff]  ;;  %v10225_v46 = vld [vmem:[%s18678_s7 + $0x498] sm:$0xff] }
 0x6e0   :  { %11724 = vmatpush3.msra.mxu0 %v10143_v42  ;;  %v10245_v3 = vld [vmem:[%s18678_s7 + $0x538] sm:$0xff]  ;;  %v10260_v42 = vld [vmem:[%s18678_s7 + $0x5b0] sm:$0xff] }
 0x6e1   :  { %11725 = vmatprep.subr.mxu0 %v10158_v37  ;;  %v10209_v32 = vld [vmem:[%s18678_s7 + $0x418] sm:$0xff]  ;;  %v10224_v37 = vld [vmem:[%s18678_s7 + $0x490] sm:$0xff] }
 0x6e2   :  { %11726 = vmatpush3.msra.mxu0 %v10142_v50  ;;  %v10244_v50 = vld [vmem:[%s18678_s7 + $0x530] sm:$0xff] }
 0x6e3   :  { %11765 = vmatprep.subr.mxu0 %v10237_v40  ;;  %v10208_v40 = vld [vmem:[%s18678_s7 + $0x410] sm:$0xff] }
 0x6ef   :  { %v9670_v9 = vpop.f32.mrf.mxu0 }
 0x6f0   :  { %v9671_v20 = vadd.f32 %v9670_v9, %v17918_v8  ;;  %v10259_v9 = vld [vmem:[%s18678_s7 + $0x5a8] sm:$0xff] }
 0x6f1   :  { %v9672_v55 = vpop.f32.mrf.mxu0 }
 0x6f2   :  { %v9673_v54 = vadd.f32 %v9672_v55, %v17918_v8  ;;  %v10050_v5 = vmul.f32 0.01, %v9671_v20  ;;  %vm10034_vm0 = vcmp.gt.f32.partialorder %v9671_v20, 0.0  ;;  %v10243_v55 = vld [vmem:[%s18678_s7 + $0x528] sm:$0xff] }
 0x6f4   :  { %v10051_v19 = vmul.f32 0.01, %v9673_v54  ;;  %vm10035_vm15 = vcmp.gt.f32.partialorder %v9673_v54, 0.0  ;;  %v10066_v48 = vsel %vm10034_vm0, %v9671_v20, %v10050_v5  ;;  %v10223_v20 = vld [vmem:[%s18678_s7 + $0x488] sm:$0xff]  ;;  %v10258_v5 = vld [vmem:[%s18678_s7 + $0x5a0] sm:$0xff] }
 0x6f6   :  { %v10067_v31 = vsel %vm10035_vm15, %v9673_v54, %v10051_v19  ;;  %v10207_v54 = vld [vmem:[%s18678_s7 + $0x408] sm:$0xff]  ;;  %v10222_v19 = vld [vmem:[%s18678_s7 + $0x480] sm:$0xff]  ;;  %vm11045_vm15 = vcmask 818176  }
 0x6f7   :  { %10538 = vmatprep.mubr.f32.mxu0 %v10067_v31  ;;  %v10242_v31 = vld [vmem:[%s18678_s7 + $0x520] sm:$0xff] }
 0x6f8   :  { %v9741_v28 = vpop.f32.mrf.mxu1  ;;  %10539 = vmatmul.mubr.f32.vlgmr.msra.gmra.mxu0 %v10066_v48  ;;  %v10301_v48 = vld [vmem:[%s18678_s7 + $0x6f8] sm:$0xff] }
 0x6f9   :  { %v9742_v30 = vadd.f32 %v9741_v28, %v17918_v8  ;;  %11766 = vmatpush3.msra.mxu0 %v10221_v12  ;;  %v10206_v12 = vld [vmem:[%s18678_s7 + $0x400] sm:$0xff]  ;;  %v10257_v28 = vld [vmem:[%s18678_s7 + $0x598] sm:$0xff] }
 0x6fa   :  { %v9743_v61 = vpop.f32.mrf.mxu1  ;;  %11767 = vmatprep.subr.mxu0 %v10236_v62  ;;  %v10241_v62 = vld [vmem:[%s18678_s7 + $0x518] sm:$0xff] }
 0x6fb   :  { %v9744_v34 = vadd.f32 %v9743_v61, %v17918_v8  ;;  %v10052_v29 = vmul.f32 0.01, %v9742_v30  ;;  %11768 = vmatpush3.msra.mxu0 %v10220_v18  ;;  %vm10036_vm3 = vcmp.gt.f32.partialorder %v9742_v30, 0.0  ;;  %v10240_v18 = vld [vmem:[%s18678_s7 + $0x510] sm:$0xff]  ;;  %v10255_v61 = vld [vmem:[%s18678_s7 + $0x588] sm:$0xff] }
 0x6fc   :  { %11769 = vmatprep.subr.mxu0 %v10235_v16  ;;  %v10239_v16 = vld [vmem:[%s18678_s7 + $0x508] sm:$0xff] }
 0x6fd   :  { %v10053_v15 = vmul.f32 0.01, %v9744_v34  ;;  %vm10037_vm14 = vcmp.gt.f32.partialorder %v9744_v34, 0.0  ;;  %11770 = vmatpush3.msra.mxu0 %v10219_v41  ;;  %v10068_v43 = vsel %vm10036_vm3, %v9742_v30, %v10052_v29  ;;  %v10256_v30 = vld [vmem:[%s18678_s7 + $0x590] sm:$0xff]  ;;  %v10238_v41 = vld [vmem:[%s18678_s7 + $0x500] sm:$0xff]  ;;  %v10333_v29 = vld [vmem:[%s18678_s7 + $0x7f8] sm:$0xff] }
 0x6fe   :  { %11771 = vmatprep.subr.mxu0 %v10234_v44  ;;  %vm11123_vm3 = vcmask 74752  }
 0x6ff   :  { %v10069_v47 = vsel %vm10037_vm14, %v9744_v34, %v10053_v15  ;;  %11772 = vmatpush3.msra.mxu0 %v10218_v39  ;;  %v10254_v34 = vld [vmem:[%s18678_s7 + $0x580] sm:$0xff] }
 0x700   :  { %10608 = vmatprep.mubr.f32.mxu1 %v10069_v47  ;;  %11773 = vmatprep.subr.mxu0 %v10233_v2 }
 0x701   :  { %10609 = vmatmul.mubr.f32.vlgmr.msra.gmra.mxu1 %v10068_v43  ;;  %11774 = vmatpush3.msra.mxu0 %v10217_v7  ;;  %v10285_v43 = vld [vmem:[%s18678_s7 + $0x678] sm:$0xff] }
 0x702   :  { %11801 = vmatpush3.msra.mxu1 %v10253_v24  ;;  %11775 = vmatprep.subr.mxu0 %v10232_v25 }
 0x703   :  { %11802 = vmatprep.subr.mxu1 %v10268_v11  ;;  %11776 = vmatpush3.msra.mxu0 %v10216_v23 }
 0x704   :  { %11803 = vmatpush3.msra.mxu1 %v10252_v26  ;;  %11777 = vmatprep.subr.mxu0 %v10231_v14  ;;  %v10300_v26 = vld [vmem:[%s18678_s7 + $0x6f0] sm:$0xff] }
 0x705   :  { %11804 = vmatprep.subr.mxu1 %v10267_v33  ;;  %11778 = vmatpush3.msra.mxu0 %v10215_v27  ;;  %v10284_v33 = vld [vmem:[%s18678_s7 + $0x670] sm:$0xff] }
 0x706   :  { %11805 = vmatpush3.msra.mxu1 %v10251_v59  ;;  %11779 = vmatprep.subr.mxu0 %v10230_v10  ;;  %v10299_v59 = vld [vmem:[%s18678_s7 + $0x6e8] sm:$0xff] }
 0x707   :  { %11806 = vmatprep.subr.mxu1 %v10266_v6  ;;  %11780 = vmatpush3.msra.mxu0 %v10214_v49  ;;  %v10283_v6 = vld [vmem:[%s18678_s7 + $0x668] sm:$0xff] }
 0x708   :  { %11807 = vmatpush3.msra.mxu1 %v10250_v21  ;;  %11781 = vmatprep.subr.mxu0 %v10229_v17  ;;  %v10298_v21 = vld [vmem:[%s18678_s7 + $0x6e0] sm:$0xff]  ;;  %v10297_v17 = vld [vmem:[%s18678_s7 + $0x6d8] sm:$0xff] }
 0x709   :  { %11808 = vmatprep.subr.mxu1 %v10265_v1  ;;  %11782 = vmatpush3.msra.mxu0 %v10213_v13  ;;  %v10282_v1 = vld [vmem:[%s18678_s7 + $0x660] sm:$0xff]  ;;  %v10317_v13 = vld [vmem:[%s18678_s7 + $0x778] sm:$0xff] }
 0x70a   :  { %11809 = vmatpush3.msra.mxu1 %v10249_v35  ;;  %11783 = vmatprep.subr.mxu0 %v10228_v0 }
 0x70b   :  { %11810 = vmatprep.subr.mxu1 %v10264_v52  ;;  %11784 = vmatpush3.msra.mxu0 %v10212_v63  ;;  %v10281_v52 = vld [vmem:[%s18678_s7 + $0x658] sm:$0xff]  ;;  %v10296_v63 = vld [vmem:[%s18678_s7 + $0x6d0] sm:$0xff] }
 0x70c   :  { %11811 = vmatpush3.msra.mxu1 %v10248_v58  ;;  %11785 = vmatprep.subr.mxu0 %v10227_v56  ;;  %v10332_v58 = vld [vmem:[%s18678_s7 + $0x7f0] sm:$0xff] }
 0x70d   :  { %11812 = vmatprep.subr.mxu1 %v10263_v53  ;;  %11786 = vmatpush3.msra.mxu0 %v10211_v38  ;;  %v10316_v53 = vld [vmem:[%s18678_s7 + $0x770] sm:$0xff]  ;;  %v10295_v38 = vld [vmem:[%s18678_s7 + $0x6c8] sm:$0xff] }
 0x70e   :  { %11813 = vmatpush3.msra.mxu1 %v10247_v51  ;;  %11787 = vmatprep.subr.mxu0 %v10226_v4  ;;  %v10280_v56 = vld [vmem:[%s18678_s7 + $0x650] sm:$0xff]  ;;  %v10331_v51 = vld [vmem:[%s18678_s7 + $0x7e8] sm:$0xff] }
 0x70f   :  { %11814 = vmatprep.subr.mxu1 %v10262_v36  ;;  %11788 = vmatpush3.msra.mxu0 %v10210_v60  ;;  %v10315_v36 = vld [vmem:[%s18678_s7 + $0x768] sm:$0xff]  ;;  %v10294_v60 = vld [vmem:[%s18678_s7 + $0x6c0] sm:$0xff] }
 0x710   :  { %11815 = vmatpush3.msra.mxu1 %v10246_v45  ;;  %11789 = vmatprep.subr.mxu0 %v10225_v46  ;;  %v10279_v4 = vld [vmem:[%s18678_s7 + $0x648] sm:$0xff]  ;;  %v10330_v45 = vld [vmem:[%s18678_s7 + $0x7e0] sm:$0xff] }
 0x711   :  { %11816 = vmatprep.subr.mxu1 %v10261_v57  ;;  %11790 = vmatpush3.msra.mxu0 %v10209_v32  ;;  %v10314_v57 = vld [vmem:[%s18678_s7 + $0x760] sm:$0xff]  ;;  %v10293_v32 = vld [vmem:[%s18678_s7 + $0x6b8] sm:$0xff] }
 0x712   :  { %11817 = vmatpush3.msra.mxu1 %v10245_v3  ;;  %11791 = vmatprep.subr.mxu0 %v10224_v37  ;;  %v10278_v46 = vld [vmem:[%s18678_s7 + $0x640] sm:$0xff]  ;;  %v10329_v3 = vld [vmem:[%s18678_s7 + $0x7d8] sm:$0xff] }
 0x713   :  { %11818 = vmatprep.subr.mxu1 %v10260_v42  ;;  %11792 = vmatpush3.msra.mxu0 %v10208_v40  ;;  %v10313_v42 = vld [vmem:[%s18678_s7 + $0x758] sm:$0xff]  ;;  %v10292_v40 = vld [vmem:[%s18678_s7 + $0x6b0] sm:$0xff] }
 0x714   :  { %11819 = vmatpush3.msra.mxu1 %v10244_v50  ;;  %11793 = vmatprep.subr.mxu0 %v10223_v20  ;;  %v10277_v37 = vld [vmem:[%s18678_s7 + $0x638] sm:$0xff]  ;;  %v10328_v50 = vld [vmem:[%s18678_s7 + $0x7d0] sm:$0xff] }
 0x715   :  { %11820 = vmatprep.subr.mxu1 %v10259_v9  ;;  %11794 = vmatpush3.msra.mxu0 %v10207_v54  ;;  %v10312_v9 = vld [vmem:[%s18678_s7 + $0x750] sm:$0xff]  ;;  %v10291_v54 = vld [vmem:[%s18678_s7 + $0x6a8] sm:$0xff] }
 0x716   :  { %11821 = vmatpush3.msra.mxu1 %v10243_v55  ;;  %11795 = vmatprep.subr.mxu0 %v10222_v19  ;;  %v10276_v20 = vld [vmem:[%s18678_s7 + $0x630] sm:$0xff]  ;;  %v10327_v55 = vld [vmem:[%s18678_s7 + $0x7c8] sm:$0xff] }
 0x717   :  { %11822 = vmatprep.subr.mxu1 %v10258_v5  ;;  %11796 = vmatpush3.msra.mxu0 %v10206_v12  ;;  %v10311_v5 = vld [vmem:[%s18678_s7 + $0x748] sm:$0xff]  ;;  %v10290_v12 = vld [vmem:[%s18678_s7 + $0x6a0] sm:$0xff] }
 0x718   :  { %11823 = vmatpush3.msra.mxu1 %v10242_v31  ;;  %11835 = vmatprep.subr.mxu0 %v10301_v48  ;;  %v10275_v19 = vld [vmem:[%s18678_s7 + $0x628] sm:$0xff]  ;;  %v10326_v31 = vld [vmem:[%s18678_s7 + $0x7c0] sm:$0xff] }
 0x719   :  { %11824 = vmatprep.subr.mxu1 %v10257_v28  ;;  %v10310_v28 = vld [vmem:[%s18678_s7 + $0x740] sm:$0xff] }
 0x71a   :  { %11825 = vmatpush3.msra.mxu1 %v10241_v62  ;;  %v10274_v48 = vld [vmem:[%s18678_s7 + $0x620] sm:$0xff]  ;;  %v10325_v62 = vld [vmem:[%s18678_s7 + $0x7b8] sm:$0xff] }
 0x71b   :  { %11826 = vmatprep.subr.mxu1 %v10256_v30  ;;  %v10289_v30 = vld [vmem:[%s18678_s7 + $0x698] sm:$0xff] }
 0x71c   :  { %11827 = vmatpush3.msra.mxu1 %v10240_v18  ;;  %v10309_v18 = vld [vmem:[%s18678_s7 + $0x738] sm:$0xff] }
 0x71d   :  { %11828 = vmatprep.subr.mxu1 %v10255_v61  ;;  %v10273_v61 = vld [vmem:[%s18678_s7 + $0x618] sm:$0xff] }
 0x71e   :  { %11829 = vmatpush3.msra.mxu1 %v10239_v16  ;;  %v10324_v16 = vld [vmem:[%s18678_s7 + $0x7b0] sm:$0xff] }
 0x71f   :  { %11830 = vmatprep.subr.mxu1 %v10254_v34  ;;  %v10288_v34 = vld [vmem:[%s18678_s7 + $0x690] sm:$0xff] }
 0x720   :  { %11831 = vmatpush3.msra.mxu1 %v10238_v41  ;;  %v10308_v41 = vld [vmem:[%s18678_s7 + $0x730] sm:$0xff] }
 0x721   :  { %11870 = vmatprep.subr.mxu1 %v10333_v29  ;;  %v10272_v29 = vld [vmem:[%s18678_s7 + $0x610] sm:$0xff] }
 0x727   :  { %v9812_v44 = vpop.f32.mrf.mxu0 }
 0x728   :  { %v9813_v15 = vadd.f32 %v9812_v44, %v17918_v8  ;;  %v10323_v44 = vld [vmem:[%s18678_s7 + $0x7a8] sm:$0xff] }
 0x729   :  { %v9814_v39 = vpop.f32.mrf.mxu0 }
 0x72a   :  { %v9815_v2 = vadd.f32 %v9814_v39, %v17918_v8  ;;  %v10054_v47 = vmul.f32 0.01, %v9813_v15  ;;  %vm10038_vm13 = vcmp.gt.f32.partialorder %v9813_v15, 0.0 }
 0x72c   :  { %v10055_v24 = vmul.f32 0.01, %v9815_v2  ;;  %vm10039_vm7 = vcmp.gt.f32.partialorder %v9815_v2, 0.0  ;;  %v10070_v25 = vsel %vm10038_vm13, %v9813_v15, %v10054_v47  ;;  %v10287_v15 = vld [vmem:[%s18678_s7 + $0x688] sm:$0xff] }
 0x72d   :  { %v10271_v47 = vld [vmem:[%s18678_s7 + $0x608] sm:$0xff] }
 0x72e   :  { %v10071_v7 = vsel %vm10039_vm7, %v9815_v2, %v10055_v24  ;;  %v10307_v2 = vld [vmem:[%s18678_s7 + $0x728] sm:$0xff] }
 0x72f   :  { %10678 = vmatprep.mubr.f32.mxu0 %v10071_v7  ;;  %v10322_v7 = vld [vmem:[%s18678_s7 + $0x7a0] sm:$0xff] }
 0x730   :  { %v9883_v11 = vpop.f32.mrf.mxu1  ;;  %10679 = vmatmul.mubr.f32.vlgmr.msra.gmra.mxu0 %v10070_v25 }
 0x731   :  { %v9884_v23 = vadd.f32 %v9883_v11, %v17918_v8  ;;  %11836 = vmatpush3.msra.mxu0 %v10285_v43  ;;  %v10286_v43 = vld [vmem:[%s18678_s7 + $0x680] sm:$0xff] }
 0x732   :  { %v9885_v14 = vpop.f32.mrf.mxu1  ;;  %11837 = vmatprep.subr.mxu0 %v10300_v26  ;;  %v10306_v26 = vld [vmem:[%s18678_s7 + $0x720] sm:$0xff] }
 0x733   :  { %v9886_v27 = vadd.f32 %v9885_v14, %v17918_v8  ;;  %v10056_v10 = vmul.f32 0.01, %v9884_v23  ;;  %11838 = vmatpush3.msra.mxu0 %v10284_v33  ;;  %vm10040_vm1 = vcmp.gt.f32.partialorder %v9884_v23, 0.0 }
 0x734   :  { %11839 = vmatprep.subr.mxu0 %v10299_v59  ;;  %v10321_v59 = vld [vmem:[%s18678_s7 + $0x798] sm:$0xff] }
 0x735   :  { %v10057_v49 = vmul.f32 0.01, %v9886_v27  ;;  %vm10041_vm4 = vcmp.gt.f32.partialorder %v9886_v27, 0.0  ;;  %11840 = vmatpush3.msra.mxu0 %v10283_v6  ;;  %v10072_v0 = vsel %vm10040_vm1, %v9884_v23, %v10056_v10  ;;  %v10270_v23 = vld [vmem:[%s18678_s7 + $0x600] sm:$0xff]  ;;  %v10305_v6 = vld [vmem:[%s18678_s7 + $0x718] sm:$0xff] }
 0x736   :  { %11841 = vmatprep.subr.mxu0 %v10298_v21 }
 0x737   :  { %v10073_v35 = vsel %vm10041_vm4, %v9886_v27, %v10057_v49  ;;  %11842 = vmatpush3.msra.mxu0 %v10282_v1  ;;  %v10320_v1 = vld [vmem:[%s18678_s7 + $0x790] sm:$0xff] }
 0x738   :  { %10748 = vmatprep.mubr.f32.mxu1 %v10073_v35  ;;  %11843 = vmatprep.subr.mxu0 %v10297_v17  ;;  %v10304_v35 = vld [vmem:[%s18678_s7 + $0x710] sm:$0xff] }
 0x739   :  { %10749 = vmatmul.mubr.f32.vlgmr.msra.gmra.mxu1 %v10072_v0  ;;  %11844 = vmatpush3.msra.mxu0 %v10281_v52  ;;  %v10303_v0 = vld [vmem:[%s18678_s7 + $0x708] sm:$0xff] }
 0x73a   :  { %11871 = vmatpush3.msra.mxu1 %v10317_v13  ;;  %11845 = vmatprep.subr.mxu0 %v10296_v63  ;;  %v10319_v13 = vld [vmem:[%s18678_s7 + $0x788] sm:$0xff] }
 0x73b   :  { %11872 = vmatprep.subr.mxu1 %v10332_v58  ;;  %11846 = vmatpush3.msra.mxu0 %v10280_v56  ;;  %v10302_v56 = vld [vmem:[%s18678_s7 + $0x700] sm:$0xff] }
 0x73c   :  { %11873 = vmatpush3.msra.mxu1 %v10316_v53  ;;  %11847 = vmatprep.subr.mxu0 %v10295_v38  ;;  %v10318_v53 = vld [vmem:[%s18678_s7 + $0x780] sm:$0xff]  ;;  %v10933_v38 = vld [vmem:[%s18679_s8 + $0x78] sm:$0xff] }
 0x73d   :  { %11874 = vmatprep.subr.mxu1 %v10331_v51  ;;  %11848 = vmatpush3.msra.mxu0 %v10279_v4  ;;  %v10931_v4 = vld [vmem:[%s18679_s8 + $0x68] sm:$0xff] }
 0x73e   :  { %11875 = vmatpush3.msra.mxu1 %v10315_v36  ;;  %11849 = vmatprep.subr.mxu0 %v10294_v60  ;;  %v10932_v36 = vld [vmem:[%s18679_s8 + $0x70] sm:$0xff]  ;;  %v10929_v60 = vld [vmem:[%s18679_s8 + $0x58] sm:$0xff] }
 0x73f   :  { %11876 = vmatprep.subr.mxu1 %v10330_v45  ;;  %11850 = vmatpush3.msra.mxu0 %v10278_v46  ;;  %v10930_v45 = vld [vmem:[%s18679_s8 + $0x60] sm:$0xff]  ;;  %v10927_v46 = vld [vmem:[%s18679_s8 + $0x48] sm:$0xff] }
 0x740   :  { %11877 = vmatpush3.msra.mxu1 %v10314_v57  ;;  %11851 = vmatprep.subr.mxu0 %v10293_v32  ;;  %v10928_v57 = vld [vmem:[%s18679_s8 + $0x50] sm:$0xff]  ;;  %v10925_v32 = vld [vmem:[%s18679_s8 + $0x38] sm:$0xff] }
 0x741   :  { %11878 = vmatprep.subr.mxu1 %v10329_v3  ;;  %11852 = vmatpush3.msra.mxu0 %v10277_v37  ;;  %v10926_v3 = vld [vmem:[%s18679_s8 + $0x40] sm:$0xff]  ;;  %v10923_v37 = vld [vmem:[%s18679_s8 + $0x28] sm:$0xff] }
 0x742   :  { %11879 = vmatpush3.msra.mxu1 %v10313_v42  ;;  %11853 = vmatprep.subr.mxu0 %v10292_v40  ;;  %v10924_v42 = vld [vmem:[%s18679_s8 + $0x30] sm:$0xff]  ;;  %v10921_v40 = vld [vmem:[%s18679_s8 + $0x18] sm:$0xff] }
 0x743   :  { %11880 = vmatprep.subr.mxu1 %v10328_v50  ;;  %11854 = vmatpush3.msra.mxu0 %v10276_v20  ;;  %v10922_v50 = vld [vmem:[%s18679_s8 + $0x20] sm:$0xff]  ;;  %v10919_v20 = vld [vmem:[%s18679_s8 + $0x8] sm:$0xff] }
 0x744   :  { %11881 = vmatpush3.msra.mxu1 %v10312_v9  ;;  %11855 = vmatprep.subr.mxu0 %v10291_v54  ;;  %v10920_v9 = vld [vmem:[%s18679_s8 + $0x10] sm:$0xff]  ;;  %v10941_v54 = vld [vmem:[%s18679_s8 + $0xb8] sm:$0xff] }
 0x745   :  { %11882 = vmatprep.subr.mxu1 %v10327_v55  ;;  %11856 = vmatpush3.msra.mxu0 %v10275_v19  ;;  %v10918_v55 = vld [vmem:[%s18679_s8] sm:$0xff]  ;;  %v10939_v19 = vld [vmem:[%s18679_s8 + $0xa8] sm:$0xff] }
 0x746   :  { %11883 = vmatpush3.msra.mxu1 %v10311_v5  ;;  %11857 = vmatprep.subr.mxu0 %v10290_v12  ;;  %v10940_v5 = vld [vmem:[%s18679_s8 + $0xb0] sm:$0xff]  ;;  %v10937_v12 = vld [vmem:[%s18679_s8 + $0x98] sm:$0xff] }
 0x747   :  { %11884 = vmatprep.subr.mxu1 %v10326_v31  ;;  %11858 = vmatpush3.msra.mxu0 %v10274_v48  ;;  %v10938_v31 = vld [vmem:[%s18679_s8 + $0xa0] sm:$0xff] }
 0x748   :  { %11885 = vmatpush3.msra.mxu1 %v10310_v28  ;;  %11859 = vmatprep.subr.mxu0 %v10289_v30 }
 0x749   :  { %11886 = vmatprep.subr.mxu1 %v10325_v62  ;;  %11860 = vmatpush3.msra.mxu0 %v10273_v61 }
 0x74a   :  { %11887 = vmatpush3.msra.mxu1 %v10309_v18  ;;  %11861 = vmatprep.subr.mxu0 %v10288_v34 }
 0x74b   :  { %11888 = vmatprep.subr.mxu1 %v10324_v16  ;;  %11862 = vmatpush3.msra.mxu0 %v10272_v29 }
 0x74c   :  { %v10025_v39 = vpop.f32.mrf.mxu1  ;;  %11889 = vmatpush3.msra.mxu1 %v10308_v41  ;;  %11863 = vmatprep.subr.mxu0 %v10287_v15 }
 0x74d   :  { %v9954_v24 = vpop.f32.mrf.mxu0  ;;  %11890 = vmatprep.subr.mxu1 %v10323_v44  ;;  %11864 = vmatpush3.msra.mxu0 %v10271_v47  ;;  %v10026_v10 = vadd.f32 %v10025_v39, %v17918_v8 }
 0x74e   :  { %v9955_v11 = vadd.f32 %v9954_v24, %v17918_v8  ;;  %v10027_v25 = vpop.f32.mrf.mxu1  ;;  %11891 = vmatpush3.msra.mxu1 %v10307_v2  ;;  %11865 = vmatprep.subr.mxu0 %v10286_v43 }
 0x74f   :  { %v10028_v33 = vadd.f32 %v10027_v25, %v17918_v8  ;;  %v9956_v14 = vpop.f32.mrf.mxu0  ;;  %11892 = vmatprep.subr.mxu1 %v10322_v7  ;;  %11866 = vmatpush3.msra.mxu0 %v10270_v23  ;;  %v10060_v58 = vmul.f32 0.01, %v10026_v10  ;;  %vm10044_vm5 = vcmp.gt.f32.partialorder %v10026_v10, 0.0  ;;  %v10936_v23 = vld [vmem:[%s18679_s8 + $0x90] sm:$0xff] }
 0x750   :  { %v9957_v27 = vadd.f32 %v9956_v14, %v17918_v8  ;;  %v10058_v21 = vmul.f32 0.01, %v9955_v11  ;;  %11893 = vmatpush3.msra.mxu1 %v10306_v26  ;;  %vm10042_vm12 = vcmp.gt.f32.partialorder %v9955_v11, 0.0  ;;  %10952 = vmatprep.subr.mxu0 %v19013_v22  ;;  %v10935_v14 = vld [vmem:[%s18679_s8 + $0x88] sm:$0xff] }
 0x751   :  { %v10061_v49 = vmul.f32 0.01, %v10028_v33  ;;  %vm10045_vm9 = vcmp.gt.f32.partialorder %v10028_v33, 0.0  ;;  %11894 = vmatprep.subr.mxu1 %v10321_v59  ;;  %v10076_v51 = vsel %vm10044_vm5, %v10026_v10, %v10060_v58 }
 0x752   :  { %v10059_v17 = vmul.f32 0.01, %v9957_v27  ;;  %vm10043_vm10 = vcmp.gt.f32.partialorder %v9957_v27, 0.0  ;;  %11895 = vmatpush3.msra.mxu1 %v10305_v6  ;;  %v10074_v63 = vsel %vm10042_vm12, %v9955_v11, %v10058_v21  ;;  %v10934_v6 = vld [vmem:[%s18679_s8 + $0x80] sm:$0xff] }
 0x753   :  { %v10077_v8 = vsel %vm10045_vm9, %v10028_v33, %v10061_v49  ;;  %11896 = vmatprep.subr.mxu1 %v10320_v1  ;;  %v11037_v1 = vld [vmem:[%s18681_s10 + $0x60] sm:$0xf] }
 0x754   :  { %10888 = vmatprep.mubr.f32.mxu1 %v10077_v8  ;;  %v10075_v52 = vsel %vm10043_vm10, %v9957_v27, %v10059_v17  ;;  %11897 = vmatpush3.msra.mxu1 %v10304_v35  ;;  %v11036_v17 = vld [vmem:[%s18681_s10 + $0x58] sm:$0xff] }
 0x755   :  { %10818 = vmatprep.mubr.f32.mxu0 %v10075_v52  ;;  %11898 = vmatprep.subr.mxu1 %v10319_v13  ;;  %v11035_v13 = vld [vmem:[%s18681_s10 + $0x50] sm:$0xff] }
 0x756   :  { %10819 = vmatmul.mubr.f32.vlgmr.msra.gmra.mxu0 %v10074_v63  ;;  %11899 = vmatpush3.msra.mxu1 %v10303_v0  ;;  %v11034_v0 = vld [vmem:[%s18681_s10 + $0x48] sm:$0xff]  ;;  %v11033_v63 = vld [vmem:[%s18681_s10 + $0x40] sm:$0xff] }
 0x757   :  { %11900 = vmatprep.subr.mxu1 %v10318_v53  ;;  %10953 = vmatpush1.msra.mxu0 %v10933_v38  ;;  %v11031_v38 = vld [vmem:[%s18681_s10 + $0x30] sm:$0xff] }
 0x758   :  { %11901 = vmatpush3.msra.mxu1 %v10302_v56  ;;  %10954 = vmatprep.subr.mxu0 %v19013_v22  ;;  %v11032_v56 = vld [vmem:[%s18681_s10 + $0x38] sm:$0xff] }
 0x759   :  { %10889 = vmatmul.mubr.f32.vlgmr.msra.gmra.mxu1 %v10076_v51  ;;  %11919 = vmatprep.subr.mxu1 %v19013_v22 }
 0x75a   :  { %10955 = vmatpush1.msra.mxu0 %v10932_v36  ;;  %11920 = vmatpush3.msk.msra.mxu1 %vm11049_vm11, %v11037_v1  ;;  %v11030_v36 = vld [vmem:[%s18681_s10 + $0x28] sm:$0xff] }
 0x75b   :  { %10956 = vmatprep.subr.mxu0 %v19013_v22  ;;  %11921 = vmatprep.subr.mxu1 %v19013_v22 }
 0x75c   :  { %10957 = vmatpush1.msra.mxu0 %v10931_v4  ;;  %11922 = vmatpush3.msra.mxu1 %v11036_v17  ;;  %v11029_v4 = vld [vmem:[%s18681_s10 + $0x20] sm:$0xff] }
 0x75d   :  { %10958 = vmatprep.subr.mxu0 %v19013_v22  ;;  %11923 = vmatprep.subr.mxu1 %v19013_v22 }
 0x75e   :  { %10959 = vmatpush1.msra.mxu0 %v10930_v45  ;;  %11924 = vmatpush3.msra.mxu1 %v11035_v13  ;;  %v11028_v45 = vld [vmem:[%s18681_s10 + $0x18] sm:$0xff] }
 0x75f   :  { %10960 = vmatprep.subr.mxu0 %v19013_v22  ;;  %11925 = vmatprep.subr.mxu1 %v19013_v22 }
 0x760   :  { %10961 = vmatpush1.msra.mxu0 %v10929_v60  ;;  %11926 = vmatpush3.msra.mxu1 %v11034_v0 }
 0x761   :  { %10962 = vmatprep.subr.mxu0 %v19013_v22  ;;  %11927 = vmatprep.subr.mxu1 %v19013_v22 }
 0x762   :  { %10963 = vmatpush1.msra.mxu0 %v10928_v57  ;;  %11928 = vmatpush3.msra.mxu1 %v11033_v63 }
 0x763   :  { %10964 = vmatprep.subr.mxu0 %v19013_v22  ;;  %11929 = vmatprep.subr.mxu1 %v19013_v22 }
 0x764   :  { %10965 = vmatpush1.msra.mxu0 %v10927_v46  ;;  %11930 = vmatpush3.msra.mxu1 %v11032_v56 }
 0x765   :  { %10966 = vmatprep.subr.mxu0 %v19013_v22  ;;  %11931 = vmatprep.subr.mxu1 %v19013_v22 }
 0x766   :  { %10967 = vmatpush1.msra.mxu0 %v10926_v3  ;;  %11932 = vmatpush3.msra.mxu1 %v11031_v38 }
 0x767   :  { %10968 = vmatprep.subr.mxu0 %v19013_v22  ;;  %11933 = vmatprep.subr.mxu1 %v19013_v22 }
 0x768   :  { %10969 = vmatpush1.msra.mxu0 %v10925_v32  ;;  %11934 = vmatpush3.msra.mxu1 %v11030_v36 }
 0x769   :  { %10970 = vmatprep.subr.mxu0 %v19013_v22  ;;  %11935 = vmatprep.subr.mxu1 %v19013_v22 }
 0x76a   :  { %10971 = vmatpush1.msra.mxu0 %v10924_v42  ;;  %11936 = vmatpush3.msra.mxu1 %v11029_v4 }
 0x76b   :  { %10972 = vmatprep.subr.mxu0 %v19013_v22  ;;  %11937 = vmatprep.subr.mxu1 %v19013_v22 }
 0x76c   :  { %10973 = vmatpush1.msra.mxu0 %v10923_v37  ;;  %11938 = vmatpush3.msra.mxu1 %v11028_v45 }
 0x76d   :  { %10974 = vmatprep.subr.mxu0 %v19013_v22  ;;  %11939 = vmatprep.subr.mxu1 %v19013_v22 }
 0x76e   :  { %10975 = vmatpush1.msra.mxu0 %v10922_v50  ;;  %11945 = vmatprep.mubr.msk.f32.mxu1 %vm12455_vm2, %v19013_v22 }
 0x76f   :  { %10976 = vmatprep.subr.mxu0 %v19013_v22 }
 0x770   :  { %10977 = vmatpush1.msra.mxu0 %v10921_v40 }
 0x771   :  { %10978 = vmatprep.subr.mxu0 %v19013_v22 }
 0x772   :  { %10979 = vmatpush1.msra.mxu0 %v10920_v9  ;;  %v11027_v9 = vld [vmem:[%s18681_s10 + $0x10] sm:$0xff] }
 0x773   :  { %10980 = vmatprep.subr.mxu0 %v19013_v22  ;;  %11940 = vmatpush3.msra.mxu1 %v11027_v9 }
 0x774   :  { %10981 = vmatpush1.msra.mxu0 %v10919_v20  ;;  %11941 = vmatprep.subr.mxu1 %v19013_v22  ;;  %v11026_v20 = vld [vmem:[%s18681_s10 + $0x8] sm:$0xff] }
 0x775   :  { %10982 = vmatprep.subr.mxu0 %v19013_v22  ;;  %11942 = vmatpush3.msra.mxu1 %v11026_v20 }
 0x776   :  { %10983 = vmatpush1.msra.mxu0 %v10918_v55  ;;  %11943 = vmatprep.subr.mxu1 %v19013_v22  ;;  %v11025_v55 = vld [vmem:[%s18681_s10] sm:$0xff] }
 0x777   :  { %11000 = vmatprep.subr.mxu0 %v19013_v22  ;;  %11944 = vmatpush3.msra.mxu1 %v11025_v55 }
 0x778   :  { %11001 = vmatpush2.msra.mxu0 %v10941_v54  ;;  %v11620_v54 = vld [vmem:[%s18680_s9] ss:$0 sm:$0xff]  ;;  %s12456_s9 = smov [#allocation4]  }
 0x779   :  { %11002 = vmatprep.subr.mxu0 %v19013_v22  ;;  %s11152_s10 = sshll.u32 %s12456_s9, 4  ;;  %s11153_s10 = int_to_ptr.vmem [resolvable:$true] %s11152_s10 }
 0x77a   :  { %11003 = vmatpush2.msra.mxu0 %v10940_v5  ;;  %p12205_p2 = scmp.lt.s32.totalorder %s11153_s10, %s11153_s10 }
 0x77b   :  { %11004 = vmatprep.subr.mxu0 %v19013_v22 }
 0x77c   :  { %11005 = vmatpush2.msra.mxu0 %v10939_v19 }
 0x77d   :  { %11006 = vmatprep.subr.mxu0 %v19013_v22 }
 0x77e   :  { %11007 = vmatpush2.msra.mxu0 %v10938_v31 }
 0x77f   :  { %11008 = vmatprep.subr.mxu0 %v19013_v22  ;;  %v11692_v48 = vpop.f32.mrf.mxu1 }
 0x780   :  { %11009 = vmatpush2.msra.mxu0 %v10937_v12 }
 0x781   :  { %11010 = vmatprep.subr.mxu0 %v19013_v22  ;;  %v11693_v30 = vpop.f32.mrf.mxu1 }
 0x782   :  { %v11694_v15 = vadd.f32 %v11693_v30, %v11692_v48  ;;  %11011 = vmatpush2.msra.mxu0 %v10936_v23  ;;  %v11622_v48 = vld [vmem:[%s18682_s11] ss:$0 sm:$0xff]  ;;  %s12200_s11 = scalar_lea.vmem %s11153_s10, 32 }
 0x783   :  { %v11657_v28 = vpop.f32.mrf.mxu0  ;;  %11012 = vmatprep.subr.mxu0 %v19013_v22  ;;  %p12201_p1 = scmp.ne.s32.totalorder %s11153_s10, %s12200_s11  ;;  %p12206_p3 = scmp.lt.s32.totalorder %s12200_s11, %s12200_s11 }
 0x784   :  { %11013 = vmatpush2.msra.mxu0 %v10935_v14 }
 0x785   :  { %v11658_v62 = vpop.f32.mrf.mxu0  ;;  %11014 = vmatprep.subr.mxu0 %v19013_v22  ;;  %p12207_p4 = por %p12206_p3, %p12205_p2 }
 0x786   :  { %v11659_v29 = vadd.f32 %v11658_v62, %v11657_v28  ;;  %11015 = vmatpush2.msra.mxu0 %v10934_v6 }
 0x787   :  { %p12208_p5 = pnand %p12207_p4, %p12201_p1 }
 0x788   :  { %v10471_v47 = vadd.f32 %v11694_v15, %v11659_v29 }
 0x7b8   :  { %v11727_v18 = vpop.f32.mrf.mxu0 }
 0x7ba   :  { %v11728_v16 = vpop.f32.mrf.mxu0 }
 0x7bb   :  { %v11729_v39 = vadd.f32 %v11728_v16, %v11727_v18 }
 0x7bd   :  { %v10541_v43 = vadd.f32 %v11729_v39, %v10471_v47 }
 0x7c1   :  { %v11762_v61 = vpop.f32.mrf.mxu1 }
 0x7c3   :  { %v11763_v34 = vpop.f32.mrf.mxu1 }
 0x7c4   :  { %v11764_v24 = vadd.f32 %v11763_v34, %v11762_v61 }
 0x7c6   :  { %v10611_v25 = vadd.f32 %v11764_v24, %v10541_v43 }
 0x7f0   :  { %v11797_v41 = vpop.f32.mrf.mxu0 }
 0x7f2   :  { %v11798_v2 = vpop.f32.mrf.mxu0 }
 0x7f3   :  { %v11799_v11 = vadd.f32 %v11798_v2, %v11797_v41 }
 0x7f5   :  { %v10681_v59 = vadd.f32 %v11799_v11, %v10611_v25 }
 0x7f9   :  { %v11832_v44 = vpop.f32.mrf.mxu1 }
 0x7fb   :  { %v11833_v7 = vpop.f32.mrf.mxu1 }
 0x7fc   :  { %v11834_v26 = vadd.f32 %v11833_v7, %v11832_v44 }
 0x7fe   :  { %v10751_v10 = vadd.f32 %v11834_v26, %v10681_v59 }
 0x816   :  { %v11867_v33 = vpop.f32.mrf.mxu0 }
 0x818   :  { %v11868_v27 = vpop.f32.mrf.mxu0 }
 0x819   :  { %v11869_v21 = vadd.f32 %v11868_v27, %v11867_v33  ;;  %v11902_v49 = vpop.f32.mrf.mxu1 }
 0x81b   :  { %v10821_v35 = vadd.f32 %v11869_v21, %v10751_v10  ;;  %v11903_v8 = vpop.f32.mrf.mxu1 }
 0x81c   :  { %v11904_v52 = vadd.f32 %v11903_v8, %v11902_v49 }
 0x81e   :  { %v10891_v58 = vadd.f32 %v11904_v52, %v10821_v35 }
 0x820   :  { %10903 = vrot.lane.b32.xlu1 %v10891_v58, %s12440_s19  ;;  %v10899_v53 = vrot.slane %v10891_v58, 2  ;;  %v10895_v51 = vrot.slane %v10891_v58, 1 }
 0x822   :  { %10907 = vrot.lane.b32.xlu0 %v10899_v53, %s12440_s19 }
 0x824   :  { %10896 = vrot.lane.b32.xlu1 %v10895_v51, %s12440_s19 }
 0x892   :  { %v10904_v60 = vpop.permute.xlu1 %10903 }
 0x893   :  { %v10909_v57 = vsel %vm10901_vm8, %v10904_v60, %v10895_v51 }
 0x894   :  { %v10908_v46 = vpop.permute.xlu0 %10907  ;;  %v10911_v32 = vrot.slane %v10909_v57, 7 }
 0x895   :  { %v10912_v3 = vrot.slane %v10908_v46, 7 }
 0x896   :  { %v10897_v42 = vpop.permute.xlu1 %10896 }
 0x897   :  { %v10902_v37 = vsel %vm10901_vm8, %v10891_v58, %v10897_v42  ;;  %v10917_v50 = vsel %vm10915_vm6, %v10899_v53, %v10912_v3 }
 0x898   :  { %11621 = vmatprep.mubr.msk.f32.mxu0 %vm10901_vm8, %v10917_v50  ;;  %v10916_v40 = vsel %vm10915_vm6, %v10902_v37, %v10911_v32 }
 0x899   :  { %11017 = vmatmul.mubr.f32.vlgmr.msra.gmra.mxu0 %v10916_v40 }
 0x959   :  { %v11018_v5 = vpop.f32.mrf.mxu0 }
 0x95a   :  { %v11019_v19 = vadd.f32 %v11620_v54, %v11018_v5 }
 0x95b   :  { %v11020_v31 = vpop.f32.mrf.mxu0 }
 0x95c   :  { %vm11022_vm0 = vcmp.gt.f32.partialorder %v11019_v19, 0.0  ;;  %v11023_v12 = vmul.f32 0.01, %v11019_v19 }
 0x95e   :  { %v11024_v28 = vsel %vm11022_vm0, %v11019_v19, %v11023_v12 }
 0x95f   :  { %11946 = vmatmul.mubr.msk.f32.vlgmr.msra.gmra.mxu1 %vm11045_vm15, %v11024_v28 }
 0xa1f   :  { %v11119_v62 = vpop.f32.mrf.mxu1 }
 0xa20   :  { %v11120_v30 = vadd.f32 %v11622_v48, %v11119_v62 }
 0xa21   :  { %v11947_v22 = vpop.f32.mrf.mxu1 }
 0xa22   :  { %v11124_v18 = vsel %vm11123_vm3, %v11120_v30, -inf }
 0xa23   :  { %v11125_v61 = vrot.slane %v11124_v18, 4 }
 0xa25   :  { %v11126_v16 = vmax.f32 %v11124_v18, %v11125_v61 }
 0xa27   :  { %v11127_v34 = vrot.slane %v11126_v16, 2 }
 0xa29   :  { %v11128_v41 = vmax.f32 %v11126_v16, %v11127_v34 }
 0xa2b   :  { %v11129_v29 = vrot.slane %v11128_v41, 1 }
 0xa2d   :  { %v11130_v44 = vmax.f32 %v11128_v41, %v11129_v29 }
 0xa2f   :  { %v11131_v15 = vsub.f32 %v11120_v30, %v11130_v44 }
 0xa31   :  { %v11132_v39 = vmul.f32 1.442695, %v11131_v15 }
 0xa33   :  { %12194 = vpow2.f32 %v11132_v39 }
 0xa40   :  { %v12195_v2 = vpop.eup %12194 }
 0xa41   :  { %v11134_v47 = vsel %vm11123_vm3, %v12195_v2, 0.0 }
 0xa42   :  { %v11135_v24 = vrot.slane %v11134_v47, 4 }
 0xa44   :  { %v11136_v7 = vadd.f32 %v11135_v24, %v11134_v47 }
 0xa46   :  { %v11137_v43 = vrot.slane %v11136_v7, 2 }
 0xa48   :  { %v11138_v11 = vadd.f32 %v11137_v43, %v11136_v7 }
 0xa4a   :  { %v11139_v25 = vrot.slane %v11138_v11, 1 }
 0xa4c   :  { %v11140_v26 = vadd.f32 %v11139_v25, %v11138_v11 }
 0xa4e   :  { %12196 = vlog2.f32 %v11140_v26 }
 0xa5b   :  { %v12197_v23 = vpop.eup %12196 }
 0xa5c   :  { %v11142_v33 = vmul.f32 0.6931472, %v12197_v23 }
 0xa5e   :  { %v11143_v14 = vadd.f32 %v11142_v33, %v11130_v44 }
 0xa60   :  { %v11144_v59 = vsub.f32 %v11120_v30, %v11143_v14 }
 0xa62   :  { %11145 = vst.msk [vmem:[#allocation4] sm:$0x3] %vm11123_vm3, %v11144_v59 }
 0xa63   :  { %12211 = shalt.err (!%p12208_p5)
}
 0xa64   :  { %11155 = dma.vmem_to_hbm [thread:$0]  %s11153_s10, 32, %s18683_s12, [#allocation5]  }
 0xa65   :  { %12320 = dma.done.wait [#allocation5], 32  }
 0xa66   :  { %12321 = vsyncadd [#allocation5], 4294967264 }
 0xa67   :  { %11159 = vsyncpa [#allocation5], 1 }

</bundles_post_ra>
